<compile_context>
chip_gen: v7x
topology: tpu7x:2x2x1
jax: 0.10.0
libtpu: 0.0.40
codegen_flags: <defaults>
</compile_context>

<pallas_src>
import jax
import jax.numpy as jnp
from jax import lax
from jax.experimental import pallas as pl
from jax.experimental.pallas import tpu as pltpu

LANES = 128  # TPU lane width; kernel channel dims are zero-padded to this.


def _round_up(x, m):
    return (x + m - 1) // m * m


# ---------------- Pallas kernels ----------------

def _conv_pool_kernel(cols_ref, w_ref, b_ref, o_ref):
    """Fused valid-conv (as matmul) + bias + ReLU + 2x2/2 max-pool, row tile.

    cols_ref: (4, bm, Kp)  im2col patches grouped by pool quadrant, rows span batch
    w_ref:    (Kp, 128)    (kh*kw*Cin zero-padded) x (Cout zero-padded)
    b_ref:    (1, 128)
    o_ref:    (bm, 128)    pooled output rows, channel-last, lane-dense
    """
    w = w_ref[...]
    m = jnp.dot(cols_ref[0], w, preferred_element_type=jnp.float32)
    for q in range(1, 4):
        m = jnp.maximum(
            m, jnp.dot(cols_ref[q], w, preferred_element_type=jnp.float32))
    # bias add and ReLU commute with the max over pool quadrants.
    o_ref[...] = jnp.maximum(m + b_ref[...], 0.0)


def _conv2_fc_kernel(cols_ref, w2_ref, b2_ref, w1_ref, b1_ref,
                     wf2_ref, bf2_ref, wf3_ref, bf3_ref, o_ref):
    """Fused conv2(+bias+ReLU+pool) -> fc1(ReLU) -> fc2(ReLU) -> fc3, one batch tile.

    cols_ref: (4, 25*BI, Kp2) conv2 patches; within the tile rows are ordered
              spatial-major / batch-minor (row = s*BI + i) so fc1's per-spatial
              slices are contiguous, sublane-aligned (8 | BI) value slices.
    w1_ref:   (25, 128, 128)  fc1 weights per pooled spatial position
    o_ref:    (BI, 128)       logits (first 10 lanes real)
    """
    w2 = w2_ref[...]
    m = jnp.dot(cols_ref[0], w2, preferred_element_type=jnp.float32)
    for q in range(1, 4):
        m = jnp.maximum(
            m, jnp.dot(cols_ref[q], w2, preferred_element_type=jnp.float32))
    pooled = jnp.maximum(m + b2_ref[...], 0.0)            # (25*BI, 128), in VMEM

    bi = o_ref.shape[0]
    # fc1: contract over (spatial s, channel c) as 25 accumulating MXU dots.
    h = jnp.dot(pooled[0:bi, :], w1_ref[0], preferred_element_type=jnp.float32)
    for s in range(1, 25):
        h = h + jnp.dot(pooled[s * bi:(s + 1) * bi, :], w1_ref[s],
                        preferred_element_type=jnp.float32)
    h = jnp.maximum(h + b1_ref[...], 0.0)
    h = jnp.maximum(
        jnp.dot(h, wf2_ref[...], preferred_element_type=jnp.float32)
        + bf2_ref[...], 0.0)
    o_ref[...] = (jnp.dot(h, wf3_ref[...], preferred_element_type=jnp.float32)
                  + bf3_ref[...])


# ---------------- XLA glue (data movement only) ----------------

def _im2col_pooled(x, kh, kw):
    """NHWC x -> conv patches grouped by 2x2-pool quadrant.

    Returns ((B, 4, Hh*Wh, kh*kw*C), (Hh, Wh)): quadrant q = di*2+dj holds the
    patch of conv-output pixel (2*ph+di, 2*pw+dj); patch column order is (i,j,c).
    """
    B, H, W, C = x.shape
    Ho, Wo = H - kh + 1, W - kw + 1
    Hh, Wh = Ho // 2, Wo // 2
    quads = []
    for di in range(2):
        for dj in range(2):
            pats = []
            for i in range(kh):
                for j in range(kw):
                    r0, c0 = di + i, dj + j
                    pats.append(x[:, r0:r0 + 2 * Hh:2, c0:c0 + 2 * Wh:2, :])
            quads.append(jnp.stack(pats, axis=3))      # (B, Hh, Wh, kh*kw, C)
    cols = jnp.stack(quads, axis=1)                    # (B, 4, Hh, Wh, kh*kw, C)
    return cols.reshape(B, 4, Hh * Wh, kh * kw * C), (Hh, Wh)


# ---------------- wrappers ----------------

def conv_pool(x_nhwc, w_mat, b_row, kh, kw):
    """Fused conv+bias+ReLU+maxpool(2,2), batch flattened into matmul rows.

    Returns ((B, Hh, Wh, 128), (Hh, Wh)) channel-last, zero-padded channels.
    """
    B = x_nhwc.shape[0]
    # TODO(synk): patch extraction is still XLA glue; building patches inside
    # the kernel from a VMEM-resident input block would cut patch HBM traffic
    # ~kh*kw-fold but requires in-kernel strided relayouts.
    cols, (Hh, Wh) = _im2col_pooled(x_nhwc, kh, kw)    # (B, 4, Np, K)
    Np = Hh * Wh
    K = cols.shape[-1]
    Kp = w_mat.shape[0]
    N = B * Np
    cols = jnp.transpose(cols, (1, 0, 2, 3)).reshape(4, N, K)
    bm = min(512, _round_up(N, 8))
    Npad = _round_up(N, bm)
    cols = jnp.pad(cols, ((0, 0), (0, Npad - N), (0, Kp - K)))
    out = pl.pallas_call(
        _conv_pool_kernel,
        out_shape=jax.ShapeDtypeStruct((Npad, LANES), jnp.float32),
        grid=(Npad // bm,),
        in_specs=[
            pl.BlockSpec((4, bm, Kp), lambda m: (0, m, 0)),
            pl.BlockSpec((Kp, LANES), lambda m: (0, 0)),
            pl.BlockSpec((1, LANES), lambda m: (0, 0)),
        ],
        out_specs=pl.BlockSpec((bm, LANES), lambda m: (m, 0)),
        compiler_params=pltpu.CompilerParams(
            dimension_semantics=("parallel",)),
    )(cols, w_mat, b_row)
    return out[:N].reshape(B, Hh, Wh, LANES), (Hh, Wh)


def conv2_fc(a1, pp, out_dim):
    """Fused conv2+pool+fc1+fc2+fc3. a1: (B, 14, 14, Cin) real channels only."""
    B = a1.shape[0]
    cols, (Hh, Wh) = _im2col_pooled(a1, 5, 5)          # (B, 4, 25, K2)
    Np = Hh * Wh                                       # 25
    K2 = cols.shape[-1]
    Kp2 = pp["c2w"].shape[0]
    BI = min(_round_up(B, 8), 32)                      # batch tile (multiple of 8)
    Bpad = _round_up(B, BI)
    ntiles = Bpad // BI
    cols = jnp.pad(cols, ((0, Bpad - B), (0, 0), (0, 0), (0, Kp2 - K2)))
    # Within each batch tile: rows ordered spatial-major, batch-minor (s*BI + i).
    cols = cols.reshape(ntiles, BI, 4, Np, Kp2)
    cols = jnp.transpose(cols, (2, 0, 3, 1, 4)).reshape(4, ntiles * Np * BI, Kp2)
    out = pl.pallas_call(
        _conv2_fc_kernel,
        out_shape=jax.ShapeDtypeStruct((Bpad, LANES), jnp.float32),
        grid=(ntiles,),
        in_specs=[
            pl.BlockSpec((4, Np * BI, Kp2), lambda t: (0, t, 0)),
            pl.BlockSpec((Kp2, LANES), lambda t: (0, 0)),
            pl.BlockSpec((1, LANES), lambda t: (0, 0)),
            pl.BlockSpec((Np, LANES, LANES), lambda t: (0, 0, 0)),
            pl.BlockSpec((1, LANES), lambda t: (0, 0)),
            pl.BlockSpec((LANES, LANES), lambda t: (0, 0)),
            pl.BlockSpec((1, LANES), lambda t: (0, 0)),
            pl.BlockSpec((LANES, LANES), lambda t: (0, 0)),
            pl.BlockSpec((1, LANES), lambda t: (0, 0)),
        ],
        out_specs=pl.BlockSpec((BI, LANES), lambda t: (t, 0)),
        compiler_params=pltpu.CompilerParams(
            dimension_semantics=("parallel",)),
    )(cols, pp["c2w"], pp["c2b"], pp["f1w"], pp["f1b"],
      pp["f2w"], pp["f2b"], pp["f3w"], pp["f3b"])
    return out[:B, :out_dim]


# ---------------- parameters ----------------

def init_params(key):
    """Torch-layout LeNet parameters (same init scheme as nn.Conv2d / nn.Linear)."""
    def uniform(k, shape, fan_in):
        bound = 1.0 / jnp.sqrt(float(fan_in))
        return jax.random.uniform(k, shape, jnp.float32, -bound, bound)

    keys = jax.random.split(key, 10)
    return {
        "conv1_w": uniform(keys[0], (6, 3, 5, 5), 3 * 5 * 5),
        "conv1_b": uniform(keys[1], (6,), 3 * 5 * 5),
        "conv2_w": uniform(keys[2], (16, 6, 5, 5), 6 * 5 * 5),
        "conv2_b": uniform(keys[3], (16,), 6 * 5 * 5),
        "fc1_w": uniform(keys[4], (120, 16 * 5 * 5), 16 * 5 * 5),
        "fc1_b": uniform(keys[5], (120,), 16 * 5 * 5),
        "fc2_w": uniform(keys[6], (84, 120), 120),
        "fc2_b": uniform(keys[7], (84,), 120),
        "fc3_w": uniform(keys[8], (10, 84), 84),
        "fc3_b": uniform(keys[9], (10,), 84),
    }


def _pad_to(a, shape):
    return jnp.pad(a, [(0, s - d) for d, s in zip(a.shape, shape)])


def prepare_params(p):
    """One-time prep: transpose / zero-pad weights into kernel-friendly layouts."""
    def conv_mat(w, b):
        cout, cin, kh, kw = w.shape
        k = kh * kw * cin
        kp = _round_up(k, LANES)
        m = jnp.transpose(w, (2, 3, 1, 0)).reshape(k, cout)   # rows = (i, j, c)
        return _pad_to(m, (kp, LANES)), _pad_to(b.reshape(1, cout), (1, LANES))

    c1w, c1b = conv_mat(p["conv1_w"], p["conv1_b"])            # (128, 128)
    c2w, c2b = conv_mat(p["conv2_w"], p["conv2_b"])            # (256, 128)

    # fc1: torch flattens (C=16,H=5,W=5) as c*25 + s (s = h*5+w).  Kernel holds
    # the pooled conv2 block as (s, c) with c padded to 128, so store fc1 as a
    # per-spatial stack of (c_pad, n_pad) blocks: (25, 128, 128).
    f1 = jnp.transpose(p["fc1_w"].reshape(120, 16, 25), (2, 1, 0))   # (s, c, n)

    return {
        "c1w": c1w, "c1b": c1b, "c2w": c2w, "c2b": c2b,
        "f1w": _pad_to(f1, (25, LANES, LANES)),
        "f1b": _pad_to(p["fc1_b"].reshape(1, -1), (1, LANES)),
        "f2w": _pad_to(p["fc2_w"].T, (LANES, LANES)),
        "f2b": _pad_to(p["fc2_b"].reshape(1, -1), (1, LANES)),
        "f3w": _pad_to(p["fc3_w"].T, (LANES, LANES)),
        "f3b": _pad_to(p["fc3_b"].reshape(1, -1), (1, LANES)),
    }


# ---------------- forward (matches torch Net.forward) ----------------

def net_forward(pp, x):
    """x: (B, 3, 32, 32) NCHW (torch convention) -> logits (B, 10)."""
    xh = jnp.transpose(x, (0, 2, 3, 1))                         # NHWC once
    a1, _ = conv_pool(xh, pp["c1w"], pp["c1b"], 5, 5)           # (B, 14, 14, 128)
    a1 = a1[..., :6]                                            # real channels only
    return conv2_fc(a1, pp, out_dim=10)


def reference_forward(p, x):
    """Plain-XLA reference mirroring the torch module (correctness check only)."""
    def conv(x, w, b):
        y = lax.conv_general_dilated(
            x, w, window_strides=(1, 1), padding="VALID",
            dimension_numbers=("NCHW", "OIHW", "NCHW"))
        return jax.nn.relu(y + b.reshape(1, -1, 1, 1))

    def pool(x):
        return lax.reduce_window(x, -jnp.inf, lax.max,
                                 (1, 1, 2, 2), (1, 1, 2, 2), "VALID")

    x = pool(conv(x, p["conv1_w"], p["conv1_b"]))
    x = pool(conv(x, p["conv2_w"], p["conv2_b"]))
    x = x.reshape(x.shape[0], -1)
    x = jax.nn.relu(x @ p["fc1_w"].T + p["fc1_b"])
    x = jax.nn.relu(x @ p["fc2_w"].T + p["fc2_b"])
    return x @ p["fc3_w"].T + p["fc3_b"]


if __name__ == "__main__":
    key = jax.random.PRNGKey(0)
    pkey, xkey = jax.random.split(key)
    params = init_params(pkey)
    pp = prepare_params(params)
    # Module implies 3x32x32 inputs (so conv/pool leaves 16*5*5 features).
    x = jax.random.normal(xkey, (2, 3, 32, 32), jnp.float32)
    out = jax.block_until_ready(jax.jit(net_forward)(pp, x))
    assert out.shape == (2, 10) and out.dtype == jnp.float32
    ref = reference_forward(params, x)
    assert jnp.allclose(out, ref, rtol=5e-2, atol=5e-2), float(
        jnp.max(jnp.abs(out - ref)))
    print("KERNEL_OK")
</pallas_src>

<mosaic_0001>
module attributes {stable_mosaic.version = 11 : i64} {
  func.func @_conv_pool_kernel(%arg0: i32, %arg1: memref<4x392x128xf32, #tpu.memory_space<vmem>>, %arg2: memref<128x128xf32, #tpu.memory_space<vmem>>, %arg3: memref<1x128xf32, #tpu.memory_space<vmem>>, %arg4: memref<392x128xf32, #tpu.memory_space<vmem>>) attributes {dimension_semantics = [#tpu.dimension_semantics<parallel>], iteration_bounds = array<i64: 1>, scalar_prefetch = 0 : i64, scratch_operands = 0 : i64, tpu.core_type = #tpu.core_type<tc>, window_params = [{transform_indices = @transform_0, window_bounds = array<i64: 4, 392, 128>}, {pipeline_mode = #tpu.pipeline_mode<synchronous>, transform_indices = @transform_1, window_bounds = array<i64: 128, 128>}, {pipeline_mode = #tpu.pipeline_mode<synchronous>, transform_indices = @transform_2, window_bounds = array<i64: 1, 128>}, {transform_indices = @transform_3, window_bounds = array<i64: 392, 128>}]} {
    %c0 = arith.constant 0 : index
    %c0_0 = arith.constant 0 : index
    %0 = vector.load %arg2[%c0, %c0_0] : memref<128x128xf32, #tpu.memory_space<vmem>>, vector<128x128xf32>
    %c0_1 = arith.constant 0 : index
    %c0_2 = arith.constant 0 : index
    %c0_3 = arith.constant 0 : index
    %1 = vector.load %arg1[%c0_1, %c0_2, %c0_3] : memref<4x392x128xf32, #tpu.memory_space<vmem>>, vector<1x392x128xf32>
    %2 = vector.shape_cast %1 : vector<1x392x128xf32> to vector<392x128xf32>
    %cst = arith.constant dense<0.000000e+00> : vector<392x128xf32>
    %3 = tpu.matmul %2, %0, %cst {dimension_numbers = #tpu.dot_dimension_numbers<[1], [0], [0], [1], [0, 0, 1, 1], [], []>} : vector<392x128xf32>, vector<128x128xf32>, vector<392x128xf32> -> vector<392x128xf32>
    %c1 = arith.constant 1 : index
    %c0_4 = arith.constant 0 : index
    %c0_5 = arith.constant 0 : index
    %4 = vector.load %arg1[%c1, %c0_4, %c0_5] : memref<4x392x128xf32, #tpu.memory_space<vmem>>, vector<1x392x128xf32>
    %5 = vector.shape_cast %4 : vector<1x392x128xf32> to vector<392x128xf32>
    %cst_6 = arith.constant dense<0.000000e+00> : vector<392x128xf32>
    %6 = tpu.matmul %5, %0, %cst_6 {dimension_numbers = #tpu.dot_dimension_numbers<[1], [0], [0], [1], [0, 0, 1, 1], [], []>} : vector<392x128xf32>, vector<128x128xf32>, vector<392x128xf32> -> vector<392x128xf32>
    %7 = arith.maximumf %3, %6 : vector<392x128xf32>
    %c2 = arith.constant 2 : index
    %c0_7 = arith.constant 0 : index
    %c0_8 = arith.constant 0 : index
    %8 = vector.load %arg1[%c2, %c0_7, %c0_8] : memref<4x392x128xf32, #tpu.memory_space<vmem>>, vector<1x392x128xf32>
    %9 = vector.shape_cast %8 : vector<1x392x128xf32> to vector<392x128xf32>
    %cst_9 = arith.constant dense<0.000000e+00> : vector<392x128xf32>
    %10 = tpu.matmul %9, %0, %cst_9 {dimension_numbers = #tpu.dot_dimension_numbers<[1], [0], [0], [1], [0, 0, 1, 1], [], []>} : vector<392x128xf32>, vector<128x128xf32>, vector<392x128xf32> -> vector<392x128xf32>
    %11 = arith.maximumf %7, %10 : vector<392x128xf32>
    %c3 = arith.constant 3 : index
    %c0_10 = arith.constant 0 : index
    %c0_11 = arith.constant 0 : index
    %12 = vector.load %arg1[%c3, %c0_10, %c0_11] : memref<4x392x128xf32, #tpu.memory_space<vmem>>, vector<1x392x128xf32>
    %13 = vector.shape_cast %12 : vector<1x392x128xf32> to vector<392x128xf32>
    %cst_12 = arith.constant dense<0.000000e+00> : vector<392x128xf32>
    %14 = tpu.matmul %13, %0, %cst_12 {dimension_numbers = #tpu.dot_dimension_numbers<[1], [0], [0], [1], [0, 0, 1, 1], [], []>} : vector<392x128xf32>, vector<128x128xf32>, vector<392x128xf32> -> vector<392x128xf32>
    %15 = arith.maximumf %11, %14 : vector<392x128xf32>
    %c0_13 = arith.constant 0 : index
    %c0_14 = arith.constant 0 : index
    %16 = vector.load %arg3[%c0_13, %c0_14] : memref<1x128xf32, #tpu.memory_space<vmem>>, vector<1x128xf32>
    %17 = vector.broadcast %16 : vector<1x128xf32> to vector<392x128xf32>
    %18 = arith.addf %15, %17 : vector<392x128xf32>
    %cst_15 = arith.constant 0.000000e+00 : f32
    %19 = vector.broadcast %cst_15 : f32 to vector<392x128xf32>
    %20 = arith.maximumf %18, %19 : vector<392x128xf32>
    %c0_16 = arith.constant 0 : index
    %c0_17 = arith.constant 0 : index
    %21 = vector.load %arg4[%c0_16, %c0_17] : memref<392x128xf32, #tpu.memory_space<vmem>>, vector<392x128xf32>
    tpu.vector_store %arg4[%c0_16, %c0_17], %20 {strides = array<i32>} : memref<392x128xf32, #tpu.memory_space<vmem>>, vector<392x128xf32>,
    return
  }
  func.func @transform_0(%arg0: i32) -> (i32, i32, i32) {
    %c0_i32 = arith.constant 0 : i32
    %c0_i32_0 = arith.constant 0 : i32
    %c0_i32_1 = arith.constant 0 : i32
    return %c0_i32, %arg0, %c0_i32_0 : i32, i32, i32
  }
  func.func @transform_1(%arg0: i32) -> (i32, i32) {
    %c0_i32 = arith.constant 0 : i32
    %c0_i32_0 = arith.constant 0 : i32
    %c0_i32_1 = arith.constant 0 : i32
    return %c0_i32, %c0_i32_0 : i32, i32
  }
  func.func @transform_2(%arg0: i32) -> (i32, i32) {
    %c0_i32 = arith.constant 0 : i32
    %c0_i32_0 = arith.constant 0 : i32
    %c0_i32_1 = arith.constant 0 : i32
    return %c0_i32, %c0_i32_0 : i32, i32
  }
  func.func @transform_3(%arg0: i32) -> (i32, i32) {
    %c0_i32 = arith.constant 0 : i32
    %c0_i32_0 = arith.constant 0 : i32
    return %arg0, %c0_i32 : i32, i32
  }
}

module attributes {stable_mosaic.version = 11 : i64} {
  func.func @_conv2_fc_kernel(%arg0: i32, %arg1: memref<4x200x256xf32, #tpu.memory_space<vmem>>, %arg2: memref<256x128xf32, #tpu.memory_space<vmem>>, %arg3: memref<1x128xf32, #tpu.memory_space<vmem>>, %arg4: memref<25x128x128xf32, #tpu.memory_space<vmem>>, %arg5: memref<1x128xf32, #tpu.memory_space<vmem>>, %arg6: memref<128x128xf32, #tpu.memory_space<vmem>>, %arg7: memref<1x128xf32, #tpu.memory_space<vmem>>, %arg8: memref<128x128xf32, #tpu.memory_space<vmem>>, %arg9: memref<1x128xf32, #tpu.memory_space<vmem>>, %arg10: memref<8x128xf32, #tpu.memory_space<vmem>>) attributes {dimension_semantics = [#tpu.dimension_semantics<parallel>], iteration_bounds = array<i64: 1>, scalar_prefetch = 0 : i64, scratch_operands = 0 : i64, tpu.core_type = #tpu.core_type<tc>, window_params = [{transform_indices = @transform_0, window_bounds = array<i64: 4, 200, 256>}, {pipeline_mode = #tpu.pipeline_mode<synchronous>, transform_indices = @transform_1, window_bounds = array<i64: 256, 128>}, {pipeline_mode = #tpu.pipeline_mode<synchronous>, transform_indices = @transform_2, window_bounds = array<i64: 1, 128>}, {pipeline_mode = #tpu.pipeline_mode<synchronous>, transform_indices = @transform_3, window_bounds = array<i64: 25, 128, 128>}, {pipeline_mode = #tpu.pipeline_mode<synchronous>, transform_indices = @transform_4, window_bounds = array<i64: 1, 128>}, {pipeline_mode = #tpu.pipeline_mode<synchronous>, transform_indices = @transform_5, window_bounds = array<i64: 128, 128>}, {pipeline_mode = #tpu.pipeline_mode<synchronous>, transform_indices = @transform_6, window_bounds = array<i64: 1, 128>}, {pipeline_mode = #tpu.pipeline_mode<synchronous>, transform_indices = @transform_7, window_bounds = array<i64: 128, 128>}, {pipeline_mode = #tpu.pipeline_mode<synchronous>, transform_indices = @transform_8, window_bounds = array<i64: 1, 128>}, {transform_indices = @transform_9, window_bounds = array<i64: 8, 128>}]} {
    %c0 = arith.constant 0 : index
    %c0_0 = arith.constant 0 : index
    %0 = vector.load %arg2[%c0, %c0_0] : memref<256x128xf32, #tpu.memory_space<vmem>>, vector<256x128xf32>
    %c0_1 = arith.constant 0 : index
    %c0_2 = arith.constant 0 : index
    %c0_3 = arith.constant 0 : index
    %1 = vector.load %arg1[%c0_1, %c0_2, %c0_3] : memref<4x200x256xf32, #tpu.memory_space<vmem>>, vector<1x200x256xf32>
    %2 = vector.shape_cast %1 : vector<1x200x256xf32> to vector<200x256xf32>
    %cst = arith.constant dense<0.000000e+00> : vector<200x128xf32>
    %3 = tpu.matmul %2, %0, %cst {dimension_numbers = #tpu.dot_dimension_numbers<[1], [0], [0], [1], [0, 0, 1, 1], [], []>} : vector<200x256xf32>, vector<256x128xf32>, vector<200x128xf32> -> vector<200x128xf32>
    %c1 = arith.constant 1 : index
    %c0_4 = arith.constant 0 : index
    %c0_5 = arith.constant 0 : index
    %4 = vector.load %arg1[%c1, %c0_4, %c0_5] : memref<4x200x256xf32, #tpu.memory_space<vmem>>, vector<1x200x256xf32>
    %5 = vector.shape_cast %4 : vector<1x200x256xf32> to vector<200x256xf32>
    %cst_6 = arith.constant dense<0.000000e+00> : vector<200x128xf32>
    %6 = tpu.matmul %5, %0, %cst_6 {dimension_numbers = #tpu.dot_dimension_numbers<[1], [0], [0], [1], [0, 0, 1, 1], [], []>} : vector<200x256xf32>, vector<256x128xf32>, vector<200x128xf32> -> vector<200x128xf32>
    %7 = arith.maximumf %3, %6 : vector<200x128xf32>
    %c2 = arith.constant 2 : index
    %c0_7 = arith.constant 0 : index
    %c0_8 = arith.constant 0 : index
    %8 = vector.load %arg1[%c2, %c0_7, %c0_8] : memref<4x200x256xf32, #tpu.memory_space<vmem>>, vector<1x200x256xf32>
    %9 = vector.shape_cast %8 : vector<1x200x256xf32> to vector<200x256xf32>
    %cst_9 = arith.constant dense<0.000000e+00> : vector<200x128xf32>
    %10 = tpu.matmul %9, %0, %cst_9 {dimension_numbers = #tpu.dot_dimension_numbers<[1], [0], [0], [1], [0, 0, 1, 1], [], []>} : vector<200x256xf32>, vector<256x128xf32>, vector<200x128xf32> -> vector<200x128xf32>
    %11 = arith.maximumf %7, %10 : vector<200x128xf32>
    %c3 = arith.constant 3 : index
    %c0_10 = arith.constant 0 : index
    %c0_11 = arith.constant 0 : index
    %12 = vector.load %arg1[%c3, %c0_10, %c0_11] : memref<4x200x256xf32, #tpu.memory_space<vmem>>, vector<1x200x256xf32>
    %13 = vector.shape_cast %12 : vector<1x200x256xf32> to vector<200x256xf32>
    %cst_12 = arith.constant dense<0.000000e+00> : vector<200x128xf32>
    %14 = tpu.matmul %13, %0, %cst_12 {dimension_numbers = #tpu.dot_dimension_numbers<[1], [0], [0], [1], [0, 0, 1, 1], [], []>} : vector<200x256xf32>, vector<256x128xf32>, vector<200x128xf32> -> vector<200x128xf32>
    %15 = arith.maximumf %11, %14 : vector<200x128xf32>
    %c0_13 = arith.constant 0 : index
    %c0_14 = arith.constant 0 : index
    %16 = vector.load %arg3[%c0_13, %c0_14] : memref<1x128xf32, #tpu.memory_space<vmem>>, vector<1x128xf32>
    %17 = vector.broadcast %16 : vector<1x128xf32> to vector<200x128xf32>
    %18 = arith.addf %15, %17 : vector<200x128xf32>
    %cst_15 = arith.constant 0.000000e+00 : f32
    %19 = vector.broadcast %cst_15 : f32 to vector<200x128xf32>
    %20 = arith.maximumf %18, %19 : vector<200x128xf32>
    %21 = vector.extract_strided_slice %20 {offsets = [0, 0], sizes = [8, 128], strides = [1, 1]} : vector<200x128xf32> to vector<8x128xf32>
    %c0_16 = arith.constant 0 : index
    %c0_17 = arith.constant 0 : index
    %c0_18 = arith.constant 0 : index
    %22 = vector.load %arg4[%c0_16, %c0_17, %c0_18] : memref<25x128x128xf32, #tpu.memory_space<vmem>>, vector<1x128x128xf32>
    %23 = vector.shape_cast %22 : vector<1x128x128xf32> to vector<128x128xf32>
    %cst_19 = arith.constant dense<0.000000e+00> : vector<8x128xf32>
    %24 = tpu.matmul %21, %23, %cst_19 {dimension_numbers = #tpu.dot_dimension_numbers<[1], [0], [0], [1], [0, 0, 1, 1], [], []>} : vector<8x128xf32>, vector<128x128xf32>, vector<8x128xf32> -> vector<8x128xf32>
    %25 = vector.extract_strided_slice %20 {offsets = [8, 0], sizes = [8, 128], strides = [1, 1]} : vector<200x128xf32> to vector<8x128xf32>
    %c1_20 = arith.constant 1 : index
    %c0_21 = arith.constant 0 : index
    %c0_22 = arith.constant 0 : index
    %26 = vector.load %arg4[%c1_20, %c0_21, %c0_22] : memref<25x128x128xf32, #tpu.memory_space<vmem>>, vector<1x128x128xf32>
    %27 = vector.shape_cast %26 : vector<1x128x128xf32> to vector<128x128xf32>
    %cst_23 = arith.constant dense<0.000000e+00> : vector<8x128xf32>
    %28 = tpu.matmul %25, %27, %cst_23 {dimension_numbers = #tpu.dot_dimension_numbers<[1], [0], [0], [1], [0, 0, 1, 1], [], []>} : vector<8x128xf32>, vector<128x128xf32>, vector<8x128xf32> -> vector<8x128xf32>
    %29 = arith.addf %24, %28 : vector<8x128xf32>
    %30 = vector.extract_strided_slice %20 {offsets = [16, 0], sizes = [8, 128], strides = [1, 1]} : vector<200x128xf32> to vector<8x128xf32>
    %c2_24 = arith.constant 2 : index
    %c0_25 = arith.constant 0 : index
    %c0_26 = arith.constant 0 : index
    %31 = vector.load %arg4[%c2_24, %c0_25, %c0_26] : memref<25x128x128xf32, #tpu.memory_space<vmem>>, vector<1x128x128xf32>
    %32 = vector.shape_cast %31 : vector<1x128x128xf32> to vector<128x128xf32>
    %cst_27 = arith.constant dense<0.000000e+00> : vector<8x128xf32>
    %33 = tpu.matmul %30, %32, %cst_27 {dimension_numbers = #tpu.dot_dimension_numbers<[1], [0], [0], [1], [0, 0, 1, 1], [], []>} : vector<8x128xf32>, vector<128x128xf32>, vector<8x128xf32> -> vector<8x128xf32>
    %34 = arith.addf %29, %33 : vector<8x128xf32>
    %35 = vector.extract_strided_slice %20 {offsets = [24, 0], sizes = [8, 128], strides = [1, 1]} : vector<200x128xf32> to vector<8x128xf32>
    %c3_28 = arith.constant 3 : index
    %c0_29 = arith.constant 0 : index
    %c0_30 = arith.constant 0 : index
    %36 = vector.load %arg4[%c3_28, %c0_29, %c0_30] : memref<25x128x128xf32, #tpu.memory_space<vmem>>, vector<1x128x128xf32>
    %37 = vector.shape_cast %36 : vector<1x128x128xf32> to vector<128x128xf32>
    %cst_31 = arith.constant dense<0.000000e+00> : vector<8x128xf32>
    %38 = tpu.matmul %35, %37, %cst_31 {dimension_numbers = #tpu.dot_dimension_numbers<[1], [0], [0], [1], [0, 0, 1, 1], [], []>} : vector<8x128xf32>, vector<128x128xf32>, vector<8x128xf32> -> vector<8x128xf32>
    %39 = arith.addf %34, %38 : vector<8x128xf32>
    %40 = vector.extract_strided_slice %20 {offsets = [32, 0], sizes = [8, 128], strides = [1, 1]} : vector<200x128xf32> to vector<8x128xf32>
    %c4 = arith.constant 4 : index
    %c0_32 = arith.constant 0 : index
    %c0_33 = arith.constant 0 : index
    %41 = vector.load %arg4[%c4, %c0_32, %c0_33] : memref<25x128x128xf32, #tpu.memory_space<vmem>>, vector<1x128x128xf32>
    %42 = vector.shape_cast %41 : vector<1x128x128xf32> to vector<128x128xf32>
    %cst_34 = arith.constant dense<0.000000e+00> : vector<8x128xf32>
    %43 = tpu.matmul %40, %42, %cst_34 {dimension_numbers = #tpu.dot_dimension_numbers<[1], [0], [0], [1], [0, 0, 1, 1], [], []>} : vector<8x128xf32>, vector<128x128xf32>, vector<8x128xf32> -> vector<8x128xf32>
    %44 = arith.addf %39, %43 : vector<8x128xf32>
    %45 = vector.extract_strided_slice %20 {offsets = [40, 0], sizes = [8, 128], strides = [1, 1]} : vector<200x128xf32> to vector<8x128xf32>
    %c5 = arith.constant 5 : index
    %c0_35 = arith.constant 0 : index
    %c0_36 = arith.constant 0 : index
    %46 = vector.load %arg4[%c5, %c0_35, %c0_36] : memref<25x128x128xf32, #tpu.memory_space<vmem>>, vector<1x128x128xf32>
    %47 = vector.shape_cast %46 : vector<1x128x128xf32> to vector<128x128xf32>
    %cst_37 = arith.constant dense<0.000000e+00> : vector<8x128xf32>
    %48 = tpu.matmul %45, %47, %cst_37 {dimension_numbers = #tpu.dot_dimension_numbers<[1], [0], [0], [1], [0, 0, 1, 1], [], []>} : vector<8x128xf32>, vector<128x128xf32>, vector<8x128xf32> -> vector<8x128xf32>
    %49 = arith.addf %44, %48 : vector<8x128xf32>
    %50 = vector.extract_strided_slice %20 {offsets = [48, 0], sizes = [8, 128], strides = [1, 1]} : vector<200x128xf32> to vector<8x128xf32>
    %c6 = arith.constant 6 : index
    %c0_38 = arith.constant 0 : index
    %c0_39 = arith.constant 0 : index
    %51 = vector.load %arg4[%c6, %c0_38, %c0_39] : memref<25x128x128xf32, #tpu.memory_space<vmem>>, vector<1x128x128xf32>
    %52 = vector.shape_cast %51 : vector<1x128x128xf32> to vector<128x128xf32>
    %cst_40 = arith.constant dense<0.000000e+00> : vector<8x128xf32>
    %53 = tpu.matmul %50, %52, %cst_40 {dimension_numbers = #tpu.dot_dimension_numbers<[1], [0], [0], [1], [0, 0, 1, 1], [], []>} : vector<8x128xf32>, vector<128x128xf32>, vector<8x128xf32> -> vector<8x128xf32>
    %54 = arith.addf %49, %53 : vector<8x128xf32>
    %55 = vector.extract_strided_slice %20 {offsets = [56, 0], sizes = [8, 128], strides = [1, 1]} : vector<200x128xf32> to vector<8x128xf32>
    %c7 = arith.constant 7 : index
    %c0_41 = arith.constant 0 : index
    %c0_42 = arith.constant 0 : index
    %56 = vector.load %arg4[%c7, %c0_41, %c0_42] : memref<25x128x128xf32, #tpu.memory_space<vmem>>, vector<1x128x128xf32>
    %57 = vector.shape_cast %56 : vector<1x128x128xf32> to vector<128x128xf32>
    %cst_43 = arith.constant dense<0.000000e+00> : vector<8x128xf32>
    %58 = tpu.matmul %55, %57, %cst_43 {dimension_numbers = #tpu.dot_dimension_numbers<[1], [0], [0], [1], [0, 0, 1, 1], [], []>} : vector<8x128xf32>, vector<128x128xf32>, vector<8x128xf32> -> vector<8x128xf32>
    %59 = arith.addf %54, %58 : vector<8x128xf32>
    %60 = vector.extract_strided_slice %20 {offsets = [64, 0], sizes = [8, 128], strides = [1, 1]} : vector<200x128xf32> to vector<8x128xf32>
    %c8 = arith.constant 8 : index
    %c0_44 = arith.constant 0 : index
    %c0_45 = arith.constant 0 : index
    %61 = vector.load %arg4[%c8, %c0_44, %c0_45] : memref<25x128x128xf32, #tpu.memory_space<vmem>>, vector<1x128x128xf32>
    %62 = vector.shape_cast %61 : vector<1x128x128xf32> to vector<128x128xf32>
    %cst_46 = arith.constant dense<0.000000e+00> : vector<8x128xf32>
    %63 = tpu.matmul %60, %62, %cst_46 {dimension_numbers = #tpu.dot_dimension_numbers<[1], [0], [0], [1], [0, 0, 1, 1], [], []>} : vector<8x128xf32>, vector<128x128xf32>, vector<8x128xf32> -> vector<8x128xf32>
    %64 = arith.addf %59, %63 : vector<8x128xf32>
    %65 = vector.extract_strided_slice %20 {offsets = [72, 0], sizes = [8, 128], strides = [1, 1]} : vector<200x128xf32> to vector<8x128xf32>
    %c9 = arith.constant 9 : index
    %c0_47 = arith.constant 0 : index
    %c0_48 = arith.constant 0 : index
    %66 = vector.load %arg4[%c9, %c0_47, %c0_48] : memref<25x128x128xf32, #tpu.memory_space<vmem>>, vector<1x128x128xf32>
    %67 = vector.shape_cast %66 : vector<1x128x128xf32> to vector<128x128xf32>
    %cst_49 = arith.constant dense<0.000000e+00> : vector<8x128xf32>
    %68 = tpu.matmul %65, %67, %cst_49 {dimension_numbers = #tpu.dot_dimension_numbers<[1], [0], [0], [1], [0, 0, 1, 1], [], []>} : vector<8x128xf32>, vector<128x128xf32>, vector<8x128xf32> -> vector<8x128xf32>
    %69 = arith.addf %64, %68 : vector<8x128xf32>
    %70 = vector.extract_strided_slice %20 {offsets = [80, 0], sizes = [8, 128], strides = [1, 1]} : vector<200x128xf32> to vector<8x128xf32>
    %c10 = arith.constant 10 : index
    %c0_50 = arith.constant 0 : index
    %c0_51 = arith.constant 0 : index
    %71 = vector.load %arg4[%c10, %c0_50, %c0_51] : memref<25x128x128xf32, #tpu.memory_space<vmem>>, vector<1x128x128xf32>
    %72 = vector.shape_cast %71 : vector<1x128x128xf32> to vector<128x128xf32>
    %cst_52 = arith.constant dense<0.000000e+00> : vector<8x128xf32>
    %73 = tpu.matmul %70, %72, %cst_52 {dimension_numbers = #tpu.dot_dimension_numbers<[1], [0], [0], [1], [0, 0, 1, 1], [], []>} : vector<8x128xf32>, vector<128x128xf32>, vector<8x128xf32> -> vector<8x128xf32>
    %74 = arith.addf %69, %73 : vector<8x128xf32>
    %75 = vector.extract_strided_slice %20 {offsets = [88, 0], sizes = [8, 128], strides = [1, 1]} : vector<200x128xf32> to vector<8x128xf32>
    %c11 = arith.constant 11 : index
    %c0_53 = arith.constant 0 : index
    %c0_54 = arith.constant 0 : index
    %76 = vector.load %arg4[%c11, %c0_53, %c0_54] : memref<25x128x128xf32, #tpu.memory_space<vmem>>, vector<1x128x128xf32>
    %77 = vector.shape_cast %76 : vector<1x128x128xf32> to vector<128x128xf32>
    %cst_55 = arith.constant dense<0.000000e+00> : vector<8x128xf32>
    %78 = tpu.matmul %75, %77, %cst_55 {dimension_numbers = #tpu.dot_dimension_numbers<[1], [0], [0], [1], [0, 0, 1, 1], [], []>} : vector<8x128xf32>, vector<128x128xf32>, vector<8x128xf32> -> vector<8x128xf32>
    %79 = arith.addf %74, %78 : vector<8x128xf32>
    %80 = vector.extract_strided_slice %20 {offsets = [96, 0], sizes = [8, 128], strides = [1, 1]} : vector<200x128xf32> to vector<8x128xf32>
    %c12 = arith.constant 12 : index
    %c0_56 = arith.constant 0 : index
    %c0_57 = arith.constant 0 : index
    %81 = vector.load %arg4[%c12, %c0_56, %c0_57] : memref<25x128x128xf32, #tpu.memory_space<vmem>>, vector<1x128x128xf32>
    %82 = vector.shape_cast %81 : vector<1x128x128xf32> to vector<128x128xf32>
    %cst_58 = arith.constant dense<0.000000e+00> : vector<8x128xf32>
    %83 = tpu.matmul %80, %82, %cst_58 {dimension_numbers = #tpu.dot_dimension_numbers<[1], [0], [0], [1], [0, 0, 1, 1], [], []>} : vector<8x128xf32>, vector<128x128xf32>, vector<8x128xf32> -> vector<8x128xf32>
    %84 = arith.addf %79, %83 : vector<8x128xf32>
    %85 = vector.extract_strided_slice %20 {offsets = [104, 0], sizes = [8, 128], strides = [1, 1]} : vector<200x128xf32> to vector<8x128xf32>
    %c13 = arith.constant 13 : index
    %c0_59 = arith.constant 0 : index
    %c0_60 = arith.constant 0 : index
    %86 = vector.load %arg4[%c13, %c0_59, %c0_60] : memref<25x128x128xf32, #tpu.memory_space<vmem>>, vector<1x128x128xf32>
    %87 = vector.shape_cast %86 : vector<1x128x128xf32> to vector<128x128xf32>
    %cst_61 = arith.constant dense<0.000000e+00> : vector<8x128xf32>
    %88 = tpu.matmul %85, %87, %cst_61 {dimension_numbers = #tpu.dot_dimension_numbers<[1], [0], [0], [1], [0, 0, 1, 1], [], []>} : vector<8x128xf32>, vector<128x128xf32>, vector<8x128xf32> -> vector<8x128xf32>
    %89 = arith.addf %84, %88 : vector<8x128xf32>
    %90 = vector.extract_strided_slice %20 {offsets = [112, 0], sizes = [8, 128], strides = [1, 1]} : vector<200x128xf32> to vector<8x128xf32>
    %c14 = arith.constant 14 : index
    %c0_62 = arith.constant 0 : index
    %c0_63 = arith.constant 0 : index
    %91 = vector.load %arg4[%c14, %c0_62, %c0_63] : memref<25x128x128xf32, #tpu.memory_space<vmem>>, vector<1x128x128xf32>
    %92 = vector.shape_cast %91 : vector<1x128x128xf32> to vector<128x128xf32>
    %cst_64 = arith.constant dense<0.000000e+00> : vector<8x128xf32>
    %93 = tpu.matmul %90, %92, %cst_64 {dimension_numbers = #tpu.dot_dimension_numbers<[1], [0], [0], [1], [0, 0, 1, 1], [], []>} : vector<8x128xf32>, vector<128x128xf32>, vector<8x128xf32> -> vector<8x128xf32>
    %94 = arith.addf %89, %93 : vector<8x128xf32>
    %95 = vector.extract_strided_slice %20 {offsets = [120, 0], sizes = [8, 128], strides = [1, 1]} : vector<200x128xf32> to vector<8x128xf32>
    %c15 = arith.constant 15 : index
    %c0_65 = arith.constant 0 : index
    %c0_66 = arith.constant 0 : index
    %96 = vector.load %arg4[%c15, %c0_65, %c0_66] : memref<25x128x128xf32, #tpu.memory_space<vmem>>, vector<1x128x128xf32>
    %97 = vector.shape_cast %96 : vector<1x128x128xf32> to vector<128x128xf32>
    %cst_67 = arith.constant dense<0.000000e+00> : vector<8x128xf32>
    %98 = tpu.matmul %95, %97, %cst_67 {dimension_numbers = #tpu.dot_dimension_numbers<[1], [0], [0], [1], [0, 0, 1, 1], [], []>} : vector<8x128xf32>, vector<128x128xf32>, vector<8x128xf32> -> vector<8x128xf32>
    %99 = arith.addf %94, %98 : vector<8x128xf32>
    %100 = vector.extract_strided_slice %20 {offsets = [128, 0], sizes = [8, 128], strides = [1, 1]} : vector<200x128xf32> to vector<8x128xf32>
    %c16 = arith.constant 16 : index
    %c0_68 = arith.constant 0 : index
    %c0_69 = arith.constant 0 : index
    %101 = vector.load %arg4[%c16, %c0_68, %c0_69] : memref<25x128x128xf32, #tpu.memory_space<vmem>>, vector<1x128x128xf32>
    %102 = vector.shape_cast %101 : vector<1x128x128xf32> to vector<128x128xf32>
    %cst_70 = arith.constant dense<0.000000e+00> : vector<8x128xf32>
    %103 = tpu.matmul %100, %102, %cst_70 {dimension_numbers = #tpu.dot_dimension_numbers<[1], [0], [0], [1], [0, 0, 1, 1], [], []>} : vector<8x128xf32>, vector<128x128xf32>, vector<8x128xf32> -> vector<8x128xf32>
    %104 = arith.addf %99, %103 : vector<8x128xf32>
    %105 = vector.extract_strided_slice %20 {offsets = [136, 0], sizes = [8, 128], strides = [1, 1]} : vector<200x128xf32> to vector<8x128xf32>
    %c17 = arith.constant 17 : index
    %c0_71 = arith.constant 0 : index
    %c0_72 = arith.constant 0 : index
    %106 = vector.load %arg4[%c17, %c0_71, %c0_72] : memref<25x128x128xf32, #tpu.memory_space<vmem>>, vector<1x128x128xf32>
    %107 = vector.shape_cast %106 : vector<1x128x128xf32> to vector<128x128xf32>
    %cst_73 = arith.constant dense<0.000000e+00> : vector<8x128xf32>
    %108 = tpu.matmul %105, %107, %cst_73 {dimension_numbers = #tpu.dot_dimension_numbers<[1], [0], [0], [1], [0, 0, 1, 1], [], []>} : vector<8x128xf32>, vector<128x128xf32>, vector<8x128xf32> -> vector<8x128xf32>
    %109 = arith.addf %104, %108 : vector<8x128xf32>
    %110 = vector.extract_strided_slice %20 {offsets = [144, 0], sizes = [8, 128], strides = [1, 1]} : vector<200x128xf32> to vector<8x128xf32>
    %c18 = arith.constant 18 : index
    %c0_74 = arith.constant 0 : index
    %c0_75 = arith.constant 0 : index
    %111 = vector.load %arg4[%c18, %c0_74, %c0_75] : memref<25x128x128xf32, #tpu.memory_space<vmem>>, vector<1x128x128xf32>
    %112 = vector.shape_cast %111 : vector<1x128x128xf32> to vector<128x128xf32>
    %cst_76 = arith.constant dense<0.000000e+00> : vector<8x128xf32>
    %113 = tpu.matmul %110, %112, %cst_76 {dimension_numbers = #tpu.dot_dimension_numbers<[1], [0], [0], [1], [0, 0, 1, 1], [], []>} : vector<8x128xf32>, vector<128x128xf32>, vector<8x128xf32> -> vector<8x128xf32>
    %114 = arith.addf %109, %113 : vector<8x128xf32>
    %115 = vector.extract_strided_slice %20 {offsets = [152, 0], sizes = [8, 128], strides = [1, 1]} : vector<200x128xf32> to vector<8x128xf32>
    %c19 = arith.constant 19 : index
    %c0_77 = arith.constant 0 : index
    %c0_78 = arith.constant 0 : index
    %116 = vector.load %arg4[%c19, %c0_77, %c0_78] : memref<25x128x128xf32, #tpu.memory_space<vmem>>, vector<1x128x128xf32>
    %117 = vector.shape_cast %116 : vector<1x128x128xf32> to vector<128x128xf32>
    %cst_79 = arith.constant dense<0.000000e+00> : vector<8x128xf32>
    %118 = tpu.matmul %115, %117, %cst_79 {dimension_numbers = #tpu.dot_dimension_numbers<[1], [0], [0], [1], [0, 0, 1, 1], [], []>} : vector<8x128xf32>, vector<128x128xf32>, vector<8x128xf32> -> vector<8x128xf32>
    %119 = arith.addf %114, %118 : vector<8x128xf32>
    %120 = vector.extract_strided_slice %20 {offsets = [160, 0], sizes = [8, 128], strides = [1, 1]} : vector<200x128xf32> to vector<8x128xf32>
    %c20 = arith.constant 20 : index
    %c0_80 = arith.constant 0 : index
    %c0_81 = arith.constant 0 : index
    %121 = vector.load %arg4[%c20, %c0_80, %c0_81] : memref<25x128x128xf32, #tpu.memory_space<vmem>>, vector<1x128x128xf32>
    %122 = vector.shape_cast %121 : vector<1x128x128xf32> to vector<128x128xf32>
    %cst_82 = arith.constant dense<0.000000e+00> : vector<8x128xf32>
    %123 = tpu.matmul %120, %122, %cst_82 {dimension_numbers = #tpu.dot_dimension_numbers<[1], [0], [0], [1], [0, 0, 1, 1], [], []>} : vector<8x128xf32>, vector<128x128xf32>, vector<8x128xf32> -> vector<8x128xf32>
    %124 = arith.addf %119, %123 : vector<8x128xf32>
    %125 = vector.extract_strided_slice %20 {offsets = [168, 0], sizes = [8, 128], strides = [1, 1]} : vector<200x128xf32> to vector<8x128xf32>
    %c21 = arith.constant 21 : index
    %c0_83 = arith.constant 0 : index
    %c0_84 = arith.constant 0 : index
    %126 = vector.load %arg4[%c21, %c0_83, %c0_84] : memref<25x128x128xf32, #tpu.memory_space<vmem>>, vector<1x128x128xf32>
    %127 = vector.shape_cast %126 : vector<1x128x128xf32> to vector<128x128xf32>
    %cst_85 = arith.constant dense<0.000000e+00> : vector<8x128xf32>
    %128 = tpu.matmul %125, %127, %cst_85 {dimension_numbers = #tpu.dot_dimension_numbers<[1], [0], [0], [1], [0, 0, 1, 1], [], []>} : vector<8x128xf32>, vector<128x128xf32>, vector<8x128xf32> -> vector<8x128xf32>
    %129 = arith.addf %124, %128 : vector<8x128xf32>
    %130 = vector.extract_strided_slice %20 {offsets = [176, 0], sizes = [8, 128], strides = [1, 1]} : vector<200x128xf32> to vector<8x128xf32>
    %c22 = arith.constant 22 : index
    %c0_86 = arith.constant 0 : index
    %c0_87 = arith.constant 0 : index
    %131 = vector.load %arg4[%c22, %c0_86, %c0_87] : memref<25x128x128xf32, #tpu.memory_space<vmem>>, vector<1x128x128xf32>
    %132 = vector.shape_cast %131 : vector<1x128x128xf32> to vector<128x128xf32>
    %cst_88 = arith.constant dense<0.000000e+00> : vector<8x128xf32>
    %133 = tpu.matmul %130, %132, %cst_88 {dimension_numbers = #tpu.dot_dimension_numbers<[1], [0], [0], [1], [0, 0, 1, 1], [], []>} : vector<8x128xf32>, vector<128x128xf32>, vector<8x128xf32> -> vector<8x128xf32>
    %134 = arith.addf %129, %133 : vector<8x128xf32>
    %135 = vector.extract_strided_slice %20 {offsets = [184, 0], sizes = [8, 128], strides = [1, 1]} : vector<200x128xf32> to vector<8x128xf32>
    %c23 = arith.constant 23 : index
    %c0_89 = arith.constant 0 : index
    %c0_90 = arith.constant 0 : index
    %136 = vector.load %arg4[%c23, %c0_89, %c0_90] : memref<25x128x128xf32, #tpu.memory_space<vmem>>, vector<1x128x128xf32>
    %137 = vector.shape_cast %136 : vector<1x128x128xf32> to vector<128x128xf32>
    %cst_91 = arith.constant dense<0.000000e+00> : vector<8x128xf32>
    %138 = tpu.matmul %135, %137, %cst_91 {dimension_numbers = #tpu.dot_dimension_numbers<[1], [0], [0], [1], [0, 0, 1, 1], [], []>} : vector<8x128xf32>, vector<128x128xf32>, vector<8x128xf32> -> vector<8x128xf32>
    %139 = arith.addf %134, %138 : vector<8x128xf32>
    %140 = vector.extract_strided_slice %20 {offsets = [192, 0], sizes = [8, 128], strides = [1, 1]} : vector<200x128xf32> to vector<8x128xf32>
    %c24 = arith.constant 24 : index
    %c0_92 = arith.constant 0 : index
    %c0_93 = arith.constant 0 : index
    %141 = vector.load %arg4[%c24, %c0_92, %c0_93] : memref<25x128x128xf32, #tpu.memory_space<vmem>>, vector<1x128x128xf32>
    %142 = vector.shape_cast %141 : vector<1x128x128xf32> to vector<128x128xf32>
    %cst_94 = arith.constant dense<0.000000e+00> : vector<8x128xf32>
    %143 = tpu.matmul %140, %142, %cst_94 {dimension_numbers = #tpu.dot_dimension_numbers<[1], [0], [0], [1], [0, 0, 1, 1], [], []>} : vector<8x128xf32>, vector<128x128xf32>, vector<8x128xf32> -> vector<8x128xf32>
    %144 = arith.addf %139, %143 : vector<8x128xf32>
    %c0_95 = arith.constant 0 : index
    %c0_96 = arith.constant 0 : index
    %145 = vector.load %arg5[%c0_95, %c0_96] : memref<1x128xf32, #tpu.memory_space<vmem>>, vector<1x128xf32>
    %146 = vector.broadcast %145 : vector<1x128xf32> to vector<8x128xf32>
    %147 = arith.addf %144, %146 : vector<8x128xf32>
    %cst_97 = arith.constant 0.000000e+00 : f32
    %148 = vector.broadcast %cst_97 : f32 to vector<8x128xf32>
    %149 = arith.maximumf %147, %148 : vector<8x128xf32>
    %c0_98 = arith.constant 0 : index
    %c0_99 = arith.constant 0 : index
    %150 = vector.load %arg6[%c0_98, %c0_99] : memref<128x128xf32, #tpu.memory_space<vmem>>, vector<128x128xf32>
    %cst_100 = arith.constant dense<0.000000e+00> : vector<8x128xf32>
    %151 = tpu.matmul %149, %150, %cst_100 {dimension_numbers = #tpu.dot_dimension_numbers<[1], [0], [0], [1], [0, 0, 1, 1], [], []>} : vector<8x128xf32>, vector<128x128xf32>, vector<8x128xf32> -> vector<8x128xf32>
    %c0_101 = arith.constant 0 : index
    %c0_102 = arith.constant 0 : index
    %152 = vector.load %arg7[%c0_101, %c0_102] : memref<1x128xf32, #tpu.memory_space<vmem>>, vector<1x128xf32>
    %153 = vector.broadcast %152 : vector<1x128xf32> to vector<8x128xf32>
    %154 = arith.addf %151, %153 : vector<8x128xf32>
    %cst_103 = arith.constant 0.000000e+00 : f32
    %155 = vector.broadcast %cst_103 : f32 to vector<8x128xf32>
    %156 = arith.maximumf %154, %155 : vector<8x128xf32>
    %c0_104 = arith.constant 0 : index
    %c0_105 = arith.constant 0 : index
    %157 = vector.load %arg8[%c0_104, %c0_105] : memref<128x128xf32, #tpu.memory_space<vmem>>, vector<128x128xf32>
    %cst_106 = arith.constant dense<0.000000e+00> : vector<8x128xf32>
    %158 = tpu.matmul %156, %157, %cst_106 {dimension_numbers = #tpu.dot_dimension_numbers<[1], [0], [0], [1], [0, 0, 1, 1], [], []>} : vector<8x128xf32>, vector<128x128xf32>, vector<8x128xf32> -> vector<8x128xf32>
    %c0_107 = arith.constant 0 : index
    %c0_108 = arith.constant 0 : index
    %159 = vector.load %arg9[%c0_107, %c0_108] : memref<1x128xf32, #tpu.memory_space<vmem>>, vector<1x128xf32>
    %160 = vector.broadcast %159 : vector<1x128xf32> to vector<8x128xf32>
    %161 = arith.addf %158, %160 : vector<8x128xf32>
    %c0_109 = arith.constant 0 : index
    %c0_110 = arith.constant 0 : index
    %162 = vector.load %arg10[%c0_109, %c0_110] : memref<8x128xf32, #tpu.memory_space<vmem>>, vector<8x128xf32>
    tpu.vector_store %arg10[%c0_109, %c0_110], %161 {strides = array<i32>} : memref<8x128xf32, #tpu.memory_space<vmem>>, vector<8x128xf32>,
    return
  }
  func.func @transform_0(%arg0: i32) -> (i32, i32, i32) {
    %c0_i32 = arith.constant 0 : i32
    %c0_i32_0 = arith.constant 0 : i32
    %c0_i32_1 = arith.constant 0 : i32
    return %c0_i32, %arg0, %c0_i32_0 : i32, i32, i32
  }
  func.func @transform_1(%arg0: i32) -> (i32, i32) {
    %c0_i32 = arith.constant 0 : i32
    %c0_i32_0 = arith.constant 0 : i32
    %c0_i32_1 = arith.constant 0 : i32
    return %c0_i32, %c0_i32_0 : i32, i32
  }
  func.func @transform_2(%arg0: i32) -> (i32, i32) {
    %c0_i32 = arith.constant 0 : i32
    %c0_i32_0 = arith.constant 0 : i32
    %c0_i32_1 = arith.constant 0 : i32
    return %c0_i32, %c0_i32_0 : i32, i32
  }
  func.func @transform_3(%arg0: i32) -> (i32, i32, i32) {
    %c0_i32 = arith.constant 0 : i32
    %c0_i32_0 = arith.constant 0 : i32
    %c0_i32_1 = arith.constant 0 : i32
    %c0_i32_2 = arith.constant 0 : i32
    return %c0_i32, %c0_i32_0, %c0_i32_1 : i32, i32, i32
  }
  func.func @transform_4(%arg0: i32) -> (i32, i32) {
    %c0_i32 = arith.constant 0 : i32
    %c0_i32_0 = arith.constant 0 : i32
    %c0_i32_1 = arith.constant 0 : i32
    return %c0_i32, %c0_i32_0 : i32, i32
  }
  func.func @transform_5(%arg0: i32) -> (i32, i32) {
    %c0_i32 = arith.constant 0 : i32
    %c0_i32_0 = arith.constant 0 : i32
    %c0_i32_1 = arith.constant 0 : i32
    return %c0_i32, %c0_i32_0 : i32, i32
  }
  func.func @transform_6(%arg0: i32) -> (i32, i32) {
    %c0_i32 = arith.constant 0 : i32
    %c0_i32_0 = arith.constant 0 : i32
    %c0_i32_1 = arith.constant 0 : i32
    return %c0_i32, %c0_i32_0 : i32, i32
  }
  func.func @transform_7(%arg0: i32) -> (i32, i32) {
    %c0_i32 = arith.constant 0 : i32
    %c0_i32_0 = arith.constant 0 : i32
    %c0_i32_1 = arith.constant 0 : i32
    return %c0_i32, %c0_i32_0 : i32, i32
  }
  func.func @transform_8(%arg0: i32) -> (i32, i32) {
    %c0_i32 = arith.constant 0 : i32
    %c0_i32_0 = arith.constant 0 : i32
    %c0_i32_1 = arith.constant 0 : i32
    return %c0_i32, %c0_i32_0 : i32, i32
  }
  func.func @transform_9(%arg0: i32) -> (i32, i32) {
    %c0_i32 = arith.constant 0 : i32
    %c0_i32_0 = arith.constant 0 : i32
    return %arg0, %c0_i32 : i32, i32
  }
}

</mosaic_0001>

<bundles_post_ra>
// kernel: net_forward.2
= control target key start
LH: loop header
LB: loop body
LE: loop exit
PB: predicated region body
PF: predicated region fallthrough
CT: control target
= control target key end

     0   :  { %v2997_v0 = vmov 0.0|0.0   ;;  %vm2998_vm0 = vmmov 0   ;;  %v2999_v6 = vmov 0.0   ;;  %s4770_s1 = inlined_call_operand.vmem [shape: f32[128,128], index: 1, kind: input, shape index: {}]   ;;  %s4771_s0 = inlined_call_operand.vmem [shape: f32[4,392,128], index: 0, kind: input, shape index: {}]   ;;  %s4772_s2 = inlined_call_operand.vmem [shape: f32[1,128], index: 2, kind: input, shape index: {}]   ;;  %s4773_s3 = inlined_call_operand.vmem [shape: f32[392,128], index: 3, kind: output, shape index: {}]  }
   0x1   :  { %2898 = vmatprep.subr.bf16.mxu0 %v2997_v0  ;;  %v14_v1 = vld [vmem:[%s4770_s1] sm:$0xff]  ;;  %v15_v2 = vld [vmem:[%s4770_s1 + $0x8] sm:$0xff]  ;;  %2922 = vmatprep.subr.bf16.mxu1 %v2997_v0  ;;  %v16_v3 = vld [vmem:[%s4770_s1 + $0x10] sm:$0xff] }
   0x2   :  { %v3031_v4 = vpack.c.bf16 %v15_v2, %v14_v1  ;;  %v17_v5 = vld [vmem:[%s4770_s1 + $0x18] sm:$0xff]  ;;  %2214 = vmatprep.mubr.msk.f32.mxu0 %vm2998_vm0, %v2999_v6  ;;  %2393 = vmatprep.mubr.msk.f32.mxu1 %vm2998_vm0, %v2999_v6  ;;  %v18_v8 = vld [vmem:[%s4770_s1 + $0x20] sm:$0xff]  ;;  %v19_v9 = vld [vmem:[%s4770_s1 + $0x28] sm:$0xff] }
   0x3   :  { %v3042_v7 = vpack.c.bf16 %v17_v5, %v16_v3  ;;  %v3054_v10 = vpack.c.bf16 %v19_v9, %v18_v8  ;;  %v20_v11 = vld [vmem:[%s4770_s1 + $0x30] sm:$0xff]  ;;  %v21_v12 = vld [vmem:[%s4770_s1 + $0x38] sm:$0xff]  ;;  %v22_v14 = vld [vmem:[%s4770_s1 + $0x40] sm:$0xff] }
   0x4   :  { %2900 = vmatpush3.bf16.msra.mxu0 %v3031_v4  ;;  %2924 = vmatpush3.bf16.msra.mxu1 %v3031_v4  ;;  %v3066_v13 = vpack.c.bf16 %v21_v12, %v20_v11  ;;  %v23_v15 = vld [vmem:[%s4770_s1 + $0x48] sm:$0xff]  ;;  %v24_v17 = vld [vmem:[%s4770_s1 + $0x50] sm:$0xff]  ;;  %v25_v18 = vld [vmem:[%s4770_s1 + $0x58] sm:$0xff] }
   0x5   :  { %2901 = vmatprep.subr.bf16.mxu0 %v2997_v0  ;;  %2925 = vmatprep.subr.bf16.mxu1 %v2997_v0  ;;  %v3078_v16 = vpack.c.bf16 %v23_v15, %v22_v14  ;;  %v3090_v19 = vpack.c.bf16 %v25_v18, %v24_v17  ;;  %v26_v20 = vld [vmem:[%s4770_s1 + $0x60] sm:$0xff]  ;;  %v27_v21 = vld [vmem:[%s4770_s1 + $0x68] sm:$0xff]  ;;  %v28_v23 = vld [vmem:[%s4770_s1 + $0x70] sm:$0xff] }
   0x6   :  { %v3102_v22 = vpack.c.bf16 %v27_v21, %v26_v20  ;;  %v29_v24 = vld [vmem:[%s4770_s1 + $0x78] sm:$0xff]  ;;  %v30_v26 = vld [vmem:[%s4771_s0] sm:$0xff]  ;;  %v1774_v27 = vld [vmem:[%s4771_s0 + $0x188] sm:$0xff] }
   0x7   :  { %v3114_v25 = vpack.c.bf16 %v29_v24, %v28_v23  ;;  %v31_v28 = vld [vmem:[%s4771_s0 + $0x8] sm:$0xff]  ;;  %v1775_v29 = vld [vmem:[%s4771_s0 + $0x190] sm:$0xff]  ;;  %v1776_v31 = vld [vmem:[%s4771_s0 + $0x198] sm:$0xff] }
   0x8   :  { %2903 = vmatpush3.bf16.msra.mxu0 %v3042_v7  ;;  %2927 = vmatpush3.bf16.msra.mxu1 %v3042_v7  ;;  %v32_v30 = vld [vmem:[%s4771_s0 + $0x10] sm:$0xff]  ;;  %v33_v32 = vld [vmem:[%s4771_s0 + $0x18] sm:$0xff]  ;;  %v1777_v33 = vld [vmem:[%s4771_s0 + $0x1a0] sm:$0xff] }
   0x9   :  { %2904 = vmatprep.subr.bf16.mxu0 %v2997_v0  ;;  %2928 = vmatprep.subr.bf16.mxu1 %v2997_v0  ;;  %v34_v34 = vld [vmem:[%s4771_s0 + $0x20] sm:$0xff]  ;;  %v1778_v35 = vld [vmem:[%s4771_s0 + $0x1a8] sm:$0xff]  ;;  %v1779_v37 = vld [vmem:[%s4771_s0 + $0x1b0] sm:$0xff] }
   0xa   :  { %v35_v36 = vld [vmem:[%s4771_s0 + $0x28] sm:$0xff]  ;;  %v36_v38 = vld [vmem:[%s4771_s0 + $0x30] sm:$0xff]  ;;  %v1780_v39 = vld [vmem:[%s4771_s0 + $0x1b8] sm:$0xff] }
   0xb   :  { %v37_v40 = vld [vmem:[%s4771_s0 + $0x38] sm:$0xff]  ;;  %v1781_v41 = vld [vmem:[%s4771_s0 + $0x1c0] sm:$0xff]  ;;  %v1782_v43 = vld [vmem:[%s4771_s0 + $0x1c8] sm:$0xff] }
   0xc   :  { %2906 = vmatpush3.bf16.msra.mxu0 %v3054_v10  ;;  %2930 = vmatpush3.bf16.msra.mxu1 %v3054_v10  ;;  %v38_v42 = vld [vmem:[%s4771_s0 + $0x40] sm:$0xff]  ;;  %v39_v44 = vld [vmem:[%s4771_s0 + $0x48] sm:$0xff]  ;;  %v1783_v45 = vld [vmem:[%s4771_s0 + $0x1d0] sm:$0xff] }
   0xd   :  { %2907 = vmatprep.subr.bf16.mxu0 %v2997_v0  ;;  %2931 = vmatprep.subr.bf16.mxu1 %v2997_v0  ;;  %v40_v46 = vld [vmem:[%s4771_s0 + $0x50] sm:$0xff]  ;;  %v1784_v47 = vld [vmem:[%s4771_s0 + $0x1d8] sm:$0xff]  ;;  %v1785_v49 = vld [vmem:[%s4771_s0 + $0x1e0] sm:$0xff] }
   0xe   :  { %v41_v48 = vld [vmem:[%s4771_s0 + $0x58] sm:$0xff]  ;;  %v42_v50 = vld [vmem:[%s4771_s0 + $0x60] sm:$0xff]  ;;  %v1786_v51 = vld [vmem:[%s4771_s0 + $0x1e8] sm:$0xff] }
   0xf   :  { %v43_v52 = vld [vmem:[%s4771_s0 + $0x68] sm:$0xff]  ;;  %v1787_v53 = vld [vmem:[%s4771_s0 + $0x1f0] sm:$0xff]  ;;  %v1788_v55 = vld [vmem:[%s4771_s0 + $0x1f8] sm:$0xff] }
  0x10   :  { %2909 = vmatpush3.bf16.msra.mxu0 %v3066_v13  ;;  %2933 = vmatpush3.bf16.msra.mxu1 %v3066_v13  ;;  %v44_v54 = vld [vmem:[%s4771_s0 + $0x70] sm:$0xff]  ;;  %v45_v56 = vld [vmem:[%s4771_s0 + $0x78] sm:$0xff]  ;;  %v1789_v57 = vld [vmem:[%s4771_s0 + $0x200] sm:$0xff] }
  0x11   :  { %2910 = vmatprep.subr.bf16.mxu0 %v2997_v0  ;;  %2934 = vmatprep.subr.bf16.mxu1 %v2997_v0  ;;  %v46_v58 = vld [vmem:[%s4771_s0 + $0x80] sm:$0xff]  ;;  %v1790_v59 = vld [vmem:[%s4771_s0 + $0x208] sm:$0xff]  ;;  %v1791_v61 = vld [vmem:[%s4771_s0 + $0x210] sm:$0xff] }
  0x12   :  { %v47_v60 = vld [vmem:[%s4771_s0 + $0x88] sm:$0xff]  ;;  %v48_v62 = vld [vmem:[%s4771_s0 + $0x90] sm:$0xff]  ;;  %v1792_v63 = vld [vmem:[%s4771_s0 + $0x218] sm:$0xff] }
  0x13   :  { %v1793_v1 = vld [vmem:[%s4771_s0 + $0x220] sm:$0xff]  ;;  %v1794_v3 = vld [vmem:[%s4771_s0 + $0x228] sm:$0xff]  ;;  %v1795_v5 = vld [vmem:[%s4771_s0 + $0x230] sm:$0xff] }
  0x14   :  { %2912 = vmatpush3.bf16.msra.mxu0 %v3078_v16  ;;  %2936 = vmatpush3.bf16.msra.mxu1 %v3078_v16  ;;  %v50_v2 = vld [vmem:[%s4771_s0 + $0xa0] sm:$0xff]  ;;  %v1796_v8 = vld [vmem:[%s4771_s0 + $0x238] sm:$0xff]  ;;  %v1798_v12 = vld [vmem:[%s4771_s0 + $0x248] sm:$0xff] }
  0x15   :  { %2913 = vmatprep.subr.bf16.mxu0 %v2997_v0  ;;  %2937 = vmatprep.subr.bf16.mxu1 %v2997_v0  ;;  %v53_v9 = vld [vmem:[%s4771_s0 + $0xb8] sm:$0xff]  ;;  %v54_v11 = vld [vmem:[%s4771_s0 + $0xc0] sm:$0xff]  ;;  %v1799_v14 = vld [vmem:[%s4771_s0 + $0x250] sm:$0xff] }
  0x16   :  { %v56_v15 = vld [vmem:[%s4771_s0 + $0xd0] sm:$0xff]  ;;  %v57_v17 = vld [vmem:[%s4771_s0 + $0xd8] sm:$0xff]  ;;  %v1801_v18 = vld [vmem:[%s4771_s0 + $0x260] sm:$0xff] }
  0x17   :  { %v1802_v20 = vld [vmem:[%s4771_s0 + $0x268] sm:$0xff]  ;;  %v60_v23 = vld [vmem:[%s4771_s0 + $0xf0] sm:$0xff]  ;;  %v1804_v24 = vld [vmem:[%s4771_s0 + $0x278] sm:$0xff] }
  0x18   :  { %2915 = vmatpush3.bf16.msra.mxu0 %v3090_v19  ;;  %2939 = vmatpush3.bf16.msra.mxu1 %v3090_v19  ;;  %v59_v21 = vld [vmem:[%s4771_s0 + $0xe8] sm:$0xff] }
  0x19   :  { %2916 = vmatprep.subr.bf16.mxu0 %v2997_v0  ;;  %2940 = vmatprep.subr.bf16.mxu1 %v2997_v0 }
  0x1c   :  { %2918 = vmatpush3.bf16.msra.mxu0 %v3102_v22  ;;  %2942 = vmatpush3.bf16.msra.mxu1 %v3102_v22 }
  0x1d   :  { %2919 = vmatprep.subr.bf16.mxu0 %v2997_v0  ;;  %2943 = vmatprep.subr.bf16.mxu1 %v2997_v0 }
  0x20   :  { %2921 = vmatpush3.bf16.msra.mxu0 %v3114_v25  ;;  %2945 = vmatpush3.bf16.msra.mxu1 %v3114_v25 }
  0x21   :  { %2946 = vmatprep.subr.bf16.mxu0 %v2997_v0  ;;  %2970 = vmatprep.subr.bf16.mxu1 %v2997_v0 }
  0x23   :  { %2215 = vmatmul.mubr.f32.vlgmr.msra.gmra.mrb[0].mxu0 %v30_v26  ;;  %2394 = vmatmul.mubr.f32.vlgmr.msra.gmra.mrb[0].mxu1 %v1774_v27  ;;  %v1805_v26 = vld [vmem:[%s4771_s0 + $0x280] sm:$0xff] }
  0x24   :  { %2948 = vmatpush3.bf16.msra.mxu0 %v3031_v4  ;;  %2217 = vmatprep.mubr.msk.f32.mxu0 %vm2998_vm0, %v2999_v6  ;;  %v62_v27 = vld [vmem:[%s4771_s0 + $0x100] sm:$0xff] }
  0x25   :  { %2972 = vmatpush3.bf16.msra.mxu1 %v3031_v4  ;;  %2396 = vmatprep.mubr.msk.f32.mxu1 %vm2998_vm0, %v2999_v6  ;;  %v51_v4 = vld [vmem:[%s4771_s0 + $0xa8] sm:$0xff] }
  0x26   :  { %2949 = vmatprep.subr.bf16.mxu0 %v2997_v0  ;;  %2973 = vmatprep.subr.bf16.mxu1 %v2997_v0 }
  0x27   :  { %2218 = vmatmul.mubr.f32.gmra.mrb[2].mxu0 %v31_v28  ;;  %2397 = vmatmul.mubr.f32.gmra.mrb[2].mxu1 %v1775_v29  ;;  %v1806_v28 = vld [vmem:[%s4771_s0 + $0x288] sm:$0xff] }
  0x28   :  { %2220 = vmatprep.mubr.msk.f32.mxu0 %vm2998_vm0, %v2999_v6  ;;  %2399 = vmatprep.mubr.msk.f32.mxu1 %vm2998_vm0, %v2999_v6  ;;  %v63_v29 = vld [vmem:[%s4771_s0 + $0x108] sm:$0xff] }
  0x29   :  { %2951 = vmatpush3.bf16.msra.mxu0 %v3042_v7  ;;  %2975 = vmatpush3.bf16.msra.mxu1 %v3042_v7  ;;  %v52_v7 = vld [vmem:[%s4771_s0 + $0xb0] sm:$0xff] }
  0x2a   :  { %2952 = vmatprep.subr.bf16.mxu0 %v2997_v0  ;;  %2976 = vmatprep.subr.bf16.mxu1 %v2997_v0 }
  0x2b   :  { %2221 = vmatmul.mubr.f32.gmra.mrb[4].mxu0 %v32_v30  ;;  %2400 = vmatmul.mubr.f32.gmra.mrb[4].mxu1 %v1776_v31  ;;  %v1807_v30 = vld [vmem:[%s4771_s0 + $0x290] sm:$0xff] }
  0x2c   :  { %2223 = vmatprep.mubr.msk.f32.mxu0 %vm2998_vm0, %v2999_v6  ;;  %2402 = vmatprep.mubr.msk.f32.mxu1 %vm2998_vm0, %v2999_v6  ;;  %v64_v31 = vld [vmem:[%s4771_s0 + $0x110] sm:$0xff] }
  0x2d   :  { %2954 = vmatpush3.bf16.msra.mxu0 %v3054_v10  ;;  %2978 = vmatpush3.bf16.msra.mxu1 %v3054_v10  ;;  %v1797_v10 = vld [vmem:[%s4771_s0 + $0x240] sm:$0xff] }
  0x2e   :  { %2955 = vmatprep.subr.bf16.mxu0 %v2997_v0  ;;  %2979 = vmatprep.subr.bf16.mxu1 %v2997_v0 }
  0x2f   :  { %2224 = vmatmul.mubr.f32.gmra.mrb[6].mxu0 %v33_v32  ;;  %2403 = vmatmul.mubr.f32.gmra.mrb[6].mxu1 %v1777_v33  ;;  %v1808_v32 = vld [vmem:[%s4771_s0 + $0x298] sm:$0xff] }
  0x30   :  { %2226 = vmatprep.mubr.msk.f32.mxu0 %vm2998_vm0, %v2999_v6  ;;  %2405 = vmatprep.mubr.msk.f32.mxu1 %vm2998_vm0, %v2999_v6  ;;  %v65_v33 = vld [vmem:[%s4771_s0 + $0x118] sm:$0xff] }
  0x31   :  { %2957 = vmatpush3.bf16.msra.mxu0 %v3066_v13  ;;  %2981 = vmatpush3.bf16.msra.mxu1 %v3066_v13  ;;  %v55_v13 = vld [vmem:[%s4771_s0 + $0xc8] sm:$0xff] }
  0x32   :  { %2958 = vmatprep.subr.bf16.mxu0 %v2997_v0  ;;  %2982 = vmatprep.subr.bf16.mxu1 %v2997_v0 }
  0x33   :  { %2227 = vmatmul.mubr.f32.gmra.mrb[8].mxu0 %v34_v34  ;;  %2406 = vmatmul.mubr.f32.gmra.mrb[8].mxu1 %v1778_v35  ;;  %v1809_v34 = vld [vmem:[%s4771_s0 + $0x2a0] sm:$0xff] }
  0x34   :  { %2229 = vmatprep.mubr.msk.f32.mxu0 %vm2998_vm0, %v2999_v6  ;;  %2408 = vmatprep.mubr.msk.f32.mxu1 %vm2998_vm0, %v2999_v6  ;;  %v66_v35 = vld [vmem:[%s4771_s0 + $0x120] sm:$0xff] }
  0x35   :  { %2960 = vmatpush3.bf16.msra.mxu0 %v3078_v16  ;;  %2984 = vmatpush3.bf16.msra.mxu1 %v3078_v16  ;;  %v1800_v16 = vld [vmem:[%s4771_s0 + $0x258] sm:$0xff] }
  0x36   :  { %2961 = vmatprep.subr.bf16.mxu0 %v2997_v0  ;;  %2985 = vmatprep.subr.bf16.mxu1 %v2997_v0 }
  0x37   :  { %2230 = vmatmul.mubr.f32.gmra.mrb[10].mxu0 %v35_v36  ;;  %2409 = vmatmul.mubr.f32.gmra.mrb[10].mxu1 %v1779_v37  ;;  %v1810_v36 = vld [vmem:[%s4771_s0 + $0x2a8] sm:$0xff] }
  0x38   :  { %2232 = vmatprep.mubr.msk.f32.mxu0 %vm2998_vm0, %v2999_v6  ;;  %2411 = vmatprep.mubr.msk.f32.mxu1 %vm2998_vm0, %v2999_v6  ;;  %v67_v37 = vld [vmem:[%s4771_s0 + $0x128] sm:$0xff] }
  0x39   :  { %2963 = vmatpush3.bf16.msra.mxu0 %v3090_v19  ;;  %2987 = vmatpush3.bf16.msra.mxu1 %v3090_v19  ;;  %v58_v19 = vld [vmem:[%s4771_s0 + $0xe0] sm:$0xff] }
  0x3a   :  { %2964 = vmatprep.subr.bf16.mxu0 %v2997_v0  ;;  %2988 = vmatprep.subr.bf16.mxu1 %v2997_v0 }
  0x3b   :  { %2233 = vmatmul.mubr.f32.gmra.mrb[12].mxu0 %v36_v38  ;;  %2412 = vmatmul.mubr.f32.gmra.mrb[12].mxu1 %v1780_v39  ;;  %v1811_v38 = vld [vmem:[%s4771_s0 + $0x2b0] sm:$0xff] }
  0x3c   :  { %2235 = vmatprep.mubr.msk.f32.mxu0 %vm2998_vm0, %v2999_v6  ;;  %2414 = vmatprep.mubr.msk.f32.mxu1 %vm2998_vm0, %v2999_v6  ;;  %v68_v39 = vld [vmem:[%s4771_s0 + $0x130] sm:$0xff] }
  0x3d   :  { %2966 = vmatpush3.bf16.msra.mxu0 %v3102_v22  ;;  %2990 = vmatpush3.bf16.msra.mxu1 %v3102_v22  ;;  %v1803_v22 = vld [vmem:[%s4771_s0 + $0x270] sm:$0xff] }
  0x3e   :  { %2967 = vmatprep.subr.bf16.mxu0 %v2997_v0  ;;  %2991 = vmatprep.subr.bf16.mxu1 %v2997_v0  ;;  %v49_v0 = vld [vmem:[%s4771_s0 + $0x98] sm:$0xff] }
  0x3f   :  { %2236 = vmatmul.mubr.f32.gmra.mrb[14].mxu0 %v37_v40  ;;  %2415 = vmatmul.mubr.f32.gmra.mrb[14].mxu1 %v1781_v41  ;;  %v1812_v40 = vld [vmem:[%s4771_s0 + $0x2b8] sm:$0xff] }
  0x40   :  { %2238 = vmatprep.mubr.msk.f32.mxu0 %vm2998_vm0, %v2999_v6  ;;  %2417 = vmatprep.mubr.msk.f32.mxu1 %vm2998_vm0, %v2999_v6  ;;  %v69_v41 = vld [vmem:[%s4771_s0 + $0x138] sm:$0xff] }
  0x41   :  { %2969 = vmatpush3.bf16.msra.mxu0 %v3114_v25  ;;  %2993 = vmatpush3.bf16.msra.mxu1 %v3114_v25  ;;  %v61_v25 = vld [vmem:[%s4771_s0 + $0xf8] sm:$0xff] }
  0x43   :  { %2239 = vmatmul.mubr.f32.gmra.mrb[16].mxu0 %v38_v42  ;;  %2418 = vmatmul.mubr.f32.gmra.mrb[16].mxu1 %v1782_v43  ;;  %v1813_v42 = vld [vmem:[%s4771_s0 + $0x2c0] sm:$0xff] }
  0x44   :  { %2241 = vmatprep.mubr.msk.f32.mxu0 %vm2998_vm0, %v2999_v6  ;;  %2420 = vmatprep.mubr.msk.f32.mxu1 %vm2998_vm0, %v2999_v6  ;;  %v70_v43 = vld [vmem:[%s4771_s0 + $0x140] sm:$0xff] }
  0x47   :  { %2242 = vmatmul.mubr.f32.gmra.mrb[18].mxu0 %v39_v44  ;;  %2421 = vmatmul.mubr.f32.gmra.mrb[18].mxu1 %v1783_v45  ;;  %v1814_v44 = vld [vmem:[%s4771_s0 + $0x2c8] sm:$0xff] }
  0x48   :  { %2244 = vmatprep.mubr.msk.f32.mxu0 %vm2998_vm0, %v2999_v6  ;;  %2423 = vmatprep.mubr.msk.f32.mxu1 %vm2998_vm0, %v2999_v6  ;;  %v71_v45 = vld [vmem:[%s4771_s0 + $0x148] sm:$0xff] }
  0x4b   :  { %2245 = vmatmul.mubr.f32.gmra.mrb[20].mxu0 %v40_v46  ;;  %2424 = vmatmul.mubr.f32.gmra.mrb[20].mxu1 %v1784_v47  ;;  %v1815_v46 = vld [vmem:[%s4771_s0 + $0x2d0] sm:$0xff] }
  0x4c   :  { %2247 = vmatprep.mubr.msk.f32.mxu0 %vm2998_vm0, %v2999_v6  ;;  %2426 = vmatprep.mubr.msk.f32.mxu1 %vm2998_vm0, %v2999_v6  ;;  %v72_v47 = vld [vmem:[%s4771_s0 + $0x150] sm:$0xff] }
  0x4f   :  { %2248 = vmatmul.mubr.f32.gmra.mrb[22].mxu0 %v41_v48  ;;  %2427 = vmatmul.mubr.f32.gmra.mrb[22].mxu1 %v1785_v49  ;;  %v1816_v48 = vld [vmem:[%s4771_s0 + $0x2d8] sm:$0xff] }
  0x50   :  { %2250 = vmatprep.mubr.msk.f32.mxu0 %vm2998_vm0, %v2999_v6  ;;  %2429 = vmatprep.mubr.msk.f32.mxu1 %vm2998_vm0, %v2999_v6  ;;  %v73_v49 = vld [vmem:[%s4771_s0 + $0x158] sm:$0xff] }
  0x53   :  { %2251 = vmatmul.mubr.f32.gmra.mrb[24].mxu0 %v42_v50  ;;  %2430 = vmatmul.mubr.f32.gmra.mrb[24].mxu1 %v1786_v51  ;;  %v1817_v50 = vld [vmem:[%s4771_s0 + $0x2e0] sm:$0xff] }
  0x54   :  { %2253 = vmatprep.mubr.msk.f32.mxu0 %vm2998_vm0, %v2999_v6  ;;  %2432 = vmatprep.mubr.msk.f32.mxu1 %vm2998_vm0, %v2999_v6  ;;  %v74_v51 = vld [vmem:[%s4771_s0 + $0x160] sm:$0xff] }
  0x57   :  { %2254 = vmatmul.mubr.f32.gmra.mrb[26].mxu0 %v43_v52  ;;  %2433 = vmatmul.mubr.f32.gmra.mrb[26].mxu1 %v1787_v53  ;;  %v1818_v52 = vld [vmem:[%s4771_s0 + $0x2e8] sm:$0xff] }
  0x58   :  { %2256 = vmatprep.mubr.msk.f32.mxu0 %vm2998_vm0, %v2999_v6  ;;  %2435 = vmatprep.mubr.msk.f32.mxu1 %vm2998_vm0, %v2999_v6  ;;  %v75_v53 = vld [vmem:[%s4771_s0 + $0x168] sm:$0xff] }
  0x5b   :  { %2257 = vmatmul.mubr.f32.gmra.mrb[28].mxu0 %v44_v54  ;;  %2436 = vmatmul.mubr.f32.gmra.mrb[28].mxu1 %v1788_v55  ;;  %v1819_v54 = vld [vmem:[%s4771_s0 + $0x2f0] sm:$0xff] }
  0x5c   :  { %2259 = vmatprep.mubr.msk.f32.mxu0 %vm2998_vm0, %v2999_v6  ;;  %2438 = vmatprep.mubr.msk.f32.mxu1 %vm2998_vm0, %v2999_v6  ;;  %v76_v55 = vld [vmem:[%s4771_s0 + $0x170] sm:$0xff] }
  0x5f   :  { %2260 = vmatmul.mubr.f32.gmra.mrb[30].mxu0 %v45_v56  ;;  %2439 = vmatmul.mubr.f32.gmra.mrb[30].mxu1 %v1789_v57  ;;  %v1820_v56 = vld [vmem:[%s4771_s0 + $0x2f8] sm:$0xff] }
  0x60   :  { %2262 = vmatprep.mubr.msk.f32.mxu0 %vm2998_vm0, %v2999_v6  ;;  %2441 = vmatprep.mubr.msk.f32.mxu1 %vm2998_vm0, %v2999_v6  ;;  %v77_v57 = vld [vmem:[%s4771_s0 + $0x178] sm:$0xff] }
  0x63   :  { %2263 = vmatmul.mubr.f32.gmra.mrb[32].mxu0 %v46_v58  ;;  %2442 = vmatmul.mubr.f32.gmra.mrb[32].mxu1 %v1790_v59  ;;  %v1821_v58 = vld [vmem:[%s4771_s0 + $0x300] sm:$0xff] }
  0x64   :  { %2265 = vmatprep.mubr.msk.f32.mxu0 %vm2998_vm0, %v2999_v6  ;;  %2444 = vmatprep.mubr.msk.f32.mxu1 %vm2998_vm0, %v2999_v6  ;;  %v78_v59 = vld [vmem:[%s4771_s0 + $0x180] sm:$0xff] }
  0x67   :  { %2266 = vmatmul.mubr.f32.gmra.mrb[34].mxu0 %v47_v60  ;;  %2445 = vmatmul.mubr.f32.gmra.mrb[34].mxu1 %v1791_v61  ;;  %v1822_v60 = vld [vmem:[%s4771_s0 + $0x308] sm:$0xff]  ;;  %v1823_v61 = vld [vmem:[%s4771_s0 + $0x310] sm:$0xff] }
  0x68   :  { %2268 = vmatprep.mubr.msk.f32.mxu0 %vm2998_vm0, %v2999_v6  ;;  %2447 = vmatprep.mubr.msk.f32.mxu1 %vm2998_vm0, %v2999_v6 }
  0x6b   :  { %2269 = vmatmul.mubr.f32.gmra.mrb[36].mxu0 %v48_v62  ;;  %2448 = vmatmul.mubr.f32.gmra.mrb[36].mxu1 %v1792_v63  ;;  %v1872_v62 = vld [vmem:[%s4771_s0 + $0x498] sm:$0xff] }
  0x6c   :  { %2271 = vmatprep.mubr.msk.f32.mxu0 %vm2998_vm0, %v2999_v6  ;;  %2450 = vmatprep.mubr.msk.f32.mxu1 %vm2998_vm0, %v2999_v6  ;;  %v1824_v63 = vld [vmem:[%s4771_s0 + $0x318] sm:$0xff] }
  0x6f   :  { %2272 = vmatmul.mubr.f32.gmra.mrb[38].mxu0 %v49_v0  ;;  %2451 = vmatmul.mubr.f32.gmra.mrb[38].mxu1 %v1793_v1  ;;  %v1873_v0 = vld [vmem:[%s4771_s0 + $0x4a0] sm:$0xff] }
  0x70   :  { %2274 = vmatprep.mubr.msk.f32.mxu0 %vm2998_vm0, %v2999_v6  ;;  %2453 = vmatprep.mubr.msk.f32.mxu1 %vm2998_vm0, %v2999_v6  ;;  %v1825_v1 = vld [vmem:[%s4771_s0 + $0x320] sm:$0xff] }
  0x73   :  { %2275 = vmatmul.mubr.f32.gmra.mrb[40].mxu0 %v50_v2  ;;  %2454 = vmatmul.mubr.f32.gmra.mrb[40].mxu1 %v1794_v3  ;;  %v1874_v2 = vld [vmem:[%s4771_s0 + $0x4a8] sm:$0xff] }
  0x74   :  { %2277 = vmatprep.mubr.msk.f32.mxu0 %vm2998_vm0, %v2999_v6  ;;  %2456 = vmatprep.mubr.msk.f32.mxu1 %vm2998_vm0, %v2999_v6  ;;  %v1826_v3 = vld [vmem:[%s4771_s0 + $0x328] sm:$0xff] }
  0x77   :  { %2278 = vmatmul.mubr.f32.gmra.mrb[42].mxu0 %v51_v4  ;;  %2457 = vmatmul.mubr.f32.gmra.mrb[42].mxu1 %v1795_v5  ;;  %v1875_v4 = vld [vmem:[%s4771_s0 + $0x4b0] sm:$0xff] }
  0x78   :  { %2280 = vmatprep.mubr.msk.f32.mxu0 %vm2998_vm0, %v2999_v6  ;;  %2459 = vmatprep.mubr.msk.f32.mxu1 %vm2998_vm0, %v2999_v6  ;;  %v1827_v5 = vld [vmem:[%s4771_s0 + $0x330] sm:$0xff] }
  0x7b   :  { %2281 = vmatmul.mubr.f32.gmra.mrb[44].mxu0 %v52_v7  ;;  %2460 = vmatmul.mubr.f32.gmra.mrb[44].mxu1 %v1796_v8  ;;  %v1876_v7 = vld [vmem:[%s4771_s0 + $0x4b8] sm:$0xff] }
  0x7c   :  { %2283 = vmatprep.mubr.msk.f32.mxu0 %vm2998_vm0, %v2999_v6  ;;  %2462 = vmatprep.mubr.msk.f32.mxu1 %vm2998_vm0, %v2999_v6 }
  0x7f   :  { %2284 = vmatmul.mubr.f32.gmra.mrb[46].mxu0 %v53_v9  ;;  %2463 = vmatmul.mubr.f32.gmra.mrb[46].mxu1 %v1797_v10 }
  0x80   :  { %2286 = vmatprep.mubr.msk.f32.mxu0 %vm2998_vm0, %v2999_v6  ;;  %2465 = vmatprep.mubr.msk.f32.mxu1 %vm2998_vm0, %v2999_v6 }
  0x83   :  { %2287 = vmatmul.mubr.f32.gmra.mrb[48].mxu0 %v54_v11  ;;  %2466 = vmatmul.mubr.f32.gmra.mrb[48].mxu1 %v1798_v12 }
  0x84   :  { %2289 = vmatprep.mubr.msk.f32.mxu0 %vm2998_vm0, %v2999_v6  ;;  %2468 = vmatprep.mubr.msk.f32.mxu1 %vm2998_vm0, %v2999_v6 }
  0x87   :  { %2290 = vmatmul.mubr.f32.gmra.mrb[50].mxu0 %v55_v13  ;;  %2469 = vmatmul.mubr.f32.gmra.mrb[50].mxu1 %v1799_v14  ;;  %v1828_v13 = vld [vmem:[%s4771_s0 + $0x338] sm:$0xff]  ;;  %v1877_v14 = vld [vmem:[%s4771_s0 + $0x4c0] sm:$0xff] }
  0x88   :  { %2292 = vmatprep.mubr.msk.f32.mxu0 %vm2998_vm0, %v2999_v6  ;;  %2471 = vmatprep.mubr.msk.f32.mxu1 %vm2998_vm0, %v2999_v6 }
  0x8b   :  { %2293 = vmatmul.mubr.f32.gmra.mrb[52].mxu0 %v56_v15  ;;  %2472 = vmatmul.mubr.f32.gmra.mrb[52].mxu1 %v1800_v16 }
  0x8c   :  { %2295 = vmatprep.mubr.msk.f32.mxu0 %vm2998_vm0, %v2999_v6  ;;  %2474 = vmatprep.mubr.msk.f32.mxu1 %vm2998_vm0, %v2999_v6 }
  0x8f   :  { %2296 = vmatmul.mubr.f32.gmra.mrb[54].mxu0 %v57_v17  ;;  %2475 = vmatmul.mubr.f32.gmra.mrb[54].mxu1 %v1801_v18  ;;  %v1855_v18 = vld [vmem:[%s4771_s0 + $0x410] sm:$0xff] }
  0x90   :  { %2298 = vmatprep.mubr.msk.f32.mxu0 %vm2998_vm0, %v2999_v6  ;;  %2477 = vmatprep.mubr.msk.f32.mxu1 %vm2998_vm0, %v2999_v6 }
  0x93   :  { %2299 = vmatmul.mubr.f32.gmra.mrb[56].mxu0 %v58_v19  ;;  %2478 = vmatmul.mubr.f32.gmra.mrb[56].mxu1 %v1802_v20  ;;  %v1829_v20 = vld [vmem:[%s4771_s0 + $0x340] sm:$0xff] }
  0x94   :  { %2301 = vmatprep.mubr.msk.f32.mxu0 %vm2998_vm0, %v2999_v6  ;;  %2480 = vmatprep.mubr.msk.f32.mxu1 %vm2998_vm0, %v2999_v6 }
  0x97   :  { %2302 = vmatmul.mubr.f32.gmra.mrb[58].mxu0 %v59_v21  ;;  %2481 = vmatmul.mubr.f32.gmra.mrb[58].mxu1 %v1803_v22  ;;  %v1878_v21 = vld [vmem:[%s4771_s0 + $0x4c8] sm:$0xff] }
  0x98   :  { %2304 = vmatprep.mubr.msk.f32.mxu0 %vm2998_vm0, %v2999_v6  ;;  %2483 = vmatprep.mubr.msk.f32.mxu1 %vm2998_vm0, %v2999_v6 }
  0x9b   :  { %2305 = vmatmul.mubr.f32.gmra.mrb[60].mxu0 %v60_v23  ;;  %2484 = vmatmul.mubr.f32.gmra.mrb[60].mxu1 %v1804_v24 }
  0x9c   :  { %2307 = vmatprep.mubr.msk.f32.mxu0 %vm2998_vm0, %v2999_v6  ;;  %2486 = vmatprep.mubr.msk.f32.mxu1 %vm2998_vm0, %v2999_v6 }
  0x9f   :  { %2308 = vmatmul.mubr.f32.gmra.mrb[62].mxu0 %v61_v25  ;;  %2487 = vmatmul.mubr.f32.gmra.mrb[62].mxu1 %v1805_v26 }
  0xa0   :  { %2310 = vmatprep.mubr.msk.f32.mxu0 %vm2998_vm0, %v2999_v6  ;;  %2489 = vmatprep.mubr.msk.f32.mxu1 %vm2998_vm0, %v2999_v6 }
  0xa3   :  { %2311 = vmatmul.mubr.f32.gmra.mrb[64].mxu0 %v62_v27  ;;  %2490 = vmatmul.mubr.f32.gmra.mrb[64].mxu1 %v1806_v28  ;;  %v1830_v27 = vld [vmem:[%s4771_s0 + $0x348] sm:$0xff]  ;;  %v1879_v28 = vld [vmem:[%s4771_s0 + $0x4d0] sm:$0xff] }
  0xa4   :  { %2313 = vmatprep.mubr.msk.f32.mxu0 %vm2998_vm0, %v2999_v6  ;;  %2492 = vmatprep.mubr.msk.f32.mxu1 %vm2998_vm0, %v2999_v6 }
  0xa7   :  { %2314 = vmatmul.mubr.f32.gmra.mrb[66].mxu0 %v63_v29  ;;  %2493 = vmatmul.mubr.f32.gmra.mrb[66].mxu1 %v1807_v30 }
  0xa8   :  { %2316 = vmatprep.mubr.msk.f32.mxu0 %vm2998_vm0, %v2999_v6  ;;  %2495 = vmatprep.mubr.msk.f32.mxu1 %vm2998_vm0, %v2999_v6 }
  0xab   :  { %2317 = vmatmul.mubr.f32.gmra.mrb[68].mxu0 %v64_v31  ;;  %2496 = vmatmul.mubr.f32.gmra.mrb[68].mxu1 %v1808_v32  ;;  %v1854_v32 = vld [vmem:[%s4771_s0 + $0x408] sm:$0xff] }
  0xac   :  { %2319 = vmatprep.mubr.msk.f32.mxu0 %vm2998_vm0, %v2999_v6  ;;  %2498 = vmatprep.mubr.msk.f32.mxu1 %vm2998_vm0, %v2999_v6 }
  0xaf   :  { %2320 = vmatmul.mubr.f32.gmra.mrb[70].mxu0 %v65_v33  ;;  %2499 = vmatmul.mubr.f32.gmra.mrb[70].mxu1 %v1809_v34  ;;  %v1831_v34 = vld [vmem:[%s4771_s0 + $0x350] sm:$0xff] }
  0xb0   :  { %2322 = vmatprep.mubr.msk.f32.mxu0 %vm2998_vm0, %v2999_v6  ;;  %2501 = vmatprep.mubr.msk.f32.mxu1 %vm2998_vm0, %v2999_v6 }
  0xb3   :  { %2323 = vmatmul.mubr.f32.gmra.mrb[72].mxu0 %v66_v35  ;;  %2502 = vmatmul.mubr.f32.gmra.mrb[72].mxu1 %v1810_v36  ;;  %v1880_v35 = vld [vmem:[%s4771_s0 + $0x4d8] sm:$0xff] }
  0xb4   :  { %2325 = vmatprep.mubr.msk.f32.mxu0 %vm2998_vm0, %v2999_v6  ;;  %2504 = vmatprep.mubr.msk.f32.mxu1 %vm2998_vm0, %v2999_v6 }
  0xb7   :  { %2326 = vmatmul.mubr.f32.gmra.mrb[74].mxu0 %v67_v37  ;;  %2505 = vmatmul.mubr.f32.gmra.mrb[74].mxu1 %v1811_v38 }
  0xb8   :  { %2328 = vmatprep.mubr.msk.f32.mxu0 %vm2998_vm0, %v2999_v6  ;;  %2507 = vmatprep.mubr.msk.f32.mxu1 %vm2998_vm0, %v2999_v6 }
  0xbb   :  { %2329 = vmatmul.mubr.f32.gmra.mrb[76].mxu0 %v68_v39  ;;  %2508 = vmatmul.mubr.f32.gmra.mrb[76].mxu1 %v1812_v40 }
  0xbc   :  { %2331 = vmatprep.mubr.msk.f32.mxu0 %vm2998_vm0, %v2999_v6  ;;  %2510 = vmatprep.mubr.msk.f32.mxu1 %vm2998_vm0, %v2999_v6 }
  0xbf   :  { %2332 = vmatmul.mubr.f32.gmra.mrb[78].mxu0 %v69_v41  ;;  %2511 = vmatmul.mubr.f32.gmra.mrb[78].mxu1 %v1813_v42  ;;  %v1832_v41 = vld [vmem:[%s4771_s0 + $0x358] sm:$0xff]  ;;  %v1881_v42 = vld [vmem:[%s4771_s0 + $0x4e0] sm:$0xff] }
  0xc0   :  { %2334 = vmatprep.mubr.msk.f32.mxu0 %vm2998_vm0, %v2999_v6  ;;  %2513 = vmatprep.mubr.msk.f32.mxu1 %vm2998_vm0, %v2999_v6 }
  0xc3   :  { %2335 = vmatmul.mubr.f32.gmra.mrb[80].mxu0 %v70_v43  ;;  %2514 = vmatmul.mubr.f32.gmra.mrb[80].mxu1 %v1814_v44 }
  0xc4   :  { %2337 = vmatprep.mubr.msk.f32.mxu0 %vm2998_vm0, %v2999_v6  ;;  %2516 = vmatprep.mubr.msk.f32.mxu1 %vm2998_vm0, %v2999_v6 }
  0xc7   :  { %2338 = vmatmul.mubr.f32.gmra.mrb[82].mxu0 %v71_v45  ;;  %2517 = vmatmul.mubr.f32.gmra.mrb[82].mxu1 %v1815_v46  ;;  %v1853_v46 = vld [vmem:[%s4771_s0 + $0x400] sm:$0xff] }
  0xc8   :  { %2340 = vmatprep.mubr.msk.f32.mxu0 %vm2998_vm0, %v2999_v6  ;;  %2519 = vmatprep.mubr.msk.f32.mxu1 %vm2998_vm0, %v2999_v6 }
  0xcb   :  { %2341 = vmatmul.mubr.f32.gmra.mrb[84].mxu0 %v72_v47  ;;  %2520 = vmatmul.mubr.f32.gmra.mrb[84].mxu1 %v1816_v48  ;;  %v1833_v48 = vld [vmem:[%s4771_s0 + $0x360] sm:$0xff] }
  0xcc   :  { %2343 = vmatprep.mubr.msk.f32.mxu0 %vm2998_vm0, %v2999_v6  ;;  %2522 = vmatprep.mubr.msk.f32.mxu1 %vm2998_vm0, %v2999_v6 }
  0xcf   :  { %2344 = vmatmul.mubr.f32.gmra.mrb[86].mxu0 %v73_v49  ;;  %2523 = vmatmul.mubr.f32.gmra.mrb[86].mxu1 %v1817_v50  ;;  %v1882_v49 = vld [vmem:[%s4771_s0 + $0x4e8] sm:$0xff] }
  0xd0   :  { %2346 = vmatprep.mubr.msk.f32.mxu0 %vm2998_vm0, %v2999_v6  ;;  %2525 = vmatprep.mubr.msk.f32.mxu1 %vm2998_vm0, %v2999_v6 }
  0xd3   :  { %2347 = vmatmul.mubr.f32.gmra.mrb[88].mxu0 %v74_v51  ;;  %2526 = vmatmul.mubr.f32.gmra.mrb[88].mxu1 %v1818_v52 }
  0xd4   :  { %2349 = vmatprep.mubr.msk.f32.mxu0 %vm2998_vm0, %v2999_v6  ;;  %2528 = vmatprep.mubr.msk.f32.mxu1 %vm2998_vm0, %v2999_v6 }
  0xd7   :  { %2350 = vmatmul.mubr.f32.gmra.mrb[90].mxu0 %v75_v53  ;;  %2529 = vmatmul.mubr.f32.gmra.mrb[90].mxu1 %v1819_v54 }
  0xd8   :  { %2352 = vmatprep.mubr.msk.f32.mxu0 %vm2998_vm0, %v2999_v6  ;;  %2531 = vmatprep.mubr.msk.f32.mxu1 %vm2998_vm0, %v2999_v6 }
  0xdb   :  { %2353 = vmatmul.mubr.f32.gmra.mrb[92].mxu0 %v76_v55  ;;  %2532 = vmatmul.mubr.f32.gmra.mrb[92].mxu1 %v1820_v56  ;;  %v1834_v55 = vld [vmem:[%s4771_s0 + $0x368] sm:$0xff]  ;;  %v1883_v56 = vld [vmem:[%s4771_s0 + $0x4f0] sm:$0xff] }
  0xdc   :  { %2355 = vmatprep.mubr.msk.f32.mxu0 %vm2998_vm0, %v2999_v6  ;;  %2534 = vmatprep.mubr.msk.f32.mxu1 %vm2998_vm0, %v2999_v6 }
  0xdf   :  { %2356 = vmatmul.mubr.f32.gmra.mrb[94].mxu0 %v77_v57  ;;  %2535 = vmatmul.mubr.f32.gmra.mrb[94].mxu1 %v1821_v58 }
  0xe0   :  { %2358 = vmatprep.mubr.msk.f32.mxu0 %vm2998_vm0, %v2999_v6  ;;  %2537 = vmatprep.mubr.msk.f32.mxu1 %vm2998_vm0, %v2999_v6 }
  0xe3   :  { %2359 = vmatmul.mubr.f32.gmra.mrb[96].mxu0 %v78_v59  ;;  %2538 = vmatmul.mubr.f32.gmra.mrb[96].mxu1 %v1822_v60  ;;  %v1852_v60 = vld [vmem:[%s4771_s0 + $0x3f8] sm:$0xff] }
  0xe4   :  { %2572 = vmatprep.mubr.msk.f32.mxu0 %vm2998_vm0, %v2999_v6  ;;  %2751 = vmatprep.mubr.msk.f32.mxu1 %vm2998_vm0, %v2999_v6 }
  0xe7   :  { %2573 = vmatmul.mubr.f32.vlgmr.msra.gmra.mrb[98].mxu0 %v1823_v61  ;;  %2752 = vmatmul.mubr.f32.vlgmr.msra.gmra.mrb[98].mxu1 %v1872_v62  ;;  %v1835_v62 = vld [vmem:[%s4771_s0 + $0x370] sm:$0xff] }
  0xe8   :  { %2575 = vmatprep.mubr.msk.f32.mxu0 %vm2998_vm0, %v2999_v6  ;;  %2754 = vmatprep.mubr.msk.f32.mxu1 %vm2998_vm0, %v2999_v6 }
  0xeb   :  { %2576 = vmatmul.mubr.f32.gmra.mrb[100].mxu0 %v1824_v63  ;;  %2755 = vmatmul.mubr.f32.gmra.mrb[100].mxu1 %v1873_v0  ;;  %v1884_v63 = vld [vmem:[%s4771_s0 + $0x4f8] sm:$0xff] }
  0xec   :  { %2578 = vmatprep.mubr.msk.f32.mxu0 %vm2998_vm0, %v2999_v6  ;;  %2757 = vmatprep.mubr.msk.f32.mxu1 %vm2998_vm0, %v2999_v6 }
  0xef   :  { %2579 = vmatmul.mubr.f32.gmra.mrb[102].mxu0 %v1825_v1  ;;  %2758 = vmatmul.mubr.f32.gmra.mrb[102].mxu1 %v1874_v2 }
  0xf0   :  { %2581 = vmatprep.mubr.msk.f32.mxu0 %vm2998_vm0, %v2999_v6  ;;  %2760 = vmatprep.mubr.msk.f32.mxu1 %vm2998_vm0, %v2999_v6 }
  0xf3   :  { %2582 = vmatmul.mubr.f32.gmra.mrb[104].mxu0 %v1826_v3  ;;  %2761 = vmatmul.mubr.f32.gmra.mrb[104].mxu1 %v1875_v4 }
  0xf4   :  { %2584 = vmatprep.mubr.msk.f32.mxu0 %vm2998_vm0, %v2999_v6  ;;  %2763 = vmatprep.mubr.msk.f32.mxu1 %vm2998_vm0, %v2999_v6 }
  0xf6   :  { %v3688_v8 = vpop.f32.mrb[0].mxu0  ;;  %v3690_v9 = vpop.f32.mrb[0].mxu1 }
  0xf7   :  { %v2216_v10 = vpop.f32.mrb[1].mxu0  ;;  %2585 = vmatmul.mubr.f32.gmra.mrb[106].mxu0 %v1827_v5  ;;  %v2395_v12 = vpop.f32.mrb[1].mxu1  ;;  %2764 = vmatmul.mubr.f32.gmra.mrb[106].mxu1 %v1876_v7  ;;  %v1836_v5 = vld [vmem:[%s4771_s0 + $0x378] sm:$0xff]  ;;  %v1885_v7 = vld [vmem:[%s4771_s0 + $0x500] sm:$0xff] }
  0xf8   :  { %2587 = vmatprep.mubr.msk.f32.mxu0 %vm2998_vm0, %v2999_v6  ;;  %2766 = vmatprep.mubr.msk.f32.mxu1 %vm2998_vm0, %v2999_v6 }
  0xfa   :  { %v3704_v15 = vpop.f32.mrb[2].mxu0  ;;  %v3706_v16 = vpop.f32.mrb[2].mxu1 }
  0xfb   :  { %v2219_v17 = vpop.f32.mrb[3].mxu0  ;;  %2588 = vmatmul.mubr.f32.gmra.mrb[108].mxu0 %v1828_v13  ;;  %v2398_v19 = vpop.f32.mrb[3].mxu1  ;;  %2767 = vmatmul.mubr.f32.gmra.mrb[108].mxu1 %v1877_v14  ;;  %v1851_v14 = vld [vmem:[%s4771_s0 + $0x3f0] sm:$0xff] }
  0xfc   :  { %2590 = vmatprep.mubr.msk.f32.mxu0 %vm2998_vm0, %v2999_v6  ;;  %2769 = vmatprep.mubr.msk.f32.mxu1 %vm2998_vm0, %v2999_v6  ;;  %v1837_v19 = vld [vmem:[%s4771_s0 + $0x380] sm:$0xff] }
  0xfe   :  { %v3720_v22 = vpop.f32.mrb[4].mxu0  ;;  %v3722_v23 = vpop.f32.mrb[4].mxu1 }
  0xff   :  { %v2222_v24 = vpop.f32.mrb[5].mxu0  ;;  %2591 = vmatmul.mubr.f32.gmra.mrb[110].mxu0 %v1829_v20  ;;  %v2401_v26 = vpop.f32.mrb[5].mxu1  ;;  %2770 = vmatmul.mubr.f32.gmra.mrb[110].mxu1 %v1878_v21  ;;  %v1886_v20 = vld [vmem:[%s4771_s0 + $0x508] sm:$0xff] }
 0x100   :  { %2593 = vmatprep.mubr.msk.f32.mxu0 %vm2998_vm0, %v2999_v6  ;;  %2772 = vmatprep.mubr.msk.f32.mxu1 %vm2998_vm0, %v2999_v6 }
 0x102   :  { %v3736_v29 = vpop.f32.mrb[6].mxu0  ;;  %v3738_v30 = vpop.f32.mrb[6].mxu1 }
 0x103   :  { %v2225_v31 = vpop.f32.mrb[7].mxu0  ;;  %2594 = vmatmul.mubr.f32.gmra.mrb[112].mxu0 %v1830_v27  ;;  %v2404_v33 = vpop.f32.mrb[7].mxu1  ;;  %2773 = vmatmul.mubr.f32.gmra.mrb[112].mxu1 %v1879_v28 }
 0x104   :  { %2596 = vmatprep.mubr.msk.f32.mxu0 %vm2998_vm0, %v2999_v6  ;;  %2775 = vmatprep.mubr.msk.f32.mxu1 %vm2998_vm0, %v2999_v6  ;;  %v1838_v31 = vld [vmem:[%s4771_s0 + $0x388] sm:$0xff]  ;;  %v1887_v33 = vld [vmem:[%s4771_s0 + $0x510] sm:$0xff] }
 0x106   :  { %v3752_v36 = vpop.f32.mrb[8].mxu0  ;;  %v3754_v37 = vpop.f32.mrb[8].mxu1 }
 0x107   :  { %v2228_v38 = vpop.f32.mrb[9].mxu0  ;;  %2597 = vmatmul.mubr.f32.gmra.mrb[114].mxu0 %v1831_v34  ;;  %v2407_v40 = vpop.f32.mrb[9].mxu1  ;;  %2776 = vmatmul.mubr.f32.gmra.mrb[114].mxu1 %v1880_v35 }
 0x108   :  { %2599 = vmatprep.mubr.msk.f32.mxu0 %vm2998_vm0, %v2999_v6  ;;  %2778 = vmatprep.mubr.msk.f32.mxu1 %vm2998_vm0, %v2999_v6  ;;  %v1850_v40 = vld [vmem:[%s4771_s0 + $0x3e8] sm:$0xff] }
 0x10a   :  { %v3768_v43 = vpop.f32.mrb[10].mxu0  ;;  %v3770_v44 = vpop.f32.mrb[10].mxu1 }
 0x10b   :  { %v2231_v45 = vpop.f32.mrb[11].mxu0  ;;  %2600 = vmatmul.mubr.f32.gmra.mrb[116].mxu0 %v1832_v41  ;;  %v2410_v47 = vpop.f32.mrb[11].mxu1  ;;  %2779 = vmatmul.mubr.f32.gmra.mrb[116].mxu1 %v1881_v42  ;;  %v1839_v42 = vld [vmem:[%s4771_s0 + $0x390] sm:$0xff] }
 0x10c   :  { %2602 = vmatprep.mubr.msk.f32.mxu0 %vm2998_vm0, %v2999_v6  ;;  %2781 = vmatprep.mubr.msk.f32.mxu1 %vm2998_vm0, %v2999_v6  ;;  %v1888_v45 = vld [vmem:[%s4771_s0 + $0x518] sm:$0xff] }
 0x10e   :  { %v3784_v50 = vpop.f32.mrb[12].mxu0  ;;  %v3786_v51 = vpop.f32.mrb[12].mxu1 }
 0x10f   :  { %v2234_v52 = vpop.f32.mrb[13].mxu0  ;;  %2603 = vmatmul.mubr.f32.gmra.mrb[118].mxu0 %v1833_v48  ;;  %v2413_v54 = vpop.f32.mrb[13].mxu1  ;;  %2782 = vmatmul.mubr.f32.gmra.mrb[118].mxu1 %v1882_v49 }
 0x110   :  { %2605 = vmatprep.mubr.msk.f32.mxu0 %vm2998_vm0, %v2999_v6  ;;  %2784 = vmatprep.mubr.msk.f32.mxu1 %vm2998_vm0, %v2999_v6 }
 0x112   :  { %v3800_v57 = vpop.f32.mrb[14].mxu0  ;;  %v3802_v58 = vpop.f32.mrb[14].mxu1 }
 0x113   :  { %v2237_v59 = vpop.f32.mrb[15].mxu0  ;;  %2606 = vmatmul.mubr.f32.gmra.mrb[120].mxu0 %v1834_v55  ;;  %v2416_v61 = vpop.f32.mrb[15].mxu1  ;;  %2785 = vmatmul.mubr.f32.gmra.mrb[120].mxu1 %v1883_v56  ;;  %v1840_v55 = vld [vmem:[%s4771_s0 + $0x398] sm:$0xff]  ;;  %v1889_v56 = vld [vmem:[%s4771_s0 + $0x520] sm:$0xff] }
 0x114   :  { %2608 = vmatprep.mubr.msk.f32.mxu0 %vm2998_vm0, %v2999_v6  ;;  %2787 = vmatprep.mubr.msk.f32.mxu1 %vm2998_vm0, %v2999_v6 }
 0x116   :  { %v3816_v0 = vpop.f32.mrb[16].mxu0  ;;  %v3818_v1 = vpop.f32.mrb[16].mxu1 }
 0x117   :  { %v2240_v2 = vpop.f32.mrb[17].mxu0  ;;  %2609 = vmatmul.mubr.f32.gmra.mrb[122].mxu0 %v1835_v62  ;;  %v2419_v4 = vpop.f32.mrb[17].mxu1  ;;  %2788 = vmatmul.mubr.f32.gmra.mrb[122].mxu1 %v1884_v63  ;;  %v1849_v63 = vld [vmem:[%s4771_s0 + $0x3e0] sm:$0xff] }
 0x118   :  { %2611 = vmatprep.mubr.msk.f32.mxu0 %vm2998_vm0, %v2999_v6  ;;  %2790 = vmatprep.mubr.msk.f32.mxu1 %vm2998_vm0, %v2999_v6  ;;  %v1841_v4 = vld [vmem:[%s4771_s0 + $0x3a0] sm:$0xff] }
 0x11a   :  { %v3832_v10 = vpop.f32.mrb[18].mxu0  ;;  %v3834_v12 = vpop.f32.mrb[18].mxu1 }
 0x11b   :  { %v2243_v13 = vpop.f32.mrb[19].mxu0  ;;  %2612 = vmatmul.mubr.f32.gmra.mrb[124].mxu0 %v1836_v5  ;;  %v2422_v17 = vpop.f32.mrb[19].mxu1  ;;  %2791 = vmatmul.mubr.f32.gmra.mrb[124].mxu1 %v1885_v7  ;;  %v1890_v5 = vld [vmem:[%s4771_s0 + $0x528] sm:$0xff] }
 0x11c   :  { %2614 = vmatprep.mubr.msk.f32.mxu0 %vm2998_vm0, %v2999_v6  ;;  %2793 = vmatprep.mubr.msk.f32.mxu1 %vm2998_vm0, %v2999_v6 }
 0x11e   :  { %v3848_v21 = vpop.f32.mrb[20].mxu0  ;;  %v3850_v24 = vpop.f32.mrb[20].mxu1 }
 0x11f   :  { %v2246_v26 = vpop.f32.mrb[21].mxu0  ;;  %2615 = vmatmul.mubr.f32.gmra.mrb[126].mxu0 %v1837_v19  ;;  %v2425_v28 = vpop.f32.mrb[21].mxu1  ;;  %2794 = vmatmul.mubr.f32.gmra.mrb[126].mxu1 %v1886_v20 }
 0x120   :  { %2617 = vmatprep.mubr.msk.f32.mxu0 %vm2998_vm0, %v2999_v6  ;;  %2796 = vmatprep.mubr.msk.f32.mxu1 %vm2998_vm0, %v2999_v6  ;;  %v1842_v26 = vld [vmem:[%s4771_s0 + $0x3a8] sm:$0xff]  ;;  %v1891_v28 = vld [vmem:[%s4771_s0 + $0x530] sm:$0xff] }
 0x122   :  { %v3864_v34 = vpop.f32.mrb[22].mxu0  ;;  %v3866_v35 = vpop.f32.mrb[22].mxu1 }
 0x123   :  { %v2249_v38 = vpop.f32.mrb[23].mxu0  ;;  %2618 = vmatmul.mubr.f32.gmra.mrb[128].mxu0 %v1838_v31  ;;  %v2428_v41 = vpop.f32.mrb[23].mxu1  ;;  %2797 = vmatmul.mubr.f32.gmra.mrb[128].mxu1 %v1887_v33 }
 0x124   :  { %2620 = vmatprep.mubr.msk.f32.mxu0 %vm2998_vm0, %v2999_v6  ;;  %2799 = vmatprep.mubr.msk.f32.mxu1 %vm2998_vm0, %v2999_v6  ;;  %v1848_v41 = vld [vmem:[%s4771_s0 + $0x3d8] sm:$0xff] }
 0x126   :  { %v3880_v47 = vpop.f32.mrb[24].mxu0  ;;  %v3882_v48 = vpop.f32.mrb[24].mxu1 }
 0x127   :  { %v2252_v49 = vpop.f32.mrb[25].mxu0  ;;  %2621 = vmatmul.mubr.f32.gmra.mrb[130].mxu0 %v1839_v42  ;;  %v2431_v54 = vpop.f32.mrb[25].mxu1  ;;  %2800 = vmatmul.mubr.f32.gmra.mrb[130].mxu1 %v1888_v45  ;;  %v1843_v45 = vld [vmem:[%s4771_s0 + $0x3b0] sm:$0xff] }
 0x128   :  { %2623 = vmatprep.mubr.msk.f32.mxu0 %vm2998_vm0, %v2999_v6  ;;  %2802 = vmatprep.mubr.msk.f32.mxu1 %vm2998_vm0, %v2999_v6  ;;  %v1892_v49 = vld [vmem:[%s4771_s0 + $0x538] sm:$0xff] }
 0x12a   :  { %v3896_v59 = vpop.f32.mrb[26].mxu0  ;;  %v3898_v61 = vpop.f32.mrb[26].mxu1 }
 0x12b   :  { %v2255_v62 = vpop.f32.mrb[27].mxu0  ;;  %2624 = vmatmul.mubr.f32.gmra.mrb[132].mxu0 %v1840_v55  ;;  %v2434_v2 = vpop.f32.mrb[27].mxu1  ;;  %2803 = vmatmul.mubr.f32.gmra.mrb[132].mxu1 %v1889_v56 }
 0x12c   :  { %2626 = vmatprep.mubr.msk.f32.mxu0 %vm2998_vm0, %v2999_v6  ;;  %2805 = vmatprep.mubr.msk.f32.mxu1 %vm2998_vm0, %v2999_v6 }
 0x12e   :  { %v3912_v7 = vpop.f32.mrb[28].mxu0  ;;  %v3914_v13 = vpop.f32.mrb[28].mxu1 }
 0x12f   :  { %v2258_v17 = vpop.f32.mrb[29].mxu0  ;;  %2627 = vmatmul.mubr.f32.gmra.mrb[134].mxu0 %v1841_v4  ;;  %v2437_v20 = vpop.f32.mrb[29].mxu1  ;;  %2806 = vmatmul.mubr.f32.gmra.mrb[134].mxu1 %v1890_v5  ;;  %v1844_v4 = vld [vmem:[%s4771_s0 + $0x3b8] sm:$0xff]  ;;  %v1893_v5 = vld [vmem:[%s4771_s0 + $0x540] sm:$0xff] }
 0x130   :  { %2629 = vmatprep.mubr.msk.f32.mxu0 %vm2998_vm0, %v2999_v6  ;;  %2808 = vmatprep.mubr.msk.f32.mxu1 %vm2998_vm0, %v2999_v6 }
 0x132   :  { %v3928_v31 = vpop.f32.mrb[30].mxu0  ;;  %v3930_v33 = vpop.f32.mrb[30].mxu1 }
 0x133   :  { %v2261_v38 = vpop.f32.mrb[31].mxu0  ;;  %2630 = vmatmul.mubr.f32.gmra.mrb[136].mxu0 %v1842_v26  ;;  %v2440_v42 = vpop.f32.mrb[31].mxu1  ;;  %2809 = vmatmul.mubr.f32.gmra.mrb[136].mxu1 %v1891_v28  ;;  %v1847_v28 = vld [vmem:[%s4771_s0 + $0x3d0] sm:$0xff] }
 0x134   :  { %2632 = vmatprep.mubr.msk.f32.mxu0 %vm2998_vm0, %v2999_v6  ;;  %2811 = vmatprep.mubr.msk.f32.mxu1 %vm2998_vm0, %v2999_v6  ;;  %v1845_v42 = vld [vmem:[%s4771_s0 + $0x3c0] sm:$0xff] }
 0x136   :  { %v3944_v54 = vpop.f32.mrb[32].mxu0  ;;  %v3946_v55 = vpop.f32.mrb[32].mxu1 }
 0x137   :  { %v2264_v56 = vpop.f32.mrb[33].mxu0  ;;  %2633 = vmatmul.mubr.f32.gmra.mrb[138].mxu0 %v1843_v45  ;;  %v2443_v2 = vpop.f32.mrb[33].mxu1  ;;  %2812 = vmatmul.mubr.f32.gmra.mrb[138].mxu1 %v1892_v49  ;;  %v1894_v45 = vld [vmem:[%s4771_s0 + $0x548] sm:$0xff] }
 0x138   :  { %2635 = vmatprep.mubr.msk.f32.mxu0 %vm2998_vm0, %v2999_v6  ;;  %2814 = vmatprep.mubr.msk.f32.mxu1 %vm2998_vm0, %v2999_v6 }
 0x13a   :  { %v3960_v17 = vpop.f32.mrb[34].mxu0  ;;  %v3962_v20 = vpop.f32.mrb[34].mxu1 }
 0x13b   :  { %v2267_v26 = vpop.f32.mrb[35].mxu0  ;;  %2636 = vmatmul.mubr.f32.gmra.mrb[140].mxu0 %v1844_v4  ;;  %v2446_v38 = vpop.f32.mrb[35].mxu1  ;;  %2815 = vmatmul.mubr.f32.gmra.mrb[140].mxu1 %v1893_v5 }
 0x13c   :  { %2638 = vmatprep.mubr.msk.f32.mxu0 %vm2998_vm0, %v2999_v6  ;;  %2817 = vmatprep.mubr.msk.f32.mxu1 %vm2998_vm0, %v2999_v6  ;;  %v1846_v26 = vld [vmem:[%s4771_s0 + $0x3c8] sm:$0xff]  ;;  %v1895_v38 = vld [vmem:[%s4771_s0 + $0x550] sm:$0xff] }
 0x13e   :  { %v3976_v49 = vpop.f32.mrb[36].mxu0  ;;  %v3978_v56 = vpop.f32.mrb[36].mxu1 }
 0x13f   :  { %v2270_v2 = vpop.f32.mrb[37].mxu0  ;;  %2639 = vmatmul.mubr.f32.gmra.mrb[142].mxu0 %v1845_v42  ;;  %v2449_v5 = vpop.f32.mrb[37].mxu1  ;;  %2818 = vmatmul.mubr.f32.gmra.mrb[142].mxu1 %v1894_v45 }
 0x140   :  { %2641 = vmatprep.mubr.msk.f32.mxu0 %vm2998_vm0, %v2999_v6  ;;  %2820 = vmatprep.mubr.msk.f32.mxu1 %vm2998_vm0, %v2999_v6 }
 0x142   :  { %v3992_v2 = vpop.f32.mrb[38].mxu0  ;;  %v3994_v4 = vpop.f32.mrb[38].mxu1 }
 0x143   :  { %v2273_v42 = vpop.f32.mrb[39].mxu0  ;;  %2642 = vmatmul.mubr.f32.gmra.mrb[144].mxu0 %v1846_v26  ;;  %v2452_v5 = vpop.f32.mrb[39].mxu1  ;;  %2821 = vmatmul.mubr.f32.gmra.mrb[144].mxu1 %v1895_v38 }
 0x144   :  { %2644 = vmatprep.mubr.msk.f32.mxu0 %vm2998_vm0, %v2999_v6  ;;  %2823 = vmatprep.mubr.msk.f32.mxu1 %vm2998_vm0, %v2999_v6  ;;  %v1896_v42 = vld [vmem:[%s4771_s0 + $0x558] sm:$0xff] }
 0x146   :  { %v4008_v62 = vpop.f32.mrb[40].mxu0  ;;  %v4010_v45 = vpop.f32.mrb[40].mxu1 }
 0x147   :  { %v2276_v26 = vpop.f32.mrb[41].mxu0  ;;  %2645 = vmatmul.mubr.f32.gmra.mrb[146].mxu0 %v1847_v28  ;;  %v2455_v5 = vpop.f32.mrb[41].mxu1  ;;  %2824 = vmatmul.mubr.f32.gmra.mrb[146].mxu1 %v1896_v42 }
 0x148   :  { %2647 = vmatprep.mubr.msk.f32.mxu0 %vm2998_vm0, %v2999_v6  ;;  %2826 = vmatprep.mubr.msk.f32.mxu1 %vm2998_vm0, %v2999_v6  ;;  %v1897_v26 = vld [vmem:[%s4771_s0 + $0x560] sm:$0xff] }
 0x14a   :  { %v4024_v19 = vpop.f32.mrb[42].mxu0  ;;  %v4026_v38 = vpop.f32.mrb[42].mxu1 }
 0x14b   :  { %v2279_v28 = vpop.f32.mrb[43].mxu0  ;;  %2648 = vmatmul.mubr.f32.gmra.mrb[148].mxu0 %v1848_v41  ;;  %v2458_v5 = vpop.f32.mrb[43].mxu1  ;;  %2827 = vmatmul.mubr.f32.gmra.mrb[148].mxu1 %v1897_v26 }
 0x14c   :  { %2650 = vmatprep.mubr.msk.f32.mxu0 %vm2998_vm0, %v2999_v6  ;;  %2829 = vmatprep.mubr.msk.f32.mxu1 %vm2998_vm0, %v2999_v6  ;;  %v1898_v28 = vld [vmem:[%s4771_s0 + $0x568] sm:$0xff] }
 0x14e   :  { %v4040_v52 = vpop.f32.mrb[44].mxu0  ;;  %v4042_v42 = vpop.f32.mrb[44].mxu1 }
 0x14f   :  { %v2282_v41 = vpop.f32.mrb[45].mxu0  ;;  %2651 = vmatmul.mubr.f32.gmra.mrb[150].mxu0 %v1849_v63  ;;  %v2461_v5 = vpop.f32.mrb[45].mxu1  ;;  %2830 = vmatmul.mubr.f32.gmra.mrb[150].mxu1 %v1898_v28 }
 0x150   :  { %2653 = vmatprep.mubr.msk.f32.mxu0 %vm2998_vm0, %v2999_v6  ;;  %2832 = vmatprep.mubr.msk.f32.mxu1 %vm2998_vm0, %v2999_v6  ;;  %v1899_v41 = vld [vmem:[%s4771_s0 + $0x570] sm:$0xff] }
 0x152   :  { %v4056_v27 = vpop.f32.mrb[46].mxu0  ;;  %v4058_v26 = vpop.f32.mrb[46].mxu1 }
 0x153   :  { %v2285_v63 = vpop.f32.mrb[47].mxu0  ;;  %2654 = vmatmul.mubr.f32.gmra.mrb[152].mxu0 %v1850_v40  ;;  %v2464_v5 = vpop.f32.mrb[47].mxu1  ;;  %2833 = vmatmul.mubr.f32.gmra.mrb[152].mxu1 %v1899_v41 }
 0x154   :  { %2656 = vmatprep.mubr.msk.f32.mxu0 %vm2998_vm0, %v2999_v6  ;;  %2835 = vmatprep.mubr.msk.f32.mxu1 %vm2998_vm0, %v2999_v6  ;;  %v1900_v63 = vld [vmem:[%s4771_s0 + $0x578] sm:$0xff] }
 0x156   :  { %v4072_v3 = vpop.f32.mrb[48].mxu0  ;;  %v4074_v28 = vpop.f32.mrb[48].mxu1 }
 0x157   :  { %4823 = vst [vmem:[#allocation2_spill] sm:$0xff] %v4074_v28  ;;  %v2288_v40 = vpop.f32.mrb[49].mxu0  ;;  %2657 = vmatmul.mubr.f32.gmra.mrb[154].mxu0 %v1851_v14  ;;  %v2467_v5 = vpop.f32.mrb[49].mxu1  ;;  %2836 = vmatmul.mubr.f32.gmra.mrb[154].mxu1 %v1900_v63 }
 0x158   :  { %2659 = vmatprep.mubr.msk.f32.mxu0 %vm2998_vm0, %v2999_v6  ;;  %2838 = vmatprep.mubr.msk.f32.mxu1 %vm2998_vm0, %v2999_v6  ;;  %v1901_v40 = vld [vmem:[%s4771_s0 + $0x580] sm:$0xff] }
 0x15a   :  { %v4088_v53 = vpop.f32.mrb[50].mxu0  ;;  %v4090_v41 = vpop.f32.mrb[50].mxu1 }
 0x15b   :  { %4824 = vst [vmem:[#allocation3_spill] sm:$0xff] %v4088_v53  ;;  %4825 = vst [vmem:[#allocation4_spill] sm:$0xff] %v4090_v41  ;;  %v2291_v14 = vpop.f32.mrb[51].mxu0  ;;  %2660 = vmatmul.mubr.f32.gmra.mrb[156].mxu0 %v1852_v60  ;;  %v2470_v5 = vpop.f32.mrb[51].mxu1  ;;  %2839 = vmatmul.mubr.f32.gmra.mrb[156].mxu1 %v1901_v40 }
 0x15c   :  { %2662 = vmatprep.mubr.msk.f32.mxu0 %vm2998_vm0, %v2999_v6  ;;  %2841 = vmatprep.mubr.msk.f32.mxu1 %vm2998_vm0, %v2999_v6  ;;  %v1902_v14 = vld [vmem:[%s4771_s0 + $0x588] sm:$0xff] }
 0x15e   :  { %v4104_v39 = vpop.f32.mrb[52].mxu0  ;;  %v4106_v63 = vpop.f32.mrb[52].mxu1 }
 0x15f   :  { %4826 = vst [vmem:[#allocation5_spill] sm:$0xff] %v4104_v39  ;;  %4827 = vst [vmem:[#allocation6_spill] sm:$0xff] %v4106_v63  ;;  %v2294_v60 = vpop.f32.mrb[53].mxu0  ;;  %2663 = vmatmul.mubr.f32.gmra.mrb[158].mxu0 %v1853_v46  ;;  %v2473_v5 = vpop.f32.mrb[53].mxu1  ;;  %2842 = vmatmul.mubr.f32.gmra.mrb[158].mxu1 %v1902_v14 }
 0x160   :  { %2665 = vmatprep.mubr.msk.f32.mxu0 %vm2998_vm0, %v2999_v6  ;;  %2844 = vmatprep.mubr.msk.f32.mxu1 %vm2998_vm0, %v2999_v6  ;;  %v1903_v60 = vld [vmem:[%s4771_s0 + $0x590] sm:$0xff] }
 0x162   :  { %v4120_v25 = vpop.f32.mrb[54].mxu0  ;;  %v4122_v40 = vpop.f32.mrb[54].mxu1 }
 0x163   :  { %4828 = vst [vmem:[#allocation7_spill] sm:$0xff] %v4120_v25  ;;  %4829 = vst [vmem:[#allocation8_spill] sm:$0xff] %v4122_v40  ;;  %v2297_v46 = vpop.f32.mrb[55].mxu0  ;;  %2666 = vmatmul.mubr.f32.gmra.mrb[160].mxu0 %v1854_v32  ;;  %v2476_v5 = vpop.f32.mrb[55].mxu1  ;;  %2845 = vmatmul.mubr.f32.gmra.mrb[160].mxu1 %v1903_v60  ;;  %v1856_v40 = vld [vmem:[%s4771_s0 + $0x418] sm:$0xff] }
 0x164   :  { %2668 = vmatprep.mubr.msk.f32.mxu0 %vm2998_vm0, %v2999_v6  ;;  %2847 = vmatprep.mubr.msk.f32.mxu1 %vm2998_vm0, %v2999_v6  ;;  %v1904_v46 = vld [vmem:[%s4771_s0 + $0x598] sm:$0xff] }
 0x166   :  { %v4136_v11 = vpop.f32.mrb[56].mxu0  ;;  %v4138_v14 = vpop.f32.mrb[56].mxu1 }
 0x167   :  { %4830 = vst [vmem:[#allocation9_spill] sm:$0xff] %v4136_v11  ;;  %4831 = vst [vmem:[#allocation10_spill] sm:$0xff] %v4138_v14  ;;  %v2300_v32 = vpop.f32.mrb[57].mxu0  ;;  %2669 = vmatmul.mubr.f32.gmra.mrb[162].mxu0 %v1855_v18  ;;  %v2479_v5 = vpop.f32.mrb[57].mxu1  ;;  %2848 = vmatmul.mubr.f32.gmra.mrb[162].mxu1 %v1904_v46  ;;  %v1857_v14 = vld [vmem:[%s4771_s0 + $0x420] sm:$0xff] }
 0x168   :  { %2671 = vmatprep.mubr.msk.f32.mxu0 %vm2998_vm0, %v2999_v6  ;;  %2850 = vmatprep.mubr.msk.f32.mxu1 %vm2998_vm0, %v2999_v6  ;;  %v1905_v32 = vld [vmem:[%s4771_s0 + $0x5a0] sm:$0xff] }
 0x16a   :  { %v4152_v25 = vpop.f32.mrb[58].mxu0  ;;  %v4154_v60 = vpop.f32.mrb[58].mxu1 }
 0x16b   :  { %4832 = vst [vmem:[#allocation11_spill] sm:$0xff] %v4152_v25  ;;  %4833 = vst [vmem:[#allocation12_spill] sm:$0xff] %v4154_v60  ;;  %v2303_v18 = vpop.f32.mrb[59].mxu0  ;;  %2672 = vmatmul.mubr.f32.gmra.mrb[164].mxu0 %v1856_v40  ;;  %v2482_v5 = vpop.f32.mrb[59].mxu1  ;;  %2851 = vmatmul.mubr.f32.gmra.mrb[164].mxu1 %v1905_v32  ;;  %v1858_v60 = vld [vmem:[%s4771_s0 + $0x428] sm:$0xff] }
 0x16c   :  { %2674 = vmatprep.mubr.msk.f32.mxu0 %vm2998_vm0, %v2999_v6  ;;  %2853 = vmatprep.mubr.msk.f32.mxu1 %vm2998_vm0, %v2999_v6  ;;  %v1906_v18 = vld [vmem:[%s4771_s0 + $0x5a8] sm:$0xff] }
 0x16e   :  { %v4168_v11 = vpop.f32.mrb[60].mxu0  ;;  %v4170_v46 = vpop.f32.mrb[60].mxu1 }
 0x16f   :  { %4834 = vst [vmem:[#allocation13_spill] sm:$0xff] %v4168_v11  ;;  %4835 = vst [vmem:[#allocation14_spill] sm:$0xff] %v4170_v46  ;;  %v2306_v40 = vpop.f32.mrb[61].mxu0  ;;  %2675 = vmatmul.mubr.f32.gmra.mrb[166].mxu0 %v1857_v14  ;;  %v2485_v5 = vpop.f32.mrb[61].mxu1  ;;  %2854 = vmatmul.mubr.f32.gmra.mrb[166].mxu1 %v1906_v18  ;;  %v1859_v46 = vld [vmem:[%s4771_s0 + $0x430] sm:$0xff] }
 0x170   :  { %2677 = vmatprep.mubr.msk.f32.mxu0 %vm2998_vm0, %v2999_v6  ;;  %2856 = vmatprep.mubr.msk.f32.mxu1 %vm2998_vm0, %v2999_v6  ;;  %v1907_v40 = vld [vmem:[%s4771_s0 + $0x5b0] sm:$0xff] }
 0x172   :  { %v4184_v25 = vpop.f32.mrb[62].mxu0  ;;  %v4186_v32 = vpop.f32.mrb[62].mxu1 }
 0x173   :  { %4836 = vst [vmem:[#allocation15_spill] sm:$0xff] %v4184_v25  ;;  %4837 = vst [vmem:[#allocation16_spill] sm:$0xff] %v4186_v32  ;;  %v2309_v14 = vpop.f32.mrb[63].mxu0  ;;  %2678 = vmatmul.mubr.f32.gmra.mrb[168].mxu0 %v1858_v60  ;;  %v2488_v5 = vpop.f32.mrb[63].mxu1  ;;  %2857 = vmatmul.mubr.f32.gmra.mrb[168].mxu1 %v1907_v40  ;;  %v1860_v32 = vld [vmem:[%s4771_s0 + $0x438] sm:$0xff] }
 0x174   :  { %2680 = vmatprep.mubr.msk.f32.mxu0 %vm2998_vm0, %v2999_v6  ;;  %2859 = vmatprep.mubr.msk.f32.mxu1 %vm2998_vm0, %v2999_v6  ;;  %v1908_v14 = vld [vmem:[%s4771_s0 + $0x5b8] sm:$0xff] }
 0x176   :  { %v4200_v11 = vpop.f32.mrb[64].mxu0  ;;  %v4202_v18 = vpop.f32.mrb[64].mxu1 }
 0x177   :  { %4838 = vst [vmem:[#allocation17_spill] sm:$0xff] %v4200_v11  ;;  %4839 = vst [vmem:[#allocation18_spill] sm:$0xff] %v4202_v18  ;;  %v2312_v60 = vpop.f32.mrb[65].mxu0  ;;  %2681 = vmatmul.mubr.f32.gmra.mrb[170].mxu0 %v1859_v46  ;;  %v2491_v5 = vpop.f32.mrb[65].mxu1  ;;  %2860 = vmatmul.mubr.f32.gmra.mrb[170].mxu1 %v1908_v14  ;;  %v1861_v18 = vld [vmem:[%s4771_s0 + $0x440] sm:$0xff] }
 0x178   :  { %2683 = vmatprep.mubr.msk.f32.mxu0 %vm2998_vm0, %v2999_v6  ;;  %2862 = vmatprep.mubr.msk.f32.mxu1 %vm2998_vm0, %v2999_v6  ;;  %v1909_v60 = vld [vmem:[%s4771_s0 + $0x5c0] sm:$0xff] }
 0x17a   :  { %v4216_v25 = vpop.f32.mrb[66].mxu0  ;;  %v4218_v40 = vpop.f32.mrb[66].mxu1 }
 0x17b   :  { %4840 = vst [vmem:[#allocation19_spill] sm:$0xff] %v4216_v25  ;;  %4841 = vst [vmem:[#allocation20_spill] sm:$0xff] %v4218_v40  ;;  %v2315_v46 = vpop.f32.mrb[67].mxu0  ;;  %2684 = vmatmul.mubr.f32.gmra.mrb[172].mxu0 %v1860_v32  ;;  %v2494_v5 = vpop.f32.mrb[67].mxu1  ;;  %2863 = vmatmul.mubr.f32.gmra.mrb[172].mxu1 %v1909_v60  ;;  %v1862_v40 = vld [vmem:[%s4771_s0 + $0x448] sm:$0xff] }
 0x17c   :  { %2686 = vmatprep.mubr.msk.f32.mxu0 %vm2998_vm0, %v2999_v6  ;;  %2865 = vmatprep.mubr.msk.f32.mxu1 %vm2998_vm0, %v2999_v6  ;;  %v1910_v46 = vld [vmem:[%s4771_s0 + $0x5c8] sm:$0xff] }
 0x17e   :  { %v4232_v11 = vpop.f32.mrb[68].mxu0  ;;  %v4234_v14 = vpop.f32.mrb[68].mxu1 }
 0x17f   :  { %4842 = vst [vmem:[#allocation21_spill] sm:$0xff] %v4232_v11  ;;  %4843 = vst [vmem:[#allocation22_spill] sm:$0xff] %v4234_v14  ;;  %v2318_v32 = vpop.f32.mrb[69].mxu0  ;;  %2687 = vmatmul.mubr.f32.gmra.mrb[174].mxu0 %v1861_v18  ;;  %v2497_v5 = vpop.f32.mrb[69].mxu1  ;;  %2866 = vmatmul.mubr.f32.gmra.mrb[174].mxu1 %v1910_v46  ;;  %v1863_v14 = vld [vmem:[%s4771_s0 + $0x450] sm:$0xff] }
 0x180   :  { %2689 = vmatprep.mubr.msk.f32.mxu0 %vm2998_vm0, %v2999_v6  ;;  %2868 = vmatprep.mubr.msk.f32.mxu1 %vm2998_vm0, %v2999_v6  ;;  %v1911_v32 = vld [vmem:[%s4771_s0 + $0x5d0] sm:$0xff] }
 0x182   :  { %v4248_v25 = vpop.f32.mrb[70].mxu0  ;;  %v4250_v60 = vpop.f32.mrb[70].mxu1 }
 0x183   :  { %4844 = vst [vmem:[#allocation23_spill] sm:$0xff] %v4248_v25  ;;  %4845 = vst [vmem:[#allocation24_spill] sm:$0xff] %v4250_v60  ;;  %v2321_v18 = vpop.f32.mrb[71].mxu0  ;;  %2690 = vmatmul.mubr.f32.gmra.mrb[176].mxu0 %v1862_v40  ;;  %v2500_v5 = vpop.f32.mrb[71].mxu1  ;;  %2869 = vmatmul.mubr.f32.gmra.mrb[176].mxu1 %v1911_v32  ;;  %v1864_v60 = vld [vmem:[%s4771_s0 + $0x458] sm:$0xff] }
 0x184   :  { %2692 = vmatprep.mubr.msk.f32.mxu0 %vm2998_vm0, %v2999_v6  ;;  %2871 = vmatprep.mubr.msk.f32.mxu1 %vm2998_vm0, %v2999_v6  ;;  %v1912_v18 = vld [vmem:[%s4771_s0 + $0x5d8] sm:$0xff] }
 0x186   :  { %v4264_v11 = vpop.f32.mrb[72].mxu0  ;;  %v4266_v46 = vpop.f32.mrb[72].mxu1 }
 0x187   :  { %4846 = vst [vmem:[#allocation25_spill] sm:$0xff] %v4264_v11  ;;  %4847 = vst [vmem:[#allocation26_spill] sm:$0xff] %v4266_v46  ;;  %v2324_v40 = vpop.f32.mrb[73].mxu0  ;;  %2693 = vmatmul.mubr.f32.gmra.mrb[178].mxu0 %v1863_v14  ;;  %v2503_v5 = vpop.f32.mrb[73].mxu1  ;;  %2872 = vmatmul.mubr.f32.gmra.mrb[178].mxu1 %v1912_v18  ;;  %v1865_v46 = vld [vmem:[%s4771_s0 + $0x460] sm:$0xff] }
 0x188   :  { %2695 = vmatprep.mubr.msk.f32.mxu0 %vm2998_vm0, %v2999_v6  ;;  %2874 = vmatprep.mubr.msk.f32.mxu1 %vm2998_vm0, %v2999_v6  ;;  %v1913_v40 = vld [vmem:[%s4771_s0 + $0x5e0] sm:$0xff] }
 0x18a   :  { %v4280_v25 = vpop.f32.mrb[74].mxu0  ;;  %v4282_v32 = vpop.f32.mrb[74].mxu1 }
 0x18b   :  { %4848 = vst [vmem:[#allocation27_spill] sm:$0xff] %v4280_v25  ;;  %4849 = vst [vmem:[#allocation28_spill] sm:$0xff] %v4282_v32  ;;  %v2327_v14 = vpop.f32.mrb[75].mxu0  ;;  %2696 = vmatmul.mubr.f32.gmra.mrb[180].mxu0 %v1864_v60  ;;  %v2506_v5 = vpop.f32.mrb[75].mxu1  ;;  %2875 = vmatmul.mubr.f32.gmra.mrb[180].mxu1 %v1913_v40  ;;  %v1866_v32 = vld [vmem:[%s4771_s0 + $0x468] sm:$0xff] }
 0x18c   :  { %2698 = vmatprep.mubr.msk.f32.mxu0 %vm2998_vm0, %v2999_v6  ;;  %2877 = vmatprep.mubr.msk.f32.mxu1 %vm2998_vm0, %v2999_v6  ;;  %v1914_v14 = vld [vmem:[%s4771_s0 + $0x5e8] sm:$0xff] }
 0x18e   :  { %v4296_v11 = vpop.f32.mrb[76].mxu0  ;;  %v4298_v18 = vpop.f32.mrb[76].mxu1 }
 0x18f   :  { %4850 = vst [vmem:[#allocation29_spill] sm:$0xff] %v4296_v11  ;;  %4851 = vst [vmem:[#allocation30_spill] sm:$0xff] %v4298_v18  ;;  %v2330_v60 = vpop.f32.mrb[77].mxu0  ;;  %2699 = vmatmul.mubr.f32.gmra.mrb[182].mxu0 %v1865_v46  ;;  %v2509_v5 = vpop.f32.mrb[77].mxu1  ;;  %2878 = vmatmul.mubr.f32.gmra.mrb[182].mxu1 %v1914_v14  ;;  %v1867_v18 = vld [vmem:[%s4771_s0 + $0x470] sm:$0xff] }
 0x190   :  { %2701 = vmatprep.mubr.msk.f32.mxu0 %vm2998_vm0, %v2999_v6  ;;  %2880 = vmatprep.mubr.msk.f32.mxu1 %vm2998_vm0, %v2999_v6  ;;  %v1915_v60 = vld [vmem:[%s4771_s0 + $0x5f0] sm:$0xff] }
 0x192   :  { %v4312_v25 = vpop.f32.mrb[78].mxu0  ;;  %v4314_v40 = vpop.f32.mrb[78].mxu1 }
 0x193   :  { %4852 = vst [vmem:[#allocation31_spill] sm:$0xff] %v4312_v25  ;;  %4853 = vst [vmem:[#allocation32_spill] sm:$0xff] %v4314_v40  ;;  %v2333_v46 = vpop.f32.mrb[79].mxu0  ;;  %2702 = vmatmul.mubr.f32.gmra.mrb[184].mxu0 %v1866_v32  ;;  %v2512_v5 = vpop.f32.mrb[79].mxu1  ;;  %2881 = vmatmul.mubr.f32.gmra.mrb[184].mxu1 %v1915_v60  ;;  %v1868_v40 = vld [vmem:[%s4771_s0 + $0x478] sm:$0xff] }
 0x194   :  { %2704 = vmatprep.mubr.msk.f32.mxu0 %vm2998_vm0, %v2999_v6  ;;  %2883 = vmatprep.mubr.msk.f32.mxu1 %vm2998_vm0, %v2999_v6  ;;  %v1916_v46 = vld [vmem:[%s4771_s0 + $0x5f8] sm:$0xff] }
 0x196   :  { %v4328_v11 = vpop.f32.mrb[80].mxu0  ;;  %v4330_v14 = vpop.f32.mrb[80].mxu1 }
 0x197   :  { %4854 = vst [vmem:[#allocation33_spill] sm:$0xff] %v4328_v11  ;;  %4855 = vst [vmem:[#allocation34_spill] sm:$0xff] %v4330_v14  ;;  %v2336_v32 = vpop.f32.mrb[81].mxu0  ;;  %2705 = vmatmul.mubr.f32.gmra.mrb[186].mxu0 %v1867_v18  ;;  %v2515_v5 = vpop.f32.mrb[81].mxu1  ;;  %2884 = vmatmul.mubr.f32.gmra.mrb[186].mxu1 %v1916_v46  ;;  %v1869_v14 = vld [vmem:[%s4771_s0 + $0x480] sm:$0xff] }
 0x198   :  { %2707 = vmatprep.mubr.msk.f32.mxu0 %vm2998_vm0, %v2999_v6  ;;  %2886 = vmatprep.mubr.msk.f32.mxu1 %vm2998_vm0, %v2999_v6  ;;  %v1917_v32 = vld [vmem:[%s4771_s0 + $0x600] sm:$0xff] }
 0x19a   :  { %v4344_v25 = vpop.f32.mrb[82].mxu0  ;;  %v4346_v60 = vpop.f32.mrb[82].mxu1 }
 0x19b   :  { %4856 = vst [vmem:[#allocation35_spill] sm:$0xff] %v4344_v25  ;;  %4857 = vst [vmem:[#allocation36_spill] sm:$0xff] %v4346_v60  ;;  %v2339_v18 = vpop.f32.mrb[83].mxu0  ;;  %2708 = vmatmul.mubr.f32.gmra.mrb[188].mxu0 %v1868_v40  ;;  %v2518_v5 = vpop.f32.mrb[83].mxu1  ;;  %2887 = vmatmul.mubr.f32.gmra.mrb[188].mxu1 %v1917_v32  ;;  %v1870_v60 = vld [vmem:[%s4771_s0 + $0x488] sm:$0xff] }
 0x19c   :  { %2710 = vmatprep.mubr.msk.f32.mxu0 %vm2998_vm0, %v2999_v6  ;;  %2889 = vmatprep.mubr.msk.f32.mxu1 %vm2998_vm0, %v2999_v6  ;;  %v1918_v18 = vld [vmem:[%s4771_s0 + $0x608] sm:$0xff] }
 0x19e   :  { %v4360_v11 = vpop.f32.mrb[84].mxu0  ;;  %v4362_v46 = vpop.f32.mrb[84].mxu1 }
 0x19f   :  { %4858 = vst [vmem:[#allocation37_spill] sm:$0xff] %v4360_v11  ;;  %4859 = vst [vmem:[#allocation38_spill] sm:$0xff] %v4362_v46  ;;  %v2342_v40 = vpop.f32.mrb[85].mxu0  ;;  %2711 = vmatmul.mubr.f32.gmra.mrb[190].mxu0 %v1869_v14  ;;  %v2521_v5 = vpop.f32.mrb[85].mxu1  ;;  %2890 = vmatmul.mubr.f32.gmra.mrb[190].mxu1 %v1918_v18  ;;  %v1871_v46 = vld [vmem:[%s4771_s0 + $0x490] sm:$0xff] }
 0x1a0   :  { %2713 = vmatprep.mubr.msk.f32.mxu0 %vm2998_vm0, %v2999_v6  ;;  %2892 = vmatprep.mubr.msk.f32.mxu1 %vm2998_vm0, %v2999_v6  ;;  %v1919_v40 = vld [vmem:[%s4771_s0 + $0x610] sm:$0xff] }
 0x1a2   :  { %v4376_v25 = vpop.f32.mrb[86].mxu0  ;;  %v4378_v32 = vpop.f32.mrb[86].mxu1 }
 0x1a3   :  { %4860 = vst [vmem:[#allocation39_spill] sm:$0xff] %v4376_v25  ;;  %4861 = vst [vmem:[#allocation40_spill] sm:$0xff] %v4378_v32  ;;  %v2345_v14 = vpop.f32.mrb[87].mxu0  ;;  %2714 = vmatmul.mubr.f32.gmra.mrb[192].mxu0 %v1870_v60  ;;  %v2524_v5 = vpop.f32.mrb[87].mxu1  ;;  %2893 = vmatmul.mubr.f32.gmra.mrb[192].mxu1 %v1919_v40 }
 0x1a4   :  { %2716 = vmatprep.mubr.msk.f32.mxu0 %vm2998_vm0, %v2999_v6  ;;  %2895 = vmatprep.mubr.msk.f32.mxu1 %vm2998_vm0, %v2999_v6  ;;  %v1920_v14 = vld [vmem:[%s4771_s0 + $0x618] sm:$0xff] }
 0x1a6   :  { %v4392_v11 = vpop.f32.mrb[88].mxu0  ;;  %v4394_v18 = vpop.f32.mrb[88].mxu1 }
 0x1a7   :  { %4862 = vst [vmem:[#allocation41_spill] sm:$0xff] %v4392_v11  ;;  %4863 = vst [vmem:[#allocation42_spill] sm:$0xff] %v4394_v18  ;;  %v2348_v60 = vpop.f32.mrb[89].mxu0  ;;  %2717 = vmatmul.mubr.f32.gmra.mrb[194].mxu0 %v1871_v46  ;;  %v2527_v5 = vpop.f32.mrb[89].mxu1  ;;  %2896 = vmatmul.mubr.f32.gmra.mrb[194].mxu1 %v1920_v14 }
 0x1aa   :  { %v4398_v32 = vpop.f32.mrb[90].mxu0  ;;  %v4400_v25 = vpop.f32.mrb[90].mxu1 }
 0x1ab   :  { %4864 = vst [vmem:[#allocation43_spill] sm:$0xff] %v4398_v32  ;;  %4865 = vst [vmem:[#allocation44_spill] sm:$0xff] %v4400_v25  ;;  %v2351_v6 = vpop.f32.mrb[91].mxu0  ;;  %v2530_v39 = vpop.f32.mrb[91].mxu1 }
 0x1ae   :  { %v4404_v41 = vpop.f32.mrb[92].mxu0  ;;  %v4406_v53 = vpop.f32.mrb[92].mxu1 }
 0x1af   :  { %4866 = vst [vmem:[#allocation45_spill] sm:$0xff] %v4404_v41  ;;  %4867 = vst [vmem:[#allocation46_spill] sm:$0xff] %v4406_v53  ;;  %v2354_v60 = vpop.f32.mrb[93].mxu0  ;;  %v2533_v46 = vpop.f32.mrb[93].mxu1  ;;  %v4872_v53 = vmax.f32 %v3688_v8, %v3690_v9 }
 0x1b2   :  { %v4410_v5 = vpop.f32.mrb[94].mxu0  ;;  %v4412_v14 = vpop.f32.mrb[94].mxu1 }
 0x1b3   :  { %4868 = vst [vmem:[#allocation47_spill] sm:$0xff] %v4410_v5  ;;  %4869 = vst [vmem:[#allocation48_spill] sm:$0xff] %v4412_v14  ;;  %v2357_v18 = vpop.f32.mrb[95].mxu0  ;;  %v2536_v11 = vpop.f32.mrb[95].mxu1 }
 0x1b4   :  { %v4428_v11 = vld [vmem:[%s4772_s2] ss:$0 sm:$0xff] }
 0x1b6   :  { %v4416_v63 = vpop.f32.mrb[96].mxu0  ;;  %v4418_v39 = vpop.f32.mrb[96].mxu1 }
 0x1b7   :  { %4870 = vst [vmem:[#allocation49_spill] sm:$0xff] %v4416_v63  ;;  %4871 = vst [vmem:[#allocation50_spill] sm:$0xff] %v4418_v39  ;;  %v2360_v25 = vpop.f32.mrb[97].mxu0  ;;  %v2539_v32 = vpop.f32.mrb[97].mxu1 }
 0x1b8   :  { %v4873_v32 = vmax.f32 %v3704_v15, %v3706_v16 }
 0x1ba   :  { %v914_v40 = vpop.f32.mrb[98].mxu0  ;;  %v1323_v46 = vpop.f32.mrb[98].mxu1 }
 0x1bb   :  { %v1158_v41 = vmax.f32 %v4872_v53, %v914_v40  ;;  %v2574_v18 = vpop.f32.mrb[99].mxu0  ;;  %v2753_v28 = vpop.f32.mrb[99].mxu1  ;;  %v4874_v40 = vmax.f32 %v3720_v22, %v3722_v23 }
 0x1bd   :  { %v1567_v6 = vmax.f32 %v1158_v41, %v1323_v46 }
 0x1be   :  { %v919_v14 = vpop.f32.mrb[100].mxu0  ;;  %v1328_v25 = vpop.f32.mrb[100].mxu1 }
 0x1bf   :  { %v1623_v5 = vadd.f32 %v4428_v11, %v1567_v6  ;;  %v1159_v60 = vmax.f32 %v4873_v32, %v919_v14  ;;  %v2577_v39 = vpop.f32.mrb[101].mxu0  ;;  %v2756_v63 = vpop.f32.mrb[101].mxu1 }
 0x1c0   :  { %v4875_v39 = vmax.f32 %v3736_v29, %v3738_v30 }
 0x1c1   :  { %v1672_v8 = vmax.f32 %v1623_v5, 0.0  ;;  %v1568_v9 = vmax.f32 %v1159_v60, %v1328_v25 }
 0x1c2   :  { %v924_v53 = vpop.f32.mrb[102].mxu0  ;;  %v1333_v28 = vpop.f32.mrb[102].mxu1 }
 0x1c3   :  { %1721 = vst [vmem:[%s4773_s3] sm:$0xff] %v1672_v8  ;;  %v1624_v41 = vadd.f32 %v4428_v11, %v1568_v9  ;;  %v1160_v6 = vmax.f32 %v4874_v40, %v924_v53  ;;  %v2580_v46 = vpop.f32.mrb[103].mxu0  ;;  %v2759_v18 = vpop.f32.mrb[103].mxu1 }
 0x1c5   :  { %v1673_v15 = vmax.f32 %v1624_v41, 0.0  ;;  %v1569_v16 = vmax.f32 %v1160_v6, %v1333_v28  ;;  %v4876_v28 = vmax.f32 %v3752_v36, %v3754_v37 }
 0x1c6   :  { %v929_v14 = vpop.f32.mrb[104].mxu0  ;;  %v1338_v63 = vpop.f32.mrb[104].mxu1 }
 0x1c7   :  { %1722 = vst [vmem:[%s4773_s3 + $0x8] sm:$0xff] %v1673_v15  ;;  %v1625_v5 = vadd.f32 %v4428_v11, %v1569_v16  ;;  %v1161_v60 = vmax.f32 %v4875_v39, %v929_v14  ;;  %v2583_v25 = vpop.f32.mrb[105].mxu0  ;;  %v2762_v32 = vpop.f32.mrb[105].mxu1  ;;  %v4877_v16 = vmax.f32 %v3768_v43, %v3770_v44 }
 0x1c8   :  { %v4878_v32 = vmax.f32 %v3784_v50, %v3786_v51 }
 0x1c9   :  { %v1674_v22 = vmax.f32 %v1625_v5, 0.0  ;;  %v1570_v23 = vmax.f32 %v1161_v60, %v1338_v63 }
 0x1ca   :  { %v934_v8 = vpop.f32.mrb[106].mxu0  ;;  %v1343_v9 = vpop.f32.mrb[106].mxu1 }
 0x1cb   :  { %1723 = vst [vmem:[%s4773_s3 + $0x10] sm:$0xff] %v1674_v22  ;;  %v1626_v53 = vadd.f32 %v4428_v11, %v1570_v23  ;;  %v1162_v41 = vmax.f32 %v4876_v28, %v934_v8  ;;  %v2586_v40 = vpop.f32.mrb[107].mxu0  ;;  %v2765_v6 = vpop.f32.mrb[107].mxu1 }
 0x1cd   :  { %v1675_v29 = vmax.f32 %v1626_v53, 0.0  ;;  %v1571_v30 = vmax.f32 %v1162_v41, %v1343_v9  ;;  %v4879_v41 = vmax.f32 %v3800_v57, %v3802_v58 }
 0x1ce   :  { %v939_v46 = vpop.f32.mrb[108].mxu0  ;;  %v1348_v18 = vpop.f32.mrb[108].mxu1 }
 0x1cf   :  { %1724 = vst [vmem:[%s4773_s3 + $0x18] sm:$0xff] %v1675_v29  ;;  %v1627_v15 = vadd.f32 %v4428_v11, %v1571_v30  ;;  %v1163_v14 = vmax.f32 %v4877_v16, %v939_v46  ;;  %v2589_v63 = vpop.f32.mrb[109].mxu0  ;;  %v2768_v5 = vpop.f32.mrb[109].mxu1 }
 0x1d1   :  { %v1676_v36 = vmax.f32 %v1627_v15, 0.0  ;;  %v1572_v37 = vmax.f32 %v1163_v14, %v1348_v18  ;;  %v4880_v15 = vmax.f32 %v3816_v0, %v3818_v1 }
 0x1d2   :  { %v944_v39 = vpop.f32.mrb[110].mxu0  ;;  %v1353_v60 = vpop.f32.mrb[110].mxu1 }
 0x1d3   :  { %1725 = vst [vmem:[%s4773_s3 + $0x20] sm:$0xff] %v1676_v36  ;;  %v1628_v25 = vadd.f32 %v4428_v11, %v1572_v37  ;;  %v1164_v22 = vmax.f32 %v4878_v32, %v944_v39  ;;  %v2592_v23 = vpop.f32.mrb[111].mxu0  ;;  %v2771_v8 = vpop.f32.mrb[111].mxu1  ;;  %v4881_v39 = vmax.f32 %v3832_v10, %v3834_v12 }
 0x1d5   :  { %v1677_v43 = vmax.f32 %v1628_v25, 0.0  ;;  %v1573_v44 = vmax.f32 %v1164_v22, %v1353_v60 }
 0x1d6   :  { %v949_v9 = vpop.f32.mrb[112].mxu0  ;;  %v1358_v53 = vpop.f32.mrb[112].mxu1 }
 0x1d7   :  { %1726 = vst [vmem:[%s4773_s3 + $0x28] sm:$0xff] %v1677_v43  ;;  %v1629_v28 = vadd.f32 %v4428_v11, %v1573_v44  ;;  %v1165_v40 = vmax.f32 %v4879_v41, %v949_v9  ;;  %v2595_v6 = vpop.f32.mrb[113].mxu0  ;;  %v2774_v29 = vpop.f32.mrb[113].mxu1  ;;  %v4882_v43 = vmax.f32 %v3848_v21, %v3850_v24 }
 0x1d8   :  { %v4883_v6 = vmax.f32 %v3864_v34, %v3866_v35 }
 0x1d9   :  { %v1678_v50 = vmax.f32 %v1629_v28, 0.0  ;;  %v1574_v51 = vmax.f32 %v1165_v40, %v1358_v53 }
 0x1da   :  { %v954_v30 = vpop.f32.mrb[114].mxu0  ;;  %v1363_v46 = vpop.f32.mrb[114].mxu1 }
 0x1db   :  { %1727 = vst [vmem:[%s4773_s3 + $0x30] sm:$0xff] %v1678_v50  ;;  %v1630_v18 = vadd.f32 %v4428_v11, %v1574_v51  ;;  %v1166_v16 = vmax.f32 %v4880_v15, %v954_v30  ;;  %v2598_v14 = vpop.f32.mrb[115].mxu0  ;;  %v2777_v63 = vpop.f32.mrb[115].mxu1  ;;  %v4884_v15 = vmax.f32 %v3880_v47, %v3882_v48 }
 0x1dd   :  { %v1679_v57 = vmax.f32 %v1630_v18, 0.0  ;;  %v1575_v58 = vmax.f32 %v1166_v16, %v1363_v46 }
 0x1de   :  { %v959_v5 = vpop.f32.mrb[116].mxu0  ;;  %v1368_v36 = vpop.f32.mrb[116].mxu1 }
 0x1df   :  { %1728 = vst [vmem:[%s4773_s3 + $0x38] sm:$0xff] %v1679_v57  ;;  %v1631_v37 = vadd.f32 %v4428_v11, %v1575_v58  ;;  %v1167_v60 = vmax.f32 %v4881_v39, %v959_v5  ;;  %v2601_v25 = vpop.f32.mrb[117].mxu0  ;;  %v2780_v32 = vpop.f32.mrb[117].mxu1 }
 0x1e1   :  { %v1680_v0 = vmax.f32 %v1631_v37, 0.0  ;;  %v1576_v1 = vmax.f32 %v1167_v60, %v1368_v36  ;;  %v4885_v36 = vmax.f32 %v3896_v59, %v3898_v61 }
 0x1e2   :  { %v964_v22 = vpop.f32.mrb[118].mxu0  ;;  %v1373_v23 = vpop.f32.mrb[118].mxu1 }
 0x1e3   :  { %1729 = vst [vmem:[%s4773_s3 + $0x40] sm:$0xff] %v1680_v0  ;;  %v1632_v8 = vadd.f32 %v4428_v11, %v1576_v1  ;;  %v1168_v44 = vmax.f32 %v4882_v43, %v964_v22  ;;  %v2604_v9 = vpop.f32.mrb[119].mxu0  ;;  %v2783_v53 = vpop.f32.mrb[119].mxu1  ;;  %v4886_v1 = vmax.f32 %v3912_v7, %v3914_v13 }
 0x1e4   :  { %v4887_v53 = vmax.f32 %v3928_v31, %v3930_v33 }
 0x1e5   :  { %v1681_v10 = vmax.f32 %v1632_v8, 0.0  ;;  %v1577_v12 = vmax.f32 %v1168_v44, %v1373_v23 }
 0x1e6   :  { %v969_v28 = vpop.f32.mrb[120].mxu0  ;;  %v1378_v41 = vpop.f32.mrb[120].mxu1 }
 0x1e7   :  { %1730 = vst [vmem:[%s4773_s3 + $0x48] sm:$0xff] %v1681_v10  ;;  %v1633_v40 = vadd.f32 %v4428_v11, %v1577_v12  ;;  %v1169_v29 = vmax.f32 %v4883_v6, %v969_v28  ;;  %v2607_v50 = vpop.f32.mrb[121].mxu0  ;;  %v2786_v51 = vpop.f32.mrb[121].mxu1 }
 0x1e9   :  { %v1682_v21 = vmax.f32 %v1633_v40, 0.0  ;;  %v1578_v24 = vmax.f32 %v1169_v29, %v1378_v41  ;;  %v4888_v29 = vmax.f32 %v3944_v54, %v3946_v55 }
 0x1ea   :  { %v974_v30 = vpop.f32.mrb[122].mxu0  ;;  %v1383_v46 = vpop.f32.mrb[122].mxu1 }
 0x1eb   :  { %1731 = vst [vmem:[%s4773_s3 + $0x50] sm:$0xff] %v1682_v21  ;;  %v1634_v18 = vadd.f32 %v4428_v11, %v1578_v24  ;;  %v1170_v16 = vmax.f32 %v4884_v15, %v974_v30  ;;  %v2610_v14 = vpop.f32.mrb[123].mxu0  ;;  %v2789_v63 = vpop.f32.mrb[123].mxu1 }
 0x1ed   :  { %v1683_v34 = vmax.f32 %v1634_v18, 0.0  ;;  %v1579_v35 = vmax.f32 %v1170_v16, %v1383_v46  ;;  %v4889_v18 = vmax.f32 %v3960_v17, %v3962_v20 }
 0x1ee   :  { %v979_v57 = vpop.f32.mrb[124].mxu0  ;;  %v1388_v58 = vpop.f32.mrb[124].mxu1 }
 0x1ef   :  { %1732 = vst [vmem:[%s4773_s3 + $0x58] sm:$0xff] %v1683_v34  ;;  %v1635_v5 = vadd.f32 %v4428_v11, %v1579_v35  ;;  %v1171_v37 = vmax.f32 %v4885_v36, %v979_v57  ;;  %v2613_v39 = vpop.f32.mrb[125].mxu0  ;;  %v2792_v60 = vpop.f32.mrb[125].mxu1  ;;  %v4890_v57 = vmax.f32 %v3976_v49, %v3978_v56 }
 0x1f1   :  { %v1684_v47 = vmax.f32 %v1635_v5, 0.0  ;;  %v1580_v48 = vmax.f32 %v1171_v37, %v1388_v58 }
 0x1f2   :  { %v984_v25 = vpop.f32.mrb[126].mxu0  ;;  %v1393_v32 = vpop.f32.mrb[126].mxu1 }
 0x1f3   :  { %1733 = vst [vmem:[%s4773_s3 + $0x60] sm:$0xff] %v1684_v47  ;;  %v1636_v0 = vadd.f32 %v4428_v11, %v1580_v48  ;;  %v1172_v22 = vmax.f32 %v4886_v1, %v984_v25  ;;  %v2616_v23 = vpop.f32.mrb[127].mxu0  ;;  %v2795_v8 = vpop.f32.mrb[127].mxu1  ;;  %v4891_v47 = vmax.f32 %v3992_v2, %v3994_v4 }
 0x1f4   :  { %v4892_v23 = vmax.f32 %v4008_v62, %v4010_v45 }
 0x1f5   :  { %v1685_v59 = vmax.f32 %v1636_v0, 0.0  ;;  %v1581_v61 = vmax.f32 %v1172_v22, %v1393_v32 }
 0x1f6   :  { %v989_v43 = vpop.f32.mrb[128].mxu0  ;;  %v1398_v44 = vpop.f32.mrb[128].mxu1 }
 0x1f7   :  { %1734 = vst [vmem:[%s4773_s3 + $0x68] sm:$0xff] %v1685_v59  ;;  %v1637_v9 = vadd.f32 %v4428_v11, %v1581_v61  ;;  %v1173_v10 = vmax.f32 %v4887_v53, %v989_v43  ;;  %v2619_v12 = vpop.f32.mrb[129].mxu0  ;;  %v2798_v28 = vpop.f32.mrb[129].mxu1  ;;  %v4893_v53 = vmax.f32 %v4024_v19, %v4026_v38 }
 0x1f9   :  { %v1686_v7 = vmax.f32 %v1637_v9, 0.0  ;;  %v1582_v13 = vmax.f32 %v1173_v10, %v1398_v44 }
 0x1fa   :  { %v994_v41 = vpop.f32.mrb[130].mxu0  ;;  %v1403_v40 = vpop.f32.mrb[130].mxu1 }
 0x1fb   :  { %1735 = vst [vmem:[%s4773_s3 + $0x70] sm:$0xff] %v1686_v7  ;;  %v1638_v6 = vadd.f32 %v4428_v11, %v1582_v13  ;;  %v1174_v50 = vmax.f32 %v4888_v29, %v994_v41  ;;  %v2622_v51 = vpop.f32.mrb[131].mxu0  ;;  %v2801_v21 = vpop.f32.mrb[131].mxu1 }
 0x1fd   :  { %v1687_v31 = vmax.f32 %v1638_v6, 0.0  ;;  %v1583_v33 = vmax.f32 %v1174_v50, %v1403_v40  ;;  %v4894_v40 = vmax.f32 %v4040_v52, %v4042_v42 }
 0x1fe   :  { %v999_v24 = vpop.f32.mrb[132].mxu0  ;;  %v1408_v30 = vpop.f32.mrb[132].mxu1 }
 0x1ff   :  { %1736 = vst [vmem:[%s4773_s3 + $0x78] sm:$0xff] %v1687_v31  ;;  %v1639_v46 = vadd.f32 %v4428_v11, %v1583_v33  ;;  %v1175_v15 = vmax.f32 %v4889_v18, %v999_v24  ;;  %v2625_v16 = vpop.f32.mrb[133].mxu0  ;;  %v2804_v14 = vpop.f32.mrb[133].mxu1  ;;  %v4895_v33 = vmax.f32 %v4056_v27, %v4058_v26 }
 0x200   :  { %v4896_v14 = vld [vmem:[#allocation2_spill] sm:$0xff] }
 0x201   :  { %v1688_v54 = vmax.f32 %v1639_v46, 0.0  ;;  %v1584_v55 = vmax.f32 %v1175_v15, %v1408_v30 }
 0x202   :  { %v1004_v63 = vpop.f32.mrb[134].mxu0  ;;  %v1413_v34 = vpop.f32.mrb[134].mxu1 }
 0x203   :  { %1737 = vst [vmem:[%s4773_s3 + $0x80] sm:$0xff] %v1688_v54  ;;  %v1640_v35 = vadd.f32 %v4428_v11, %v1584_v55  ;;  %v1176_v58 = vmax.f32 %v4890_v57, %v1004_v63  ;;  %v2628_v5 = vpop.f32.mrb[135].mxu0  ;;  %v2807_v36 = vpop.f32.mrb[135].mxu1  ;;  %v4897_v54 = vmax.f32 %v4072_v3, %v4896_v14 }
 0x204   :  { %v4898_v5 = vld [vmem:[#allocation3_spill] sm:$0xff]  ;;  %v4899_v36 = vld [vmem:[#allocation4_spill] sm:$0xff] }
 0x205   :  { %v1689_v17 = vmax.f32 %v1640_v35, 0.0  ;;  %v1585_v20 = vmax.f32 %v1176_v58, %v1413_v34 }
 0x206   :  { %v1009_v37 = vpop.f32.mrb[136].mxu0  ;;  %v1418_v39 = vpop.f32.mrb[136].mxu1 }
 0x207   :  { %1738 = vst [vmem:[%s4773_s3 + $0x88] sm:$0xff] %v1689_v17  ;;  %v1641_v60 = vadd.f32 %v4428_v11, %v1585_v20  ;;  %v1177_v48 = vmax.f32 %v4891_v47, %v1009_v37  ;;  %v2631_v25 = vpop.f32.mrb[137].mxu0  ;;  %v2810_v32 = vpop.f32.mrb[137].mxu1  ;;  %v4900_v17 = vmax.f32 %v4898_v5, %v4899_v36 }
 0x208   :  { %v4901_v32 = vld [vmem:[#allocation5_spill] sm:$0xff] }
 0x209   :  { %v1690_v49 = vmax.f32 %v1641_v60, 0.0  ;;  %v1586_v56 = vmax.f32 %v1177_v48, %v1418_v39 }
 0x20a   :  { %v1014_v0 = vpop.f32.mrb[138].mxu0  ;;  %v1423_v1 = vpop.f32.mrb[138].mxu1 }
 0x20b   :  { %1739 = vst [vmem:[%s4773_s3 + $0x90] sm:$0xff] %v1690_v49  ;;  %v1642_v22 = vadd.f32 %v4428_v11, %v1586_v56  ;;  %v1178_v8 = vmax.f32 %v4892_v23, %v1014_v0  ;;  %v2634_v59 = vpop.f32.mrb[139].mxu0  ;;  %v2813_v61 = vpop.f32.mrb[139].mxu1  ;;  %v4902_v49 = vld [vmem:[#allocation6_spill] sm:$0xff] }
 0x20c   :  { %v4903_v56 = vmax.f32 %v4901_v32, %v4902_v49 }
 0x20d   :  { %v1691_v4 = vmax.f32 %v1642_v22, 0.0  ;;  %v1587_v2 = vmax.f32 %v1178_v8, %v1423_v1 }
 0x20e   :  { %v1019_v43 = vpop.f32.mrb[140].mxu0  ;;  %v1428_v44 = vpop.f32.mrb[140].mxu1 }
 0x20f   :  { %1740 = vst [vmem:[%s4773_s3 + $0x98] sm:$0xff] %v1691_v4  ;;  %v1643_v9 = vadd.f32 %v4428_v11, %v1587_v2  ;;  %v1179_v10 = vmax.f32 %v4893_v53, %v1019_v43  ;;  %v2637_v12 = vpop.f32.mrb[141].mxu0  ;;  %v2816_v28 = vpop.f32.mrb[141].mxu1  ;;  %v4904_v2 = vld [vmem:[#allocation7_spill] sm:$0xff]  ;;  %v4905_v43 = vld [vmem:[#allocation8_spill] sm:$0xff] }
 0x211   :  { %v1692_v62 = vmax.f32 %v1643_v9, 0.0  ;;  %v1588_v45 = vmax.f32 %v1179_v10, %v1428_v44  ;;  %v4906_v44 = vmax.f32 %v4904_v2, %v4905_v43 }
 0x212   :  { %v1024_v7 = vpop.f32.mrb[142].mxu0  ;;  %v1433_v13 = vpop.f32.mrb[142].mxu1 }
 0x213   :  { %1741 = vst [vmem:[%s4773_s3 + $0xa0] sm:$0xff] %v1692_v62  ;;  %v1644_v41 = vadd.f32 %v4428_v11, %v1588_v45  ;;  %v1180_v6 = vmax.f32 %v4894_v40, %v1024_v7  ;;  %v2640_v29 = vpop.f32.mrb[143].mxu0  ;;  %v2819_v50 = vpop.f32.mrb[143].mxu1 }
 0x215   :  { %v1693_v19 = vmax.f32 %v1644_v41, 0.0  ;;  %v1589_v38 = vmax.f32 %v1180_v6, %v1433_v13  ;;  %v4907_v13 = vld [vmem:[#allocation9_spill] sm:$0xff]  ;;  %v4908_v41 = vld [vmem:[#allocation10_spill] sm:$0xff] }
 0x216   :  { %v1029_v51 = vpop.f32.mrb[144].mxu0  ;;  %v1438_v21 = vpop.f32.mrb[144].mxu1  ;;  %v4909_v40 = vmax.f32 %v4907_v13, %v4908_v41 }
 0x217   :  { %1742 = vst [vmem:[%s4773_s3 + $0xa8] sm:$0xff] %v1693_v19  ;;  %v1645_v31 = vadd.f32 %v4428_v11, %v1589_v38  ;;  %v1181_v24 = vmax.f32 %v4895_v33, %v1029_v51  ;;  %v2643_v30 = vpop.f32.mrb[145].mxu0  ;;  %v2822_v46 = vpop.f32.mrb[145].mxu1  ;;  %v4910_v33 = vld [vmem:[#allocation11_spill] sm:$0xff] }
 0x219   :  { %v1694_v52 = vmax.f32 %v1645_v31, 0.0  ;;  %v1590_v42 = vmax.f32 %v1181_v24, %v1438_v21  ;;  %v4911_v24 = vld [vmem:[#allocation12_spill] sm:$0xff] }
 0x21a   :  { %v1034_v18 = vpop.f32.mrb[146].mxu0  ;;  %v1443_v15 = vpop.f32.mrb[146].mxu1  ;;  %v4912_v30 = vmax.f32 %v4910_v33, %v4911_v24 }
 0x21b   :  { %1743 = vst [vmem:[%s4773_s3 + $0xb0] sm:$0xff] %v1694_v52  ;;  %v1646_v16 = vadd.f32 %v4428_v11, %v1590_v42  ;;  %v1182_v55 = vmax.f32 %v4897_v54, %v1034_v18  ;;  %v2646_v63 = vpop.f32.mrb[147].mxu0  ;;  %v2825_v34 = vpop.f32.mrb[147].mxu1 }
 0x21c   :  { %v4914_v63 = vld [vmem:[#allocation14_spill] sm:$0xff] }
 0x21d   :  { %v1695_v27 = vmax.f32 %v1646_v16, 0.0  ;;  %v1591_v26 = vmax.f32 %v1182_v55, %v1443_v15  ;;  %v4913_v55 = vld [vmem:[#allocation13_spill] sm:$0xff] }
 0x21e   :  { %v1039_v35 = vpop.f32.mrb[148].mxu0  ;;  %v1448_v57 = vpop.f32.mrb[148].mxu1  ;;  %v4915_v34 = vmax.f32 %v4913_v55, %v4914_v63 }
 0x21f   :  { %1744 = vst [vmem:[%s4773_s3 + $0xb8] sm:$0xff] %v1695_v27  ;;  %v1647_v58 = vadd.f32 %v4428_v11, %v1591_v26  ;;  %v1183_v20 = vmax.f32 %v4900_v17, %v1039_v35  ;;  %v2649_v37 = vpop.f32.mrb[149].mxu0  ;;  %v2828_v39 = vpop.f32.mrb[149].mxu1 }
 0x220   :  { %v4917_v37 = vld [vmem:[#allocation16_spill] sm:$0xff] }
 0x221   :  { %v1696_v3 = vmax.f32 %v1647_v58, 0.0  ;;  %v1592_v60 = vmax.f32 %v1183_v20, %v1448_v57  ;;  %v4916_v20 = vld [vmem:[#allocation15_spill] sm:$0xff] }
 0x222   :  { %v1044_v47 = vpop.f32.mrb[150].mxu0  ;;  %v1453_v48 = vpop.f32.mrb[150].mxu1  ;;  %v4918_v39 = vmax.f32 %v4916_v20, %v4917_v37 }
 0x223   :  { %1745 = vst [vmem:[%s4773_s3 + $0xc0] sm:$0xff] %v1696_v3  ;;  %v1648_v25 = vadd.f32 %v4428_v11, %v1592_v60  ;;  %v1184_v0 = vmax.f32 %v4903_v56, %v1044_v47  ;;  %v2652_v1 = vpop.f32.mrb[151].mxu0  ;;  %v2831_v22 = vpop.f32.mrb[151].mxu1 }
 0x224   :  { %v4920_v1 = vld [vmem:[#allocation18_spill] sm:$0xff] }
 0x225   :  { %v1697_v23 = vmax.f32 %v1648_v25, 0.0  ;;  %v1593_v8 = vmax.f32 %v1184_v0, %v1453_v48  ;;  %v4919_v0 = vld [vmem:[#allocation17_spill] sm:$0xff] }
 0x226   :  { %v1049_v59 = vpop.f32.mrb[152].mxu0  ;;  %v1458_v61 = vpop.f32.mrb[152].mxu1  ;;  %v4921_v22 = vmax.f32 %v4919_v0, %v4920_v1 }
 0x227   :  { %1746 = vst [vmem:[%s4773_s3 + $0xc8] sm:$0xff] %v1697_v23  ;;  %v1649_v4 = vadd.f32 %v4428_v11, %v1593_v8  ;;  %v1185_v9 = vmax.f32 %v4906_v44, %v1049_v59  ;;  %v2655_v53 = vpop.f32.mrb[153].mxu0  ;;  %v2834_v10 = vpop.f32.mrb[153].mxu1 }
 0x228   :  { %v4923_v53 = vld [vmem:[#allocation20_spill] sm:$0xff] }
 0x229   :  { %v1698_v12 = vmax.f32 %v1649_v4, 0.0  ;;  %v1594_v28 = vmax.f32 %v1185_v9, %v1458_v61  ;;  %v4922_v9 = vld [vmem:[#allocation19_spill] sm:$0xff] }
 0x22a   :  { %v1054_v62 = vpop.f32.mrb[154].mxu0  ;;  %v1463_v45 = vpop.f32.mrb[154].mxu1  ;;  %v4924_v10 = vmax.f32 %v4922_v9, %v4923_v53 }
 0x22b   :  { %1747 = vst [vmem:[%s4773_s3 + $0xd0] sm:$0xff] %v1698_v12  ;;  %v1650_v7 = vadd.f32 %v4428_v11, %v1594_v28  ;;  %v1186_v6 = vmax.f32 %v4909_v40, %v1054_v62  ;;  %v2658_v29 = vpop.f32.mrb[155].mxu0  ;;  %v2837_v50 = vpop.f32.mrb[155].mxu1 }
 0x22c   :  { %v4926_v29 = vld [vmem:[#allocation22_spill] sm:$0xff] }
 0x22d   :  { %v1699_v19 = vmax.f32 %v1650_v7, 0.0  ;;  %v1595_v38 = vmax.f32 %v1186_v6, %v1463_v45  ;;  %v4925_v6 = vld [vmem:[#allocation21_spill] sm:$0xff] }
 0x22e   :  { %v1059_v51 = vpop.f32.mrb[156].mxu0  ;;  %v1468_v21 = vpop.f32.mrb[156].mxu1  ;;  %v4927_v50 = vmax.f32 %v4925_v6, %v4926_v29 }
 0x22f   :  { %1748 = vst [vmem:[%s4773_s3 + $0xd8] sm:$0xff] %v1699_v19  ;;  %v1651_v31 = vadd.f32 %v4428_v11, %v1595_v38  ;;  %v1187_v46 = vmax.f32 %v4912_v30, %v1059_v51  ;;  %v2661_v52 = vpop.f32.mrb[157].mxu0  ;;  %v2840_v42 = vpop.f32.mrb[157].mxu1 }
 0x230   :  { %v4929_v52 = vld [vmem:[#allocation24_spill] sm:$0xff] }
 0x231   :  { %v1700_v18 = vmax.f32 %v1651_v31, 0.0  ;;  %v1596_v15 = vmax.f32 %v1187_v46, %v1468_v21  ;;  %v4928_v46 = vld [vmem:[#allocation23_spill] sm:$0xff] }
 0x232   :  { %v1064_v16 = vpop.f32.mrb[158].mxu0  ;;  %v1473_v14 = vpop.f32.mrb[158].mxu1  ;;  %v4930_v42 = vmax.f32 %v4928_v46, %v4929_v52 }
 0x233   :  { %1749 = vst [vmem:[%s4773_s3 + $0xe0] sm:$0xff] %v1700_v18  ;;  %v1652_v54 = vadd.f32 %v4428_v11, %v1596_v15  ;;  %v1188_v27 = vmax.f32 %v4915_v34, %v1064_v16  ;;  %v2664_v26 = vpop.f32.mrb[159].mxu0  ;;  %v2843_v35 = vpop.f32.mrb[159].mxu1 }
 0x234   :  { %v4932_v26 = vld [vmem:[#allocation26_spill] sm:$0xff] }
 0x235   :  { %v1701_v57 = vmax.f32 %v1652_v54, 0.0  ;;  %v1597_v58 = vmax.f32 %v1188_v27, %v1473_v14  ;;  %v4931_v27 = vld [vmem:[#allocation25_spill] sm:$0xff] }
 0x236   :  { %v1069_v5 = vpop.f32.mrb[160].mxu0  ;;  %v1478_v36 = vpop.f32.mrb[160].mxu1  ;;  %v4933_v35 = vmax.f32 %v4931_v27, %v4932_v26 }
 0x237   :  { %1750 = vst [vmem:[%s4773_s3 + $0xe8] sm:$0xff] %v1701_v57  ;;  %v1653_v17 = vadd.f32 %v4428_v11, %v1597_v58  ;;  %v1189_v3 = vmax.f32 %v4918_v39, %v1069_v5  ;;  %v2667_v60 = vpop.f32.mrb[161].mxu0  ;;  %v2846_v47 = vpop.f32.mrb[161].mxu1 }
 0x238   :  { %v4935_v60 = vld [vmem:[#allocation28_spill] sm:$0xff] }
 0x239   :  { %v1702_v48 = vmax.f32 %v1653_v17, 0.0  ;;  %v1598_v25 = vmax.f32 %v1189_v3, %v1478_v36  ;;  %v4934_v3 = vld [vmem:[#allocation27_spill] sm:$0xff] }
 0x23a   :  { %v1074_v32 = vpop.f32.mrb[162].mxu0  ;;  %v1483_v49 = vpop.f32.mrb[162].mxu1  ;;  %v4936_v47 = vmax.f32 %v4934_v3, %v4935_v60 }
 0x23b   :  { %1751 = vst [vmem:[%s4773_s3 + $0xf0] sm:$0xff] %v1702_v48  ;;  %v1654_v56 = vadd.f32 %v4428_v11, %v1598_v25  ;;  %v1190_v23 = vmax.f32 %v4921_v22, %v1074_v32  ;;  %v2670_v8 = vpop.f32.mrb[163].mxu0  ;;  %v2849_v59 = vpop.f32.mrb[163].mxu1 }
 0x23c   :  { %v4938_v8 = vld [vmem:[#allocation30_spill] sm:$0xff] }
 0x23d   :  { %v1703_v61 = vmax.f32 %v1654_v56, 0.0  ;;  %v1599_v4 = vmax.f32 %v1190_v23, %v1483_v49  ;;  %v4937_v23 = vld [vmem:[#allocation29_spill] sm:$0xff] }
 0x23e   :  { %v1079_v2 = vpop.f32.mrb[164].mxu0  ;;  %v1488_v43 = vpop.f32.mrb[164].mxu1  ;;  %v4939_v59 = vmax.f32 %v4937_v23, %v4938_v8 }
 0x23f   :  { %1752 = vst [vmem:[%s4773_s3 + $0xf8] sm:$0xff] %v1703_v61  ;;  %v1655_v44 = vadd.f32 %v4428_v11, %v1599_v4  ;;  %v1191_v12 = vmax.f32 %v4924_v10, %v1079_v2  ;;  %v2673_v28 = vpop.f32.mrb[165].mxu0  ;;  %v2852_v62 = vpop.f32.mrb[165].mxu1 }
 0x240   :  { %v4941_v28 = vld [vmem:[#allocation32_spill] sm:$0xff] }
 0x241   :  { %v1704_v45 = vmax.f32 %v1655_v44, 0.0  ;;  %v1600_v7 = vmax.f32 %v1191_v12, %v1488_v43  ;;  %v4940_v12 = vld [vmem:[#allocation31_spill] sm:$0xff] }
 0x242   :  { %v1084_v13 = vpop.f32.mrb[166].mxu0  ;;  %v1493_v41 = vpop.f32.mrb[166].mxu1  ;;  %v4942_v62 = vmax.f32 %v4940_v12, %v4941_v28 }
 0x243   :  { %1753 = vst [vmem:[%s4773_s3 + $0x100] sm:$0xff] %v1704_v45  ;;  %v1656_v40 = vadd.f32 %v4428_v11, %v1600_v7  ;;  %v1192_v19 = vmax.f32 %v4927_v50, %v1084_v13  ;;  %v2676_v38 = vpop.f32.mrb[167].mxu0  ;;  %v2855_v51 = vpop.f32.mrb[167].mxu1 }
 0x244   :  { %v4944_v38 = vld [vmem:[#allocation34_spill] sm:$0xff] }
 0x245   :  { %v1705_v21 = vmax.f32 %v1656_v40, 0.0  ;;  %v1601_v31 = vmax.f32 %v1192_v19, %v1493_v41  ;;  %v4943_v19 = vld [vmem:[#allocation33_spill] sm:$0xff] }
 0x246   :  { %v1089_v33 = vpop.f32.mrb[168].mxu0  ;;  %v1498_v24 = vpop.f32.mrb[168].mxu1  ;;  %v4945_v51 = vmax.f32 %v4943_v19, %v4944_v38 }
 0x247   :  { %1754 = vst [vmem:[%s4773_s3 + $0x108] sm:$0xff] %v1705_v21  ;;  %v1657_v30 = vadd.f32 %v4428_v11, %v1601_v31  ;;  %v1193_v18 = vmax.f32 %v4930_v42, %v1089_v33  ;;  %v2679_v15 = vpop.f32.mrb[169].mxu0  ;;  %v2858_v16 = vpop.f32.mrb[169].mxu1 }
 0x248   :  { %v4947_v15 = vld [vmem:[#allocation36_spill] sm:$0xff] }
 0x249   :  { %v1706_v14 = vmax.f32 %v1657_v30, 0.0  ;;  %v1602_v54 = vmax.f32 %v1193_v18, %v1498_v24  ;;  %v4946_v18 = vld [vmem:[#allocation35_spill] sm:$0xff] }
 0x24a   :  { %v1094_v55 = vpop.f32.mrb[170].mxu0  ;;  %v1503_v63 = vpop.f32.mrb[170].mxu1  ;;  %v4948_v16 = vmax.f32 %v4946_v18, %v4947_v15 }
 0x24b   :  { %1755 = vst [vmem:[%s4773_s3 + $0x110] sm:$0xff] %v1706_v14  ;;  %v1658_v34 = vadd.f32 %v4428_v11, %v1602_v54  ;;  %v1194_v57 = vmax.f32 %v4933_v35, %v1094_v55  ;;  %v2682_v58 = vpop.f32.mrb[171].mxu0  ;;  %v2861_v5 = vpop.f32.mrb[171].mxu1 }
 0x24c   :  { %v4950_v58 = vld [vmem:[#allocation38_spill] sm:$0xff] }
 0x24d   :  { %v1707_v36 = vmax.f32 %v1658_v34, 0.0  ;;  %v1603_v17 = vmax.f32 %v1194_v57, %v1503_v63  ;;  %v4949_v57 = vld [vmem:[#allocation37_spill] sm:$0xff] }
 0x24e   :  { %v1099_v20 = vpop.f32.mrb[172].mxu0  ;;  %v1508_v37 = vpop.f32.mrb[172].mxu1  ;;  %v4951_v5 = vmax.f32 %v4949_v57, %v4950_v58 }
 0x24f   :  { %1756 = vst [vmem:[%s4773_s3 + $0x118] sm:$0xff] %v1707_v36  ;;  %v1659_v39 = vadd.f32 %v4428_v11, %v1603_v17  ;;  %v1195_v48 = vmax.f32 %v4936_v47, %v1099_v20  ;;  %v2685_v25 = vpop.f32.mrb[173].mxu0  ;;  %v2864_v32 = vpop.f32.mrb[173].mxu1 }
 0x250   :  { %v4953_v25 = vld [vmem:[#allocation40_spill] sm:$0xff] }
 0x251   :  { %v1708_v49 = vmax.f32 %v1659_v39, 0.0  ;;  %v1604_v56 = vmax.f32 %v1195_v48, %v1508_v37  ;;  %v4952_v48 = vld [vmem:[#allocation39_spill] sm:$0xff] }
 0x252   :  { %v1104_v0 = vpop.f32.mrb[174].mxu0  ;;  %v1513_v1 = vpop.f32.mrb[174].mxu1  ;;  %v4954_v32 = vmax.f32 %v4952_v48, %v4953_v25 }
 0x253   :  { %1757 = vst [vmem:[%s4773_s3 + $0x120] sm:$0xff] %v1708_v49  ;;  %v1660_v22 = vadd.f32 %v4428_v11, %v1604_v56  ;;  %v1196_v61 = vmax.f32 %v4939_v59, %v1104_v0  ;;  %v2688_v4 = vpop.f32.mrb[175].mxu0  ;;  %v2867_v2 = vpop.f32.mrb[175].mxu1 }
 0x254   :  { %v4956_v4 = vld [vmem:[#allocation42_spill] sm:$0xff] }
 0x255   :  { %v1709_v43 = vmax.f32 %v1660_v22, 0.0  ;;  %v1605_v44 = vmax.f32 %v1196_v61, %v1513_v1  ;;  %v4955_v61 = vld [vmem:[#allocation41_spill] sm:$0xff] }
 0x256   :  { %v1109_v9 = vpop.f32.mrb[176].mxu0  ;;  %v1518_v53 = vpop.f32.mrb[176].mxu1  ;;  %v4957_v2 = vmax.f32 %v4955_v61, %v4956_v4 }
 0x257   :  { %1758 = vst [vmem:[%s4773_s3 + $0x128] sm:$0xff] %v1709_v43  ;;  %v1661_v10 = vadd.f32 %v4428_v11, %v1605_v44  ;;  %v1197_v45 = vmax.f32 %v4942_v62, %v1109_v9  ;;  %v2691_v7 = vpop.f32.mrb[177].mxu0  ;;  %v2870_v13 = vpop.f32.mrb[177].mxu1 }
 0x258   :  { %v4959_v7 = vld [vmem:[#allocation44_spill] sm:$0xff] }
 0x259   :  { %v1710_v41 = vmax.f32 %v1661_v10, 0.0  ;;  %v1606_v40 = vmax.f32 %v1197_v45, %v1518_v53  ;;  %v4958_v45 = vld [vmem:[#allocation43_spill] sm:$0xff] }
 0x25a   :  { %v1114_v6 = vpop.f32.mrb[178].mxu0  ;;  %v1523_v29 = vpop.f32.mrb[178].mxu1  ;;  %v4960_v13 = vmax.f32 %v4958_v45, %v4959_v7 }
 0x25b   :  { %1759 = vst [vmem:[%s4773_s3 + $0x130] sm:$0xff] %v1710_v41  ;;  %v1662_v50 = vadd.f32 %v4428_v11, %v1606_v40  ;;  %v1198_v21 = vmax.f32 %v4945_v51, %v1114_v6  ;;  %v2694_v31 = vpop.f32.mrb[179].mxu0  ;;  %v2873_v33 = vpop.f32.mrb[179].mxu1 }
 0x25c   :  { %v4962_v31 = vld [vmem:[#allocation46_spill] sm:$0xff] }
 0x25d   :  { %v1711_v24 = vmax.f32 %v1662_v50, 0.0  ;;  %v1607_v30 = vmax.f32 %v1198_v21, %v1523_v29  ;;  %v4961_v21 = vld [vmem:[#allocation45_spill] sm:$0xff] }
 0x25e   :  { %v1119_v46 = vpop.f32.mrb[180].mxu0  ;;  %v1528_v52 = vpop.f32.mrb[180].mxu1  ;;  %v4963_v33 = vmax.f32 %v4961_v21, %v4962_v31 }
 0x25f   :  { %1760 = vst [vmem:[%s4773_s3 + $0x138] sm:$0xff] %v1711_v24  ;;  %v1663_v42 = vadd.f32 %v4428_v11, %v1607_v30  ;;  %v1199_v14 = vmax.f32 %v4948_v16, %v1119_v46  ;;  %v2697_v54 = vpop.f32.mrb[181].mxu0  ;;  %v2876_v55 = vpop.f32.mrb[181].mxu1 }
 0x260   :  { %v4965_v54 = vld [vmem:[#allocation48_spill] sm:$0xff] }
 0x261   :  { %v1712_v63 = vmax.f32 %v1663_v42, 0.0  ;;  %v1608_v34 = vmax.f32 %v1199_v14, %v1528_v52  ;;  %v4964_v14 = vld [vmem:[#allocation47_spill] sm:$0xff] }
 0x262   :  { %v1124_v27 = vpop.f32.mrb[182].mxu0  ;;  %v1533_v26 = vpop.f32.mrb[182].mxu1  ;;  %v4966_v55 = vmax.f32 %v4964_v14, %v4965_v54 }
 0x263   :  { %1761 = vst [vmem:[%s4773_s3 + $0x140] sm:$0xff] %v1712_v63  ;;  %v1664_v35 = vadd.f32 %v4428_v11, %v1608_v34  ;;  %v1200_v36 = vmax.f32 %v4951_v5, %v1124_v27  ;;  %v2700_v17 = vpop.f32.mrb[183].mxu0  ;;  %v2879_v20 = vpop.f32.mrb[183].mxu1 }
 0x264   :  { %v4968_v17 = vld [vmem:[#allocation50_spill] sm:$0xff] }
 0x265   :  { %v1713_v37 = vmax.f32 %v1664_v35, 0.0  ;;  %v1609_v39 = vmax.f32 %v1200_v36, %v1533_v26  ;;  %v4967_v36 = vld [vmem:[#allocation49_spill] sm:$0xff] }
 0x266   :  { %v1129_v3 = vpop.f32.mrb[184].mxu0  ;;  %v1538_v60 = vpop.f32.mrb[184].mxu1  ;;  %v4969_v20 = vmax.f32 %v4967_v36, %v4968_v17 }
 0x267   :  { %1762 = vst [vmem:[%s4773_s3 + $0x148] sm:$0xff] %v1713_v37  ;;  %v1665_v47 = vadd.f32 %v4428_v11, %v1609_v39  ;;  %v1201_v49 = vmax.f32 %v4954_v32, %v1129_v3  ;;  %v2703_v56 = vpop.f32.mrb[185].mxu0  ;;  %v2882_v0 = vpop.f32.mrb[185].mxu1 }
 0x269   :  { %v1714_v1 = vmax.f32 %v1665_v47, 0.0  ;;  %v1610_v22 = vmax.f32 %v1201_v49, %v1538_v60 }
 0x26a   :  { %v1134_v23 = vpop.f32.mrb[186].mxu0  ;;  %v1543_v8 = vpop.f32.mrb[186].mxu1 }
 0x26b   :  { %1763 = vst [vmem:[%s4773_s3 + $0x150] sm:$0xff] %v1714_v1  ;;  %v1666_v59 = vadd.f32 %v4428_v11, %v1610_v22  ;;  %v1202_v43 = vmax.f32 %v4957_v2, %v1134_v23  ;;  %v2706_v44 = vpop.f32.mrb[187].mxu0  ;;  %v2885_v9 = vpop.f32.mrb[187].mxu1 }
 0x26d   :  { %v1715_v53 = vmax.f32 %v1666_v59, 0.0  ;;  %v1611_v10 = vmax.f32 %v1202_v43, %v1543_v8 }
 0x26e   :  { %v1139_v12 = vpop.f32.mrb[188].mxu0  ;;  %v1548_v28 = vpop.f32.mrb[188].mxu1 }
 0x26f   :  { %1764 = vst [vmem:[%s4773_s3 + $0x158] sm:$0xff] %v1715_v53  ;;  %v1667_v62 = vadd.f32 %v4428_v11, %v1611_v10  ;;  %v1203_v41 = vmax.f32 %v4960_v13, %v1139_v12  ;;  %v2709_v40 = vpop.f32.mrb[189].mxu0  ;;  %v2888_v6 = vpop.f32.mrb[189].mxu1 }
 0x271   :  { %v1716_v29 = vmax.f32 %v1667_v62, 0.0  ;;  %v1612_v50 = vmax.f32 %v1203_v41, %v1548_v28 }
 0x272   :  { %v1144_v19 = vpop.f32.mrb[190].mxu0  ;;  %v1553_v38 = vpop.f32.mrb[190].mxu1 }
 0x273   :  { %1765 = vst [vmem:[%s4773_s3 + $0x160] sm:$0xff] %v1716_v29  ;;  %v1668_v51 = vadd.f32 %v4428_v11, %v1612_v50  ;;  %v1204_v24 = vmax.f32 %v4963_v33, %v1144_v19  ;;  %v2712_v30 = vpop.f32.mrb[191].mxu0  ;;  %v2891_v46 = vpop.f32.mrb[191].mxu1 }
 0x275   :  { %v1717_v52 = vmax.f32 %v1668_v51, 0.0  ;;  %v1613_v42 = vmax.f32 %v1204_v24, %v1553_v38 }
 0x276   :  { %v1149_v18 = vpop.f32.mrb[192].mxu0  ;;  %v1558_v15 = vpop.f32.mrb[192].mxu1 }
 0x277   :  { %1766 = vst [vmem:[%s4773_s3 + $0x168] sm:$0xff] %v1717_v52  ;;  %v1669_v16 = vadd.f32 %v4428_v11, %v1613_v42  ;;  %v1205_v63 = vmax.f32 %v4966_v55, %v1149_v18  ;;  %v2715_v34 = vpop.f32.mrb[193].mxu0  ;;  %v2894_v27 = vpop.f32.mrb[193].mxu1 }
 0x279   :  { %v1718_v26 = vmax.f32 %v1669_v16, 0.0  ;;  %v1614_v35 = vmax.f32 %v1205_v63, %v1558_v15 }
 0x27a   :  { %v1154_v57 = vpop.f32.mrb[194].mxu0  ;;  %v1563_v58 = vpop.f32.mrb[194].mxu1 }
 0x27b   :  { %1767 = vst [vmem:[%s4773_s3 + $0x170] sm:$0xff] %v1718_v26  ;;  %v1670_v5 = vadd.f32 %v4428_v11, %v1614_v35  ;;  %v1206_v37 = vmax.f32 %v4969_v20, %v1154_v57  ;;  %v2718_v39 = vpop.f32.mrb[195].mxu0  ;;  %v2897_v3 = vpop.f32.mrb[195].mxu1 }
 0x27d   :  { %v1719_v60 = vmax.f32 %v1670_v5, 0.0  ;;  %v1615_v47 = vmax.f32 %v1206_v37, %v1563_v58 }
 0x27f   :  { %1768 = vst [vmem:[%s4773_s3 + $0x178] sm:$0xff] %v1719_v60  ;;  %v1671_v48 = vadd.f32 %v4428_v11, %v1615_v47 }
 0x281   :  { %v1720_v25 = vmax.f32 %v1671_v48, 0.0 }
 0x283   :  { %1769 = vst [vmem:[%s4773_s3 + $0x180] sm:$0xff] %v1720_v25 }

// kernel: net_forward.3
= control target key start
LH: loop header
LB: loop body
LE: loop exit
PB: predicated region body
PF: predicated region fallthrough
CT: control target
= control target key end

     0   :  { %v9325_v0 = vmov 0.0|0.0   ;;  %vm6345_vm0 = vmmov 0   ;;  %s9315_s1 = inlined_call_operand.vmem [shape: f32[256,128], index: 1, kind: input, shape index: {}]   ;;  %s9316_s0 = inlined_call_operand.vmem [shape: f32[4,200,256], index: 0, kind: input, shape index: {}]   ;;  %s9317_s3 = inlined_call_operand.vmem [shape: f32[25,128,128], index: 3, kind: input, shape index: {}]   ;;  %s9318_s2 = inlined_call_operand.vmem [shape: f32[1,128], index: 2, kind: input, shape index: {}]   ;;  %s9319_s5 = inlined_call_operand.vmem [shape: f32[128,128], index: 5, kind: input, shape index: {}]   ;;  %s9320_s7 = inlined_call_operand.vmem [shape: f32[128,128], index: 7, kind: input, shape index: {}]   ;;  %s9321_s4 = inlined_call_operand.vmem [shape: f32[1,128], index: 4, kind: input, shape index: {}]   ;;  %s9322_s6 = inlined_call_operand.vmem [shape: f32[1,128], index: 6, kind: input, shape index: {}]   ;;  %s9323_s8 = inlined_call_operand.vmem [shape: f32[1,128], index: 8, kind: input, shape index: {}]   ;;  %s9324_s9 = inlined_call_operand.vmem [shape: f32[8,128], index: 9, kind: output, shape index: {}]  }
   0x1   :  { %5499 = vmatprep.subr.bf16.mxu0 %v9325_v0  ;;  %v32_v1 = vld [vmem:[%s9315_s1] sm:$0xff]  ;;  %v33_v2 = vld [vmem:[%s9315_s1 + $0x8] sm:$0xff]  ;;  %5547 = vmatprep.subr.bf16.mxu1 %v9325_v0  ;;  %v34_v3 = vld [vmem:[%s9315_s1 + $0x10] sm:$0xff] }
   0x2   :  { %v6408_v4 = vpack.c.bf16 %v33_v2, %v32_v1  ;;  %v35_v5 = vld [vmem:[%s9315_s1 + $0x18] sm:$0xff]  ;;  %v36_v7 = vld [vmem:[%s9315_s1 + $0x20] sm:$0xff]  ;;  %v37_v8 = vld [vmem:[%s9315_s1 + $0x28] sm:$0xff] }
   0x3   :  { %v6415_v6 = vpack.c.bf16 %v35_v5, %v34_v3  ;;  %v6427_v9 = vpack.c.bf16 %v37_v8, %v36_v7  ;;  %v38_v10 = vld [vmem:[%s9315_s1 + $0x30] sm:$0xff]  ;;  %v39_v11 = vld [vmem:[%s9315_s1 + $0x38] sm:$0xff]  ;;  %v65_v12 = vld [vmem:[%s9316_s0 + $0x8] sm:$0xff] }
   0x4   :  { %5501 = vmatpush1.bf16.msra.mxu0 %v6408_v4  ;;  %5549 = vmatpush1.bf16.msra.mxu1 %v6408_v4  ;;  %v6442_v13 = vpack.c.bf16 %v39_v11, %v38_v10  ;;  %v3558_v14 = vld [vmem:[%s9316_s0 + $0x198] sm:$0xff]  ;;  %v40_v15 = vld [vmem:[%s9315_s1 + $0x40] sm:$0xff]  ;;  %v41_v16 = vld [vmem:[%s9315_s1 + $0x48] sm:$0xff] }
   0x5   :  { %5502 = vmatprep.subr.bf16.mxu0 %v9325_v0  ;;  %5550 = vmatprep.subr.bf16.mxu1 %v9325_v0  ;;  %v6457_v17 = vpack.c.bf16 %v41_v16, %v40_v15  ;;  %v42_v18 = vld [vmem:[%s9315_s1 + $0x50] sm:$0xff]  ;;  %v43_v19 = vld [vmem:[%s9315_s1 + $0x58] sm:$0xff]  ;;  %v44_v21 = vld [vmem:[%s9315_s1 + $0x60] sm:$0xff] }
   0x6   :  { %178 = vmatprep.mubr.f32.mxu0 %v65_v12  ;;  %419 = vmatprep.mubr.f32.mxu1 %v3558_v14  ;;  %v6469_v20 = vpack.c.bf16 %v43_v19, %v42_v18  ;;  %v45_v22 = vld [vmem:[%s9315_s1 + $0x68] sm:$0xff]  ;;  %v46_v24 = vld [vmem:[%s9315_s1 + $0x70] sm:$0xff]  ;;  %v47_v25 = vld [vmem:[%s9315_s1 + $0x78] sm:$0xff] }
   0x7   :  { %v6481_v23 = vpack.c.bf16 %v45_v22, %v44_v21  ;;  %v6493_v26 = vpack.c.bf16 %v47_v25, %v46_v24  ;;  %v48_v27 = vld [vmem:[%s9315_s1 + $0x80] sm:$0xff]  ;;  %v49_v28 = vld [vmem:[%s9315_s1 + $0x88] sm:$0xff]  ;;  %v50_v30 = vld [vmem:[%s9315_s1 + $0x90] sm:$0xff] }
   0x8   :  { %5504 = vmatpush1.bf16.msra.mxu0 %v6415_v6  ;;  %5552 = vmatpush1.bf16.msra.mxu1 %v6415_v6  ;;  %v6505_v29 = vpack.c.bf16 %v49_v28, %v48_v27  ;;  %v51_v31 = vld [vmem:[%s9315_s1 + $0x98] sm:$0xff]  ;;  %v52_v33 = vld [vmem:[%s9315_s1 + $0xa0] sm:$0xff]  ;;  %v53_v34 = vld [vmem:[%s9315_s1 + $0xa8] sm:$0xff] }
   0x9   :  { %5505 = vmatprep.subr.bf16.mxu0 %v9325_v0  ;;  %5553 = vmatprep.subr.bf16.mxu1 %v9325_v0  ;;  %v6517_v32 = vpack.c.bf16 %v51_v31, %v50_v30  ;;  %v6529_v35 = vpack.c.bf16 %v53_v34, %v52_v33  ;;  %v54_v36 = vld [vmem:[%s9315_s1 + $0xb0] sm:$0xff]  ;;  %v55_v37 = vld [vmem:[%s9315_s1 + $0xb8] sm:$0xff]  ;;  %v56_v39 = vld [vmem:[%s9315_s1 + $0xc0] sm:$0xff] }
   0xa   :  { %v6541_v38 = vpack.c.bf16 %v55_v37, %v54_v36  ;;  %v57_v40 = vld [vmem:[%s9315_s1 + $0xc8] sm:$0xff]  ;;  %v58_v42 = vld [vmem:[%s9315_s1 + $0xd0] sm:$0xff]  ;;  %v59_v43 = vld [vmem:[%s9315_s1 + $0xd8] sm:$0xff] }
   0xb   :  { %v6553_v41 = vpack.c.bf16 %v57_v40, %v56_v39  ;;  %v6565_v44 = vpack.c.bf16 %v59_v43, %v58_v42  ;;  %v60_v45 = vld [vmem:[%s9315_s1 + $0xe0] sm:$0xff]  ;;  %v61_v46 = vld [vmem:[%s9315_s1 + $0xe8] sm:$0xff]  ;;  %v62_v48 = vld [vmem:[%s9315_s1 + $0xf0] sm:$0xff] }
   0xc   :  { %5507 = vmatpush1.bf16.msra.mxu0 %v6427_v9  ;;  %5555 = vmatpush1.bf16.msra.mxu1 %v6427_v9  ;;  %v6577_v47 = vpack.c.bf16 %v61_v46, %v60_v45  ;;  %v63_v49 = vld [vmem:[%s9315_s1 + $0xf8] sm:$0xff]  ;;  %v64_v51 = vld [vmem:[%s9316_s0] sm:$0xff]  ;;  %v3557_v52 = vld [vmem:[%s9316_s0 + $0x190] sm:$0xff] }
   0xd   :  { %5508 = vmatprep.subr.bf16.mxu0 %v9325_v0  ;;  %5556 = vmatprep.subr.bf16.mxu1 %v9325_v0  ;;  %v6589_v50 = vpack.c.bf16 %v63_v49, %v62_v48  ;;  %v67_v53 = vld [vmem:[%s9316_s0 + $0x18] sm:$0xff]  ;;  %v3560_v54 = vld [vmem:[%s9316_s0 + $0x1a8] sm:$0xff]  ;;  %v66_v55 = vld [vmem:[%s9316_s0 + $0x10] sm:$0xff] }
   0xe   :  { %v3559_v56 = vld [vmem:[%s9316_s0 + $0x1a0] sm:$0xff]  ;;  %v69_v57 = vld [vmem:[%s9316_s0 + $0x28] sm:$0xff]  ;;  %v3562_v58 = vld [vmem:[%s9316_s0 + $0x1b8] sm:$0xff] }
   0xf   :  { %v68_v59 = vld [vmem:[%s9316_s0 + $0x20] sm:$0xff]  ;;  %v3561_v60 = vld [vmem:[%s9316_s0 + $0x1b0] sm:$0xff]  ;;  %v71_v61 = vld [vmem:[%s9316_s0 + $0x38] sm:$0xff] }
  0x10   :  { %5510 = vmatpush1.bf16.msra.mxu0 %v6442_v13  ;;  %5558 = vmatpush1.bf16.msra.mxu1 %v6442_v13  ;;  %v3564_v62 = vld [vmem:[%s9316_s0 + $0x1c8] sm:$0xff]  ;;  %v70_v63 = vld [vmem:[%s9316_s0 + $0x30] sm:$0xff]  ;;  %v3563_v1 = vld [vmem:[%s9316_s0 + $0x1c0] sm:$0xff] }
  0x11   :  { %5511 = vmatprep.subr.bf16.mxu0 %v9325_v0  ;;  %5559 = vmatprep.subr.bf16.mxu1 %v9325_v0  ;;  %v73_v2 = vld [vmem:[%s9316_s0 + $0x48] sm:$0xff]  ;;  %v3566_v3 = vld [vmem:[%s9316_s0 + $0x1d8] sm:$0xff]  ;;  %v3565_v5 = vld [vmem:[%s9316_s0 + $0x1d0] sm:$0xff] }
  0x12   :  { %v3568_v7 = vld [vmem:[%s9316_s0 + $0x1e8] sm:$0xff]  ;;  %v74_v8 = vld [vmem:[%s9316_s0 + $0x50] sm:$0xff]  ;;  %v3570_v11 = vld [vmem:[%s9316_s0 + $0x1f8] sm:$0xff] }
  0x13   :  { %v77_v10 = vld [vmem:[%s9316_s0 + $0x68] sm:$0xff]  ;;  %v76_v12 = vld [vmem:[%s9316_s0 + $0x60] sm:$0xff]  ;;  %v79_v14 = vld [vmem:[%s9316_s0 + $0x78] sm:$0xff] }
  0x14   :  { %5513 = vmatpush1.bf16.msra.mxu0 %v6457_v17  ;;  %5561 = vmatpush1.bf16.msra.mxu1 %v6457_v17  ;;  %v3572_v15 = vld [vmem:[%s9316_s0 + $0x208] sm:$0xff]  ;;  %v78_v16 = vld [vmem:[%s9316_s0 + $0x70] sm:$0xff]  ;;  %v3574_v19 = vld [vmem:[%s9316_s0 + $0x218] sm:$0xff] }
  0x15   :  { %5514 = vmatprep.subr.bf16.mxu0 %v9325_v0  ;;  %5562 = vmatprep.subr.bf16.mxu1 %v9325_v0  ;;  %v81_v18 = vld [vmem:[%s9316_s0 + $0x88] sm:$0xff]  ;;  %v3573_v21 = vld [vmem:[%s9316_s0 + $0x210] sm:$0xff]  ;;  %v83_v22 = vld [vmem:[%s9316_s0 + $0x98] sm:$0xff] }
  0x16   :  { %v82_v24 = vld [vmem:[%s9316_s0 + $0x90] sm:$0xff]  ;;  %v3575_v25 = vld [vmem:[%s9316_s0 + $0x220] sm:$0xff]  ;;  %v3578_v27 = vld [vmem:[%s9316_s0 + $0x238] sm:$0xff] }
  0x17   :  { %v84_v28 = vld [vmem:[%s9316_s0 + $0xa0] sm:$0xff]  ;;  %v3577_v30 = vld [vmem:[%s9316_s0 + $0x230] sm:$0xff]  ;;  %v3580_v31 = vld [vmem:[%s9316_s0 + $0x248] sm:$0xff] }
  0x18   :  { %5516 = vmatpush1.bf16.msra.mxu0 %v6469_v20  ;;  %5564 = vmatpush1.bf16.msra.mxu1 %v6469_v20  ;;  %v86_v33 = vld [vmem:[%s9316_s0 + $0xb0] sm:$0xff]  ;;  %v3579_v34 = vld [vmem:[%s9316_s0 + $0x240] sm:$0xff]  ;;  %v3582_v36 = vld [vmem:[%s9316_s0 + $0x258] sm:$0xff] }
  0x19   :  { %5517 = vmatprep.subr.bf16.mxu0 %v9325_v0  ;;  %5565 = vmatprep.subr.bf16.mxu1 %v9325_v0  ;;  %v88_v37 = vld [vmem:[%s9316_s0 + $0xc0] sm:$0xff]  ;;  %v3581_v39 = vld [vmem:[%s9316_s0 + $0x250] sm:$0xff]  ;;  %v3584_v40 = vld [vmem:[%s9316_s0 + $0x268] sm:$0xff] }
  0x1a   :  { %v90_v42 = vld [vmem:[%s9316_s0 + $0xd0] sm:$0xff]  ;;  %v3583_v43 = vld [vmem:[%s9316_s0 + $0x260] sm:$0xff]  ;;  %v3586_v45 = vld [vmem:[%s9316_s0 + $0x278] sm:$0xff] }
  0x1b   :  { %v92_v46 = vld [vmem:[%s9316_s0 + $0xe0] sm:$0xff]  ;;  %v3585_v48 = vld [vmem:[%s9316_s0 + $0x270] sm:$0xff]  ;;  %v3588_v49 = vld [vmem:[%s9316_s0 + $0x288] sm:$0xff] }
  0x1c   :  { %5519 = vmatpush1.bf16.msra.mxu0 %v6481_v23  ;;  %5567 = vmatpush1.bf16.msra.mxu1 %v6481_v23 }
  0x1d   :  { %5520 = vmatprep.subr.bf16.mxu0 %v9325_v0  ;;  %5568 = vmatprep.subr.bf16.mxu1 %v9325_v0 }
  0x20   :  { %5522 = vmatpush1.bf16.msra.mxu0 %v6493_v26  ;;  %5570 = vmatpush1.bf16.msra.mxu1 %v6493_v26 }
  0x21   :  { %5523 = vmatprep.subr.bf16.mxu0 %v9325_v0  ;;  %5571 = vmatprep.subr.bf16.mxu1 %v9325_v0 }
  0x24   :  { %5525 = vmatpush1.bf16.msra.mxu0 %v6505_v29  ;;  %5573 = vmatpush1.bf16.msra.mxu1 %v6505_v29 }
  0x25   :  { %5526 = vmatprep.subr.bf16.mxu0 %v9325_v0  ;;  %5574 = vmatprep.subr.bf16.mxu1 %v9325_v0 }
  0x28   :  { %5528 = vmatpush1.bf16.msra.mxu0 %v6517_v32  ;;  %5576 = vmatpush1.bf16.msra.mxu1 %v6517_v32 }
  0x29   :  { %5529 = vmatprep.subr.bf16.mxu0 %v9325_v0  ;;  %5577 = vmatprep.subr.bf16.mxu1 %v9325_v0 }
  0x2c   :  { %5531 = vmatpush1.bf16.msra.mxu0 %v6529_v35  ;;  %5579 = vmatpush1.bf16.msra.mxu1 %v6529_v35 }
  0x2d   :  { %5532 = vmatprep.subr.bf16.mxu0 %v9325_v0  ;;  %5580 = vmatprep.subr.bf16.mxu1 %v9325_v0 }
  0x30   :  { %5534 = vmatpush1.bf16.msra.mxu0 %v6541_v38  ;;  %5582 = vmatpush1.bf16.msra.mxu1 %v6541_v38 }
  0x31   :  { %5535 = vmatprep.subr.bf16.mxu0 %v9325_v0  ;;  %5583 = vmatprep.subr.bf16.mxu1 %v9325_v0 }
  0x34   :  { %5537 = vmatpush1.bf16.msra.mxu0 %v6553_v41  ;;  %5585 = vmatpush1.bf16.msra.mxu1 %v6553_v41 }
  0x35   :  { %5538 = vmatprep.subr.bf16.mxu0 %v9325_v0  ;;  %5586 = vmatprep.subr.bf16.mxu1 %v9325_v0 }
  0x38   :  { %5540 = vmatpush1.bf16.msra.mxu0 %v6565_v44  ;;  %5588 = vmatpush1.bf16.msra.mxu1 %v6565_v44 }
  0x39   :  { %5541 = vmatprep.subr.bf16.mxu0 %v9325_v0  ;;  %5589 = vmatprep.subr.bf16.mxu1 %v9325_v0 }
  0x3c   :  { %5543 = vmatpush1.bf16.msra.mxu0 %v6577_v47  ;;  %5591 = vmatpush1.bf16.msra.mxu1 %v6577_v47 }
  0x3d   :  { %5544 = vmatprep.subr.bf16.mxu0 %v9325_v0  ;;  %5592 = vmatprep.subr.bf16.mxu1 %v9325_v0 }
  0x40   :  { %5546 = vmatpush1.bf16.msra.mxu0 %v6589_v50  ;;  %5594 = vmatpush1.bf16.msra.mxu1 %v6589_v50 }
  0x41   :  { %5595 = vmatprep.subr.bf16.mxu0 %v9325_v0  ;;  %5643 = vmatprep.subr.bf16.mxu1 %v9325_v0 }
  0x43   :  { %179 = vmatmul.mubr.f32.vlgmr.msra.gmra.mrb[0].mxu0 %v64_v51  ;;  %420 = vmatmul.mubr.f32.vlgmr.msra.gmra.mrb[0].mxu1 %v3557_v52  ;;  %v94_v51 = vld [vmem:[%s9316_s0 + $0xf0] sm:$0xff]  ;;  %v3587_v52 = vld [vmem:[%s9316_s0 + $0x280] sm:$0xff] }
  0x44   :  { %5597 = vmatpush1.bf16.msra.mxu0 %v6408_v4  ;;  %183 = vmatprep.mubr.f32.mxu0 %v67_v53  ;;  %v3590_v53 = vld [vmem:[%s9316_s0 + $0x298] sm:$0xff] }
  0x45   :  { %5645 = vmatpush1.bf16.msra.mxu1 %v6408_v4  ;;  %424 = vmatprep.mubr.f32.mxu1 %v3560_v54  ;;  %v72_v4 = vld [vmem:[%s9316_s0 + $0x40] sm:$0xff] }
  0x46   :  { %5598 = vmatprep.subr.bf16.mxu0 %v9325_v0  ;;  %5646 = vmatprep.subr.bf16.mxu1 %v9325_v0  ;;  %v96_v54 = vld [vmem:[%s9316_s0 + $0x100] sm:$0xff] }
  0x47   :  { %184 = vmatmul.mubr.f32.gmra.mrb[2].mxu0 %v66_v55  ;;  %425 = vmatmul.mubr.f32.gmra.mrb[2].mxu1 %v3559_v56  ;;  %v3589_v55 = vld [vmem:[%s9316_s0 + $0x290] sm:$0xff]  ;;  %v3592_v56 = vld [vmem:[%s9316_s0 + $0x2a8] sm:$0xff] }
  0x48   :  { %188 = vmatprep.mubr.f32.mxu0 %v69_v57  ;;  %429 = vmatprep.mubr.f32.mxu1 %v3562_v58  ;;  %v98_v57 = vld [vmem:[%s9316_s0 + $0x110] sm:$0xff]  ;;  %v3591_v58 = vld [vmem:[%s9316_s0 + $0x2a0] sm:$0xff] }
  0x49   :  { %5600 = vmatpush1.bf16.msra.mxu0 %v6415_v6  ;;  %5648 = vmatpush1.bf16.msra.mxu1 %v6415_v6  ;;  %v75_v6 = vld [vmem:[%s9316_s0 + $0x58] sm:$0xff] }
  0x4a   :  { %5601 = vmatprep.subr.bf16.mxu0 %v9325_v0  ;;  %5649 = vmatprep.subr.bf16.mxu1 %v9325_v0 }
  0x4b   :  { %189 = vmatmul.mubr.f32.gmra.mrb[4].mxu0 %v68_v59  ;;  %430 = vmatmul.mubr.f32.gmra.mrb[4].mxu1 %v3561_v60  ;;  %v3594_v59 = vld [vmem:[%s9316_s0 + $0x2b8] sm:$0xff]  ;;  %v100_v60 = vld [vmem:[%s9316_s0 + $0x120] sm:$0xff] }
  0x4c   :  { %193 = vmatprep.mubr.f32.mxu0 %v71_v61  ;;  %434 = vmatprep.mubr.f32.mxu1 %v3564_v62  ;;  %v3593_v61 = vld [vmem:[%s9316_s0 + $0x2b0] sm:$0xff]  ;;  %v103_v62 = vld [vmem:[%s9316_s0 + $0x138] sm:$0xff] }
  0x4d   :  { %5603 = vmatpush1.bf16.msra.mxu0 %v6427_v9  ;;  %5651 = vmatpush1.bf16.msra.mxu1 %v6427_v9  ;;  %v3567_v9 = vld [vmem:[%s9316_s0 + $0x1e0] sm:$0xff] }
  0x4e   :  { %5604 = vmatprep.subr.bf16.mxu0 %v9325_v0  ;;  %5652 = vmatprep.subr.bf16.mxu1 %v9325_v0 }
  0x4f   :  { %194 = vmatmul.mubr.f32.gmra.mrb[6].mxu0 %v70_v63  ;;  %435 = vmatmul.mubr.f32.gmra.mrb[6].mxu1 %v3563_v1  ;;  %v3596_v63 = vld [vmem:[%s9316_s0 + $0x2c8] sm:$0xff]  ;;  %v102_v1 = vld [vmem:[%s9316_s0 + $0x130] sm:$0xff] }
  0x50   :  { %198 = vmatprep.mubr.f32.mxu0 %v73_v2  ;;  %439 = vmatprep.mubr.f32.mxu1 %v3566_v3  ;;  %v3595_v2 = vld [vmem:[%s9316_s0 + $0x2c0] sm:$0xff]  ;;  %v105_v3 = vld [vmem:[%s9316_s0 + $0x148] sm:$0xff] }
  0x51   :  { %5606 = vmatpush1.bf16.msra.mxu0 %v6442_v13  ;;  %5654 = vmatpush1.bf16.msra.mxu1 %v6442_v13  ;;  %v3569_v13 = vld [vmem:[%s9316_s0 + $0x1f0] sm:$0xff] }
  0x52   :  { %5607 = vmatprep.subr.bf16.mxu0 %v9325_v0  ;;  %5655 = vmatprep.subr.bf16.mxu1 %v9325_v0 }
  0x53   :  { %199 = vmatmul.mubr.f32.gmra.mrb[8].mxu0 %v72_v4  ;;  %440 = vmatmul.mubr.f32.gmra.mrb[8].mxu1 %v3565_v5  ;;  %v3598_v4 = vld [vmem:[%s9316_s0 + $0x2d8] sm:$0xff]  ;;  %v104_v5 = vld [vmem:[%s9316_s0 + $0x140] sm:$0xff] }
  0x54   :  { %203 = vmatprep.mubr.f32.mxu0 %v75_v6  ;;  %444 = vmatprep.mubr.f32.mxu1 %v3568_v7  ;;  %v3597_v6 = vld [vmem:[%s9316_s0 + $0x2d0] sm:$0xff]  ;;  %v107_v7 = vld [vmem:[%s9316_s0 + $0x158] sm:$0xff] }
  0x55   :  { %5609 = vmatpush1.bf16.msra.mxu0 %v6457_v17  ;;  %5657 = vmatpush1.bf16.msra.mxu1 %v6457_v17  ;;  %v3571_v17 = vld [vmem:[%s9316_s0 + $0x200] sm:$0xff] }
  0x56   :  { %5610 = vmatprep.subr.bf16.mxu0 %v9325_v0  ;;  %5658 = vmatprep.subr.bf16.mxu1 %v9325_v0 }
  0x57   :  { %204 = vmatmul.mubr.f32.gmra.mrb[10].mxu0 %v74_v8  ;;  %445 = vmatmul.mubr.f32.gmra.mrb[10].mxu1 %v3567_v9  ;;  %v3600_v8 = vld [vmem:[%s9316_s0 + $0x2e8] sm:$0xff]  ;;  %v106_v9 = vld [vmem:[%s9316_s0 + $0x150] sm:$0xff] }
  0x58   :  { %208 = vmatprep.mubr.f32.mxu0 %v77_v10  ;;  %449 = vmatprep.mubr.f32.mxu1 %v3570_v11  ;;  %v3599_v10 = vld [vmem:[%s9316_s0 + $0x2e0] sm:$0xff]  ;;  %v109_v11 = vld [vmem:[%s9316_s0 + $0x168] sm:$0xff] }
  0x59   :  { %5612 = vmatpush1.bf16.msra.mxu0 %v6469_v20  ;;  %5660 = vmatpush1.bf16.msra.mxu1 %v6469_v20  ;;  %v80_v20 = vld [vmem:[%s9316_s0 + $0x80] sm:$0xff] }
  0x5a   :  { %5613 = vmatprep.subr.bf16.mxu0 %v9325_v0  ;;  %5661 = vmatprep.subr.bf16.mxu1 %v9325_v0 }
  0x5b   :  { %209 = vmatmul.mubr.f32.gmra.mrb[12].mxu0 %v76_v12  ;;  %450 = vmatmul.mubr.f32.gmra.mrb[12].mxu1 %v3569_v13  ;;  %v3602_v12 = vld [vmem:[%s9316_s0 + $0x2f8] sm:$0xff]  ;;  %v108_v13 = vld [vmem:[%s9316_s0 + $0x160] sm:$0xff] }
  0x5c   :  { %213 = vmatprep.mubr.f32.mxu0 %v79_v14  ;;  %454 = vmatprep.mubr.f32.mxu1 %v3572_v15  ;;  %v3601_v14 = vld [vmem:[%s9316_s0 + $0x2f0] sm:$0xff]  ;;  %v111_v15 = vld [vmem:[%s9316_s0 + $0x178] sm:$0xff] }
  0x5d   :  { %5615 = vmatpush1.bf16.msra.mxu0 %v6481_v23  ;;  %5663 = vmatpush1.bf16.msra.mxu1 %v6481_v23  ;;  %v3576_v23 = vld [vmem:[%s9316_s0 + $0x228] sm:$0xff] }
  0x5e   :  { %5616 = vmatprep.subr.bf16.mxu0 %v9325_v0  ;;  %5664 = vmatprep.subr.bf16.mxu1 %v9325_v0 }
  0x5f   :  { %214 = vmatmul.mubr.f32.gmra.mrb[14].mxu0 %v78_v16  ;;  %455 = vmatmul.mubr.f32.gmra.mrb[14].mxu1 %v3571_v17  ;;  %v3604_v16 = vld [vmem:[%s9316_s0 + $0x308] sm:$0xff]  ;;  %v110_v17 = vld [vmem:[%s9316_s0 + $0x170] sm:$0xff] }
  0x60   :  { %218 = vmatprep.mubr.f32.mxu0 %v81_v18  ;;  %459 = vmatprep.mubr.f32.mxu1 %v3574_v19  ;;  %v3603_v18 = vld [vmem:[%s9316_s0 + $0x300] sm:$0xff]  ;;  %v113_v19 = vld [vmem:[%s9316_s0 + $0x188] sm:$0xff] }
  0x61   :  { %5618 = vmatpush1.bf16.msra.mxu0 %v6493_v26  ;;  %5666 = vmatpush1.bf16.msra.mxu1 %v6493_v26  ;;  %v85_v26 = vld [vmem:[%s9316_s0 + $0xa8] sm:$0xff] }
  0x62   :  { %5619 = vmatprep.subr.bf16.mxu0 %v9325_v0  ;;  %5667 = vmatprep.subr.bf16.mxu1 %v9325_v0 }
  0x63   :  { %219 = vmatmul.mubr.f32.gmra.mrb[16].mxu0 %v80_v20  ;;  %460 = vmatmul.mubr.f32.gmra.mrb[16].mxu1 %v3573_v21  ;;  %v3606_v20 = vld [vmem:[%s9316_s0 + $0x318] sm:$0xff]  ;;  %v112_v21 = vld [vmem:[%s9316_s0 + $0x180] sm:$0xff] }
  0x64   :  { %223 = vmatprep.mubr.f32.mxu0 %v83_v22  ;;  %464 = vmatprep.mubr.f32.mxu1 %v3576_v23  ;;  %v3605_v22 = vld [vmem:[%s9316_s0 + $0x310] sm:$0xff]  ;;  %v3608_v23 = vld [vmem:[%s9316_s0 + $0x328] sm:$0xff] }
  0x65   :  { %5621 = vmatpush1.bf16.msra.mxu0 %v6505_v29  ;;  %5669 = vmatpush1.bf16.msra.mxu1 %v6505_v29  ;;  %v87_v29 = vld [vmem:[%s9316_s0 + $0xb8] sm:$0xff] }
  0x66   :  { %5622 = vmatprep.subr.bf16.mxu0 %v9325_v0  ;;  %5670 = vmatprep.subr.bf16.mxu1 %v9325_v0 }
  0x67   :  { %224 = vmatmul.mubr.f32.gmra.mrb[18].mxu0 %v82_v24  ;;  %465 = vmatmul.mubr.f32.gmra.mrb[18].mxu1 %v3575_v25  ;;  %v3658_v24 = vld [vmem:[%s9316_s0 + $0x4b8] sm:$0xff]  ;;  %v3607_v25 = vld [vmem:[%s9316_s0 + $0x320] sm:$0xff] }
  0x68   :  { %228 = vmatprep.mubr.f32.mxu0 %v85_v26  ;;  %469 = vmatprep.mubr.f32.mxu1 %v3578_v27  ;;  %v3657_v26 = vld [vmem:[%s9316_s0 + $0x4b0] sm:$0xff]  ;;  %v3708_v27 = vld [vmem:[%s9317_s3 + $0x80] sm:$0xff] }
  0x69   :  { %5624 = vmatpush1.bf16.msra.mxu0 %v6517_v32  ;;  %5672 = vmatpush1.bf16.msra.mxu1 %v6517_v32  ;;  %v89_v32 = vld [vmem:[%s9316_s0 + $0xc8] sm:$0xff] }
  0x6a   :  { %5625 = vmatprep.subr.bf16.mxu0 %v9325_v0  ;;  %5673 = vmatprep.subr.bf16.mxu1 %v9325_v0 }
  0x6b   :  { %229 = vmatmul.mubr.f32.gmra.mrb[20].mxu0 %v84_v28  ;;  %470 = vmatmul.mubr.f32.gmra.mrb[20].mxu1 %v3577_v30  ;;  %v3709_v28 = vld [vmem:[%s9317_s3 + $0x88] sm:$0xff]  ;;  %v3610_v30 = vld [vmem:[%s9316_s0 + $0x338] sm:$0xff] }
  0x6c   :  { %233 = vmatprep.mubr.f32.mxu0 %v87_v29  ;;  %474 = vmatprep.mubr.f32.mxu1 %v3580_v31  ;;  %v3660_v29 = vld [vmem:[%s9316_s0 + $0x4c8] sm:$0xff]  ;;  %v5692_v31 = vpack.c.bf16 %v3709_v28, %v3708_v27  ;;  %v3682_v27 = vld [vmem:[%s9316_s0 + $0x578] sm:$0xff]  ;;  %v3631_v28 = vld [vmem:[%s9316_s0 + $0x3e0] sm:$0xff] }
  0x6d   :  { %5627 = vmatpush1.bf16.msra.mxu0 %v6529_v35  ;;  %5675 = vmatpush1.bf16.msra.mxu1 %v6529_v35  ;;  %v91_v35 = vld [vmem:[%s9316_s0 + $0xd8] sm:$0xff] }
  0x6e   :  { %5628 = vmatprep.subr.bf16.mxu0 %v9325_v0  ;;  %5676 = vmatprep.subr.bf16.mxu1 %v9325_v0 }
  0x6f   :  { %234 = vmatmul.mubr.f32.gmra.mrb[22].mxu0 %v86_v33  ;;  %475 = vmatmul.mubr.f32.gmra.mrb[22].mxu1 %v3579_v34  ;;  %v3609_v33 = vld [vmem:[%s9316_s0 + $0x330] sm:$0xff]  ;;  %v3659_v34 = vld [vmem:[%s9316_s0 + $0x4c0] sm:$0xff] }
  0x70   :  { %238 = vmatprep.mubr.f32.mxu0 %v89_v32  ;;  %479 = vmatprep.mubr.f32.mxu1 %v3582_v36  ;;  %v3612_v32 = vld [vmem:[%s9316_s0 + $0x348] sm:$0xff]  ;;  %v3662_v36 = vld [vmem:[%s9316_s0 + $0x4d8] sm:$0xff] }
  0x71   :  { %5630 = vmatpush1.bf16.msra.mxu0 %v6541_v38  ;;  %5678 = vmatpush1.bf16.msra.mxu1 %v6541_v38  ;;  %v93_v38 = vld [vmem:[%s9316_s0 + $0xe8] sm:$0xff] }
  0x72   :  { %5631 = vmatprep.subr.bf16.mxu0 %v9325_v0  ;;  %5679 = vmatprep.subr.bf16.mxu1 %v9325_v0 }
  0x73   :  { %239 = vmatmul.mubr.f32.gmra.mrb[24].mxu0 %v88_v37  ;;  %480 = vmatmul.mubr.f32.gmra.mrb[24].mxu1 %v3581_v39  ;;  %v3611_v37 = vld [vmem:[%s9316_s0 + $0x340] sm:$0xff]  ;;  %v3661_v39 = vld [vmem:[%s9316_s0 + $0x4d0] sm:$0xff] }
  0x74   :  { %243 = vmatprep.mubr.f32.mxu0 %v91_v35  ;;  %484 = vmatprep.mubr.f32.mxu1 %v3584_v40  ;;  %v3614_v35 = vld [vmem:[%s9316_s0 + $0x358] sm:$0xff]  ;;  %v3664_v40 = vld [vmem:[%s9316_s0 + $0x4e8] sm:$0xff] }
  0x75   :  { %5633 = vmatpush1.bf16.msra.mxu0 %v6553_v41  ;;  %5681 = vmatpush1.bf16.msra.mxu1 %v6553_v41  ;;  %v95_v41 = vld [vmem:[%s9316_s0 + $0xf8] sm:$0xff] }
  0x76   :  { %5634 = vmatprep.subr.bf16.mxu0 %v9325_v0  ;;  %5682 = vmatprep.subr.bf16.mxu1 %v9325_v0 }
  0x77   :  { %244 = vmatmul.mubr.f32.gmra.mrb[26].mxu0 %v90_v42  ;;  %485 = vmatmul.mubr.f32.gmra.mrb[26].mxu1 %v3583_v43  ;;  %v3710_v42 = vld [vmem:[%s9317_s3 + $0x90] sm:$0xff]  ;;  %v3711_v43 = vld [vmem:[%s9317_s3 + $0x98] sm:$0xff] }
  0x78   :  { %248 = vmatprep.mubr.f32.mxu0 %v93_v38  ;;  %489 = vmatprep.mubr.f32.mxu1 %v3586_v45  ;;  %v3613_v38 = vld [vmem:[%s9316_s0 + $0x350] sm:$0xff]  ;;  %v3663_v45 = vld [vmem:[%s9316_s0 + $0x4e0] sm:$0xff] }
  0x79   :  { %5636 = vmatpush1.bf16.msra.mxu0 %v6565_v44  ;;  %5684 = vmatpush1.bf16.msra.mxu1 %v6565_v44  ;;  %v97_v44 = vld [vmem:[%s9316_s0 + $0x108] sm:$0xff] }
  0x7a   :  { %5637 = vmatprep.subr.bf16.mxu0 %v9325_v0  ;;  %5685 = vmatprep.subr.bf16.mxu1 %v9325_v0 }
  0x7b   :  { %249 = vmatmul.mubr.f32.gmra.mrb[28].mxu0 %v92_v46  ;;  %490 = vmatmul.mubr.f32.gmra.mrb[28].mxu1 %v3585_v48  ;;  %v5695_v46 = vpack.c.bf16 %v3711_v43, %v3710_v42  ;;  %v3616_v48 = vld [vmem:[%s9316_s0 + $0x368] sm:$0xff]  ;;  %v3635_v43 = vld [vmem:[%s9316_s0 + $0x400] sm:$0xff] }
  0x7c   :  { %253 = vmatprep.mubr.f32.mxu0 %v95_v41  ;;  %494 = vmatprep.mubr.f32.mxu1 %v3588_v49  ;;  %v3666_v41 = vld [vmem:[%s9316_s0 + $0x4f8] sm:$0xff]  ;;  %v3615_v49 = vld [vmem:[%s9316_s0 + $0x360] sm:$0xff]  ;;  %v1164_v42 = vld [vmem:[%s9317_s3 + $0x28] sm:$0xff] }
  0x7d   :  { %5639 = vmatpush1.bf16.msra.mxu0 %v6577_v47  ;;  %5687 = vmatpush1.bf16.msra.mxu1 %v6577_v47  ;;  %v99_v47 = vld [vmem:[%s9316_s0 + $0x118] sm:$0xff] }
  0x7e   :  { %5640 = vmatprep.subr.bf16.mxu0 %v9325_v0  ;;  %5688 = vmatprep.subr.bf16.mxu1 %v9325_v0 }
  0x7f   :  { %254 = vmatmul.mubr.f32.gmra.mrb[30].mxu0 %v94_v51  ;;  %495 = vmatmul.mubr.f32.gmra.mrb[30].mxu1 %v3587_v52  ;;  %v3665_v51 = vld [vmem:[%s9316_s0 + $0x4f0] sm:$0xff]  ;;  %v3618_v52 = vld [vmem:[%s9316_s0 + $0x378] sm:$0xff] }
  0x80   :  { %258 = vmatprep.mubr.f32.mxu0 %v97_v44  ;;  %499 = vmatprep.mubr.f32.mxu1 %v3590_v53  ;;  %v3668_v44 = vld [vmem:[%s9316_s0 + $0x508] sm:$0xff]  ;;  %v3617_v53 = vld [vmem:[%s9316_s0 + $0x370] sm:$0xff] }
  0x81   :  { %5642 = vmatpush1.bf16.msra.mxu0 %v6589_v50  ;;  %5690 = vmatpush1.bf16.msra.mxu1 %v6589_v50  ;;  %v101_v50 = vld [vmem:[%s9316_s0 + $0x128] sm:$0xff] }
  0x82   :  { %5691 = vmatprep.subr.bf16.mxu0 %v9325_v0  ;;  %5715 = vmatprep.subr.bf16.mxu1 %v9325_v0 }
  0x83   :  { %259 = vmatmul.mubr.f32.gmra.mrb[32].mxu0 %v96_v54  ;;  %500 = vmatmul.mubr.f32.gmra.mrb[32].mxu1 %v3589_v55  ;;  %v3667_v54 = vld [vmem:[%s9316_s0 + $0x500] sm:$0xff]  ;;  %v3620_v55 = vld [vmem:[%s9316_s0 + $0x388] sm:$0xff] }
  0x84   :  { %263 = vmatprep.mubr.f32.mxu0 %v99_v47  ;;  %504 = vmatprep.mubr.f32.mxu1 %v3592_v56  ;;  %v3670_v47 = vld [vmem:[%s9316_s0 + $0x518] sm:$0xff]  ;;  %v3712_v56 = vld [vmem:[%s9317_s3 + $0xa0] sm:$0xff] }
  0x87   :  { %264 = vmatmul.mubr.f32.gmra.mrb[34].mxu0 %v98_v57  ;;  %505 = vmatmul.mubr.f32.gmra.mrb[34].mxu1 %v3591_v58  ;;  %v3713_v57 = vld [vmem:[%s9317_s3 + $0xa8] sm:$0xff]  ;;  %v3619_v58 = vld [vmem:[%s9316_s0 + $0x380] sm:$0xff] }
  0x88   :  { %268 = vmatprep.mubr.f32.mxu0 %v101_v50  ;;  %509 = vmatprep.mubr.f32.mxu1 %v3594_v59  ;;  %v3669_v50 = vld [vmem:[%s9316_s0 + $0x510] sm:$0xff]  ;;  %v5698_v59 = vpack.c.bf16 %v3713_v57, %v3712_v56  ;;  %v3642_v56 = vld [vmem:[%s9316_s0 + $0x438] sm:$0xff]  ;;  %v3692_v57 = vld [vmem:[%s9316_s0 + $0x5c8] sm:$0xff] }
  0x8b   :  { %269 = vmatmul.mubr.f32.gmra.mrb[36].mxu0 %v100_v60  ;;  %510 = vmatmul.mubr.f32.gmra.mrb[36].mxu1 %v3593_v61  ;;  %v3622_v60 = vld [vmem:[%s9316_s0 + $0x398] sm:$0xff]  ;;  %v3672_v61 = vld [vmem:[%s9316_s0 + $0x528] sm:$0xff] }
  0x8c   :  { %273 = vmatprep.mubr.f32.mxu0 %v103_v62  ;;  %514 = vmatprep.mubr.f32.mxu1 %v3596_v63  ;;  %v3621_v62 = vld [vmem:[%s9316_s0 + $0x390] sm:$0xff]  ;;  %v3671_v63 = vld [vmem:[%s9316_s0 + $0x520] sm:$0xff] }
  0x8f   :  { %274 = vmatmul.mubr.f32.gmra.mrb[38].mxu0 %v102_v1  ;;  %515 = vmatmul.mubr.f32.gmra.mrb[38].mxu1 %v3595_v2  ;;  %v3624_v1 = vld [vmem:[%s9316_s0 + $0x3a8] sm:$0xff]  ;;  %v3674_v2 = vld [vmem:[%s9316_s0 + $0x538] sm:$0xff] }
  0x90   :  { %278 = vmatprep.mubr.f32.mxu0 %v105_v3  ;;  %519 = vmatprep.mubr.f32.mxu1 %v3598_v4  ;;  %v1159_v3 = vld [vmem:[%s9317_s3] sm:$0xff]  ;;  %v1160_v4 = vld [vmem:[%s9317_s3 + $0x8] sm:$0xff] }
  0x93   :  { %279 = vmatmul.mubr.f32.gmra.mrb[40].mxu0 %v104_v5  ;;  %520 = vmatmul.mubr.f32.gmra.mrb[40].mxu1 %v3597_v6  ;;  %v5716_v5 = vpack.c.bf16 %v1160_v4, %v1159_v3  ;;  %v3623_v6 = vld [vmem:[%s9316_s0 + $0x3a0] sm:$0xff]  ;;  %v3646_v3 = vld [vmem:[%s9316_s0 + $0x458] sm:$0xff]  ;;  %v3696_v4 = vld [vmem:[%s9316_s0 + $0x5e8] sm:$0xff] }
  0x94   :  { %283 = vmatprep.mubr.f32.mxu0 %v107_v7  ;;  %524 = vmatprep.mubr.f32.mxu1 %v3600_v8  ;;  %v3673_v7 = vld [vmem:[%s9316_s0 + $0x530] sm:$0xff]  ;;  %v3626_v8 = vld [vmem:[%s9316_s0 + $0x3b8] sm:$0xff] }
  0x97   :  { %284 = vmatmul.mubr.f32.gmra.mrb[42].mxu0 %v106_v9  ;;  %525 = vmatmul.mubr.f32.gmra.mrb[42].mxu1 %v3599_v10  ;;  %v3676_v9 = vld [vmem:[%s9316_s0 + $0x548] sm:$0xff]  ;;  %v3625_v10 = vld [vmem:[%s9316_s0 + $0x3b0] sm:$0xff] }
  0x98   :  { %288 = vmatprep.mubr.f32.mxu0 %v109_v11  ;;  %529 = vmatprep.mubr.f32.mxu1 %v3602_v12  ;;  %v3675_v11 = vld [vmem:[%s9316_s0 + $0x540] sm:$0xff]  ;;  %v3628_v12 = vld [vmem:[%s9316_s0 + $0x3c8] sm:$0xff] }
  0x9b   :  { %289 = vmatmul.mubr.f32.gmra.mrb[44].mxu0 %v108_v13  ;;  %530 = vmatmul.mubr.f32.gmra.mrb[44].mxu1 %v3601_v14  ;;  %v3678_v13 = vld [vmem:[%s9316_s0 + $0x558] sm:$0xff]  ;;  %v3714_v14 = vld [vmem:[%s9317_s3 + $0xb0] sm:$0xff] }
  0x9c   :  { %293 = vmatprep.mubr.f32.mxu0 %v111_v15  ;;  %534 = vmatprep.mubr.f32.mxu1 %v3604_v16  ;;  %v3715_v15 = vld [vmem:[%s9317_s3 + $0xb8] sm:$0xff] }
  0x9d   :  { %v5701_v16 = vpack.c.bf16 %v3715_v15, %v3714_v14  ;;  %v3647_v15 = vld [vmem:[%s9316_s0 + $0x460] sm:$0xff] }
  0x9f   :  { %294 = vmatmul.mubr.f32.gmra.mrb[46].mxu0 %v110_v17  ;;  %535 = vmatmul.mubr.f32.gmra.mrb[46].mxu1 %v3603_v18  ;;  %v3627_v17 = vld [vmem:[%s9316_s0 + $0x3c0] sm:$0xff]  ;;  %v3677_v18 = vld [vmem:[%s9316_s0 + $0x550] sm:$0xff] }
  0xa0   :  { %298 = vmatprep.mubr.f32.mxu0 %v113_v19  ;;  %539 = vmatprep.mubr.f32.mxu1 %v3606_v20  ;;  %v3630_v19 = vld [vmem:[%s9316_s0 + $0x3d8] sm:$0xff]  ;;  %v3680_v20 = vld [vmem:[%s9316_s0 + $0x568] sm:$0xff] }
  0xa3   :  { %299 = vmatmul.mubr.f32.gmra.mrb[48].mxu0 %v112_v21  ;;  %540 = vmatmul.mubr.f32.gmra.mrb[48].mxu1 %v3605_v22  ;;  %v1161_v21 = vld [vmem:[%s9317_s3 + $0x10] sm:$0xff]  ;;  %v1162_v22 = vld [vmem:[%s9317_s3 + $0x18] sm:$0xff] }
  0xa4   :  { %685 = vmatprep.mubr.f32.mxu0 %v3608_v23  ;;  %951 = vmatprep.mubr.f32.mxu1 %v3658_v24  ;;  %v3629_v23 = vld [vmem:[%s9316_s0 + $0x3d0] sm:$0xff]  ;;  %v3679_v24 = vld [vmem:[%s9316_s0 + $0x560] sm:$0xff] }
  0xa7   :  { %686 = vmatmul.mubr.f32.vlgmr.msra.gmra.mrb[50].mxu0 %v3607_v25  ;;  %952 = vmatmul.mubr.f32.vlgmr.msra.gmra.mrb[50].mxu1 %v3657_v26  ;;  %v5719_v25 = vpack.c.bf16 %v1162_v22, %v1161_v21  ;;  %v3632_v26 = vld [vmem:[%s9316_s0 + $0x3e8] sm:$0xff]  ;;  %v3649_v22 = vld [vmem:[%s9316_s0 + $0x470] sm:$0xff] }
  0xa8   :  { %690 = vmatprep.mubr.f32.mxu0 %v3610_v30  ;;  %956 = vmatprep.mubr.f32.mxu1 %v3660_v29  ;;  %v3681_v30 = vld [vmem:[%s9316_s0 + $0x570] sm:$0xff]  ;;  %v3634_v29 = vld [vmem:[%s9316_s0 + $0x3f8] sm:$0xff] }
  0xa9   :  { %5693 = vmatpush3.bf16.msra.mxu0 %v5692_v31  ;;  %5717 = vmatpush3.bf16.msra.mxu1 %v5716_v5  ;;  %v3684_v31 = vld [vmem:[%s9316_s0 + $0x588] sm:$0xff]  ;;  %v3645_v5 = vld [vmem:[%s9316_s0 + $0x450] sm:$0xff] }
  0xaa   :  { %5694 = vmatprep.subr.bf16.mxu0 %v9325_v0  ;;  %5718 = vmatprep.subr.bf16.mxu1 %v9325_v0 }
  0xab   :  { %691 = vmatmul.mubr.f32.gmra.mrb[52].mxu0 %v3609_v33  ;;  %957 = vmatmul.mubr.f32.gmra.mrb[52].mxu1 %v3659_v34  ;;  %v3716_v33 = vld [vmem:[%s9317_s3 + $0xc0] sm:$0xff]  ;;  %v3717_v34 = vld [vmem:[%s9317_s3 + $0xc8] sm:$0xff] }
  0xac   :  { %695 = vmatprep.mubr.f32.mxu0 %v3612_v32  ;;  %961 = vmatprep.mubr.f32.mxu1 %v3662_v36  ;;  %v5704_v32 = vpack.c.bf16 %v3717_v34, %v3716_v33  ;;  %v3633_v36 = vld [vmem:[%s9316_s0 + $0x3f0] sm:$0xff]  ;;  %v1174_v33 = vld [vmem:[%s9317_s3 + $0x78] sm:$0xff] }
  0xad   :  { %5696 = vmatpush3.bf16.msra.mxu0 %v5695_v46  ;;  %5720 = vmatpush3.bf16.msra.mxu1 %v5719_v25  ;;  %v3638_v46 = vld [vmem:[%s9316_s0 + $0x418] sm:$0xff]  ;;  %v1172_v25 = vld [vmem:[%s9317_s3 + $0x68] sm:$0xff] }
  0xae   :  { %5697 = vmatprep.subr.bf16.mxu0 %v9325_v0  ;;  %5721 = vmatprep.subr.bf16.mxu1 %v9325_v0  ;;  %v3654_v34 = vld [vmem:[%s9316_s0 + $0x498] sm:$0xff] }
  0xaf   :  { %696 = vmatmul.mubr.f32.gmra.mrb[54].mxu0 %v3611_v37  ;;  %962 = vmatmul.mubr.f32.gmra.mrb[54].mxu1 %v3661_v39  ;;  %v3683_v37 = vld [vmem:[%s9316_s0 + $0x580] sm:$0xff]  ;;  %v3636_v39 = vld [vmem:[%s9316_s0 + $0x408] sm:$0xff] }
  0xb0   :  { %700 = vmatprep.mubr.f32.mxu0 %v3614_v35  ;;  %966 = vmatprep.mubr.f32.mxu1 %v3664_v40  ;;  %v3686_v35 = vld [vmem:[%s9316_s0 + $0x598] sm:$0xff]  ;;  %v1163_v40 = vld [vmem:[%s9317_s3 + $0x20] sm:$0xff] }
  0xb1   :  { %5699 = vmatpush3.bf16.msra.mxu0 %v5698_v59  ;;  %v3641_v59 = vld [vmem:[%s9316_s0 + $0x430] sm:$0xff] }
  0xb2   :  { %5700 = vmatprep.subr.bf16.mxu0 %v9325_v0 }
  0xb3   :  { %701 = vmatmul.mubr.f32.gmra.mrb[56].mxu0 %v3613_v38  ;;  %967 = vmatmul.mubr.f32.gmra.mrb[56].mxu1 %v3663_v45  ;;  %v3685_v38 = vld [vmem:[%s9316_s0 + $0x590] sm:$0xff]  ;;  %v5722_v45 = vpack.c.bf16 %v1164_v42, %v1163_v40  ;;  %v3723_v40 = vld [vmem:[%s9317_s3 + $0xf8] sm:$0xff]  ;;  %v3656_v42 = vld [vmem:[%s9316_s0 + $0x4a8] sm:$0xff] }
  0xb4   :  { %705 = vmatprep.mubr.f32.mxu0 %v3616_v48  ;;  %971 = vmatprep.mubr.f32.mxu1 %v3666_v41  ;;  %v3688_v48 = vld [vmem:[%s9316_s0 + $0x5a8] sm:$0xff]  ;;  %v3637_v41 = vld [vmem:[%s9316_s0 + $0x410] sm:$0xff] }
  0xb5   :  { %5702 = vmatpush3.bf16.msra.mxu0 %v5701_v16  ;;  %5723 = vmatpush3.bf16.msra.mxu1 %v5722_v45  ;;  %v3697_v16 = vld [vmem:[%s9316_s0 + $0x5f0] sm:$0xff]  ;;  %v3655_v45 = vld [vmem:[%s9316_s0 + $0x4a0] sm:$0xff] }
  0xb6   :  { %5703 = vmatprep.subr.bf16.mxu0 %v9325_v0  ;;  %5724 = vmatprep.subr.bf16.mxu1 %v9325_v0 }
  0xb7   :  { %706 = vmatmul.mubr.f32.gmra.mrb[58].mxu0 %v3615_v49  ;;  %972 = vmatmul.mubr.f32.gmra.mrb[58].mxu1 %v3665_v51  ;;  %v3687_v49 = vld [vmem:[%s9316_s0 + $0x5a0] sm:$0xff]  ;;  %v3640_v51 = vld [vmem:[%s9316_s0 + $0x428] sm:$0xff] }
  0xb8   :  { %710 = vmatprep.mubr.f32.mxu0 %v3618_v52  ;;  %976 = vmatprep.mubr.f32.mxu1 %v3668_v44  ;;  %v3690_v52 = vld [vmem:[%s9316_s0 + $0x5b8] sm:$0xff]  ;;  %v3718_v44 = vld [vmem:[%s9317_s3 + $0xd0] sm:$0xff] }
  0xb9   :  { %5705 = vmatpush3.bf16.msra.mxu0 %v5704_v32  ;;  %v3704_v32 = vld [vmem:[%s9316_s0 + $0x628] sm:$0xff] }
  0xba   :  { %5706 = vmatprep.subr.bf16.mxu0 %v9325_v0 }
  0xbb   :  { %711 = vmatmul.mubr.f32.gmra.mrb[60].mxu0 %v3617_v53  ;;  %977 = vmatmul.mubr.f32.gmra.mrb[60].mxu1 %v3667_v54  ;;  %v3719_v53 = vld [vmem:[%s9317_s3 + $0xd8] sm:$0xff]  ;;  %v3639_v54 = vld [vmem:[%s9316_s0 + $0x420] sm:$0xff] }
  0xbc   :  { %715 = vmatprep.mubr.f32.mxu0 %v3620_v55  ;;  %981 = vmatprep.mubr.f32.mxu1 %v3670_v47  ;;  %v3689_v55 = vld [vmem:[%s9316_s0 + $0x5b0] sm:$0xff]  ;;  %v5707_v47 = vpack.c.bf16 %v3719_v53, %v3718_v44 }
  0xbe   :  { %5708 = vmatpush3.bf16.msra.mxu0 %v5707_v47 }
  0xbf   :  { %716 = vmatmul.mubr.f32.gmra.mrb[62].mxu0 %v3619_v58  ;;  %982 = vmatmul.mubr.f32.gmra.mrb[62].mxu1 %v3669_v50  ;;  %v1165_v58 = vld [vmem:[%s9317_s3 + $0x30] sm:$0xff]  ;;  %v1166_v50 = vld [vmem:[%s9317_s3 + $0x38] sm:$0xff] }
  0xc0   :  { %720 = vmatprep.mubr.f32.mxu0 %v3622_v60  ;;  %986 = vmatprep.mubr.f32.mxu1 %v3672_v61  ;;  %v3691_v60 = vld [vmem:[%s9316_s0 + $0x5c0] sm:$0xff]  ;;  %v5725_v61 = vpack.c.bf16 %v1166_v50, %v1165_v58 }
  0xc1   :  { %5709 = vmatprep.subr.bf16.mxu0 %v9325_v0 }
  0xc2   :  { %5726 = vmatpush3.bf16.msra.mxu1 %v5725_v61 }
  0xc3   :  { %721 = vmatmul.mubr.f32.gmra.mrb[64].mxu0 %v3621_v62  ;;  %987 = vmatmul.mubr.f32.gmra.mrb[64].mxu1 %v3671_v63  ;;  %v3644_v62 = vld [vmem:[%s9316_s0 + $0x448] sm:$0xff]  ;;  %v3694_v63 = vld [vmem:[%s9316_s0 + $0x5d8] sm:$0xff] }
  0xc4   :  { %725 = vmatprep.mubr.f32.mxu0 %v3624_v1  ;;  %991 = vmatprep.mubr.f32.mxu1 %v3674_v2  ;;  %v3643_v1 = vld [vmem:[%s9316_s0 + $0x440] sm:$0xff]  ;;  %v3693_v2 = vld [vmem:[%s9316_s0 + $0x5d0] sm:$0xff] }
  0xc5   :  { %5727 = vmatprep.subr.bf16.mxu1 %v9325_v0 }
  0xc7   :  { %726 = vmatmul.mubr.f32.gmra.mrb[66].mxu0 %v3623_v6  ;;  %992 = vmatmul.mubr.f32.gmra.mrb[66].mxu1 %v3673_v7  ;;  %v3720_v6 = vld [vmem:[%s9317_s3 + $0xe0] sm:$0xff]  ;;  %v3721_v7 = vld [vmem:[%s9317_s3 + $0xe8] sm:$0xff] }
  0xc8   :  { %730 = vmatprep.mubr.f32.mxu0 %v3626_v8  ;;  %996 = vmatprep.mubr.f32.mxu1 %v3676_v9  ;;  %v3695_v8 = vld [vmem:[%s9316_s0 + $0x5e0] sm:$0xff]  ;;  %v5710_v9 = vpack.c.bf16 %v3721_v7, %v3720_v6 }
  0xca   :  { %5711 = vmatpush3.bf16.msra.mxu0 %v5710_v9 }
  0xcb   :  { %731 = vmatmul.mubr.f32.gmra.mrb[68].mxu0 %v3625_v10  ;;  %997 = vmatmul.mubr.f32.gmra.mrb[68].mxu1 %v3675_v11  ;;  %v1167_v10 = vld [vmem:[%s9317_s3 + $0x40] sm:$0xff]  ;;  %v1168_v11 = vld [vmem:[%s9317_s3 + $0x48] sm:$0xff] }
  0xcc   :  { %735 = vmatprep.mubr.f32.mxu0 %v3628_v12  ;;  %1001 = vmatprep.mubr.f32.mxu1 %v3678_v13  ;;  %v3648_v12 = vld [vmem:[%s9316_s0 + $0x468] sm:$0xff]  ;;  %v3698_v13 = vld [vmem:[%s9316_s0 + $0x5f8] sm:$0xff]  ;;  %v5728_v14 = vpack.c.bf16 %v1168_v11, %v1167_v10 }
  0xcd   :  { %5712 = vmatprep.subr.bf16.mxu0 %v9325_v0 }
  0xce   :  { %5729 = vmatpush3.bf16.msra.mxu1 %v5728_v14 }
  0xcf   :  { %736 = vmatmul.mubr.f32.gmra.mrb[70].mxu0 %v3627_v17  ;;  %1002 = vmatmul.mubr.f32.gmra.mrb[70].mxu1 %v3677_v18  ;;  %v1169_v17 = vld [vmem:[%s9317_s3 + $0x50] sm:$0xff]  ;;  %v1170_v18 = vld [vmem:[%s9317_s3 + $0x58] sm:$0xff] }
  0xd0   :  { %740 = vmatprep.mubr.f32.mxu0 %v3630_v19  ;;  %1006 = vmatprep.mubr.f32.mxu1 %v3680_v20  ;;  %v3650_v19 = vld [vmem:[%s9316_s0 + $0x478] sm:$0xff]  ;;  %v3700_v20 = vld [vmem:[%s9316_s0 + $0x608] sm:$0xff]  ;;  %v5731_v21 = vpack.c.bf16 %v1170_v18, %v1169_v17 }
  0xd1   :  { %5730 = vmatprep.subr.bf16.mxu1 %v9325_v0 }
  0xd2   :  { %5732 = vmatpush3.bf16.msra.mxu1 %v5731_v21 }
  0xd3   :  { %741 = vmatmul.mubr.f32.gmra.mrb[72].mxu0 %v3629_v23  ;;  %1007 = vmatmul.mubr.f32.gmra.mrb[72].mxu1 %v3679_v24  ;;  %v3699_v23 = vld [vmem:[%s9316_s0 + $0x600] sm:$0xff] }
  0xd4   :  { %745 = vmatprep.mubr.f32.mxu0 %v3632_v26  ;;  %1011 = vmatprep.mubr.f32.mxu1 %v3682_v27  ;;  %v1171_v24 = vld [vmem:[%s9317_s3 + $0x60] sm:$0xff]  ;;  %v3652_v26 = vld [vmem:[%s9316_s0 + $0x488] sm:$0xff]  ;;  %v3702_v27 = vld [vmem:[%s9316_s0 + $0x618] sm:$0xff] }
  0xd5   :  { %5733 = vmatprep.subr.bf16.mxu1 %v9325_v0 }
  0xd7   :  { %746 = vmatmul.mubr.f32.gmra.mrb[74].mxu0 %v3631_v28  ;;  %1012 = vmatmul.mubr.f32.gmra.mrb[74].mxu1 %v3681_v30  ;;  %v5734_v28 = vpack.c.bf16 %v1172_v25, %v1171_v24  ;;  %v3651_v30 = vld [vmem:[%s9316_s0 + $0x480] sm:$0xff] }
  0xd8   :  { %750 = vmatprep.mubr.f32.mxu0 %v3634_v29  ;;  %1016 = vmatprep.mubr.f32.mxu1 %v3684_v31  ;;  %v3701_v29 = vld [vmem:[%s9316_s0 + $0x610] sm:$0xff] }
  0xd9   :  { %v1173_v31 = vld [vmem:[%s9317_s3 + $0x70] sm:$0xff]  ;;  %5735 = vmatpush3.bf16.msra.mxu1 %v5734_v28 }
  0xda   :  { %5736 = vmatprep.subr.bf16.mxu1 %v9325_v0 }
  0xdb   :  { %751 = vmatmul.mubr.f32.gmra.mrb[76].mxu0 %v3633_v36  ;;  %1017 = vmatmul.mubr.f32.gmra.mrb[76].mxu1 %v3683_v37  ;;  %v5737_v36 = vpack.c.bf16 %v1174_v33, %v1173_v31  ;;  %v3653_v37 = vld [vmem:[%s9316_s0 + $0x490] sm:$0xff] }
  0xdc   :  { %755 = vmatprep.mubr.f32.mxu0 %v3636_v39  ;;  %1021 = vmatprep.mubr.f32.mxu1 %v3686_v35  ;;  %v3703_v39 = vld [vmem:[%s9316_s0 + $0x620] sm:$0xff]  ;;  %v3722_v35 = vld [vmem:[%s9317_s3 + $0xf0] sm:$0xff] }
  0xdd   :  { %5738 = vmatpush3.bf16.msra.mxu1 %v5737_v36 }
  0xde   :  { %5763 = vmatprep.subr.bf16.mxu1 %v9325_v0 }
  0xdf   :  { %756 = vmatmul.mubr.f32.gmra.mrb[78].mxu0 %v3635_v43  ;;  %1022 = vmatmul.mubr.f32.gmra.mrb[78].mxu1 %v3685_v38  ;;  %v3706_v43 = vld [vmem:[%s9316_s0 + $0x638] sm:$0xff]  ;;  %v5713_v38 = vpack.c.bf16 %v3723_v40, %v3722_v35 }
  0xe0   :  { %760 = vmatprep.mubr.f32.mxu0 %v3638_v46  ;;  %1026 = vmatprep.mubr.f32.mxu1 %v3688_v48  ;;  %v3705_v46 = vld [vmem:[%s9316_s0 + $0x630] sm:$0xff]  ;;  %v9327_v48 = vmov 0.0  }
  0xe1   :  { %5714 = vmatpush3.bf16.msra.mxu0 %v5713_v38 }
  0xe2   :  { %5739 = vmatprep.subr.bf16.mxu0 %v9325_v0 }
  0xe3   :  { %761 = vmatmul.mubr.f32.gmra.mrb[80].mxu0 %v3637_v41  ;;  %1027 = vmatmul.mubr.f32.gmra.mrb[80].mxu1 %v3687_v49 }
  0xe4   :  { %765 = vmatprep.mubr.f32.mxu0 %v3640_v51  ;;  %1031 = vmatprep.mubr.f32.mxu1 %v3690_v52 }
  0xe7   :  { %766 = vmatmul.mubr.f32.gmra.mrb[82].mxu0 %v3639_v54  ;;  %1032 = vmatmul.mubr.f32.gmra.mrb[82].mxu1 %v3689_v55 }
  0xe8   :  { %770 = vmatprep.mubr.f32.mxu0 %v3642_v56  ;;  %1036 = vmatprep.mubr.f32.mxu1 %v3692_v57 }
  0xeb   :  { %771 = vmatmul.mubr.f32.gmra.mrb[84].mxu0 %v3641_v59  ;;  %1037 = vmatmul.mubr.f32.gmra.mrb[84].mxu1 %v3691_v60  ;;  %v3725_v59 = vld [vmem:[%s9317_s3 + $0x108] sm:$0xff] }
  0xec   :  { %775 = vmatprep.mubr.f32.mxu0 %v3644_v62  ;;  %1041 = vmatprep.mubr.f32.mxu1 %v3694_v63 }
  0xef   :  { %776 = vmatmul.mubr.f32.gmra.mrb[86].mxu0 %v3643_v1  ;;  %1042 = vmatmul.mubr.f32.gmra.mrb[86].mxu1 %v3693_v2 }
  0xf0   :  { %780 = vmatprep.mubr.f32.mxu0 %v3646_v3  ;;  %1046 = vmatprep.mubr.f32.mxu1 %v3696_v4 }
  0xf3   :  { %781 = vmatmul.mubr.f32.gmra.mrb[88].mxu0 %v3645_v5  ;;  %1047 = vmatmul.mubr.f32.gmra.mrb[88].mxu1 %v3695_v8 }
  0xf4   :  { %785 = vmatprep.mubr.f32.mxu0 %v3648_v12  ;;  %1051 = vmatprep.mubr.f32.mxu1 %v3698_v13 }
  0xf7   :  { %786 = vmatmul.mubr.f32.gmra.mrb[90].mxu0 %v3647_v15  ;;  %1052 = vmatmul.mubr.f32.gmra.mrb[90].mxu1 %v3697_v16 }
  0xf8   :  { %790 = vmatprep.mubr.f32.mxu0 %v3650_v19  ;;  %1056 = vmatprep.mubr.f32.mxu1 %v3700_v20 }
  0xfb   :  { %791 = vmatmul.mubr.f32.gmra.mrb[92].mxu0 %v3649_v22  ;;  %1057 = vmatmul.mubr.f32.gmra.mrb[92].mxu1 %v3699_v23 }
  0xfc   :  { %795 = vmatprep.mubr.f32.mxu0 %v3652_v26  ;;  %1061 = vmatprep.mubr.f32.mxu1 %v3702_v27 }
  0xff   :  { %796 = vmatmul.mubr.f32.gmra.mrb[94].mxu0 %v3651_v30  ;;  %1062 = vmatmul.mubr.f32.gmra.mrb[94].mxu1 %v3701_v29 }
 0x100   :  { %800 = vmatprep.mubr.f32.mxu0 %v3654_v34  ;;  %1066 = vmatprep.mubr.f32.mxu1 %v3704_v32 }
 0x103   :  { %801 = vmatmul.mubr.f32.gmra.mrb[96].mxu0 %v3653_v37  ;;  %1067 = vmatmul.mubr.f32.gmra.mrb[96].mxu1 %v3703_v39 }
 0x104   :  { %805 = vmatprep.mubr.f32.mxu0 %v3656_v42  ;;  %1071 = vmatprep.mubr.f32.mxu1 %v3706_v43 }
 0x107   :  { %806 = vmatmul.mubr.f32.gmra.mrb[98].mxu0 %v3655_v45  ;;  %1072 = vmatmul.mubr.f32.gmra.mrb[98].mxu1 %v3705_v46 }
 0x108   :  { %4621 = vmatprep.mubr.msk.f32.mxu1 %vm6345_vm0, %v9327_v48  ;;  %4586 = vmatprep.mubr.msk.f32.mxu0 %vm6345_vm0, %v9327_v48 }
 0x116   :  { %v7371_v41 = vpop.f32.mrb[0].mxu0  ;;  %v7373_v49 = vpop.f32.mrb[0].mxu1 }
 0x117   :  { %v182_v51 = vpop.f32.mrb[1].mxu0  ;;  %v545_v52 = vmax.f32 %v7371_v41, %v7373_v49  ;;  %v423_v44 = vpop.f32.mrb[1].mxu1 }
 0x11a   :  { %v7377_v53 = vpop.f32.mrb[2].mxu0  ;;  %v7379_v54 = vpop.f32.mrb[2].mxu1 }
 0x11b   :  { %v187_v55 = vpop.f32.mrb[3].mxu0  ;;  %v546_v47 = vmax.f32 %v7377_v53, %v7379_v54  ;;  %v428_v56 = vpop.f32.mrb[3].mxu1  ;;  %v3743_v53 = vld [vmem:[%s9317_s3 + $0x198] sm:$0xff] }
 0x11e   :  { %v7383_v57 = vpop.f32.mrb[4].mxu0  ;;  %v7385_v58 = vpop.f32.mrb[4].mxu1 }
 0x11f   :  { %v192_v50 = vpop.f32.mrb[5].mxu0  ;;  %v433_v60 = vpop.f32.mrb[5].mxu1 }
 0x122   :  { %v7389_v61 = vpop.f32.mrb[6].mxu0  ;;  %v7391_v62 = vpop.f32.mrb[6].mxu1 }
 0x123   :  { %v197_v63 = vpop.f32.mrb[7].mxu0  ;;  %v438_v2 = vpop.f32.mrb[7].mxu1 }
 0x126   :  { %v7395_v3 = vpop.f32.mrb[8].mxu0  ;;  %v7397_v4 = vpop.f32.mrb[8].mxu1 }
 0x127   :  { %v202_v5 = vpop.f32.mrb[9].mxu0  ;;  %v443_v7 = vpop.f32.mrb[9].mxu1 }
 0x12a   :  { %v7401_v8 = vpop.f32.mrb[10].mxu0  ;;  %v7403_v9 = vpop.f32.mrb[10].mxu1 }
 0x12b   :  { %v207_v10 = vpop.f32.mrb[11].mxu0  ;;  %v448_v12 = vpop.f32.mrb[11].mxu1 }
 0x12e   :  { %v7407_v13 = vpop.f32.mrb[12].mxu0  ;;  %v7409_v14 = vpop.f32.mrb[12].mxu1 }
 0x12f   :  { %v212_v15 = vpop.f32.mrb[13].mxu0  ;;  %v453_v17 = vpop.f32.mrb[13].mxu1 }
 0x132   :  { %v7413_v18 = vpop.f32.mrb[14].mxu0  ;;  %v7415_v19 = vpop.f32.mrb[14].mxu1 }
 0x133   :  { %v217_v20 = vpop.f32.mrb[15].mxu0  ;;  %v458_v22 = vpop.f32.mrb[15].mxu1 }
 0x136   :  { %v7419_v23 = vpop.f32.mrb[16].mxu0  ;;  %v7421_v24 = vpop.f32.mrb[16].mxu1 }
 0x137   :  { %v222_v25 = vpop.f32.mrb[17].mxu0  ;;  %v463_v27 = vpop.f32.mrb[17].mxu1 }
 0x13a   :  { %v7425_v28 = vpop.f32.mrb[18].mxu0  ;;  %v7427_v30 = vpop.f32.mrb[18].mxu1 }
 0x13b   :  { %v227_v29 = vpop.f32.mrb[19].mxu0  ;;  %v468_v33 = vpop.f32.mrb[19].mxu1 }
 0x13e   :  { %v7431_v34 = vpop.f32.mrb[20].mxu0  ;;  %v7433_v32 = vpop.f32.mrb[20].mxu1 }
 0x13f   :  { %v232_v36 = vpop.f32.mrb[21].mxu0  ;;  %v473_v39 = vpop.f32.mrb[21].mxu1 }
 0x142   :  { %v7437_v35 = vpop.f32.mrb[22].mxu0  ;;  %v7439_v40 = vpop.f32.mrb[22].mxu1 }
 0x143   :  { %v237_v42 = vpop.f32.mrb[23].mxu0  ;;  %v478_v38 = vpop.f32.mrb[23].mxu1 }
 0x146   :  { %v7443_v45 = vpop.f32.mrb[24].mxu0  ;;  %v7445_v46 = vpop.f32.mrb[24].mxu1 }
 0x147   :  { %v242_v51 = vpop.f32.mrb[25].mxu0  ;;  %v483_v55 = vpop.f32.mrb[25].mxu1 }
 0x14a   :  { %v7449_v56 = vpop.f32.mrb[26].mxu0  ;;  %v7451_v50 = vpop.f32.mrb[26].mxu1 }
 0x14b   :  { %v247_v60 = vpop.f32.mrb[27].mxu0  ;;  %v488_v2 = vpop.f32.mrb[27].mxu1 }
 0x14e   :  { %v7455_v5 = vpop.f32.mrb[28].mxu0  ;;  %v7457_v7 = vpop.f32.mrb[28].mxu1 }
 0x14f   :  { %v252_v10 = vpop.f32.mrb[29].mxu0  ;;  %v493_v15 = vpop.f32.mrb[29].mxu1 }
 0x152   :  { %v7461_v17 = vpop.f32.mrb[30].mxu0  ;;  %v7463_v20 = vpop.f32.mrb[30].mxu1 }
 0x153   :  { %v257_v22 = vpop.f32.mrb[31].mxu0  ;;  %v498_v27 = vpop.f32.mrb[31].mxu1 }
 0x156   :  { %v7467_v29 = vpop.f32.mrb[32].mxu0  ;;  %v7469_v33 = vpop.f32.mrb[32].mxu1 }
 0x157   :  { %v262_v36 = vpop.f32.mrb[33].mxu0  ;;  %v503_v42 = vpop.f32.mrb[33].mxu1 }
 0x15a   :  { %v7473_v38 = vpop.f32.mrb[34].mxu0  ;;  %v7475_v51 = vpop.f32.mrb[34].mxu1 }
 0x15b   :  { %v267_v55 = vpop.f32.mrb[35].mxu0  ;;  %v508_v2 = vpop.f32.mrb[35].mxu1 }
 0x15e   :  { %v7479_v10 = vpop.f32.mrb[36].mxu0  ;;  %v7481_v15 = vpop.f32.mrb[36].mxu1 }
 0x15f   :  { %v272_v22 = vpop.f32.mrb[37].mxu0  ;;  %v513_v36 = vpop.f32.mrb[37].mxu1 }
 0x162   :  { %v7485_v39 = vpop.f32.mrb[38].mxu0  ;;  %v7487_v42 = vpop.f32.mrb[38].mxu1 }
 0x163   :  { %v277_v25 = vpop.f32.mrb[39].mxu0  ;;  %v518_v12 = vpop.f32.mrb[39].mxu1 }
 0x166   :  { %v7491_v60 = vpop.f32.mrb[40].mxu0  ;;  %v7493_v2 = vpop.f32.mrb[40].mxu1 }
 0x167   :  { %v282_v63 = vpop.f32.mrb[41].mxu0  ;;  %v523_v44 = vpop.f32.mrb[41].mxu1 }
 0x16a   :  { %v7497_v27 = vpop.f32.mrb[42].mxu0  ;;  %v7499_v36 = vpop.f32.mrb[42].mxu1 }
 0x16b   :  { %v287_v43 = vpop.f32.mrb[43].mxu0  ;;  %v528_v37 = vpop.f32.mrb[43].mxu1 }
 0x16e   :  { %v7503_v55 = vpop.f32.mrb[44].mxu0  ;;  %v7505_v12 = vpop.f32.mrb[44].mxu1 }
 0x16f   :  { %v292_v31 = vpop.f32.mrb[45].mxu0  ;;  %v533_v26 = vpop.f32.mrb[45].mxu1 }
 0x172   :  { %v7509_v22 = vpop.f32.mrb[46].mxu0  ;;  %v7511_v44 = vpop.f32.mrb[46].mxu1 }
 0x173   :  { %v297_v21 = vpop.f32.mrb[47].mxu0  ;;  %v538_v16 = vpop.f32.mrb[47].mxu1 }
 0x174   :  { %v7527_v16 = vld [vmem:[%s9318_s2] ss:$0 sm:$0xff] }
 0x176   :  { %v7515_v25 = vpop.f32.mrb[48].mxu0  ;;  %v7517_v37 = vpop.f32.mrb[48].mxu1 }
 0x177   :  { %9331 = vst [vmem:[#allocation2_spill] sm:$0xff] %v7515_v25  ;;  %9332 = vst [vmem:[#allocation3_spill] sm:$0xff] %v7517_v37  ;;  %v302_v11 = vpop.f32.mrb[49].mxu0  ;;  %v543_v6 = vpop.f32.mrb[49].mxu1  ;;  %v9334_v37 = vmov 0.0  }
 0x178   :  { %v3740_v11 = vld [vmem:[%s9317_s3 + $0x180] sm:$0xff]  ;;  %v3741_v6 = vld [vmem:[%s9317_s3 + $0x188] sm:$0xff] }
 0x17a   :  { %v687_v63 = vpop.f32.mrb[50].mxu0  ;;  %v953_v26 = vpop.f32.mrb[50].mxu1 }
 0x17b   :  { %v811_v1 = vmax.f32 %v545_v52, %v687_v63  ;;  %v689_v21 = vpop.f32.mrb[51].mxu0  ;;  %v955_v0 = vpop.f32.mrb[51].mxu1  ;;  %v5764_v63 = vpack.c.bf16 %v3741_v6, %v3740_v11 }
 0x17d   :  { %v1077_v43 = vmax.f32 %v811_v1, %v953_v26  ;;  %v3724_v1 = vld [vmem:[%s9317_s3 + $0x100] sm:$0xff] }
 0x17e   :  { %v692_v31 = vpop.f32.mrb[52].mxu0  ;;  %v958_v48 = vpop.f32.mrb[52].mxu1 }
 0x17f   :  { %v1109_v41 = vadd.f32 %v7527_v16, %v1077_v43  ;;  %v812_v0 = vmax.f32 %v546_v47, %v692_v31  ;;  %v694_v49 = vpop.f32.mrb[53].mxu0  ;;  %v960_v52 = vpop.f32.mrb[53].mxu1  ;;  %v3742_v43 = vld [vmem:[%s9317_s3 + $0x190] sm:$0xff] }
 0x180   :  { %v5767_v49 = vpack.c.bf16 %v3743_v53, %v3742_v43  ;;  %v3726_v52 = vld [vmem:[%s9317_s3 + $0x110] sm:$0xff]  ;;  %v9336_v43 = vmax.f32 %v7389_v61, %v7391_v62  ;;  %v3729_v61 = vld [vmem:[%s9317_s3 + $0x128] sm:$0xff] }
 0x181   :  { %v1134_v26 = vmax.f32 %v1109_v41, 0.0  ;;  %v1078_v21 = vmax.f32 %v812_v0, %v958_v48  ;;  %v9333_v48 = vmax.f32 %v7383_v57, %v7385_v58  ;;  %v5740_v0 = vpack.c.bf16 %v3725_v59, %v3724_v1  ;;  %v3727_v58 = vld [vmem:[%s9317_s3 + $0x118] sm:$0xff]  ;;  %v3744_v59 = vld [vmem:[%s9317_s3 + $0x1a0] sm:$0xff]  ;;  %v3746_v62 = vld [vmem:[%s9317_s3 + $0x1b0] sm:$0xff] }
 0x182   :  { %v697_v54 = vpop.f32.mrb[54].mxu0  ;;  %v7551_v47 = vpop.f32.mrb[54].mxu1  ;;  %v9335_v57 = vmov 0.0|0.0  }
 0x183   :  { %v1110_v31 = vadd.f32 %v7527_v16, %v1078_v21  ;;  %v7557_v11 = vmax.f32 %v9333_v48, %v697_v54  ;;  %4622 = vmatmul.mubr.f32.vlgmr.msra.gmra.mrb[100].mxu1 %v1134_v26  ;;  %v699_v6 = vpop.f32.mrb[55].mxu0  ;;  %v965_v41 = vpop.f32.mrb[55].mxu1  ;;  %v5743_v48 = vpack.c.bf16 %v3727_v58, %v3726_v52  ;;  %v9337_v52 = vmax.f32 %v7395_v3, %v7397_v4  ;;  %v3731_v3 = vld [vmem:[%s9317_s3 + $0x138] sm:$0xff]  ;;  %v3748_v4 = vld [vmem:[%s9317_s3 + $0x1c0] sm:$0xff] }
 0x184   :  { %5765 = vmatpush3.bf16.msra.mxu1 %v5764_v63  ;;  %4691 = vmatprep.mubr.msk.f32.mxu1 %vm6345_vm0, %v9334_v37  ;;  %v3745_v63 = vld [vmem:[%s9317_s3 + $0x1a8] sm:$0xff]  ;;  %v3728_v41 = vld [vmem:[%s9317_s3 + $0x120] sm:$0xff] }
 0x185   :  { %v1135_v25 = vmax.f32 %v1110_v31, 0.0  ;;  %5766 = vmatprep.subr.bf16.mxu1 %v9335_v57  ;;  %v5770_v6 = vpack.c.bf16 %v3745_v63, %v3744_v59 }
 0x186   :  { %v702_v1 = vpop.f32.mrb[56].mxu0  ;;  %v7576_v26 = vpop.f32.mrb[56].mxu1 }
 0x187   :  { %v7581_v53 = vmax.f32 %v9336_v43, %v702_v1  ;;  %4587 = vmatmul.mubr.f32.vlgmr.msra.gmra.mrb[100].mxu0 %v1135_v25  ;;  %v704_v54 = vpop.f32.mrb[57].mxu0  ;;  %v970_v31 = vpop.f32.mrb[57].mxu1  ;;  %v3747_v25 = vld [vmem:[%s9317_s3 + $0x1b8] sm:$0xff]  ;;  %v5746_v1 = vpack.c.bf16 %v3729_v61, %v3728_v41  ;;  %v9338_v61 = vmax.f32 %v7401_v8, %v7403_v9  ;;  %v3733_v8 = vld [vmem:[%s9317_s3 + $0x148] sm:$0xff]  ;;  %v3750_v9 = vld [vmem:[%s9317_s3 + $0x1d0] sm:$0xff] }
 0x188   :  { %5741 = vmatpush3.bf16.msra.mxu0 %v5740_v0  ;;  %5768 = vmatpush3.bf16.msra.mxu1 %v5767_v49  ;;  %v5773_v43 = vpack.c.bf16 %v3747_v25, %v3746_v62  ;;  %v3730_v54 = vld [vmem:[%s9317_s3 + $0x130] sm:$0xff] }
 0x189   :  { %v1080_v21 = vmax.f32 %v7581_v53, %v7576_v26  ;;  %5742 = vmatprep.subr.bf16.mxu0 %v9335_v57  ;;  %5769 = vmatprep.subr.bf16.mxu1 %v9335_v57  ;;  %v3773_v26 = vld [vmem:[%s9317_s3 + $0x288] sm:$0xff] }
 0x18a   :  { %v707_v0 = vpop.f32.mrb[58].mxu0  ;;  %v7599_v49 = vpop.f32.mrb[58].mxu1  ;;  %4656 = vmatprep.mubr.msk.f32.mxu0 %vm6345_vm0, %v9334_v37 }
 0x18b   :  { %v7606_v58 = vmax.f32 %v9337_v52, %v707_v0  ;;  %v709_v59 = vpop.f32.mrb[59].mxu0  ;;  %v975_v63 = vpop.f32.mrb[59].mxu1  ;;  %v5749_v52 = vpack.c.bf16 %v3731_v3, %v3730_v54  ;;  %v9339_v3 = vmax.f32 %v7407_v13, %v7409_v14  ;;  %v3735_v13 = vld [vmem:[%s9317_s3 + $0x158] sm:$0xff]  ;;  %v3752_v14 = vld [vmem:[%s9317_s3 + $0x1e0] sm:$0xff]  ;;  %v1112_v31 = vadd.f32 %v7527_v16, %v1080_v21 }
 0x18c   :  { %5744 = vmatpush3.bf16.msra.mxu0 %v5743_v48  ;;  %5771 = vmatpush3.bf16.msra.mxu1 %v5770_v6  ;;  %v3749_v48 = vld [vmem:[%s9317_s3 + $0x1c8] sm:$0xff]  ;;  %v3732_v63 = vld [vmem:[%s9317_s3 + $0x140] sm:$0xff] }
 0x18d   :  { %5745 = vmatprep.subr.bf16.mxu0 %v9335_v57  ;;  %5772 = vmatprep.subr.bf16.mxu1 %v9335_v57  ;;  %v5776_v59 = vpack.c.bf16 %v3749_v48, %v3748_v4 }
 0x18e   :  { %v712_v6 = vpop.f32.mrb[60].mxu0  ;;  %v7624_v41 = vpop.f32.mrb[60].mxu1 }
 0x18f   :  { %v7629_v62 = vmax.f32 %v9338_v61, %v712_v6  ;;  %v714_v25 = vpop.f32.mrb[61].mxu0  ;;  %v980_v0 = vpop.f32.mrb[61].mxu1  ;;  %v5752_v61 = vpack.c.bf16 %v3733_v8, %v3732_v63  ;;  %v9340_v8 = vmax.f32 %v7413_v18, %v7415_v19  ;;  %v3737_v18 = vld [vmem:[%s9317_s3 + $0x168] sm:$0xff]  ;;  %v3754_v19 = vld [vmem:[%s9317_s3 + $0x1f0] sm:$0xff] }
 0x190   :  { %5747 = vmatpush3.bf16.msra.mxu0 %v5746_v1  ;;  %5774 = vmatpush3.bf16.msra.mxu1 %v5773_v43  ;;  %v3751_v1 = vld [vmem:[%s9317_s3 + $0x1d8] sm:$0xff]  ;;  %v3734_v0 = vld [vmem:[%s9317_s3 + $0x150] sm:$0xff] }
 0x191   :  { %5748 = vmatprep.subr.bf16.mxu0 %v9335_v57  ;;  %5775 = vmatprep.subr.bf16.mxu1 %v9335_v57  ;;  %v5779_v25 = vpack.c.bf16 %v3751_v1, %v3750_v9 }
 0x192   :  { %v717_v43 = vpop.f32.mrb[62].mxu0  ;;  %v7647_v54 = vpop.f32.mrb[62].mxu1 }
 0x193   :  { %v7652_v4 = vmax.f32 %v9339_v3, %v717_v43  ;;  %v719_v48 = vpop.f32.mrb[63].mxu0  ;;  %v985_v6 = vpop.f32.mrb[63].mxu1  ;;  %v5755_v3 = vpack.c.bf16 %v3735_v13, %v3734_v0  ;;  %v9341_v13 = vmax.f32 %v7419_v23, %v7421_v24  ;;  %v3739_v24 = vld [vmem:[%s9317_s3 + $0x178] sm:$0xff]  ;;  %v1137_v23 = vmax.f32 %v1112_v31, 0.0 }
 0x194   :  { %5750 = vmatpush3.bf16.msra.mxu0 %v5749_v52  ;;  %5777 = vmatpush3.bf16.msra.mxu1 %v5776_v59  ;;  %v3753_v52 = vld [vmem:[%s9317_s3 + $0x1e8] sm:$0xff]  ;;  %v3736_v6 = vld [vmem:[%s9317_s3 + $0x160] sm:$0xff] }
 0x195   :  { %5751 = vmatprep.subr.bf16.mxu0 %v9335_v57  ;;  %5778 = vmatprep.subr.bf16.mxu1 %v9335_v57  ;;  %v5782_v48 = vpack.c.bf16 %v3753_v52, %v3752_v14 }
 0x196   :  { %v722_v59 = vpop.f32.mrb[64].mxu0  ;;  %v7670_v63 = vpop.f32.mrb[64].mxu1 }
 0x197   :  { %v7675_v9 = vmax.f32 %v9340_v8, %v722_v59  ;;  %v724_v1 = vpop.f32.mrb[65].mxu0  ;;  %v990_v43 = vpop.f32.mrb[65].mxu1  ;;  %v5758_v8 = vpack.c.bf16 %v3737_v18, %v3736_v6 }
 0x198   :  { %5753 = vmatpush3.bf16.msra.mxu0 %v5752_v61  ;;  %5780 = vmatpush3.bf16.msra.mxu1 %v5779_v25  ;;  %v3755_v61 = vld [vmem:[%s9317_s3 + $0x1f8] sm:$0xff]  ;;  %v3738_v43 = vld [vmem:[%s9317_s3 + $0x170] sm:$0xff] }
 0x199   :  { %5754 = vmatprep.subr.bf16.mxu0 %v9335_v57  ;;  %5781 = vmatprep.subr.bf16.mxu1 %v9335_v57  ;;  %v5785_v1 = vpack.c.bf16 %v3755_v61, %v3754_v19  ;;  %v5761_v61 = vpack.c.bf16 %v3739_v24, %v3738_v43 }
 0x19a   :  { %v727_v25 = vpop.f32.mrb[66].mxu0  ;;  %v7693_v0 = vpop.f32.mrb[66].mxu1 }
 0x19b   :  { %v7698_v14 = vmax.f32 %v9341_v13, %v727_v25  ;;  %v729_v52 = vpop.f32.mrb[67].mxu0  ;;  %v995_v59 = vpop.f32.mrb[67].mxu1  ;;  %v3756_v13 = vld [vmem:[%s9317_s3 + $0x200] sm:$0xff] }
 0x19c   :  { %5756 = vmatpush3.bf16.msra.mxu0 %v5755_v3  ;;  %5783 = vmatpush3.bf16.msra.mxu1 %v5782_v48  ;;  %v3772_v3 = vld [vmem:[%s9317_s3 + $0x280] sm:$0xff]  ;;  %v9342_v48 = vmax.f32 %v7425_v28, %v7427_v30  ;;  %v9343_v52 = vmax.f32 %v7557_v11, %v7551_v47  ;;  %v3757_v30 = vld [vmem:[%s9317_s3 + $0x208] sm:$0xff]  ;;  %v3775_v47 = vld [vmem:[%s9317_s3 + $0x298] sm:$0xff] }
 0x19d   :  { %5757 = vmatprep.subr.bf16.mxu0 %v9335_v57  ;;  %5784 = vmatprep.subr.bf16.mxu1 %v9335_v57  ;;  %v5812_v25 = vpack.c.bf16 %v3773_v26, %v3772_v3  ;;  %v5788_v26 = vpack.c.bf16 %v3757_v30, %v3756_v13  ;;  %v9345_v13 = vmax.f32 %v7437_v35, %v7439_v40  ;;  %v3761_v35 = vld [vmem:[%s9317_s3 + $0x228] sm:$0xff]  ;;  %v3778_v40 = vld [vmem:[%s9317_s3 + $0x2b0] sm:$0xff] }
 0x19e   :  { %v732_v21 = vpop.f32.mrb[68].mxu0  ;;  %v7720_v53 = vpop.f32.mrb[68].mxu1  ;;  %v1111_v59 = vadd.f32 %v7527_v16, %v9343_v52 }
 0x19f   :  { %v7725_v6 = vmax.f32 %v9342_v48, %v732_v21  ;;  %v734_v18 = vpop.f32.mrb[69].mxu0  ;;  %v1000_v19 = vpop.f32.mrb[69].mxu1  ;;  %v3758_v48 = vld [vmem:[%s9317_s3 + $0x210] sm:$0xff] }
 0x1a0   :  { %5759 = vmatpush3.bf16.msra.mxu0 %v5758_v8  ;;  %5786 = vmatpush3.bf16.msra.mxu1 %v5785_v1  ;;  %v3774_v8 = vld [vmem:[%s9317_s3 + $0x290] sm:$0xff]  ;;  %v9344_v1 = vmax.f32 %v7431_v34, %v7433_v32  ;;  %v1136_v18 = vmax.f32 %v1111_v59, 0.0  ;;  %v3759_v34 = vld [vmem:[%s9317_s3 + $0x218] sm:$0xff]  ;;  %v3776_v32 = vld [vmem:[%s9317_s3 + $0x2a0] sm:$0xff] }
 0x1a1   :  { %v1086_v28 = vmax.f32 %v7725_v6, %v7720_v53  ;;  %5760 = vmatprep.subr.bf16.mxu0 %v9335_v57  ;;  %5811 = vmatprep.subr.bf16.mxu1 %v9335_v57  ;;  %v5815_v21 = vpack.c.bf16 %v3775_v47, %v3774_v8  ;;  %v5791_v8 = vpack.c.bf16 %v3759_v34, %v3758_v48 }
 0x1a2   :  { %v737_v11 = vpop.f32.mrb[70].mxu0  ;;  %v7747_v31 = vpop.f32.mrb[70].mxu1 }
 0x1a3   :  { %v7752_v43 = vmax.f32 %v9344_v1, %v737_v11  ;;  %4692 = vmatmul.mubr.f32.vlgmr.msra.gmra.mrb[102].mxu1 %v1137_v23  ;;  %v739_v24 = vpop.f32.mrb[71].mxu0  ;;  %v1005_v3 = vpop.f32.mrb[71].mxu1  ;;  %v3777_v23 = vld [vmem:[%s9317_s3 + $0x2a8] sm:$0xff]  ;;  %v3760_v11 = vld [vmem:[%s9317_s3 + $0x220] sm:$0xff] }
 0x1a4   :  { %5762 = vmatpush3.bf16.msra.mxu0 %v5761_v61  ;;  %5813 = vmatpush3.bf16.msra.mxu1 %v5812_v25  ;;  %v5818_v47 = vpack.c.bf16 %v3777_v23, %v3776_v32  ;;  %v3779_v24 = vld [vmem:[%s9317_s3 + $0x2b8] sm:$0xff]  ;;  %v5794_v32 = vpack.c.bf16 %v3761_v35, %v3760_v11 }
 0x1a5   :  { %v1087_v19 = vmax.f32 %v7752_v43, %v7747_v31  ;;  %5787 = vmatprep.subr.bf16.mxu0 %v9335_v57  ;;  %5814 = vmatprep.subr.bf16.mxu1 %v9335_v57  ;;  %v5821_v23 = vpack.c.bf16 %v3779_v24, %v3778_v40 }
 0x1a6   :  { %v742_v61 = vpop.f32.mrb[72].mxu0  ;;  %v7770_v25 = vpop.f32.mrb[72].mxu1  ;;  %4761 = vmatprep.mubr.msk.f32.mxu1 %vm6345_vm0, %v9334_v37 }
 0x1a7   :  { %v7777_v52 = vmax.f32 %v9345_v13, %v742_v61  ;;  %4657 = vmatmul.mubr.f32.vlgmr.msra.gmra.mrb[102].mxu0 %v1136_v18  ;;  %v744_v59 = vpop.f32.mrb[73].mxu0  ;;  %v1010_v30 = vpop.f32.mrb[73].mxu1  ;;  %v3762_v61 = vld [vmem:[%s9317_s3 + $0x230] sm:$0xff] }
 0x1a8   :  { %5789 = vmatpush3.bf16.msra.mxu0 %v5788_v26  ;;  %5816 = vmatpush3.bf16.msra.mxu1 %v5815_v21  ;;  %v9346_v21 = vmax.f32 %v7443_v45, %v7445_v46  ;;  %v3763_v45 = vld [vmem:[%s9317_s3 + $0x238] sm:$0xff]  ;;  %v3780_v46 = vld [vmem:[%s9317_s3 + $0x2c0] sm:$0xff]  ;;  %v3781_v59 = vld [vmem:[%s9317_s3 + $0x2c8] sm:$0xff] }
 0x1a9   :  { %v1088_v1 = vmax.f32 %v7777_v52, %v7770_v25  ;;  %5790 = vmatprep.subr.bf16.mxu0 %v9335_v57  ;;  %5817 = vmatprep.subr.bf16.mxu1 %v9335_v57  ;;  %v5797_v24 = vpack.c.bf16 %v3763_v45, %v3762_v61  ;;  %v9348_v61 = vmax.f32 %v7455_v5, %v7457_v7  ;;  %v3767_v5 = vld [vmem:[%s9317_s3 + $0x258] sm:$0xff]  ;;  %v3784_v7 = vld [vmem:[%s9317_s3 + $0x2e0] sm:$0xff] }
 0x1aa   :  { %v747_v3 = vpop.f32.mrb[74].mxu0  ;;  %v7795_v26 = vpop.f32.mrb[74].mxu1  ;;  %4726 = vmatprep.mubr.msk.f32.mxu0 %vm6345_vm0, %v9334_v37 }
 0x1ab   :  { %v7802_v48 = vmax.f32 %v9346_v21, %v747_v3  ;;  %v749_v18 = vpop.f32.mrb[75].mxu0  ;;  %v1015_v34 = vpop.f32.mrb[75].mxu1  ;;  %v5824_v3 = vpack.c.bf16 %v3781_v59, %v3780_v46  ;;  %v3764_v21 = vld [vmem:[%s9317_s3 + $0x240] sm:$0xff] }
 0x1ac   :  { %5792 = vmatpush3.bf16.msra.mxu0 %v5791_v8  ;;  %5819 = vmatpush3.bf16.msra.mxu1 %v5818_v47  ;;  %v9347_v47 = vmax.f32 %v7449_v56, %v7451_v50  ;;  %v3765_v56 = vld [vmem:[%s9317_s3 + $0x248] sm:$0xff]  ;;  %v3782_v50 = vld [vmem:[%s9317_s3 + $0x2d0] sm:$0xff]  ;;  %v3783_v34 = vld [vmem:[%s9317_s3 + $0x2d8] sm:$0xff] }
 0x1ad   :  { %5793 = vmatprep.subr.bf16.mxu0 %v9335_v57  ;;  %5820 = vmatprep.subr.bf16.mxu1 %v9335_v57 }
 0x1ae   :  { %v752_v30 = vpop.f32.mrb[76].mxu0  ;;  %v7820_v8 = vpop.f32.mrb[76].mxu1 }
 0x1af   :  { %v7825_v11 = vmax.f32 %v9347_v47, %v752_v30  ;;  %v754_v35 = vpop.f32.mrb[77].mxu0  ;;  %v1020_v40 = vpop.f32.mrb[77].mxu1  ;;  %v5800_v30 = vpack.c.bf16 %v3765_v56, %v3764_v21  ;;  %v5827_v47 = vpack.c.bf16 %v3783_v34, %v3782_v50  ;;  %v9349_v56 = vmax.f32 %v7461_v17, %v7463_v20  ;;  %v3769_v17 = vld [vmem:[%s9317_s3 + $0x268] sm:$0xff]  ;;  %v3786_v20 = vld [vmem:[%s9317_s3 + $0x2f0] sm:$0xff] }
 0x1b0   :  { %5795 = vmatpush3.bf16.msra.mxu0 %v5794_v32  ;;  %5822 = vmatpush3.bf16.msra.mxu1 %v5821_v23  ;;  %v3766_v35 = vld [vmem:[%s9317_s3 + $0x250] sm:$0xff]  ;;  %v9351_v40 = vmax.f32 %v7629_v62, %v7624_v41  ;;  %v3805_v41 = vld [vmem:[%s9317_s3 + $0x388] sm:$0xff] }
 0x1b1   :  { %v1090_v18 = vmax.f32 %v7825_v11, %v7820_v8  ;;  %5796 = vmatprep.subr.bf16.mxu0 %v9335_v57  ;;  %5823 = vmatprep.subr.bf16.mxu1 %v9335_v57 }
 0x1b2   :  { %v757_v32 = vpop.f32.mrb[78].mxu0  ;;  %v7843_v23 = vpop.f32.mrb[78].mxu1  ;;  %v1114_v13 = vadd.f32 %v7527_v16, %v9351_v40 }
 0x1b3   :  { %v7848_v45 = vmax.f32 %v9348_v61, %v757_v32  ;;  %v759_v46 = vpop.f32.mrb[79].mxu0  ;;  %v1025_v59 = vpop.f32.mrb[79].mxu1  ;;  %v5803_v61 = vpack.c.bf16 %v3767_v5, %v3766_v35  ;;  %v9350_v5 = vmax.f32 %v7467_v29, %v7469_v33  ;;  %v3771_v33 = vld [vmem:[%s9317_s3 + $0x278] sm:$0xff] }
 0x1b4   :  { %5798 = vmatpush3.bf16.msra.mxu0 %v5797_v24  ;;  %5825 = vmatpush3.bf16.msra.mxu1 %v5824_v3  ;;  %v3785_v24 = vld [vmem:[%s9317_s3 + $0x2e8] sm:$0xff]  ;;  %v3768_v59 = vld [vmem:[%s9317_s3 + $0x260] sm:$0xff]  ;;  %v1139_v29 = vmax.f32 %v1114_v13, 0.0 }
 0x1b5   :  { %5799 = vmatprep.subr.bf16.mxu0 %v9335_v57  ;;  %5826 = vmatprep.subr.bf16.mxu1 %v9335_v57  ;;  %v5830_v46 = vpack.c.bf16 %v3785_v24, %v3784_v7 }
 0x1b6   :  { %v762_v3 = vpop.f32.mrb[80].mxu0  ;;  %v7866_v21 = vpop.f32.mrb[80].mxu1 }
 0x1b7   :  { %v7871_v50 = vmax.f32 %v9349_v56, %v762_v3  ;;  %v764_v34 = vpop.f32.mrb[81].mxu0  ;;  %v1030_v32 = vpop.f32.mrb[81].mxu1  ;;  %v5806_v56 = vpack.c.bf16 %v3769_v17, %v3768_v59 }
 0x1b8   :  { %5801 = vmatpush3.bf16.msra.mxu0 %v5800_v30  ;;  %5828 = vmatpush3.bf16.msra.mxu1 %v5827_v47  ;;  %v3787_v30 = vld [vmem:[%s9317_s3 + $0x2f8] sm:$0xff]  ;;  %v3770_v32 = vld [vmem:[%s9317_s3 + $0x270] sm:$0xff] }
 0x1b9   :  { %5802 = vmatprep.subr.bf16.mxu0 %v9335_v57  ;;  %5829 = vmatprep.subr.bf16.mxu1 %v9335_v57  ;;  %v5833_v34 = vpack.c.bf16 %v3787_v30, %v3786_v20  ;;  %v5809_v30 = vpack.c.bf16 %v3771_v33, %v3770_v32 }
 0x1ba   :  { %v767_v47 = vpop.f32.mrb[82].mxu0  ;;  %v7889_v35 = vpop.f32.mrb[82].mxu1 }
 0x1bb   :  { %v7894_v7 = vmax.f32 %v9350_v5, %v767_v47  ;;  %v769_v24 = vpop.f32.mrb[83].mxu0  ;;  %v1035_v3 = vpop.f32.mrb[83].mxu1  ;;  %v3788_v5 = vld [vmem:[%s9317_s3 + $0x300] sm:$0xff] }
 0x1bc   :  { %5804 = vmatpush3.bf16.msra.mxu0 %v5803_v61  ;;  %5831 = vmatpush3.bf16.msra.mxu1 %v5830_v46  ;;  %v3804_v61 = vld [vmem:[%s9317_s3 + $0x380] sm:$0xff]  ;;  %v9352_v46 = vmax.f32 %v7473_v38, %v7475_v51  ;;  %v9353_v24 = vmax.f32 %v7606_v58, %v7599_v49  ;;  %v3789_v51 = vld [vmem:[%s9317_s3 + $0x308] sm:$0xff]  ;;  %v3807_v49 = vld [vmem:[%s9317_s3 + $0x398] sm:$0xff] }
 0x1bd   :  { %5805 = vmatprep.subr.bf16.mxu0 %v9335_v57  ;;  %5832 = vmatprep.subr.bf16.mxu1 %v9335_v57  ;;  %v5860_v47 = vpack.c.bf16 %v3805_v41, %v3804_v61  ;;  %v5836_v41 = vpack.c.bf16 %v3789_v51, %v3788_v5  ;;  %v9355_v5 = vmax.f32 %v7485_v39, %v7487_v42  ;;  %v3793_v39 = vld [vmem:[%s9317_s3 + $0x328] sm:$0xff]  ;;  %v3810_v42 = vld [vmem:[%s9317_s3 + $0x3b0] sm:$0xff] }
 0x1be   :  { %v772_v62 = vpop.f32.mrb[84].mxu0  ;;  %v7916_v40 = vpop.f32.mrb[84].mxu1  ;;  %v1113_v3 = vadd.f32 %v7527_v16, %v9353_v24 }
 0x1bf   :  { %v7921_v59 = vmax.f32 %v9352_v46, %v772_v62  ;;  %v774_v17 = vpop.f32.mrb[85].mxu0  ;;  %v1040_v20 = vpop.f32.mrb[85].mxu1  ;;  %v3790_v46 = vld [vmem:[%s9317_s3 + $0x310] sm:$0xff] }
 0x1c0   :  { %5807 = vmatpush3.bf16.msra.mxu0 %v5806_v56  ;;  %5834 = vmatpush3.bf16.msra.mxu1 %v5833_v34  ;;  %v3806_v56 = vld [vmem:[%s9317_s3 + $0x390] sm:$0xff]  ;;  %v9354_v34 = vmax.f32 %v7479_v10, %v7481_v15  ;;  %v1138_v17 = vmax.f32 %v1113_v3, 0.0  ;;  %v3791_v10 = vld [vmem:[%s9317_s3 + $0x318] sm:$0xff]  ;;  %v3808_v15 = vld [vmem:[%s9317_s3 + $0x3a0] sm:$0xff] }
 0x1c1   :  { %v1094_v38 = vmax.f32 %v7921_v59, %v7916_v40  ;;  %5808 = vmatprep.subr.bf16.mxu0 %v9335_v57  ;;  %5859 = vmatprep.subr.bf16.mxu1 %v9335_v57  ;;  %v5863_v62 = vpack.c.bf16 %v3807_v49, %v3806_v56  ;;  %v5839_v56 = vpack.c.bf16 %v3791_v10, %v3790_v46 }
 0x1c2   :  { %v777_v58 = vpop.f32.mrb[86].mxu0  ;;  %v7943_v13 = vpop.f32.mrb[86].mxu1 }
 0x1c3   :  { %v7948_v32 = vmax.f32 %v9354_v34, %v777_v58  ;;  %4762 = vmatmul.mubr.f32.vlgmr.msra.gmra.mrb[104].mxu1 %v1139_v29  ;;  %v779_v33 = vpop.f32.mrb[87].mxu0  ;;  %v1045_v61 = vpop.f32.mrb[87].mxu1  ;;  %v3809_v29 = vld [vmem:[%s9317_s3 + $0x3a8] sm:$0xff]  ;;  %v3792_v58 = vld [vmem:[%s9317_s3 + $0x320] sm:$0xff] }
 0x1c4   :  { %5810 = vmatpush3.bf16.msra.mxu0 %v5809_v30  ;;  %5861 = vmatpush3.bf16.msra.mxu1 %v5860_v47  ;;  %v5866_v49 = vpack.c.bf16 %v3809_v29, %v3808_v15  ;;  %v3811_v33 = vld [vmem:[%s9317_s3 + $0x3b8] sm:$0xff]  ;;  %v5842_v15 = vpack.c.bf16 %v3793_v39, %v3792_v58 }
 0x1c5   :  { %5835 = vmatprep.subr.bf16.mxu0 %v9335_v57  ;;  %5862 = vmatprep.subr.bf16.mxu1 %v9335_v57  ;;  %v5869_v29 = vpack.c.bf16 %v3811_v33, %v3810_v42 }
 0x1c6   :  { %v782_v30 = vpop.f32.mrb[88].mxu0  ;;  %v7966_v47 = vpop.f32.mrb[88].mxu1  ;;  %4831 = vmatprep.mubr.msk.f32.mxu1 %vm6345_vm0, %v9334_v37 }
 0x1c7   :  { %v7973_v24 = vmax.f32 %v9355_v5, %v782_v30  ;;  %4727 = vmatmul.mubr.f32.vlgmr.msra.gmra.mrb[104].mxu0 %v1138_v17  ;;  %v784_v3 = vpop.f32.mrb[89].mxu0  ;;  %v1050_v51 = vpop.f32.mrb[89].mxu1  ;;  %v3794_v30 = vld [vmem:[%s9317_s3 + $0x330] sm:$0xff] }
 0x1c8   :  { %5837 = vmatpush3.bf16.msra.mxu0 %v5836_v41  ;;  %5864 = vmatpush3.bf16.msra.mxu1 %v5863_v62  ;;  %v9356_v62 = vmax.f32 %v7491_v60, %v7493_v2  ;;  %v3795_v60 = vld [vmem:[%s9317_s3 + $0x338] sm:$0xff]  ;;  %v3812_v2 = vld [vmem:[%s9317_s3 + $0x3c0] sm:$0xff]  ;;  %v3813_v3 = vld [vmem:[%s9317_s3 + $0x3c8] sm:$0xff] }
 0x1c9   :  { %v1096_v34 = vmax.f32 %v7973_v24, %v7966_v47  ;;  %5838 = vmatprep.subr.bf16.mxu0 %v9335_v57  ;;  %5865 = vmatprep.subr.bf16.mxu1 %v9335_v57  ;;  %v5845_v33 = vpack.c.bf16 %v3795_v60, %v3794_v30  ;;  %v9358_v30 = vmax.f32 %v7503_v55, %v7505_v12  ;;  %v3799_v55 = vld [vmem:[%s9317_s3 + $0x358] sm:$0xff]  ;;  %v3816_v12 = vld [vmem:[%s9317_s3 + $0x3e0] sm:$0xff]  ;;  %v3802_v5 = vld [vmem:[%s9317_s3 + $0x370] sm:$0xff] }
 0x1ca   :  { %v787_v61 = vpop.f32.mrb[90].mxu0  ;;  %v7991_v41 = vpop.f32.mrb[90].mxu1  ;;  %4796 = vmatprep.mubr.msk.f32.mxu0 %vm6345_vm0, %v9334_v37 }
 0x1cb   :  { %v7998_v46 = vmax.f32 %v9356_v62, %v787_v61  ;;  %v789_v17 = vpop.f32.mrb[91].mxu0  ;;  %v1055_v10 = vpop.f32.mrb[91].mxu1  ;;  %v5872_v61 = vpack.c.bf16 %v3813_v3, %v3812_v2  ;;  %v3796_v62 = vld [vmem:[%s9317_s3 + $0x340] sm:$0xff] }
 0x1cc   :  { %5840 = vmatpush3.bf16.msra.mxu0 %v5839_v56  ;;  %5867 = vmatpush3.bf16.msra.mxu1 %v5866_v49  ;;  %v9357_v49 = vmax.f32 %v7497_v27, %v7499_v36  ;;  %v3797_v27 = vld [vmem:[%s9317_s3 + $0x348] sm:$0xff]  ;;  %v3814_v36 = vld [vmem:[%s9317_s3 + $0x3d0] sm:$0xff]  ;;  %v3815_v10 = vld [vmem:[%s9317_s3 + $0x3d8] sm:$0xff]  ;;  %v9363_v17 = vmax.f32 %v7675_v9, %v7670_v63 }
 0x1cd   :  { %5841 = vmatprep.subr.bf16.mxu0 %v9335_v57  ;;  %5868 = vmatprep.subr.bf16.mxu1 %v9335_v57  ;;  %v3837_v63 = vld [vmem:[%s9317_s3 + $0x488] sm:$0xff] }
 0x1ce   :  { %v792_v51 = vpop.f32.mrb[92].mxu0  ;;  %v8016_v56 = vpop.f32.mrb[92].mxu1  ;;  %v1116_v20 = vadd.f32 %v7527_v16, %v9363_v17 }
 0x1cf   :  { %v8021_v58 = vmax.f32 %v9357_v49, %v792_v51  ;;  %v794_v39 = vpop.f32.mrb[93].mxu0  ;;  %v1060_v42 = vpop.f32.mrb[93].mxu1  ;;  %v5848_v51 = vpack.c.bf16 %v3797_v27, %v3796_v62  ;;  %v5875_v49 = vpack.c.bf16 %v3815_v10, %v3814_v36  ;;  %v9359_v27 = vmax.f32 %v7509_v22, %v7511_v44  ;;  %v3801_v22 = vld [vmem:[%s9317_s3 + $0x368] sm:$0xff]  ;;  %v3818_v44 = vld [vmem:[%s9317_s3 + $0x3f0] sm:$0xff] }
 0x1d0   :  { %5843 = vmatpush3.bf16.msra.mxu0 %v5842_v15  ;;  %5870 = vmatpush3.bf16.msra.mxu1 %v5869_v29  ;;  %v3798_v39 = vld [vmem:[%s9317_s3 + $0x350] sm:$0xff] }
 0x1d1   :  { %5844 = vmatprep.subr.bf16.mxu0 %v9335_v57  ;;  %5871 = vmatprep.subr.bf16.mxu1 %v9335_v57 }
 0x1d2   :  { %v797_v15 = vpop.f32.mrb[94].mxu0  ;;  %v8039_v29 = vpop.f32.mrb[94].mxu1 }
 0x1d3   :  { %v8044_v60 = vmax.f32 %v9358_v30, %v797_v15  ;;  %v799_v2 = vpop.f32.mrb[95].mxu0  ;;  %v1065_v3 = vpop.f32.mrb[95].mxu1  ;;  %v5851_v30 = vpack.c.bf16 %v3799_v55, %v3798_v39  ;;  %v9360_v55 = vld [vmem:[#allocation2_spill] sm:$0xff] }
 0x1d4   :  { %5846 = vmatpush3.bf16.msra.mxu0 %v5845_v33  ;;  %5873 = vmatpush3.bf16.msra.mxu1 %v5872_v61  ;;  %v3817_v33 = vld [vmem:[%s9317_s3 + $0x3e8] sm:$0xff]  ;;  %v3800_v3 = vld [vmem:[%s9317_s3 + $0x360] sm:$0xff] }
 0x1d5   :  { %5847 = vmatprep.subr.bf16.mxu0 %v9335_v57  ;;  %5874 = vmatprep.subr.bf16.mxu1 %v9335_v57  ;;  %v5878_v2 = vpack.c.bf16 %v3817_v33, %v3816_v12  ;;  %v9361_v12 = vld [vmem:[#allocation3_spill] sm:$0xff] }
 0x1d6   :  { %v802_v61 = vpop.f32.mrb[96].mxu0  ;;  %v8062_v62 = vpop.f32.mrb[96].mxu1  ;;  %v9362_v33 = vmax.f32 %v9360_v55, %v9361_v12 }
 0x1d7   :  { %v8067_v36 = vmax.f32 %v9359_v27, %v802_v61  ;;  %v804_v10 = vpop.f32.mrb[97].mxu0  ;;  %v1070_v15 = vpop.f32.mrb[97].mxu1 }
 0x1d8   :  { %5849 = vmatpush3.bf16.msra.mxu0 %v5848_v51  ;;  %5876 = vmatpush3.bf16.msra.mxu1 %v5875_v49  ;;  %v3819_v51 = vld [vmem:[%s9317_s3 + $0x3f8] sm:$0xff]  ;;  %v5854_v15 = vpack.c.bf16 %v3801_v22, %v3800_v3  ;;  %v3820_v3 = vld [vmem:[%s9317_s3 + $0x400] sm:$0xff]  ;;  %v9364_v22 = vmax.f32 %v7652_v4, %v7647_v54 }
 0x1d9   :  { %5850 = vmatprep.subr.bf16.mxu0 %v9335_v57  ;;  %5877 = vmatprep.subr.bf16.mxu1 %v9335_v57  ;;  %v5881_v42 = vpack.c.bf16 %v3819_v51, %v3818_v44  ;;  %v1141_v51 = vmax.f32 %v1116_v20, 0.0  ;;  %v3822_v20 = vld [vmem:[%s9317_s3 + $0x410] sm:$0xff] }
 0x1da   :  { %v807_v49 = vpop.f32.mrb[98].mxu0  ;;  %v8085_v39 = vpop.f32.mrb[98].mxu1  ;;  %v1115_v44 = vadd.f32 %v7527_v16, %v9364_v22 }
 0x1db   :  { %v8090_v61 = vmax.f32 %v9362_v33, %v807_v49  ;;  %v1075_v27 = vpop.f32.mrb[99].mxu1  ;;  %v809_v10 = vpop.f32.mrb[99].mxu0  ;;  %v3839_v49 = vld [vmem:[%s9317_s3 + $0x498] sm:$0xff] }
 0x1dc   :  { %5852 = vmatpush3.bf16.msra.mxu0 %v5851_v30  ;;  %5879 = vmatpush3.bf16.msra.mxu1 %v5878_v2  ;;  %v3803_v30 = vld [vmem:[%s9317_s3 + $0x378] sm:$0xff]  ;;  %v3836_v2 = vld [vmem:[%s9317_s3 + $0x480] sm:$0xff]  ;;  %v1140_v12 = vmax.f32 %v1115_v44, 0.0  ;;  %v3841_v10 = vld [vmem:[%s9317_s3 + $0x4a8] sm:$0xff] }
 0x1dd   :  { %v1101_v55 = vmax.f32 %v8090_v61, %v8085_v39  ;;  %5853 = vmatprep.subr.bf16.mxu0 %v9335_v57  ;;  %5880 = vmatprep.subr.bf16.mxu1 %v9335_v57  ;;  %v5857_v9 = vpack.c.bf16 %v3803_v30, %v3802_v5  ;;  %v5908_v17 = vpack.c.bf16 %v3837_v63, %v3836_v2  ;;  %v3838_v5 = vld [vmem:[%s9317_s3 + $0x490] sm:$0xff]  ;;  %v3823_v33 = vld [vmem:[%s9317_s3 + $0x418] sm:$0xff]  ;;  %v3840_v27 = vld [vmem:[%s9317_s3 + $0x4a0] sm:$0xff] }
 0x1de   :  { %v5911_v4 = vpack.c.bf16 %v3839_v49, %v3838_v5  ;;  %v5914_v30 = vpack.c.bf16 %v3841_v10, %v3840_v27  ;;  %v3824_v2 = vld [vmem:[%s9317_s3 + $0x420] sm:$0xff]  ;;  %v3825_v63 = vld [vmem:[%s9317_s3 + $0x428] sm:$0xff]  ;;  %v3826_v44 = vld [vmem:[%s9317_s3 + $0x430] sm:$0xff] }
 0x1df   :  { %v3845_v5 = vld [vmem:[%s9317_s3 + $0x4c8] sm:$0xff] }
 0x1e0   :  { %5855 = vmatpush3.bf16.msra.mxu0 %v5854_v15  ;;  %5882 = vmatpush3.bf16.msra.mxu1 %v5881_v42  ;;  %v3821_v42 = vld [vmem:[%s9317_s3 + $0x408] sm:$0xff]  ;;  %v5887_v15 = vpack.c.bf16 %v3823_v33, %v3822_v20  ;;  %v3847_v33 = vld [vmem:[%s9317_s3 + $0x4d8] sm:$0xff] }
 0x1e1   :  { %5856 = vmatprep.subr.bf16.mxu0 %v9335_v57  ;;  %5907 = vmatprep.subr.bf16.mxu1 %v9335_v57  ;;  %v5884_v54 = vpack.c.bf16 %v3821_v42, %v3820_v3  ;;  %v5890_v3 = vpack.c.bf16 %v3825_v63, %v3824_v2  ;;  %v3844_v42 = vld [vmem:[%s9317_s3 + $0x4c0] sm:$0xff]  ;;  %v3829_v20 = vld [vmem:[%s9317_s3 + $0x448] sm:$0xff] }
 0x1e2   :  { %v3848_v2 = vld [vmem:[%s9317_s3 + $0x4e0] sm:$0xff]  ;;  %v3849_v63 = vld [vmem:[%s9317_s3 + $0x4e8] sm:$0xff] }
 0x1e3   :  { %4832 = vmatmul.mubr.f32.vlgmr.msra.gmra.mrb[106].mxu1 %v1141_v51  ;;  %v3827_v51 = vld [vmem:[%s9317_s3 + $0x438] sm:$0xff] }
 0x1e4   :  { %5858 = vmatpush3.bf16.msra.mxu0 %v5857_v9  ;;  %5909 = vmatpush3.bf16.msra.mxu1 %v5908_v17  ;;  %v3842_v9 = vld [vmem:[%s9317_s3 + $0x4b0] sm:$0xff]  ;;  %v3843_v17 = vld [vmem:[%s9317_s3 + $0x4b8] sm:$0xff]  ;;  %v5893_v49 = vpack.c.bf16 %v3827_v51, %v3826_v44 }
 0x1e5   :  { %5883 = vmatprep.subr.bf16.mxu0 %v9335_v57  ;;  %5910 = vmatprep.subr.bf16.mxu1 %v9335_v57  ;;  %v5917_v22 = vpack.c.bf16 %v3843_v17, %v3842_v9  ;;  %v5926_v17 = vpack.c.bf16 %v3849_v63, %v3848_v2  ;;  %v3850_v44 = vld [vmem:[%s9317_s3 + $0x4f0] sm:$0xff]  ;;  %v3851_v51 = vld [vmem:[%s9317_s3 + $0x4f8] sm:$0xff] }
 0x1e6   :  { %4901 = vmatprep.mubr.msk.f32.mxu1 %vm6345_vm0, %v9334_v37  ;;  %v3871_v2 = vld [vmem:[%s9317_s3 + $0x598] sm:$0xff] }
 0x1e7   :  { %4797 = vmatmul.mubr.f32.vlgmr.msra.gmra.mrb[106].mxu0 %v1140_v12  ;;  %v3846_v12 = vld [vmem:[%s9317_s3 + $0x4d0] sm:$0xff] }
 0x1e8   :  { %5885 = vmatpush3.bf16.msra.mxu0 %v5884_v54  ;;  %5912 = vmatpush3.bf16.msra.mxu1 %v5911_v4  ;;  %v5920_v54 = vpack.c.bf16 %v3845_v5, %v3844_v42  ;;  %v3828_v4 = vld [vmem:[%s9317_s3 + $0x440] sm:$0xff]  ;;  %v5923_v10 = vpack.c.bf16 %v3847_v33, %v3846_v12  ;;  %v5929_v5 = vpack.c.bf16 %v3851_v51, %v3850_v44  ;;  %v3869_v12 = vld [vmem:[%s9317_s3 + $0x588] sm:$0xff] }
 0x1e9   :  { %5886 = vmatprep.subr.bf16.mxu0 %v9335_v57  ;;  %5913 = vmatprep.subr.bf16.mxu1 %v9335_v57  ;;  %v5896_v27 = vpack.c.bf16 %v3829_v20, %v3828_v4  ;;  %v3835_v4 = vld [vmem:[%s9317_s3 + $0x478] sm:$0xff]  ;;  %v3868_v20 = vld [vmem:[%s9317_s3 + $0x580] sm:$0xff]  ;;  %v9365_v33 = vmax.f32 %v7698_v14, %v7693_v0  ;;  %v3854_v14 = vld [vmem:[%s9317_s3 + $0x510] sm:$0xff] }
 0x1ea   :  { %4866 = vmatprep.mubr.msk.f32.mxu0 %vm6345_vm0, %v9334_v37  ;;  %v5956_v6 = vpack.c.bf16 %v3869_v12, %v3868_v20  ;;  %v3856_v51 = vld [vmem:[%s9317_s3 + $0x520] sm:$0xff]  ;;  %v3858_v20 = vld [vmem:[%s9317_s3 + $0x530] sm:$0xff]  ;;  %v3859_v12 = vld [vmem:[%s9317_s3 + $0x538] sm:$0xff] }
 0x1ec   :  { %5888 = vmatpush3.bf16.msra.mxu0 %v5887_v15  ;;  %5915 = vmatpush3.bf16.msra.mxu1 %v5914_v30  ;;  %v3830_v15 = vld [vmem:[%s9317_s3 + $0x450] sm:$0xff]  ;;  %v3831_v30 = vld [vmem:[%s9317_s3 + $0x458] sm:$0xff] }
 0x1ed   :  { %5889 = vmatprep.subr.bf16.mxu0 %v9335_v57  ;;  %5916 = vmatprep.subr.bf16.mxu1 %v9335_v57  ;;  %v5899_v9 = vpack.c.bf16 %v3831_v30, %v3830_v15  ;;  %v3853_v15 = vld [vmem:[%s9317_s3 + $0x508] sm:$0xff]  ;;  %v3870_v30 = vld [vmem:[%s9317_s3 + $0x590] sm:$0xff] }
 0x1ee   :  { %v5959_v0 = vpack.c.bf16 %v3871_v2, %v3870_v30  ;;  %v3879_v30 = vld [vmem:[%s9317_s3 + $0x5d8] sm:$0xff] }
 0x1f0   :  { %5891 = vmatpush3.bf16.msra.mxu0 %v5890_v3  ;;  %5918 = vmatpush3.bf16.msra.mxu1 %v5917_v22  ;;  %v3832_v3 = vld [vmem:[%s9317_s3 + $0x460] sm:$0xff]  ;;  %v3833_v22 = vld [vmem:[%s9317_s3 + $0x468] sm:$0xff] }
 0x1f1   :  { %5892 = vmatprep.subr.bf16.mxu0 %v9335_v57  ;;  %5919 = vmatprep.subr.bf16.mxu1 %v9335_v57  ;;  %v5902_v42 = vpack.c.bf16 %v3833_v22, %v3832_v3  ;;  %v3873_v3 = vld [vmem:[%s9317_s3 + $0x5a8] sm:$0xff] }
 0x1f4   :  { %5894 = vmatpush3.bf16.msra.mxu0 %v5893_v49  ;;  %5921 = vmatpush3.bf16.msra.mxu1 %v5920_v54  ;;  %v3834_v49 = vld [vmem:[%s9317_s3 + $0x470] sm:$0xff]  ;;  %v1118_v54 = vadd.f32 %v7527_v16, %v1086_v28  ;;  %v3852_v28 = vld [vmem:[%s9317_s3 + $0x500] sm:$0xff] }
 0x1f5   :  { %5895 = vmatprep.subr.bf16.mxu0 %v9335_v57  ;;  %5922 = vmatprep.subr.bf16.mxu1 %v9335_v57  ;;  %v5905_v53 = vpack.c.bf16 %v3835_v4, %v3834_v49  ;;  %v3875_v49 = vld [vmem:[%s9317_s3 + $0x5b8] sm:$0xff] }
 0x1f8   :  { %5897 = vmatpush3.bf16.msra.mxu0 %v5896_v27  ;;  %5924 = vmatpush3.bf16.msra.mxu1 %v5923_v10  ;;  %v1117_v27 = vadd.f32 %v7527_v16, %v9365_v33  ;;  %v1143_v10 = vmax.f32 %v1118_v54, 0.0  ;;  %v5932_v16 = vpack.c.bf16 %v3853_v15, %v3852_v28  ;;  %v5941_v28 = vpack.c.bf16 %v3859_v12, %v3858_v20  ;;  %v3878_v15 = vld [vmem:[%s9317_s3 + $0x5d0] sm:$0xff]  ;;  %v3867_v12 = vld [vmem:[%s9317_s3 + $0x578] sm:$0xff] }
 0x1f9   :  { %5898 = vmatprep.subr.bf16.mxu0 %v9335_v57  ;;  %5925 = vmatprep.subr.bf16.mxu1 %v9335_v57 }
 0x1fa   :  { %v1142_v63 = vmax.f32 %v1117_v27, 0.0  ;;  %v3860_v27 = vld [vmem:[%s9317_s3 + $0x540] sm:$0xff] }
 0x1fc   :  { %5900 = vmatpush3.bf16.msra.mxu0 %v5899_v9  ;;  %5927 = vmatpush3.bf16.msra.mxu1 %v5926_v17  ;;  %v3855_v9 = vld [vmem:[%s9317_s3 + $0x518] sm:$0xff]  ;;  %v3872_v17 = vld [vmem:[%s9317_s3 + $0x5a0] sm:$0xff] }
 0x1fd   :  { %5901 = vmatprep.subr.bf16.mxu0 %v9335_v57  ;;  %5928 = vmatprep.subr.bf16.mxu1 %v9335_v57  ;;  %v5935_v22 = vpack.c.bf16 %v3855_v9, %v3854_v14  ;;  %v5962_v44 = vpack.c.bf16 %v3873_v3, %v3872_v17  ;;  %v3863_v14 = vld [vmem:[%s9317_s3 + $0x558] sm:$0xff]  ;;  %v3881_v9 = vld [vmem:[%s9317_s3 + $0x5e8] sm:$0xff] }
 0x200   :  { %5903 = vmatpush3.bf16.msra.mxu0 %v5902_v42  ;;  %5930 = vmatpush3.bf16.msra.mxu1 %v5929_v5  ;;  %v3857_v42 = vld [vmem:[%s9317_s3 + $0x528] sm:$0xff]  ;;  %v3874_v5 = vld [vmem:[%s9317_s3 + $0x5b0] sm:$0xff] }
 0x201   :  { %5904 = vmatprep.subr.bf16.mxu0 %v9335_v57  ;;  %5955 = vmatprep.subr.bf16.mxu1 %v9335_v57  ;;  %v5938_v54 = vpack.c.bf16 %v3857_v42, %v3856_v51  ;;  %v5965_v4 = vpack.c.bf16 %v3875_v49, %v3874_v5  ;;  %v3882_v51 = vld [vmem:[%s9317_s3 + $0x5f0] sm:$0xff]  ;;  %v3883_v42 = vld [vmem:[%s9317_s3 + $0x5f8] sm:$0xff] }
 0x202   :  { %v5977_v49 = vpack.c.bf16 %v3883_v42, %v3882_v51  ;;  %v3890_v42 = vld [vmem:[%s9317_s3 + $0x630] sm:$0xff] }
 0x203   :  { %4902 = vmatmul.mubr.f32.vlgmr.msra.gmra.mrb[108].mxu1 %v1143_v10  ;;  %v3861_v10 = vld [vmem:[%s9317_s3 + $0x548] sm:$0xff] }
 0x204   :  { %5906 = vmatpush3.bf16.msra.mxu0 %v5905_v53  ;;  %5957 = vmatpush3.bf16.msra.mxu1 %v5956_v6  ;;  %v3876_v53 = vld [vmem:[%s9317_s3 + $0x5c0] sm:$0xff]  ;;  %v3877_v6 = vld [vmem:[%s9317_s3 + $0x5c8] sm:$0xff]  ;;  %v5944_v2 = vpack.c.bf16 %v3861_v10, %v3860_v27  ;;  %v3902_v10 = vld [vmem:[%s9317_s3 + $0x690] sm:$0xff] }
 0x205   :  { %5931 = vmatprep.subr.bf16.mxu0 %v9335_v57  ;;  %5958 = vmatprep.subr.bf16.mxu1 %v9335_v57  ;;  %v5968_v33 = vpack.c.bf16 %v3877_v6, %v3876_v53  ;;  %v3900_v53 = vld [vmem:[%s9317_s3 + $0x680] sm:$0xff]  ;;  %v3901_v6 = vld [vmem:[%s9317_s3 + $0x688] sm:$0xff] }
 0x206   :  { %4971 = vmatprep.mubr.msk.f32.mxu1 %vm6345_vm0, %v9334_v37  ;;  %v6004_v52 = vpack.c.bf16 %v3901_v6, %v3900_v53  ;;  %v3885_v27 = vld [vmem:[%s9317_s3 + $0x608] sm:$0xff]  ;;  %v3892_v53 = vld [vmem:[%s9317_s3 + $0x640] sm:$0xff] }
 0x207   :  { %4867 = vmatmul.mubr.f32.vlgmr.msra.gmra.mrb[108].mxu0 %v1142_v63  ;;  %v3880_v63 = vld [vmem:[%s9317_s3 + $0x5e0] sm:$0xff]  ;;  %v3893_v6 = vld [vmem:[%s9317_s3 + $0x648] sm:$0xff] }
 0x208   :  { %5933 = vmatpush3.bf16.msra.mxu0 %v5932_v16  ;;  %5960 = vmatpush3.bf16.msra.mxu1 %v5959_v0  ;;  %v5971_v16 = vpack.c.bf16 %v3879_v30, %v3878_v15  ;;  %v3862_v0 = vld [vmem:[%s9317_s3 + $0x550] sm:$0xff]  ;;  %v5974_v3 = vpack.c.bf16 %v3881_v9, %v3880_v63  ;;  %v3903_v15 = vld [vmem:[%s9317_s3 + $0x698] sm:$0xff]  ;;  %v3888_v9 = vld [vmem:[%s9317_s3 + $0x620] sm:$0xff] }
 0x209   :  { %5934 = vmatprep.subr.bf16.mxu0 %v9335_v57  ;;  %5961 = vmatprep.subr.bf16.mxu1 %v9335_v57  ;;  %v5947_v17 = vpack.c.bf16 %v3863_v14, %v3862_v0  ;;  %v6007_v43 = vpack.c.bf16 %v3903_v15, %v3902_v10  ;;  %v3905_v0 = vld [vmem:[%s9317_s3 + $0x6a8] sm:$0xff]  ;;  %v3912_v10 = vld [vmem:[%s9317_s3 + $0x6e0] sm:$0xff] }
 0x20a   :  { %4936 = vmatprep.mubr.msk.f32.mxu0 %vm6345_vm0, %v9334_v37  ;;  %v3913_v15 = vld [vmem:[%s9317_s3 + $0x6e8] sm:$0xff] }
 0x20c   :  { %5936 = vmatpush3.bf16.msra.mxu0 %v5935_v22  ;;  %5963 = vmatpush3.bf16.msra.mxu1 %v5962_v44  ;;  %v3864_v22 = vld [vmem:[%s9317_s3 + $0x560] sm:$0xff]  ;;  %v3865_v44 = vld [vmem:[%s9317_s3 + $0x568] sm:$0xff] }
 0x20d   :  { %5937 = vmatprep.subr.bf16.mxu0 %v9335_v57  ;;  %5964 = vmatprep.subr.bf16.mxu1 %v9335_v57  ;;  %v5950_v5 = vpack.c.bf16 %v3865_v44, %v3864_v22  ;;  %v3907_v22 = vld [vmem:[%s9317_s3 + $0x6b8] sm:$0xff] }
 0x210   :  { %5939 = vmatpush3.bf16.msra.mxu0 %v5938_v54  ;;  %5966 = vmatpush3.bf16.msra.mxu1 %v5965_v4  ;;  %v3866_v54 = vld [vmem:[%s9317_s3 + $0x570] sm:$0xff]  ;;  %v8348_v4 = vld [vmem:[%s9318_s2] ss:$0 sm:$0xff] }
 0x211   :  { %5940 = vmatprep.subr.bf16.mxu0 %v9335_v57  ;;  %5967 = vmatprep.subr.bf16.mxu1 %v9335_v57  ;;  %v1120_v20 = vadd.f32 %v8348_v4, %v1088_v1  ;;  %v5953_v25 = vpack.c.bf16 %v3867_v12, %v3866_v54  ;;  %v3884_v1 = vld [vmem:[%s9317_s3 + $0x600] sm:$0xff]  ;;  %v3909_v54 = vld [vmem:[%s9317_s3 + $0x6c8] sm:$0xff] }
 0x212   :  { %v5980_v31 = vpack.c.bf16 %v3885_v27, %v3884_v1  ;;  %v5992_v1 = vpack.c.bf16 %v3893_v6, %v3892_v53  ;;  %v3895_v27 = vld [vmem:[%s9317_s3 + $0x658] sm:$0xff]  ;;  %v3936_v6 = vld [vmem:[%s9317_s3 + $0x7a0] sm:$0xff] }
 0x213   :  { %v3919_v53 = vld [vmem:[%s9317_s3 + $0x718] sm:$0xff] }
 0x214   :  { %5942 = vmatpush3.bf16.msra.mxu0 %v5941_v28  ;;  %5969 = vmatpush3.bf16.msra.mxu1 %v5968_v33  ;;  %v1119_v28 = vadd.f32 %v8348_v4, %v1087_v19  ;;  %v1145_v33 = vmax.f32 %v1120_v20, 0.0  ;;  %v3886_v19 = vld [vmem:[%s9317_s3 + $0x610] sm:$0xff] }
 0x215   :  { %5943 = vmatprep.subr.bf16.mxu0 %v9335_v57  ;;  %5970 = vmatprep.subr.bf16.mxu1 %v9335_v57 }
 0x216   :  { %v1144_v30 = vmax.f32 %v1119_v28, 0.0 }
 0x218   :  { %5945 = vmatpush3.bf16.msra.mxu0 %v5944_v2  ;;  %5972 = vmatpush3.bf16.msra.mxu1 %v5971_v16  ;;  %v3887_v2 = vld [vmem:[%s9317_s3 + $0x618] sm:$0xff]  ;;  %v3904_v16 = vld [vmem:[%s9317_s3 + $0x6a0] sm:$0xff] }
 0x219   :  { %5946 = vmatprep.subr.bf16.mxu0 %v9335_v57  ;;  %5973 = vmatprep.subr.bf16.mxu1 %v9335_v57  ;;  %v5983_v14 = vpack.c.bf16 %v3887_v2, %v3886_v19  ;;  %v6010_v63 = vpack.c.bf16 %v3905_v0, %v3904_v16  ;;  %v3896_v19 = vld [vmem:[%s9317_s3 + $0x660] sm:$0xff]  ;;  %v3914_v2 = vld [vmem:[%s9317_s3 + $0x6f0] sm:$0xff]  ;;  %v3915_v16 = vld [vmem:[%s9317_s3 + $0x6f8] sm:$0xff] }
 0x21c   :  { %5948 = vmatpush3.bf16.msra.mxu0 %v5947_v17  ;;  %5975 = vmatpush3.bf16.msra.mxu1 %v5974_v3  ;;  %v3889_v17 = vld [vmem:[%s9317_s3 + $0x628] sm:$0xff]  ;;  %v3906_v3 = vld [vmem:[%s9317_s3 + $0x6b0] sm:$0xff] }
 0x21d   :  { %5949 = vmatprep.subr.bf16.mxu0 %v9335_v57  ;;  %5976 = vmatprep.subr.bf16.mxu1 %v9335_v57  ;;  %v5986_v44 = vpack.c.bf16 %v3889_v17, %v3888_v9  ;;  %v6013_v51 = vpack.c.bf16 %v3907_v22, %v3906_v3  ;;  %v1122_v9 = vadd.f32 %v8348_v4, %v1090_v18  ;;  %v3899_v17 = vld [vmem:[%s9317_s3 + $0x678] sm:$0xff]  ;;  %v3932_v3 = vld [vmem:[%s9317_s3 + $0x780] sm:$0xff]  ;;  %v3933_v22 = vld [vmem:[%s9317_s3 + $0x788] sm:$0xff] }
 0x21e   :  { %v6052_v11 = vpack.c.bf16 %v3933_v22, %v3932_v3  ;;  %v3916_v18 = vld [vmem:[%s9317_s3 + $0x700] sm:$0xff] }
 0x220   :  { %5951 = vmatpush3.bf16.msra.mxu0 %v5950_v5  ;;  %5978 = vmatpush3.bf16.msra.mxu1 %v5977_v49  ;;  %v3891_v5 = vld [vmem:[%s9317_s3 + $0x638] sm:$0xff]  ;;  %v3908_v49 = vld [vmem:[%s9317_s3 + $0x6c0] sm:$0xff] }
 0x221   :  { %5952 = vmatprep.subr.bf16.mxu0 %v9335_v57  ;;  %6003 = vmatprep.subr.bf16.mxu1 %v9335_v57  ;;  %v5989_v20 = vpack.c.bf16 %v3891_v5, %v3890_v42  ;;  %v6016_v12 = vpack.c.bf16 %v3909_v54, %v3908_v49  ;;  %v1147_v42 = vmax.f32 %v1122_v9, 0.0  ;;  %v3917_v5 = vld [vmem:[%s9317_s3 + $0x708] sm:$0xff]  ;;  %v3934_v49 = vld [vmem:[%s9317_s3 + $0x790] sm:$0xff]  ;;  %v3935_v54 = vld [vmem:[%s9317_s3 + $0x798] sm:$0xff] }
 0x222   :  { %v3942_v9 = vld [vmem:[%s9317_s3 + $0x7d0] sm:$0xff] }
 0x223   :  { %4972 = vmatmul.mubr.f32.vlgmr.msra.gmra.mrb[110].mxu1 %v1145_v33  ;;  %v3894_v33 = vld [vmem:[%s9317_s3 + $0x650] sm:$0xff] }
 0x224   :  { %5954 = vmatpush3.bf16.msra.mxu0 %v5953_v25  ;;  %6005 = vmatpush3.bf16.msra.mxu1 %v6004_v52  ;;  %v3910_v25 = vld [vmem:[%s9317_s3 + $0x6d0] sm:$0xff]  ;;  %v3911_v52 = vld [vmem:[%s9317_s3 + $0x6d8] sm:$0xff] }
 0x225   :  { %5979 = vmatprep.subr.bf16.mxu0 %v9335_v57  ;;  %6006 = vmatprep.subr.bf16.mxu1 %v9335_v57  ;;  %v6019_v28 = vpack.c.bf16 %v3911_v52, %v3910_v25  ;;  %v3937_v25 = vld [vmem:[%s9317_s3 + $0x7a8] sm:$0xff] }
 0x226   :  { %5041 = vmatprep.mubr.msk.f32.mxu1 %vm6345_vm0, %v9334_v37 }
 0x227   :  { %4937 = vmatmul.mubr.f32.vlgmr.msra.gmra.mrb[110].mxu0 %v1144_v30  ;;  %v3897_v30 = vld [vmem:[%s9317_s3 + $0x668] sm:$0xff] }
 0x228   :  { %5981 = vmatpush3.bf16.msra.mxu0 %v5980_v31  ;;  %6008 = vmatpush3.bf16.msra.mxu1 %v6007_v43  ;;  %v5995_v31 = vpack.c.bf16 %v3895_v27, %v3894_v33  ;;  %v6022_v43 = vpack.c.bf16 %v3913_v15, %v3912_v10  ;;  %v5998_v0 = vpack.c.bf16 %v3897_v30, %v3896_v19  ;;  %v3921_v33 = vld [vmem:[%s9317_s3 + $0x728] sm:$0xff]  ;;  %v3938_v27 = vld [vmem:[%s9317_s3 + $0x7b0] sm:$0xff]  ;;  %v3939_v10 = vld [vmem:[%s9317_s3 + $0x7b8] sm:$0xff] }
 0x229   :  { %5982 = vmatprep.subr.bf16.mxu0 %v9335_v57  ;;  %6009 = vmatprep.subr.bf16.mxu1 %v9335_v57  ;;  %v3923_v19 = vld [vmem:[%s9317_s3 + $0x738] sm:$0xff]  ;;  %v3940_v30 = vld [vmem:[%s9317_s3 + $0x7c0] sm:$0xff] }
 0x22a   :  { %5006 = vmatprep.mubr.msk.f32.mxu0 %vm6345_vm0, %v9334_v37 }
 0x22c   :  { %5984 = vmatpush3.bf16.msra.mxu0 %v5983_v14  ;;  %6011 = vmatpush3.bf16.msra.mxu1 %v6010_v63  ;;  %v6025_v14 = vpack.c.bf16 %v3915_v16, %v3914_v2  ;;  %v3898_v63 = vld [vmem:[%s9317_s3 + $0x670] sm:$0xff]  ;;  %v3941_v2 = vld [vmem:[%s9317_s3 + $0x7c8] sm:$0xff] }
 0x22d   :  { %5985 = vmatprep.subr.bf16.mxu0 %v9335_v57  ;;  %6012 = vmatprep.subr.bf16.mxu1 %v9335_v57  ;;  %v6001_v8 = vpack.c.bf16 %v3899_v17, %v3898_v63  ;;  %v3925_v63 = vld [vmem:[%s9317_s3 + $0x748] sm:$0xff]  ;;  %v3943_v17 = vld [vmem:[%s9317_s3 + $0x7d8] sm:$0xff] }
 0x22e   :  { %v6067_v22 = vpack.c.bf16 %v3943_v17, %v3942_v9  ;;  %v3951_v9 = vld [vmem:[%s9317_s3 + $0x818] sm:$0xff]  ;;  %v3968_v17 = vld [vmem:[%s9317_s3 + $0x8a0] sm:$0xff] }
 0x230   :  { %5987 = vmatpush3.bf16.msra.mxu0 %v5986_v44  ;;  %6014 = vmatpush3.bf16.msra.mxu1 %v6013_v51  ;;  %v9366_v44 = vmax.f32 %v7802_v48, %v7795_v26  ;;  %v6028_v26 = vpack.c.bf16 %v3917_v5, %v3916_v18  ;;  %v6055_v48 = vpack.c.bf16 %v3935_v54, %v3934_v49  ;;  %v3944_v18 = vld [vmem:[%s9317_s3 + $0x7e0] sm:$0xff] }
 0x231   :  { %5988 = vmatprep.subr.bf16.mxu0 %v9335_v57  ;;  %6015 = vmatprep.subr.bf16.mxu1 %v9335_v57  ;;  %v3928_v54 = vld [vmem:[%s9317_s3 + $0x760] sm:$0xff] }
 0x232   :  { %v1121_v51 = vadd.f32 %v8348_v4, %v9366_v44  ;;  %v3945_v44 = vld [vmem:[%s9317_s3 + $0x7e8] sm:$0xff] }
 0x233   :  { %v6070_v49 = vpack.c.bf16 %v3945_v44, %v3944_v18  ;;  %v3953_v18 = vld [vmem:[%s9317_s3 + $0x828] sm:$0xff]  ;;  %v3970_v44 = vld [vmem:[%s9317_s3 + $0x8b0] sm:$0xff] }
 0x234   :  { %5990 = vmatpush3.bf16.msra.mxu0 %v5989_v20  ;;  %6017 = vmatpush3.bf16.msra.mxu1 %v6016_v12  ;;  %v3918_v20 = vld [vmem:[%s9317_s3 + $0x710] sm:$0xff]  ;;  %v1146_v12 = vmax.f32 %v1121_v51, 0.0 }
 0x235   :  { %5991 = vmatprep.subr.bf16.mxu0 %v9335_v57  ;;  %6018 = vmatprep.subr.bf16.mxu1 %v9335_v57  ;;  %v6031_v52 = vpack.c.bf16 %v3919_v53, %v3918_v20  ;;  %v3947_v20 = vld [vmem:[%s9317_s3 + $0x7f8] sm:$0xff] }
 0x238   :  { %5993 = vmatpush3.bf16.msra.mxu0 %v5992_v1  ;;  %6020 = vmatpush3.bf16.msra.mxu1 %v6019_v28  ;;  %v6058_v1 = vpack.c.bf16 %v3937_v25, %v3936_v6  ;;  %v3920_v28 = vld [vmem:[%s9317_s3 + $0x720] sm:$0xff] }
 0x239   :  { %5994 = vmatprep.subr.bf16.mxu0 %v9335_v57  ;;  %6021 = vmatprep.subr.bf16.mxu1 %v9335_v57  ;;  %v6034_v15 = vpack.c.bf16 %v3921_v33, %v3920_v28  ;;  %v9367_v28 = vmax.f32 %v7871_v50, %v7866_v21 }
 0x23b   :  { %v1124_v33 = vadd.f32 %v8348_v4, %v9367_v28 }
 0x23c   :  { %5996 = vmatpush3.bf16.msra.mxu0 %v5995_v31  ;;  %6023 = vmatpush3.bf16.msra.mxu1 %v6022_v43  ;;  %v6061_v31 = vpack.c.bf16 %v3939_v10, %v3938_v27  ;;  %v3922_v43 = vld [vmem:[%s9317_s3 + $0x730] sm:$0xff]  ;;  %v3931_v27 = vld [vmem:[%s9317_s3 + $0x778] sm:$0xff]  ;;  %v3964_v10 = vld [vmem:[%s9317_s3 + $0x880] sm:$0xff] }
 0x23d   :  { %5997 = vmatprep.subr.bf16.mxu0 %v9335_v57  ;;  %6024 = vmatprep.subr.bf16.mxu1 %v9335_v57  ;;  %v6037_v16 = vpack.c.bf16 %v3923_v19, %v3922_v43  ;;  %v9368_v43 = vmax.f32 %v7848_v45, %v7843_v23 }
 0x23f   :  { %v1123_v19 = vadd.f32 %v8348_v4, %v9368_v43 }
 0x240   :  { %5999 = vmatpush3.bf16.msra.mxu0 %v5998_v0  ;;  %6026 = vmatpush3.bf16.msra.mxu1 %v6025_v14  ;;  %v6064_v0 = vpack.c.bf16 %v3941_v2, %v3940_v30  ;;  %v3924_v14 = vld [vmem:[%s9317_s3 + $0x740] sm:$0xff]  ;;  %v1149_v30 = vmax.f32 %v1124_v33, 0.0  ;;  %v3949_v2 = vld [vmem:[%s9317_s3 + $0x808] sm:$0xff] }
 0x241   :  { %6000 = vmatprep.subr.bf16.mxu0 %v9335_v57  ;;  %6051 = vmatprep.subr.bf16.mxu1 %v9335_v57  ;;  %v6040_v3 = vpack.c.bf16 %v3925_v63, %v3924_v14  ;;  %v3950_v14 = vld [vmem:[%s9317_s3 + $0x810] sm:$0xff]  ;;  %v1148_v63 = vmax.f32 %v1123_v19, 0.0 }
 0x243   :  { %5042 = vmatmul.mubr.f32.vlgmr.msra.gmra.mrb[112].mxu1 %v1147_v42 }
 0x244   :  { %6002 = vmatpush3.bf16.msra.mxu0 %v6001_v8  ;;  %6053 = vmatpush3.bf16.msra.mxu1 %v6052_v11  ;;  %v3926_v8 = vld [vmem:[%s9317_s3 + $0x750] sm:$0xff]  ;;  %v3927_v11 = vld [vmem:[%s9317_s3 + $0x758] sm:$0xff] }
 0x245   :  { %6027 = vmatprep.subr.bf16.mxu0 %v9335_v57  ;;  %6054 = vmatprep.subr.bf16.mxu1 %v9335_v57  ;;  %v6043_v5 = vpack.c.bf16 %v3927_v11, %v3926_v8  ;;  %v3952_v11 = vld [vmem:[%s9317_s3 + $0x820] sm:$0xff] }
 0x246   :  { %5111 = vmatprep.mubr.msk.f32.mxu1 %vm6345_vm0, %v9334_v37 }
 0x247   :  { %5007 = vmatmul.mubr.f32.vlgmr.msra.gmra.mrb[112].mxu0 %v1146_v12 }
 0x248   :  { %6029 = vmatpush3.bf16.msra.mxu0 %v6028_v26  ;;  %6056 = vmatpush3.bf16.msra.mxu1 %v6055_v48  ;;  %v3929_v26 = vld [vmem:[%s9317_s3 + $0x768] sm:$0xff]  ;;  %v3946_v48 = vld [vmem:[%s9317_s3 + $0x7f0] sm:$0xff] }
 0x249   :  { %6030 = vmatprep.subr.bf16.mxu0 %v9335_v57  ;;  %6057 = vmatprep.subr.bf16.mxu1 %v9335_v57  ;;  %v6046_v25 = vpack.c.bf16 %v3929_v26, %v3928_v54  ;;  %v3955_v54 = vld [vmem:[%s9317_s3 + $0x838] sm:$0xff]  ;;  %v3972_v26 = vld [vmem:[%s9317_s3 + $0x8c0] sm:$0xff] }
 0x24a   :  { %5076 = vmatprep.mubr.msk.f32.mxu0 %vm6345_vm0, %v9334_v37 }
 0x24c   :  { %6032 = vmatpush3.bf16.msra.mxu0 %v6031_v52  ;;  %6059 = vmatpush3.bf16.msra.mxu1 %v6058_v1  ;;  %v6073_v52 = vpack.c.bf16 %v3947_v20, %v3946_v48  ;;  %v3930_v1 = vld [vmem:[%s9317_s3 + $0x770] sm:$0xff]  ;;  %v3973_v48 = vld [vmem:[%s9317_s3 + $0x8c8] sm:$0xff] }
 0x24d   :  { %6033 = vmatprep.subr.bf16.mxu0 %v9335_v57  ;;  %6060 = vmatprep.subr.bf16.mxu1 %v9335_v57  ;;  %v6049_v21 = vpack.c.bf16 %v3931_v27, %v3930_v1  ;;  %v3975_v1 = vld [vmem:[%s9317_s3 + $0x8d8] sm:$0xff]  ;;  %v3958_v27 = vld [vmem:[%s9317_s3 + $0x850] sm:$0xff] }
 0x250   :  { %6035 = vmatpush3.bf16.msra.mxu0 %v6034_v15  ;;  %6062 = vmatpush3.bf16.msra.mxu1 %v6061_v31  ;;  %v3965_v15 = vld [vmem:[%s9317_s3 + $0x888] sm:$0xff]  ;;  %v3948_v31 = vld [vmem:[%s9317_s3 + $0x800] sm:$0xff] }
 0x251   :  { %6036 = vmatprep.subr.bf16.mxu0 %v9335_v57  ;;  %6063 = vmatprep.subr.bf16.mxu1 %v9335_v57  ;;  %v6100_v50 = vpack.c.bf16 %v3965_v15, %v3964_v10  ;;  %v6076_v23 = vpack.c.bf16 %v3949_v2, %v3948_v31  ;;  %v3959_v10 = vld [vmem:[%s9317_s3 + $0x858] sm:$0xff]  ;;  %v3976_v15 = vld [vmem:[%s9317_s3 + $0x8e0] sm:$0xff]  ;;  %v3961_v2 = vld [vmem:[%s9317_s3 + $0x868] sm:$0xff] }
 0x252   :  { %v6091_v43 = vpack.c.bf16 %v3959_v10, %v3958_v27 }
 0x254   :  { %6038 = vmatpush3.bf16.msra.mxu0 %v6037_v16  ;;  %6065 = vmatpush3.bf16.msra.mxu1 %v6064_v0  ;;  %v3966_v16 = vld [vmem:[%s9317_s3 + $0x890] sm:$0xff]  ;;  %v3967_v0 = vld [vmem:[%s9317_s3 + $0x898] sm:$0xff] }
 0x255   :  { %6039 = vmatprep.subr.bf16.mxu0 %v9335_v57  ;;  %6066 = vmatprep.subr.bf16.mxu1 %v9335_v57  ;;  %v6103_v45 = vpack.c.bf16 %v3967_v0, %v3966_v16  ;;  %v3978_v16 = vld [vmem:[%s9317_s3 + $0x8f0] sm:$0xff]  ;;  %v3979_v0 = vld [vmem:[%s9317_s3 + $0x8f8] sm:$0xff] }
 0x256   :  { %v1328_v51 = vpop.f32.mrb[100].mxu1 }
 0x257   :  { %v4623_v42 = vpop.f32.mrb[101].mxu1 }
 0x258   :  { %6041 = vmatpush3.bf16.msra.mxu0 %v6040_v3  ;;  %6068 = vmatpush3.bf16.msra.mxu1 %v6067_v22  ;;  %v3969_v3 = vld [vmem:[%s9317_s3 + $0x8a8] sm:$0xff]  ;;  %v6079_v22 = vpack.c.bf16 %v3951_v9, %v3950_v14  ;;  %v6082_v42 = vpack.c.bf16 %v3953_v18, %v3952_v11  ;;  %v6121_v9 = vpack.c.bf16 %v3979_v0, %v3978_v16  ;;  %v4006_v16 = vld [vmem:[%s9317_s3 + $0x9d0] sm:$0xff]  ;;  %v4007_v0 = vld [vmem:[%s9317_s3 + $0x9d8] sm:$0xff] }
 0x259   :  { %6042 = vmatprep.subr.bf16.mxu0 %v9335_v57  ;;  %6069 = vmatprep.subr.bf16.mxu1 %v9335_v57  ;;  %v6106_v8 = vpack.c.bf16 %v3969_v3, %v3968_v17  ;;  %v3962_v17 = vld [vmem:[%s9317_s3 + $0x870] sm:$0xff]  ;;  %v1126_v3 = vadd.f32 %v8348_v4, %v1094_v38  ;;  %v3980_v38 = vld [vmem:[%s9317_s3 + $0x900] sm:$0xff]  ;;  %v9369_v18 = vmax.f32 %v7894_v7, %v7889_v35 }
 0x25a   :  { %v1258_v12 = vpop.f32.mrb[100].mxu0 }
 0x25b   :  { %v8595_v53 = vadd.f32 %v1328_v51, %v1258_v12  ;;  %v4588_v6 = vpop.f32.mrb[101].mxu0  ;;  %v3971_v51 = vld [vmem:[%s9317_s3 + $0x8b8] sm:$0xff]  ;;  %v6112_v12 = vpack.c.bf16 %v3973_v48, %v3972_v26 }
 0x25c   :  { %6044 = vmatpush3.bf16.msra.mxu0 %v6043_v5  ;;  %6071 = vmatpush3.bf16.msra.mxu1 %v6070_v49  ;;  %v6109_v5 = vpack.c.bf16 %v3971_v51, %v3970_v44  ;;  %v3954_v49 = vld [vmem:[%s9317_s3 + $0x830] sm:$0xff]  ;;  %v3956_v6 = vld [vmem:[%s9317_s3 + $0x840] sm:$0xff]  ;;  %v1125_v44 = vadd.f32 %v8348_v4, %v9369_v18  ;;  %v1151_v51 = vmax.f32 %v1126_v3, 0.0  ;;  %v3983_v48 = vld [vmem:[%s9317_s3 + $0x918] sm:$0xff] }
 0x25d   :  { %6045 = vmatprep.subr.bf16.mxu0 %v9335_v57  ;;  %6072 = vmatprep.subr.bf16.mxu1 %v9335_v57  ;;  %v6085_v20 = vpack.c.bf16 %v3955_v54, %v3954_v49  ;;  %v3999_v49 = vld [vmem:[%s9317_s3 + $0x998] sm:$0xff]  ;;  %v3982_v54 = vld [vmem:[%s9317_s3 + $0x910] sm:$0xff] }
 0x25e   :  { %v1150_v26 = vmax.f32 %v1125_v44, 0.0  ;;  %v4011_v18 = vld [vmem:[%s9317_s3 + $0x9f8] sm:$0xff] }
 0x260   :  { %6047 = vmatpush3.bf16.msra.mxu0 %v6046_v25  ;;  %6074 = vmatpush3.bf16.msra.mxu1 %v6073_v52  ;;  %v3957_v25 = vld [vmem:[%s9317_s3 + $0x848] sm:$0xff]  ;;  %v3974_v52 = vld [vmem:[%s9317_s3 + $0x8d0] sm:$0xff] }
 0x261   :  { %6048 = vmatprep.subr.bf16.mxu0 %v9335_v57  ;;  %6099 = vmatprep.subr.bf16.mxu1 %v9335_v57  ;;  %v6088_v28 = vpack.c.bf16 %v3957_v25, %v3956_v6  ;;  %v6115_v33 = vpack.c.bf16 %v3975_v1, %v3974_v52  ;;  %v6127_v6 = vpack.c.bf16 %v3983_v48, %v3982_v54  ;;  %v3984_v52 = vld [vmem:[%s9317_s3 + $0x920] sm:$0xff]  ;;  %v3985_v1 = vld [vmem:[%s9317_s3 + $0x928] sm:$0xff] }
 0x262   :  { %v6130_v27 = vpack.c.bf16 %v3985_v1, %v3984_v52  ;;  %v4028_v54 = vld [vmem:[%s9317_s3 + $0xa80] sm:$0xff]  ;;  %v4030_v52 = vld [vmem:[%s9317_s3 + $0xa90] sm:$0xff]  ;;  %v4031_v1 = vld [vmem:[%s9317_s3 + $0xa98] sm:$0xff] }
 0x263   :  { %5112 = vmatmul.mubr.f32.vlgmr.msra.gmra.mrb[114].mxu1 %v1149_v30  ;;  %v3960_v30 = vld [vmem:[%s9317_s3 + $0x860] sm:$0xff] }
 0x264   :  { %6050 = vmatpush3.bf16.msra.mxu0 %v6049_v21  ;;  %6101 = vmatpush3.bf16.msra.mxu1 %v6100_v50  ;;  %v3977_v21 = vld [vmem:[%s9317_s3 + $0x8e8] sm:$0xff] }
 0x265   :  { %6075 = vmatprep.subr.bf16.mxu0 %v9335_v57  ;;  %6102 = vmatprep.subr.bf16.mxu1 %v9335_v57  ;;  %v6118_v19 = vpack.c.bf16 %v3977_v21, %v3976_v15  ;;  %v3986_v15 = vld [vmem:[%s9317_s3 + $0x930] sm:$0xff]  ;;  %v3987_v21 = vld [vmem:[%s9317_s3 + $0x938] sm:$0xff] }
 0x266   :  { %5181 = vmatprep.mubr.msk.f32.mxu1 %vm6345_vm0, %v9334_v37 }
 0x267   :  { %5077 = vmatmul.mubr.f32.vlgmr.msra.gmra.mrb[114].mxu0 %v1148_v63  ;;  %v6094_v63 = vpack.c.bf16 %v3961_v2, %v3960_v30  ;;  %v3988_v30 = vld [vmem:[%s9317_s3 + $0x940] sm:$0xff]  ;;  %v3989_v2 = vld [vmem:[%s9317_s3 + $0x948] sm:$0xff] }
 0x268   :  { %6077 = vmatpush3.bf16.msra.mxu0 %v6076_v23  ;;  %6104 = vmatpush3.bf16.msra.mxu1 %v6103_v45 }
 0x269   :  { %6078 = vmatprep.subr.bf16.mxu0 %v9335_v57  ;;  %6105 = vmatprep.subr.bf16.mxu1 %v9335_v57 }
 0x26a   :  { %5146 = vmatprep.mubr.msk.f32.mxu0 %vm6345_vm0, %v9334_v37 }
 0x26c   :  { %6080 = vmatpush3.bf16.msra.mxu0 %v6079_v22  ;;  %6107 = vmatpush3.bf16.msra.mxu1 %v6106_v8  ;;  %v3996_v22 = vld [vmem:[%s9317_s3 + $0x980] sm:$0xff]  ;;  %v3997_v8 = vld [vmem:[%s9317_s3 + $0x988] sm:$0xff] }
 0x26d   :  { %6081 = vmatprep.subr.bf16.mxu0 %v9335_v57  ;;  %6108 = vmatprep.subr.bf16.mxu1 %v9335_v57  ;;  %v6148_v59 = vpack.c.bf16 %v3997_v8, %v3996_v22 }
 0x270   :  { %6083 = vmatpush3.bf16.msra.mxu0 %v6082_v42  ;;  %6110 = vmatpush3.bf16.msra.mxu1 %v6109_v5  ;;  %v3981_v42 = vld [vmem:[%s9317_s3 + $0x908] sm:$0xff]  ;;  %v3998_v5 = vld [vmem:[%s9317_s3 + $0x990] sm:$0xff] }
 0x271   :  { %6084 = vmatprep.subr.bf16.mxu0 %v9335_v57  ;;  %6111 = vmatprep.subr.bf16.mxu1 %v9335_v57  ;;  %v6124_v35 = vpack.c.bf16 %v3981_v42, %v3980_v38  ;;  %v6151_v7 = vpack.c.bf16 %v3999_v49, %v3998_v5  ;;  %v4010_v38 = vld [vmem:[%s9317_s3 + $0x9f0] sm:$0xff] }
 0x272   :  { %v6169_v49 = vpack.c.bf16 %v4011_v18, %v4010_v38  ;;  %v4023_v38 = vld [vmem:[%s9317_s3 + $0xa58] sm:$0xff]  ;;  %v4040_v18 = vld [vmem:[%s9317_s3 + $0xae0] sm:$0xff] }
 0x274   :  { %6086 = vmatpush3.bf16.msra.mxu0 %v6085_v20  ;;  %6113 = vmatpush3.bf16.msra.mxu1 %v6112_v12  ;;  %v4000_v20 = vld [vmem:[%s9317_s3 + $0x9a0] sm:$0xff]  ;;  %v4001_v12 = vld [vmem:[%s9317_s3 + $0x9a8] sm:$0xff] }
 0x275   :  { %6087 = vmatprep.subr.bf16.mxu0 %v9335_v57  ;;  %6114 = vmatprep.subr.bf16.mxu1 %v9335_v57  ;;  %v6154_v25 = vpack.c.bf16 %v4001_v12, %v4000_v20  ;;  %v9370_v20 = vmax.f32 %v7948_v32, %v7943_v13  ;;  %v6199_v32 = vpack.c.bf16 %v4031_v1, %v4030_v52  ;;  %v4060_v52 = vld [vmem:[%s9317_s3 + $0xb80] sm:$0xff]  ;;  %v4061_v1 = vld [vmem:[%s9317_s3 + $0xb88] sm:$0xff] }
 0x276   :  { %v1503_v50 = vpop.f32.mrb[102].mxu1 }
 0x277   :  { %v4693_v31 = vpop.f32.mrb[103].mxu1  ;;  %v1127_v12 = vadd.f32 %v8348_v4, %v9370_v20 }
 0x278   :  { %6089 = vmatpush3.bf16.msra.mxu0 %v6088_v28  ;;  %6116 = vmatpush3.bf16.msra.mxu1 %v6115_v33  ;;  %v4002_v28 = vld [vmem:[%s9317_s3 + $0x9b0] sm:$0xff]  ;;  %v4003_v33 = vld [vmem:[%s9317_s3 + $0x9b8] sm:$0xff]  ;;  %v4005_v31 = vld [vmem:[%s9317_s3 + $0x9c8] sm:$0xff] }
 0x279   :  { %6090 = vmatprep.subr.bf16.mxu0 %v9335_v57  ;;  %6117 = vmatprep.subr.bf16.mxu1 %v9335_v57  ;;  %v6157_v10 = vpack.c.bf16 %v4003_v33, %v4002_v28  ;;  %v4014_v28 = vld [vmem:[%s9317_s3 + $0xa10] sm:$0xff]  ;;  %v1152_v33 = vmax.f32 %v1127_v12, 0.0 }
 0x27a   :  { %v1415_v23 = vpop.f32.mrb[102].mxu0  ;;  %v4026_v12 = vld [vmem:[%s9317_s3 + $0xa70] sm:$0xff] }
 0x27b   :  { %v1419_v45 = vadd.f32 %v1415_v23, %v8595_v53  ;;  %v4658_v14 = vpop.f32.mrb[103].mxu0  ;;  %v3963_v53 = vld [vmem:[%s9317_s3 + $0x878] sm:$0xff]  ;;  %v6136_v23 = vpack.c.bf16 %v3989_v2, %v3988_v30 }
 0x27c   :  { %6092 = vmatpush3.bf16.msra.mxu0 %v6091_v43  ;;  %6119 = vmatpush3.bf16.msra.mxu1 %v6118_v19  ;;  %v6097_v40 = vpack.c.bf16 %v3963_v53, %v3962_v17  ;;  %v6133_v43 = vpack.c.bf16 %v3987_v21, %v3986_v15  ;;  %v3990_v14 = vld [vmem:[%s9317_s3 + $0x950] sm:$0xff]  ;;  %v4009_v17 = vld [vmem:[%s9317_s3 + $0x9e8] sm:$0xff]  ;;  %v4035_v30 = vld [vmem:[%s9317_s3 + $0xab8] sm:$0xff] }
 0x27d   :  { %6093 = vmatprep.subr.bf16.mxu0 %v9335_v57  ;;  %6120 = vmatprep.subr.bf16.mxu1 %v9335_v57  ;;  %v8740_v11 = vadd.f32 %v1503_v50, %v1419_v45  ;;  %v4004_v50 = vld [vmem:[%s9317_s3 + $0x9c0] sm:$0xff]  ;;  %v6163_v45 = vpack.c.bf16 %v4007_v0, %v4006_v16  ;;  %v4033_v15 = vld [vmem:[%s9317_s3 + $0xaa8] sm:$0xff]  ;;  %v4018_v0 = vld [vmem:[%s9317_s3 + $0xa30] sm:$0xff] }
 0x27e   :  { %v6160_v19 = vpack.c.bf16 %v4005_v31, %v4004_v50  ;;  %v4016_v31 = vld [vmem:[%s9317_s3 + $0xa20] sm:$0xff] }
 0x280   :  { %6095 = vmatpush3.bf16.msra.mxu0 %v6094_v63  ;;  %6122 = vmatpush3.bf16.msra.mxu1 %v6121_v9  ;;  %v3991_v63 = vld [vmem:[%s9317_s3 + $0x958] sm:$0xff]  ;;  %v4008_v9 = vld [vmem:[%s9317_s3 + $0x9e0] sm:$0xff] }
 0x281   :  { %6096 = vmatprep.subr.bf16.mxu0 %v9335_v57  ;;  %6147 = vmatprep.subr.bf16.mxu1 %v9335_v57  ;;  %v6139_v22 = vpack.c.bf16 %v3991_v63, %v3990_v14  ;;  %v6166_v8 = vpack.c.bf16 %v4009_v17, %v4008_v9  ;;  %v4037_v14 = vld [vmem:[%s9317_s3 + $0xac8] sm:$0xff]  ;;  %v4020_v17 = vld [vmem:[%s9317_s3 + $0xa40] sm:$0xff] }
 0x283   :  { %5182 = vmatmul.mubr.f32.vlgmr.msra.gmra.mrb[116].mxu1 %v1151_v51 }
 0x284   :  { %6098 = vmatpush3.bf16.msra.mxu0 %v6097_v40  ;;  %6149 = vmatpush3.bf16.msra.mxu1 %v6148_v59  ;;  %v3992_v40 = vld [vmem:[%s9317_s3 + $0x960] sm:$0xff]  ;;  %v3993_v59 = vld [vmem:[%s9317_s3 + $0x968] sm:$0xff] }
 0x285   :  { %6123 = vmatprep.subr.bf16.mxu0 %v9335_v57  ;;  %6150 = vmatprep.subr.bf16.mxu1 %v9335_v57  ;;  %v6142_v5 = vpack.c.bf16 %v3993_v59, %v3992_v40  ;;  %v4022_v59 = vld [vmem:[%s9317_s3 + $0xa50] sm:$0xff] }
 0x286   :  { %5251 = vmatprep.mubr.msk.f32.mxu1 %vm6345_vm0, %v9334_v37 }
 0x287   :  { %5147 = vmatmul.mubr.f32.vlgmr.msra.gmra.mrb[116].mxu0 %v1150_v26  ;;  %v4029_v26 = vld [vmem:[%s9317_s3 + $0xa88] sm:$0xff] }
 0x288   :  { %6125 = vmatpush3.bf16.msra.mxu0 %v6124_v35  ;;  %6152 = vmatpush3.bf16.msra.mxu1 %v6151_v7  ;;  %v3994_v35 = vld [vmem:[%s9317_s3 + $0x970] sm:$0xff]  ;;  %v1128_v7 = vadd.f32 %v8348_v4, %v1096_v34  ;;  %v6196_v24 = vpack.c.bf16 %v4029_v26, %v4028_v54  ;;  %v4012_v34 = vld [vmem:[%s9317_s3 + $0xa00] sm:$0xff]  ;;  %v4043_v54 = vld [vmem:[%s9317_s3 + $0xaf8] sm:$0xff] }
 0x289   :  { %6126 = vmatprep.subr.bf16.mxu0 %v9335_v57  ;;  %6153 = vmatprep.subr.bf16.mxu1 %v9335_v57 }
 0x28a   :  { %5216 = vmatprep.mubr.msk.f32.mxu0 %vm6345_vm0, %v9334_v37 }
 0x28c   :  { %6128 = vmatpush3.bf16.msra.mxu0 %v6127_v6  ;;  %6155 = vmatpush3.bf16.msra.mxu1 %v6154_v25  ;;  %v1153_v6 = vmax.f32 %v1128_v7, 0.0  ;;  %v4013_v25 = vld [vmem:[%s9317_s3 + $0xa08] sm:$0xff] }
 0x28d   :  { %6129 = vmatprep.subr.bf16.mxu0 %v9335_v57  ;;  %6156 = vmatprep.subr.bf16.mxu1 %v9335_v57  ;;  %v6172_v13 = vpack.c.bf16 %v4013_v25, %v4012_v34  ;;  %v4025_v7 = vld [vmem:[%s9317_s3 + $0xa68] sm:$0xff] }
 0x290   :  { %6131 = vmatpush3.bf16.msra.mxu0 %v6130_v27  ;;  %6158 = vmatpush3.bf16.msra.mxu1 %v6157_v10  ;;  %v4015_v27 = vld [vmem:[%s9317_s3 + $0xa18] sm:$0xff]  ;;  %v4032_v10 = vld [vmem:[%s9317_s3 + $0xaa0] sm:$0xff] }
 0x291   :  { %6132 = vmatprep.subr.bf16.mxu0 %v9335_v57  ;;  %6159 = vmatprep.subr.bf16.mxu1 %v9335_v57  ;;  %v6175_v21 = vpack.c.bf16 %v4015_v27, %v4014_v28  ;;  %v6202_v50 = vpack.c.bf16 %v4033_v15, %v4032_v10  ;;  %v9372_v28 = vmax.f32 %v7998_v46, %v7991_v41  ;;  %v4045_v10 = vld [vmem:[%s9317_s3 + $0xb08] sm:$0xff]  ;;  %v4062_v15 = vld [vmem:[%s9317_s3 + $0xb90] sm:$0xff] }
 0x294   :  { %6134 = vmatpush3.bf16.msra.mxu0 %v6133_v43  ;;  %6161 = vmatpush3.bf16.msra.mxu1 %v6160_v19  ;;  %v4017_v43 = vld [vmem:[%s9317_s3 + $0xa28] sm:$0xff]  ;;  %v4034_v19 = vld [vmem:[%s9317_s3 + $0xab0] sm:$0xff] }
 0x295   :  { %6135 = vmatprep.subr.bf16.mxu0 %v9335_v57  ;;  %6162 = vmatprep.subr.bf16.mxu1 %v9335_v57  ;;  %v6178_v2 = vpack.c.bf16 %v4017_v43, %v4016_v31  ;;  %v6205_v16 = vpack.c.bf16 %v4035_v30, %v4034_v19  ;;  %v4047_v31 = vld [vmem:[%s9317_s3 + $0xb18] sm:$0xff]  ;;  %v4064_v43 = vld [vmem:[%s9317_s3 + $0xba0] sm:$0xff]  ;;  %v4065_v19 = vld [vmem:[%s9317_s3 + $0xba8] sm:$0xff] }
 0x296   :  { %v1679_v3 = vpop.f32.mrb[104].mxu1 }
 0x297   :  { %v4763_v53 = vpop.f32.mrb[105].mxu1 }
 0x298   :  { %6137 = vmatpush3.bf16.msra.mxu0 %v6136_v23  ;;  %6164 = vmatpush3.bf16.msra.mxu1 %v6163_v45  ;;  %v4019_v23 = vld [vmem:[%s9317_s3 + $0xa38] sm:$0xff]  ;;  %v4036_v45 = vld [vmem:[%s9317_s3 + $0xac0] sm:$0xff]  ;;  %v4038_v53 = vld [vmem:[%s9317_s3 + $0xad0] sm:$0xff] }
 0x299   :  { %6138 = vmatprep.subr.bf16.mxu0 %v9335_v57  ;;  %6165 = vmatprep.subr.bf16.mxu1 %v9335_v57  ;;  %v6181_v63 = vpack.c.bf16 %v4019_v23, %v4018_v0  ;;  %v6208_v9 = vpack.c.bf16 %v4037_v14, %v4036_v45  ;;  %v4049_v0 = vld [vmem:[%s9317_s3 + $0xb28] sm:$0xff]  ;;  %v4066_v23 = vld [vmem:[%s9317_s3 + $0xbb0] sm:$0xff]  ;;  %v4067_v45 = vld [vmem:[%s9317_s3 + $0xbb8] sm:$0xff] }
 0x29a   :  { %v1591_v44 = vpop.f32.mrb[104].mxu0 }
 0x29b   :  { %v1595_v51 = vadd.f32 %v1591_v44, %v8740_v11  ;;  %v4728_v42 = vpop.f32.mrb[105].mxu0  ;;  %v3995_v11 = vld [vmem:[%s9317_s3 + $0x978] sm:$0xff]  ;;  %v4041_v44 = vld [vmem:[%s9317_s3 + $0xae8] sm:$0xff] }
 0x29c   :  { %6140 = vmatpush3.bf16.msra.mxu0 %v6139_v22  ;;  %6167 = vmatpush3.bf16.msra.mxu1 %v6166_v8  ;;  %v6145_v47 = vpack.c.bf16 %v3995_v11, %v3994_v35  ;;  %v4039_v22 = vld [vmem:[%s9317_s3 + $0xad8] sm:$0xff]  ;;  %v4024_v35 = vld [vmem:[%s9317_s3 + $0xa60] sm:$0xff]  ;;  %v4042_v11 = vld [vmem:[%s9317_s3 + $0xaf0] sm:$0xff] }
 0x29d   :  { %6141 = vmatprep.subr.bf16.mxu0 %v9335_v57  ;;  %6168 = vmatprep.subr.bf16.mxu1 %v9335_v57  ;;  %v8867_v48 = vadd.f32 %v1679_v3, %v1595_v51  ;;  %v4021_v3 = vld [vmem:[%s9317_s3 + $0xa48] sm:$0xff]  ;;  %v6211_v40 = vpack.c.bf16 %v4039_v22, %v4038_v53  ;;  %v6190_v34 = vpack.c.bf16 %v4025_v7, %v4024_v35 }
 0x29e   :  { %v6184_v8 = vpack.c.bf16 %v4021_v3, %v4020_v17  ;;  %v6217_v20 = vpack.c.bf16 %v4043_v54, %v4042_v11  ;;  %v4051_v17 = vld [vmem:[%s9317_s3 + $0xb38] sm:$0xff]  ;;  %v4068_v3 = vld [vmem:[%s9317_s3 + $0xbc0] sm:$0xff]  ;;  %v4069_v53 = vld [vmem:[%s9317_s3 + $0xbc8] sm:$0xff] }
 0x29f   :  { %v4073_v35 = vld [vmem:[%s9317_s3 + $0xbe8] sm:$0xff] }
 0x2a0   :  { %6143 = vmatpush3.bf16.msra.mxu0 %v6142_v5  ;;  %6170 = vmatpush3.bf16.msra.mxu1 %v6169_v49  ;;  %v6187_v5 = vpack.c.bf16 %v4023_v38, %v4022_v59  ;;  %v6214_v49 = vpack.c.bf16 %v4041_v44, %v4040_v18  ;;  %v4053_v59 = vld [vmem:[%s9317_s3 + $0xb48] sm:$0xff]  ;;  %v4070_v38 = vld [vmem:[%s9317_s3 + $0xbd0] sm:$0xff]  ;;  %v4071_v18 = vld [vmem:[%s9317_s3 + $0xbd8] sm:$0xff] }
 0x2a1   :  { %6144 = vmatprep.subr.bf16.mxu0 %v9335_v57  ;;  %6195 = vmatprep.subr.bf16.mxu1 %v9335_v57 }
 0x2a3   :  { %5252 = vmatmul.mubr.f32.vlgmr.msra.gmra.mrb[118].mxu1 %v1153_v6  ;;  %v9371_v6 = vmax.f32 %v8021_v58, %v8016_v56  ;;  %v6244_v58 = vpack.c.bf16 %v4061_v1, %v4060_v52  ;;  %v9106_v1 = vld [vmem:[%s9318_s2] ss:$0 sm:$0xff] }
 0x2a4   :  { %6146 = vmatpush3.bf16.msra.mxu0 %v6145_v47  ;;  %6197 = vmatpush3.bf16.msra.mxu1 %v6196_v24 }
 0x2a5   :  { %6171 = vmatprep.subr.bf16.mxu0 %v9335_v57  ;;  %6198 = vmatprep.subr.bf16.mxu1 %v9335_v57  ;;  %v1130_v25 = vadd.f32 %v8348_v4, %v9371_v6 }
 0x2a6   :  { %5321 = vmatprep.mubr.msk.f32.mxu1 %vm6345_vm0, %v9334_v37 }
 0x2a7   :  { %5217 = vmatmul.mubr.f32.vlgmr.msra.gmra.mrb[118].mxu0 %v1152_v33  ;;  %v1129_v33 = vadd.f32 %v8348_v4, %v9372_v28  ;;  %v1155_v27 = vmax.f32 %v1130_v25, 0.0  ;;  %v4046_v4 = vld [vmem:[%s9317_s3 + $0xb10] sm:$0xff] }
 0x2a8   :  { %6173 = vmatpush3.bf16.msra.mxu0 %v6172_v13  ;;  %6200 = vmatpush3.bf16.msra.mxu1 %v6199_v32  ;;  %v4044_v32 = vld [vmem:[%s9317_s3 + $0xb00] sm:$0xff]  ;;  %v6223_v30 = vpack.c.bf16 %v4047_v31, %v4046_v4 }
 0x2a9   :  { %6174 = vmatprep.subr.bf16.mxu0 %v9335_v57  ;;  %6201 = vmatprep.subr.bf16.mxu1 %v9335_v57  ;;  %v6220_v41 = vpack.c.bf16 %v4045_v10, %v4044_v32  ;;  %v4059_v32 = vld [vmem:[%s9317_s3 + $0xb78] sm:$0xff]  ;;  %v4076_v10 = vld [vmem:[%s9317_s3 + $0xc00] sm:$0xff] }
 0x2aa   :  { %5286 = vmatprep.mubr.msk.f32.mxu0 %vm6345_vm0, %v9334_v37  ;;  %v4080_v4 = vld [vmem:[%s9317_s3 + $0xc20] sm:$0xff] }
 0x2ac   :  { %6176 = vmatpush3.bf16.msra.mxu0 %v6175_v21  ;;  %6203 = vmatpush3.bf16.msra.mxu1 %v6202_v50  ;;  %v4063_v21 = vld [vmem:[%s9317_s3 + $0xb98] sm:$0xff]  ;;  %v1154_v50 = vmax.f32 %v1129_v33, 0.0 }
 0x2ad   :  { %6177 = vmatprep.subr.bf16.mxu0 %v9335_v57  ;;  %6204 = vmatprep.subr.bf16.mxu1 %v9335_v57  ;;  %v6247_v46 = vpack.c.bf16 %v4063_v21, %v4062_v15  ;;  %v4077_v15 = vld [vmem:[%s9317_s3 + $0xc08] sm:$0xff] }
 0x2ae   :  { %v6268_v21 = vpack.c.bf16 %v4077_v15, %v4076_v10 }
 0x2b0   :  { %6179 = vmatpush3.bf16.msra.mxu0 %v6178_v2  ;;  %6206 = vmatpush3.bf16.msra.mxu1 %v6205_v16  ;;  %v6250_v2 = vpack.c.bf16 %v4065_v19, %v4064_v43  ;;  %v4048_v16 = vld [vmem:[%s9317_s3 + $0xb20] sm:$0xff]  ;;  %v4082_v43 = vld [vmem:[%s9317_s3 + $0xc30] sm:$0xff]  ;;  %v4083_v19 = vld [vmem:[%s9317_s3 + $0xc38] sm:$0xff] }
 0x2b1   :  { %6180 = vmatprep.subr.bf16.mxu0 %v9335_v57  ;;  %6207 = vmatprep.subr.bf16.mxu1 %v9335_v57  ;;  %v6226_v14 = vpack.c.bf16 %v4049_v0, %v4048_v16  ;;  %v4085_v16 = vld [vmem:[%s9317_s3 + $0xc48] sm:$0xff] }
 0x2b4   :  { %6182 = vmatpush3.bf16.msra.mxu0 %v6181_v63  ;;  %6209 = vmatpush3.bf16.msra.mxu1 %v6208_v9  ;;  %v6253_v63 = vpack.c.bf16 %v4067_v45, %v4066_v23  ;;  %v4050_v9 = vld [vmem:[%s9317_s3 + $0xb30] sm:$0xff]  ;;  %v4087_v45 = vld [vmem:[%s9317_s3 + $0xc58] sm:$0xff] }
 0x2b5   :  { %6183 = vmatprep.subr.bf16.mxu0 %v9335_v57  ;;  %6210 = vmatprep.subr.bf16.mxu1 %v9335_v57  ;;  %v6229_v22 = vpack.c.bf16 %v4051_v17, %v4050_v9  ;;  %v4086_v23 = vld [vmem:[%s9317_s3 + $0xc50] sm:$0xff]  ;;  %v4088_v17 = vld [vmem:[%s9317_s3 + $0xc60] sm:$0xff] }
 0x2b6   :  { %v1855_v51 = vpop.f32.mrb[106].mxu1  ;;  %v6283_v9 = vpack.c.bf16 %v4087_v45, %v4086_v23  ;;  %v3462_v23 = vld [vmem:[%s9320_s7 + $0x18] sm:$0xff] }
 0x2b7   :  { %v4833_v42 = vpop.f32.mrb[107].mxu1 }
 0x2b8   :  { %6185 = vmatpush3.bf16.msra.mxu0 %v6184_v8  ;;  %6212 = vmatpush3.bf16.msra.mxu1 %v6211_v40  ;;  %v6256_v8 = vpack.c.bf16 %v4069_v53, %v4068_v3  ;;  %v4052_v40 = vld [vmem:[%s9317_s3 + $0xb40] sm:$0xff]  ;;  %v4054_v42 = vld [vmem:[%s9317_s3 + $0xb50] sm:$0xff]  ;;  %v4089_v3 = vld [vmem:[%s9317_s3 + $0xc68] sm:$0xff] }
 0x2b9   :  { %6186 = vmatprep.subr.bf16.mxu0 %v9335_v57  ;;  %6213 = vmatprep.subr.bf16.mxu1 %v9335_v57  ;;  %v6232_v44 = vpack.c.bf16 %v4053_v59, %v4052_v40  ;;  %v6286_v40 = vpack.c.bf16 %v4089_v3, %v4088_v17  ;;  %v4090_v59 = vld [vmem:[%s9317_s3 + $0xc70] sm:$0xff]  ;;  %v3466_v3 = vld [vmem:[%s9320_s7 + $0x38] sm:$0xff] }
 0x2ba   :  { %v1767_v26 = vpop.f32.mrb[106].mxu0  ;;  %v3465_v17 = vld [vmem:[%s9320_s7 + $0x30] sm:$0xff] }
 0x2bb   :  { %v1771_v47 = vadd.f32 %v1767_v26, %v8867_v48  ;;  %v4798_v24 = vpop.f32.mrb[107].mxu0  ;;  %v4027_v48 = vld [vmem:[%s9317_s3 + $0xa78] sm:$0xff] }
 0x2bc   :  { %6188 = vmatpush3.bf16.msra.mxu0 %v6187_v5  ;;  %6215 = vmatpush3.bf16.msra.mxu1 %v6214_v49  ;;  %v6193_v56 = vpack.c.bf16 %v4027_v48, %v4026_v12  ;;  %v4055_v5 = vld [vmem:[%s9317_s3 + $0xb58] sm:$0xff]  ;;  %v4072_v49 = vld [vmem:[%s9317_s3 + $0xbe0] sm:$0xff]  ;;  %v4057_v24 = vld [vmem:[%s9317_s3 + $0xb68] sm:$0xff] }
 0x2bd   :  { %6189 = vmatprep.subr.bf16.mxu0 %v9335_v57  ;;  %6216 = vmatprep.subr.bf16.mxu1 %v9335_v57  ;;  %v8994_v13 = vadd.f32 %v1855_v51, %v1771_v47  ;;  %v6259_v51 = vpack.c.bf16 %v4071_v18, %v4070_v38  ;;  %v6235_v54 = vpack.c.bf16 %v4055_v5, %v4054_v42  ;;  %v4056_v47 = vld [vmem:[%s9317_s3 + $0xb60] sm:$0xff]  ;;  %v4091_v38 = vld [vmem:[%s9317_s3 + $0xc78] sm:$0xff] }
 0x2be   :  { %v6262_v26 = vpack.c.bf16 %v4073_v35, %v4072_v49  ;;  %v6238_v48 = vpack.c.bf16 %v4057_v24, %v4056_v47  ;;  %v3365_v24 = vld [vmem:[%s9319_s5] sm:$0xff] }
 0x2c0   :  { %6191 = vmatpush3.bf16.msra.mxu0 %v6190_v34  ;;  %6218 = vmatpush3.bf16.msra.mxu1 %v6217_v20  ;;  %v4074_v34 = vld [vmem:[%s9317_s3 + $0xbf0] sm:$0xff]  ;;  %v4075_v20 = vld [vmem:[%s9317_s3 + $0xbf8] sm:$0xff] }
 0x2c1   :  { %6192 = vmatprep.subr.bf16.mxu0 %v9335_v57  ;;  %6243 = vmatprep.subr.bf16.mxu1 %v9335_v57  ;;  %v6265_v52 = vpack.c.bf16 %v4075_v20, %v4074_v34  ;;  %v3366_v34 = vld [vmem:[%s9319_s5 + $0x8] sm:$0xff] }
 0x2c3   :  { %5322 = vmatmul.mubr.f32.vlgmr.msra.gmra.mrb[120].mxu1 %v1155_v27 }
 0x2c4   :  { %6194 = vmatpush3.bf16.msra.mxu0 %v6193_v56  ;;  %6245 = vmatpush3.bf16.msra.mxu1 %v6244_v58  ;;  %v9373_v56 = vmax.f32 %v8067_v36, %v8062_v62  ;;  %v9374_v62 = vmax.f32 %v8044_v60, %v8039_v29  ;;  %v4078_v60 = vld [vmem:[%s9317_s3 + $0xc10] sm:$0xff] }
 0x2c5   :  { %6219 = vmatprep.subr.bf16.mxu0 %v9335_v57  ;;  %6246 = vmatprep.subr.bf16.mxu1 %v9335_v57 }
 0x2c6   :  { %5391 = vmatprep.mubr.msk.f32.mxu1 %vm6345_vm0, %v9334_v37  ;;  %v1132_v58 = vadd.f32 %v9106_v1, %v9373_v56  ;;  %v1131_v36 = vadd.f32 %v9106_v1, %v9374_v62  ;;  %v3371_v56 = vld [vmem:[%s9319_s5 + $0x30] sm:$0xff] }
 0x2c7   :  { %5287 = vmatmul.mubr.f32.vlgmr.msra.gmra.mrb[120].mxu0 %v1154_v50  ;;  %v4081_v50 = vld [vmem:[%s9317_s3 + $0xc28] sm:$0xff]  ;;  %v3375_v62 = vld [vmem:[%s9319_s5 + $0x50] sm:$0xff] }
 0x2c8   :  { %6221 = vmatpush3.bf16.msra.mxu0 %v6220_v41  ;;  %6248 = vmatpush3.bf16.msra.mxu1 %v6247_v46  ;;  %v1157_v27 = vmax.f32 %v1132_v58, 0.0  ;;  %v1156_v29 = vmax.f32 %v1131_v36, 0.0  ;;  %v4079_v41 = vld [vmem:[%s9317_s3 + $0xc18] sm:$0xff]  ;;  %v6274_v31 = vpack.c.bf16 %v4081_v50, %v4080_v4  ;;  %v3379_v50 = vld [vmem:[%s9319_s5 + $0x70] sm:$0xff] }
 0x2c9   :  { %6222 = vmatprep.subr.bf16.mxu0 %v9335_v57  ;;  %6249 = vmatprep.subr.bf16.mxu1 %v9335_v57  ;;  %v6271_v46 = vpack.c.bf16 %v4079_v41, %v4078_v60  ;;  %v3372_v58 = vld [vmem:[%s9319_s5 + $0x38] sm:$0xff] }
 0x2ca   :  { %5356 = vmatprep.mubr.msk.f32.mxu0 %vm6345_vm0, %v9334_v37  ;;  %v3376_v36 = vld [vmem:[%s9319_s5 + $0x58] sm:$0xff] }
 0x2cc   :  { %6224 = vmatpush3.bf16.msra.mxu0 %v6223_v30  ;;  %6251 = vmatpush3.bf16.msra.mxu1 %v6250_v2  ;;  %v6277_v30 = vpack.c.bf16 %v4083_v19, %v4082_v43  ;;  %v4084_v2 = vld [vmem:[%s9317_s3 + $0xc40] sm:$0xff] }
 0x2cd   :  { %6225 = vmatprep.subr.bf16.mxu0 %v9335_v57  ;;  %6252 = vmatprep.subr.bf16.mxu1 %v9335_v57  ;;  %v6280_v0 = vpack.c.bf16 %v4085_v16, %v4084_v2  ;;  %v3460_v2 = vld [vmem:[%s9320_s7 + $0x8] sm:$0xff]  ;;  %v3461_v16 = vld [vmem:[%s9320_s7 + $0x10] sm:$0xff] }
 0x2ce   :  { %v6319_v45 = vpack.c.bf16 %v3462_v23, %v3461_v16 }
 0x2d0   :  { %6227 = vmatpush3.bf16.msra.mxu0 %v6226_v14  ;;  %6254 = vmatpush3.bf16.msra.mxu1 %v6253_v63 }
 0x2d1   :  { %6228 = vmatprep.subr.bf16.mxu0 %v9335_v57  ;;  %6255 = vmatprep.subr.bf16.mxu1 %v9335_v57 }
 0x2d4   :  { %6230 = vmatpush3.bf16.msra.mxu0 %v6229_v22  ;;  %6257 = vmatpush3.bf16.msra.mxu1 %v6256_v8 }
 0x2d5   :  { %6231 = vmatprep.subr.bf16.mxu0 %v9335_v57  ;;  %6258 = vmatprep.subr.bf16.mxu1 %v9335_v57 }
 0x2d6   :  { %v2031_v7 = vpop.f32.mrb[108].mxu1 }
 0x2d7   :  { %v4903_v11 = vpop.f32.mrb[109].mxu1 }
 0x2d8   :  { %6233 = vmatpush3.bf16.msra.mxu0 %v6232_v44  ;;  %6260 = vmatpush3.bf16.msra.mxu1 %v6259_v51  ;;  %v6289_v44 = vpack.c.bf16 %v4091_v38, %v4090_v59  ;;  %v1133_v51 = vadd.f32 %v9106_v1, %v1101_v55  ;;  %v3469_v59 = vld [vmem:[%s9320_s7 + $0x50] sm:$0xff]  ;;  %v3470_v38 = vld [vmem:[%s9320_s7 + $0x58] sm:$0xff] }
 0x2d9   :  { %6234 = vmatprep.subr.bf16.mxu0 %v9335_v57  ;;  %6261 = vmatprep.subr.bf16.mxu1 %v9335_v57 }
 0x2da   :  { %v1943_v12 = vpop.f32.mrb[108].mxu0  ;;  %v1158_v42 = vmax.f32 %v1133_v51, 0.0  ;;  %v3471_v51 = vld [vmem:[%s9320_s7 + $0x60] sm:$0xff] }
 0x2db   :  { %v1947_v6 = vadd.f32 %v1943_v12, %v8994_v13  ;;  %v4868_v25 = vpop.f32.mrb[109].mxu0  ;;  %v4058_v13 = vld [vmem:[%s9317_s3 + $0xb70] sm:$0xff]  ;;  %v6292_v12 = vpack.c.bf16 %v3366_v34, %v3365_v24 }
 0x2dc   :  { %6236 = vmatpush3.bf16.msra.mxu0 %v6235_v54  ;;  %6263 = vmatpush3.bf16.msra.mxu1 %v6262_v26  ;;  %v6241_v33 = vpack.c.bf16 %v4059_v32, %v4058_v13  ;;  %v6301_v13 = vpack.c.bf16 %v3372_v58, %v3371_v56  ;;  %v3373_v32 = vld [vmem:[%s9319_s5 + $0x40] sm:$0xff] }
 0x2dd   :  { %6237 = vmatprep.subr.bf16.mxu0 %v9335_v57  ;;  %6264 = vmatprep.subr.bf16.mxu1 %v9335_v57  ;;  %v2035_v28 = vadd.f32 %v2031_v7, %v1947_v6  ;;  %v3368_v6 = vld [vmem:[%s9319_s5 + $0x18] sm:$0xff] }
 0x2e0   :  { %6239 = vmatpush3.bf16.msra.mxu0 %v6238_v48  ;;  %6266 = vmatpush3.bf16.msra.mxu1 %v6265_v52  ;;  %v3369_v48 = vld [vmem:[%s9319_s5 + $0x20] sm:$0xff]  ;;  %v3370_v52 = vld [vmem:[%s9319_s5 + $0x28] sm:$0xff] }
 0x2e1   :  { %6240 = vmatprep.subr.bf16.mxu0 %v9335_v57  ;;  %6291 = vmatprep.subr.bf16.mxu1 %v9335_v57  ;;  %v6298_v1 = vpack.c.bf16 %v3370_v52, %v3369_v48  ;;  %v4092_v52 = vld [vmem:[%s9321_s4] ss:$0 sm:$0xff] }
 0x2e3   :  { %5392 = vmatmul.mubr.f32.vlgmr.msra.gmra.mrb[122].mxu1 %v1157_v27  ;;  %v6307_v27 = vpack.c.bf16 %v3376_v36, %v3375_v62 }
 0x2e4   :  { %6242 = vmatpush3.bf16.msra.mxu0 %v6241_v33  ;;  %5461 = vmatprep.mubr.msk.f32.mxu1 %vm6345_vm0, %v9334_v37 }
 0x2e5   :  { %6267 = vmatprep.subr.bf16.mxu0 %v9335_v57  ;;  %6293 = vmatpush3.bf16.msra.mxu1 %v6292_v12 }
 0x2e6   :  { %6294 = vmatprep.subr.bf16.mxu1 %v9335_v57 }
 0x2e7   :  { %5357 = vmatmul.mubr.f32.vlgmr.msra.gmra.mrb[122].mxu0 %v1156_v29  ;;  %v3378_v29 = vld [vmem:[%s9319_s5 + $0x68] sm:$0xff] }
 0x2e8   :  { %6269 = vmatpush3.bf16.msra.mxu0 %v6268_v21  ;;  %5426 = vmatprep.mubr.msk.f32.mxu0 %vm6345_vm0, %v9334_v37  ;;  %v3377_v21 = vld [vmem:[%s9319_s5 + $0x60] sm:$0xff] }
 0x2e9   :  { %6270 = vmatprep.subr.bf16.mxu0 %v9335_v57  ;;  %v6310_v60 = vpack.c.bf16 %v3378_v29, %v3377_v21 }
 0x2ec   :  { %6272 = vmatpush3.bf16.msra.mxu0 %v6271_v46 }
 0x2ed   :  { %6273 = vmatprep.subr.bf16.mxu0 %v9335_v57 }
 0x2f0   :  { %6275 = vmatpush3.bf16.msra.mxu0 %v6274_v31  ;;  %v3380_v31 = vld [vmem:[%s9319_s5 + $0x78] sm:$0xff] }
 0x2f1   :  { %6276 = vmatprep.subr.bf16.mxu0 %v9335_v57  ;;  %v6313_v43 = vpack.c.bf16 %v3380_v31, %v3379_v50 }
 0x2f4   :  { %6278 = vmatpush3.bf16.msra.mxu0 %v6277_v30  ;;  %v3459_v30 = vld [vmem:[%s9320_s7] sm:$0xff] }
 0x2f5   :  { %6279 = vmatprep.subr.bf16.mxu0 %v9335_v57 }
 0x2f6   :  { %v2207_v14 = vpop.f32.mrb[110].mxu1 }
 0x2f7   :  { %v4973_v63 = vpop.f32.mrb[111].mxu1 }
 0x2f8   :  { %6281 = vmatpush3.bf16.msra.mxu0 %v6280_v0  ;;  %v6316_v0 = vpack.c.bf16 %v3460_v2, %v3459_v30  ;;  %v3464_v63 = vld [vmem:[%s9320_s7 + $0x28] sm:$0xff] }
 0x2f9   :  { %6282 = vmatprep.subr.bf16.mxu0 %v9335_v57 }
 0x2fa   :  { %v2119_v53 = vpop.f32.mrb[110].mxu0 }
 0x2fb   :  { %v2123_v22 = vadd.f32 %v2119_v53, %v2035_v28  ;;  %v4938_v8 = vpop.f32.mrb[111].mxu0  ;;  %v3374_v28 = vld [vmem:[%s9319_s5 + $0x48] sm:$0xff]  ;;  %v6325_v53 = vpack.c.bf16 %v3466_v3, %v3465_v17 }
 0x2fc   :  { %6284 = vmatpush3.bf16.msra.mxu0 %v6283_v9  ;;  %v6304_v33 = vpack.c.bf16 %v3374_v28, %v3373_v32  ;;  %v3468_v8 = vld [vmem:[%s9320_s7 + $0x48] sm:$0xff]  ;;  %v3474_v32 = vld [vmem:[%s9320_s7 + $0x78] sm:$0xff] }
 0x2fd   :  { %6285 = vmatprep.subr.bf16.mxu0 %v9335_v57  ;;  %v2211_v18 = vadd.f32 %v2207_v14, %v2123_v22  ;;  %v3463_v14 = vld [vmem:[%s9320_s7 + $0x20] sm:$0xff] }
 0x2fe   :  { %v6322_v9 = vpack.c.bf16 %v3464_v63, %v3463_v14  ;;  %v3467_v22 = vld [vmem:[%s9320_s7 + $0x40] sm:$0xff] }
 0x300   :  { %6287 = vmatpush3.bf16.msra.mxu0 %v6286_v40  ;;  %v6328_v40 = vpack.c.bf16 %v3468_v8, %v3467_v22 }
 0x301   :  { %6288 = vmatprep.subr.bf16.mxu0 %v9335_v57 }
 0x304   :  { %6290 = vmatpush3.bf16.msra.mxu0 %v6289_v44 }
 0x305   :  { %6315 = vmatprep.subr.bf16.mxu0 %v9335_v57 }
 0x307   :  { %5427 = vmatmul.mubr.f32.vlgmr.msra.gmra.mrb[124].mxu0 %v1158_v42  ;;  %v3472_v42 = vld [vmem:[%s9320_s7 + $0x68] sm:$0xff] }
 0x308   :  { %5496 = vmatprep.mubr.msk.f32.mxu0 %vm6345_vm0, %v9334_v37  ;;  %v3367_v37 = vld [vmem:[%s9319_s5 + $0x10] sm:$0xff]  ;;  %6317 = vmatpush3.bf16.msra.mxu0 %v6316_v0 }
 0x309   :  { %v6295_v25 = vpack.c.bf16 %v3368_v6, %v3367_v37  ;;  %6318 = vmatprep.subr.bf16.mxu0 %v9335_v57 }
 0x30b   :  { %6296 = vmatpush3.bf16.msra.mxu1 %v6295_v25 }
 0x30c   :  { %6297 = vmatprep.subr.bf16.mxu1 %v9335_v57  ;;  %6320 = vmatpush3.bf16.msra.mxu0 %v6319_v45 }
 0x30d   :  { %6321 = vmatprep.subr.bf16.mxu0 %v9335_v57 }
 0x30f   :  { %6299 = vmatpush3.bf16.msra.mxu1 %v6298_v1 }
 0x310   :  { %6300 = vmatprep.subr.bf16.mxu1 %v9335_v57  ;;  %6323 = vmatpush3.bf16.msra.mxu0 %v6322_v9 }
 0x311   :  { %6324 = vmatprep.subr.bf16.mxu0 %v9335_v57 }
 0x313   :  { %6302 = vmatpush3.bf16.msra.mxu1 %v6301_v13  ;;  %v3473_v13 = vld [vmem:[%s9320_s7 + $0x70] sm:$0xff] }
 0x314   :  { %6303 = vmatprep.subr.bf16.mxu1 %v9335_v57  ;;  %6326 = vmatpush3.bf16.msra.mxu0 %v6325_v53  ;;  %v6337_v28 = vpack.c.bf16 %v3474_v32, %v3473_v13 }
 0x315   :  { %6327 = vmatprep.subr.bf16.mxu0 %v9335_v57 }
 0x316   :  { %v2383_v5 = vpop.f32.mrb[112].mxu1 }
 0x317   :  { %v5043_v49 = vpop.f32.mrb[113].mxu1  ;;  %6305 = vmatpush3.bf16.msra.mxu1 %v6304_v33  ;;  %v4093_v33 = vld [vmem:[%s9322_s6] ss:$0 sm:$0xff] }
 0x318   :  { %6306 = vmatprep.subr.bf16.mxu1 %v9335_v57  ;;  %6329 = vmatpush3.bf16.msra.mxu0 %v6328_v40  ;;  %v6334_v49 = vpack.c.bf16 %v3472_v42, %v3471_v51 }
 0x319   :  { %6330 = vmatprep.subr.bf16.mxu0 %v9335_v57 }
 0x31a   :  { %v2295_v35 = vpop.f32.mrb[112].mxu0 }
 0x31b   :  { %v2299_v7 = vadd.f32 %v2295_v35, %v2211_v18  ;;  %v5008_v11 = vpop.f32.mrb[113].mxu0  ;;  %6308 = vmatpush3.bf16.msra.mxu1 %v6307_v27  ;;  %v6331_v18 = vpack.c.bf16 %v3470_v38, %v3469_v59 }
 0x31c   :  { %6309 = vmatprep.subr.bf16.mxu1 %v9335_v57 }
 0x31d   :  { %v2387_v54 = vadd.f32 %v2383_v5, %v2299_v7  ;;  %6332 = vmatpush3.bf16.msra.mxu0 %v6331_v18 }
 0x31e   :  { %6333 = vmatprep.subr.bf16.mxu0 %v9335_v57 }
 0x31f   :  { %6311 = vmatpush3.bf16.msra.mxu1 %v6310_v60 }
 0x320   :  { %6312 = vmatprep.subr.bf16.mxu1 %v9335_v57 }
 0x321   :  { %6335 = vmatpush3.bf16.msra.mxu0 %v6334_v49 }
 0x322   :  { %6336 = vmatprep.subr.bf16.mxu0 %v9335_v57 }
 0x323   :  { %6314 = vmatpush3.bf16.msra.mxu1 %v6313_v43 }
 0x325   :  { %6338 = vmatpush3.bf16.msra.mxu0 %v6337_v28 }
 0x336   :  { %v2559_v26 = vpop.f32.mrb[114].mxu1 }
 0x337   :  { %v5113_v39 = vpop.f32.mrb[115].mxu1 }
 0x33a   :  { %v2471_v61 = vpop.f32.mrb[114].mxu0 }
 0x33b   :  { %v2475_v55 = vadd.f32 %v2471_v61, %v2387_v54  ;;  %v5078_v47 = vpop.f32.mrb[115].mxu0 }
 0x33d   :  { %v2563_v20 = vadd.f32 %v2559_v26, %v2475_v55 }
 0x356   :  { %v2735_v10 = vpop.f32.mrb[116].mxu1 }
 0x357   :  { %v5183_v15 = vpop.f32.mrb[117].mxu1 }
 0x358   :  { %v4094_v15 = vld [vmem:[%s9323_s8] ss:$0 sm:$0xff] }
 0x35a   :  { %v2647_v41 = vpop.f32.mrb[116].mxu0 }
 0x35b   :  { %v2651_v46 = vadd.f32 %v2647_v41, %v2563_v20  ;;  %v5148_v4 = vpop.f32.mrb[117].mxu0 }
 0x35d   :  { %v2739_v19 = vadd.f32 %v2735_v10, %v2651_v46 }
 0x376   :  { %v2911_v44 = vpop.f32.mrb[118].mxu1 }
 0x377   :  { %v5253_v5 = vpop.f32.mrb[119].mxu1 }
 0x37a   :  { %v2823_v35 = vpop.f32.mrb[118].mxu0 }
 0x37b   :  { %v2827_v7 = vadd.f32 %v2823_v35, %v2739_v19  ;;  %v5218_v11 = vpop.f32.mrb[119].mxu0 }
 0x37d   :  { %v2915_v54 = vadd.f32 %v2911_v44, %v2827_v7 }
 0x396   :  { %v3087_v26 = vpop.f32.mrb[120].mxu1 }
 0x397   :  { %v5323_v39 = vpop.f32.mrb[121].mxu1 }
 0x39a   :  { %v2999_v61 = vpop.f32.mrb[120].mxu0 }
 0x39b   :  { %v3003_v55 = vadd.f32 %v2999_v61, %v2915_v54  ;;  %v5288_v47 = vpop.f32.mrb[121].mxu0 }
 0x39d   :  { %v3091_v24 = vadd.f32 %v3087_v26, %v3003_v55 }
 0x3b6   :  { %v3263_v34 = vpop.f32.mrb[122].mxu1 }
 0x3b7   :  { %v5393_v37 = vpop.f32.mrb[123].mxu1 }
 0x3ba   :  { %v3175_v20 = vpop.f32.mrb[122].mxu0 }
 0x3bb   :  { %v3179_v12 = vadd.f32 %v3175_v20, %v3091_v24  ;;  %v5358_v6 = vpop.f32.mrb[123].mxu0 }
 0x3bd   :  { %v3267_v25 = vadd.f32 %v3263_v34, %v3179_v12 }
 0x3da   :  { %v3351_v48 = vpop.f32.mrb[124].mxu0 }
 0x3db   :  { %v3355_v1 = vadd.f32 %v3351_v48, %v3267_v25  ;;  %v5428_v56 = vpop.f32.mrb[125].mxu0 }
 0x3dd   :  { %v3363_v57 = vadd.f32 %v4092_v52, %v3355_v1 }
 0x3df   :  { %v3364_v58 = vmax.f32 %v3363_v57, 0.0 }
 0x3e1   :  { %5462 = vmatmul.mubr.f32.vlgmr.msra.gmra.mrb[124].mxu1 %v3364_v58 }
 0x4b4   :  { %v3454_v62 = vpop.f32.mrb[124].mxu1 }
 0x4b5   :  { %v3455_v36 = vadd.f32 %v4093_v33, %v3454_v62  ;;  %v5463_v27 = vpop.f32.mrb[125].mxu1 }
 0x4b7   :  { %v3458_v10 = vmax.f32 %v3455_v36, 0.0 }
 0x4b9   :  { %5497 = vmatmul.mubr.f32.vlgmr.msra.gmra.mrb[126].mxu0 %v3458_v10 }
 0x58c   :  { %v3548_v21 = vpop.f32.mrb[126].mxu0 }
 0x58d   :  { %v3549_v29 = vadd.f32 %v4094_v15, %v3548_v21  ;;  %v5498_v60 = vpop.f32.mrb[127].mxu0 }
 0x58f   :  { %3552 = vst [vmem:[%s9324_s9] sm:$0xff] %v3549_v29 }

</bundles_post_ra>
